<compile_context>
chip_gen: v6e
topology: v6e:2x2x1
jax: 0.10.0
libtpu: 0.0.40
codegen_flags: <defaults>
</compile_context>

<pallas_src>
import functools
import math

import jax
import jax.numpy as jnp
from jax.experimental import pallas as pl
from jax.experimental.pallas import tpu as pltpu

CARDINALITY = 32
LANE = 128
VMEM_LIMIT_BYTES = 32 * 1024 * 1024


# ----------------------------------------------------------------------------
# helpers
# ----------------------------------------------------------------------------
def _pad_to(n, m):
    return ((n + m - 1) // m) * m


def _pick_tile(dim, cands):
    """Largest candidate tile that divides `dim`; else a mult-of-8 divisor; else full."""
    for c in cands:
        if dim % c == 0:
            return c
    if dim % 8 == 0:
        for c in (64, 32, 16, 8):
            if dim % c == 0:
                return c
    return dim  # full dim (legal: block dim equal to array dim)


# ----------------------------------------------------------------------------
# Pallas kernels
# ----------------------------------------------------------------------------
def _mm_kernel(x_ref, w_ref, b_ref, *rest, relu, has_res):
    """K-tiled matmul with f32 accumulator; epilogue: +bias [+res] [ReLU]."""
    if has_res:
        r_ref, o_ref, acc_ref = rest
    else:
        o_ref, acc_ref = rest
    k = pl.program_id(2)

    @pl.when(k == 0)
    def _init():
        acc_ref[...] = jnp.zeros_like(acc_ref)

    acc_ref[...] += jnp.dot(x_ref[...], w_ref[...],
                            preferred_element_type=jnp.float32)

    @pl.when(k == pl.num_programs(2) - 1)
    def _finalize():
        y = acc_ref[...] + b_ref[...]
        if has_res:
            y = y + r_ref[...].astype(jnp.float32)
        if relu:
            y = jnp.maximum(y, 0.0)
        o_ref[...] = y.astype(o_ref.dtype)


def _group_conv_kernel(x_ref, w_ref, b_ref, o_ref, *, gb, relu):
    """gb per-group matmuls (contiguous channel slices) unrolled per grid step."""
    for g in range(gb):
        acc = jnp.dot(x_ref[g], w_ref[g], preferred_element_type=jnp.float32)
        y = acc + b_ref[g]
        if relu:
            y = jnp.maximum(y, 0.0)
        o_ref[g] = y.astype(o_ref.dtype)


def _max9_kernel(*refs):
    """Elementwise max over the 9 shifted 3x3 pooling taps."""
    o_ref = refs[-1]
    m = refs[0][...]
    for r in refs[1:-1]:
        m = jnp.maximum(m, r[...])
    o_ref[...] = m


def _avgpool_fc_kernel(x_ref, w_ref, b_ref, o_ref):
    """Fused global average pool + fully-connected layer (one batch row / step)."""
    pooled = jnp.mean(x_ref[0].astype(jnp.float32), axis=0, keepdims=True)  # (1, C)
    acc = jnp.dot(pooled.astype(jnp.bfloat16), w_ref[...],
                  preferred_element_type=jnp.float32)
    o_ref[0] = acc + b_ref[...]


# ----------------------------------------------------------------------------
# Pallas wrappers
# ----------------------------------------------------------------------------
def matmul_bias_act(x, w, b, *, relu, res=None, out_dtype=jnp.bfloat16):
    """y = act(x @ w + b [+ res]); x:(M,K), w:(K,N) bf16 (BN folded), b:(1,N) f32."""
    M, K = x.shape
    Kw, N = w.shape
    assert K == Kw, (K, Kw)
    assert b.shape == (1, N), (b.shape, N)
    x = x.astype(jnp.bfloat16)

    TM = _pick_tile(M, (512, 256, 128))
    TN = 128 if N % 128 == 0 else N
    TK = K if K <= 512 else _pick_tile(K, (512, 256, 128))
    grid = (pl.cdiv(M, TM), pl.cdiv(N, TN), pl.cdiv(K, TK))

    in_specs = [
        pl.BlockSpec((TM, TK), lambda i, j, k: (i, k)),
        pl.BlockSpec((TK, TN), lambda i, j, k: (k, j)),
        pl.BlockSpec((1, TN), lambda i, j, k: (0, j)),
    ]
    args = [x, w, b]
    if res is not None:
        assert res.shape == (M, N), (res.shape, (M, N))
        in_specs.append(pl.BlockSpec((TM, TN), lambda i, j, k: (i, j)))
        args.append(res.astype(jnp.bfloat16))

    return pl.pallas_call(
        functools.partial(_mm_kernel, relu=relu, has_res=res is not None),
        out_shape=jax.ShapeDtypeStruct((M, N), out_dtype),
        grid=grid,
        in_specs=in_specs,
        out_specs=pl.BlockSpec((TM, TN), lambda i, j, k: (i, j)),
        scratch_shapes=[pltpu.VMEM((TM, TN), jnp.float32)],
        compiler_params=pltpu.CompilerParams(
            dimension_semantics=("parallel", "parallel", "arbitrary"),
            vmem_limit_bytes=VMEM_LIMIT_BYTES),
    )(*args)


def im2col(x, kh, kw, stride, pad):
    """x NHWC -> (N, OH, OW, kh*kw, C) patch tensor (XLA glue)."""
    N, H, W, C = x.shape
    xp = jnp.pad(x, ((0, 0), (pad, pad), (pad, pad), (0, 0)))
    OH = (H + 2 * pad - kh) // stride + 1
    OW = (W + 2 * pad - kw) // stride + 1
    cols = []
    for i in range(kh):
        for j in range(kw):
            cols.append(xp[:, i:i + stride * OH:stride, j:j + stride * OW:stride, :])
    return jnp.stack(cols, axis=3), OH, OW


def grouped_conv3x3(x, p, stride, relu=True):
    """Grouped 3x3 conv (contiguous channel slices per group) + folded BN + ReLU."""
    N, H, W, C = x.shape
    G, KG, CG = p["w"].shape                       # (groups, 9*Cg, Cg)
    assert C == G * CG, (C, G, CG)
    patches, OH, OW = im2col(x, 3, 3, stride, 1)   # (N, OH, OW, 9, C)
    M = N * OH * OW
    # (M, 9, G, Cg) -> (G, M, 9*Cg); K ordering (tap, in-chan) matches the weights.
    pg = patches.reshape(M, 9, G, CG).transpose(2, 0, 1, 3).reshape(G, M, KG)
    pg = pg.astype(jnp.bfloat16)

    GB = 8 if G % 8 == 0 else 1                    # groups processed per grid step
    TM = _pick_tile(M, (512, 256, 128))
    grid = (pl.cdiv(M, TM), G // GB)

    out = pl.pallas_call(
        functools.partial(_group_conv_kernel, gb=GB, relu=relu),
        out_shape=jax.ShapeDtypeStruct((G, M, CG), jnp.bfloat16),
        grid=grid,
        in_specs=[
            pl.BlockSpec((GB, TM, KG), lambda i, c: (c, i, 0)),
            pl.BlockSpec((GB, KG, CG), lambda i, c: (c, 0, 0)),
            pl.BlockSpec((GB, 1, CG), lambda i, c: (c, 0, 0)),
        ],
        out_specs=pl.BlockSpec((GB, TM, CG), lambda i, c: (c, i, 0)),
        compiler_params=pltpu.CompilerParams(
            dimension_semantics=("parallel", "parallel"),
            vmem_limit_bytes=VMEM_LIMIT_BYTES),
    )(pg, p["w"], p["b"])
    # (G, M, Cg) -> (M, G*Cg) -> NHWC
    return out.transpose(1, 0, 2).reshape(N, OH, OW, C)


def maxpool_3x3_s2_p1(x):
    """3x3 / stride-2 / pad-1 max pool as a tiled elementwise max of 9 shifted taps."""
    N, H, W, C = x.shape
    OH = (H + 2 - 3) // 2 + 1
    OW = (W + 2 - 3) // 2 + 1
    xp = jnp.pad(x, ((0, 0), (1, 1), (1, 1), (0, 0)), constant_values=-1e30)
    M = N * OH * OW
    taps = [
        xp[:, di:di + 2 * OH:2, dj:dj + 2 * OW:2, :].reshape(M, C)
        for di in range(3) for dj in range(3)
    ]
    TM = _pick_tile(M, (1024, 512, 256, 128))
    spec = pl.BlockSpec((TM, C), lambda i: (i, 0))
    out = pl.pallas_call(
        _max9_kernel,
        out_shape=jax.ShapeDtypeStruct((M, C), x.dtype),
        grid=(pl.cdiv(M, TM),),
        in_specs=[spec] * 9,
        out_specs=spec,
        compiler_params=pltpu.CompilerParams(
            dimension_semantics=("parallel",),
            vmem_limit_bytes=VMEM_LIMIT_BYTES),
    )(*taps)
    return out.reshape(N, OH, OW, C)


def avgpool_fc(x, fc_w, fc_b):
    """Fused global average pool + fc.  x NHWC (bf16) -> (N, num_classes_padded) f32."""
    N, H, W, C = x.shape
    Kw, Nc = fc_w.shape
    assert Kw == C, (Kw, C)
    out = pl.pallas_call(
        _avgpool_fc_kernel,
        out_shape=jax.ShapeDtypeStruct((N, 1, Nc), jnp.float32),
        grid=(N,),
        in_specs=[
            pl.BlockSpec((1, H * W, C), lambda i: (i, 0, 0)),
            pl.BlockSpec((Kw, Nc), lambda i: (0, 0)),
            pl.BlockSpec((1, Nc), lambda i: (0, 0)),
        ],
        out_specs=pl.BlockSpec((1, 1, Nc), lambda i: (i, 0, 0)),
        compiler_params=pltpu.CompilerParams(
            dimension_semantics=("parallel",),
            vmem_limit_bytes=VMEM_LIMIT_BYTES),
    )(x.reshape(N, H * W, C), fc_w, fc_b)
    return out.reshape(N, Nc)


# ----------------------------------------------------------------------------
# Model definition (ResNeXt-style, reduced), with TPU-prepped parameters
# ----------------------------------------------------------------------------
def init_params(key, num_classes=10):
    keys = iter(jax.random.split(key, 512))

    def nk():
        return next(keys)

    def bn_fold(c):
        gamma = 1.0 + 0.1 * jax.random.normal(nk(), (c,), jnp.float32)
        beta = 0.1 * jax.random.normal(nk(), (c,), jnp.float32)
        mean = 0.1 * jax.random.normal(nk(), (c,), jnp.float32)
        var = 0.5 + jax.random.uniform(nk(), (c,), jnp.float32)
        scale = gamma / jnp.sqrt(var + 1e-5)
        bias = beta - mean * scale
        return scale, bias

    def dense_conv(kh, kw, cin_real, cin_pad, cout_real):
        """Conv + folded BN prepped as a lane-padded (kh*kw*cin_pad, cout_pad) bf16 matrix."""
        cout_pad = _pad_to(cout_real, LANE)
        w = jax.random.normal(nk(), (kh, kw, cin_real, cout_real), jnp.float32)
        w = w / math.sqrt(kh * kw * cin_real)
        scale, bias = bn_fold(cout_real)
        w = w * scale                                          # fold BN scale
        w = jnp.pad(w, ((0, 0), (0, 0),
                        (0, cin_pad - cin_real), (0, cout_pad - cout_real)))
        bias = jnp.pad(bias, (0, cout_pad - cout_real))
        return {"w": w.reshape(kh * kw * cin_pad, cout_pad).astype(jnp.bfloat16),
                "b": bias.reshape(1, cout_pad).astype(jnp.float32),
                "cout_real": cout_real, "cout_pad": cout_pad}

    def group_conv(width, groups):
        cg = width // groups
        w = jax.random.normal(nk(), (groups, 3, 3, cg, cg), jnp.float32)
        w = w / math.sqrt(9 * cg)
        scale, bias = bn_fold(width)
        w = w * scale.reshape(groups, 1, 1, 1, cg)             # fold BN scale
        return {"w": w.reshape(groups, 9 * cg, cg).astype(jnp.bfloat16),
                "b": bias.reshape(groups, 1, cg).astype(jnp.float32)}

    params = {"num_classes": num_classes}
    params["stem"] = dense_conv(7, 7, 3, 3, 16)
    c_real, c_pad = 16, params["stem"]["cout_pad"]

    widths = [32, 64, 128, 256]       # grouped-conv widths (resnext50 / 4)
    couts = [64, 128, 256, 512]       # block output channels (resnext50 / 4)
    strides = [1, 2, 2, 2]
    blocks = []
    for wd, co, st in zip(widths, couts, strides):
        blk = {
            "stride": st,
            "width": wd,
            "conv1": dense_conv(1, 1, c_real, c_pad, wd),
            "conv2": group_conv(wd, CARDINALITY),
            "conv3": dense_conv(1, 1, wd, wd, co),
        }
        if st != 1 or c_real != co:
            blk["down"] = dense_conv(1, 1, c_real, c_pad, co)
        blocks.append(blk)
        c_real, c_pad = co, blk["conv3"]["cout_pad"]
    params["blocks"] = blocks

    fc_w = jax.random.normal(nk(), (c_pad, num_classes), jnp.float32) / math.sqrt(c_real)
    if c_pad != c_real:
        fc_w = fc_w.at[c_real:].set(0.0)
    nc_pad = _pad_to(num_classes, LANE)
    fc_b = 0.01 * jax.random.normal(nk(), (num_classes,), jnp.float32)
    params["fc_w"] = jnp.pad(fc_w, ((0, 0), (0, nc_pad - num_classes))).astype(jnp.bfloat16)
    params["fc_b"] = jnp.pad(fc_b, (0, nc_pad - num_classes)).reshape(1, nc_pad).astype(jnp.float32)
    return params


def bottleneck(h, blk):
    N, H, W, Cpad = h.shape
    s = blk["stride"]
    wd = blk["width"]

    # conv1: 1x1 + BN + ReLU (output lane-padded)
    h1 = matmul_bias_act(h.reshape(N * H * W, Cpad),
                         blk["conv1"]["w"], blk["conv1"]["b"], relu=True)
    h1 = h1.reshape(N, H, W, -1)[..., :wd]        # real channels for the grouped conv

    # conv2: grouped 3x3 (cardinality 32), stride s, + BN + ReLU
    h2 = grouped_conv3x3(h1, blk["conv2"], stride=s)
    _, OH, OW, _ = h2.shape
    M2 = N * OH * OW

    # identity branch (optional 1x1/stride-s downsample + BN)
    if "down" in blk:
        hs = h[:, ::s, ::s, :] if s > 1 else h
        idn = matmul_bias_act(hs.reshape(M2, Cpad),
                              blk["down"]["w"], blk["down"]["b"], relu=False)
    else:
        idn = h.reshape(M2, Cpad)

    # conv3: 1x1 + BN, residual add + ReLU fused into the matmul epilogue
    out = matmul_bias_act(h2.reshape(M2, wd),
                          blk["conv3"]["w"], blk["conv3"]["b"],
                          relu=True, res=idn)
    return out.reshape(N, OH, OW, -1)


def sws_resnext_forward(params, x_nchw):
    # NCHW (PyTorch) -> NHWC internal layout, bf16 activations
    x = jnp.transpose(x_nchw, (0, 2, 3, 1)).astype(jnp.bfloat16)
    N = x.shape[0]

    # stem: 7x7 / s2 / p3 conv + folded BN + ReLU
    patches, OH, OW = im2col(x, 7, 7, 2, 3)
    h = matmul_bias_act(patches.reshape(N * OH * OW, -1),
                        params["stem"]["w"], params["stem"]["b"], relu=True)
    h = h.reshape(N, OH, OW, -1)

    h = maxpool_3x3_s2_p1(h)

    for blk in params["blocks"]:
        h = bottleneck(h, blk)

    logits = avgpool_fc(h, params["fc_w"], params["fc_b"])     # (N, padded classes) f32
    return logits[:, :params["num_classes"]]


# ----------------------------------------------------------------------------
if __name__ == "__main__":
    key = jax.random.PRNGKey(0)
    pkey, xkey = jax.random.split(key)
    num_classes = 10
    params = init_params(pkey, num_classes=num_classes)

    x = jax.random.normal(xkey, (2, 3, 16, 16), jnp.float32)   # NCHW input

    fwd = jax.jit(functools.partial(sws_resnext_forward, params))
    logits = jax.block_until_ready(fwd(x))

    assert logits.shape == (2, num_classes), logits.shape
    assert bool(jnp.all(jnp.isfinite(logits)))
    print("KERNEL_OK")
</pallas_src>

<mosaic_0001>
module attributes {stable_mosaic.version = 11 : i64} {
  func.func @_mm_kernel(%arg0: i32, %arg1: i32, %arg2: i32, %arg3: memref<128x147xbf16, #tpu.memory_space<vmem>>, %arg4: memref<147x128xbf16, #tpu.memory_space<vmem>>, %arg5: memref<1x128xf32, #tpu.memory_space<vmem>>, %arg6: memref<128x128xbf16, #tpu.memory_space<vmem>>, %arg7: memref<128x128xf32, #tpu.memory_space<vmem>>) attributes {dimension_semantics = [#tpu.dimension_semantics<parallel>, #tpu.dimension_semantics<parallel>, #tpu.dimension_semantics<arbitrary>], iteration_bounds = array<i64: 1, 1, 1>, scalar_prefetch = 0 : i64, scratch_operands = 1 : i64, tpu.core_type = #tpu.core_type<tc>, window_params = [{transform_indices = @transform_0, window_bounds = array<i64: 128, 147>}, {transform_indices = @transform_1, window_bounds = array<i64: 147, 128>}, {transform_indices = @transform_2, window_bounds = array<i64: 1, 128>}, {transform_indices = @transform_3, window_bounds = array<i64: 128, 128>}]} {
    %c0_i32 = arith.constant 0 : i32
    %0 = arith.cmpi eq, %arg2, %c0_i32 : i32
    %1 = arith.extui %0 : i1 to i32
    %c0_i32_0 = arith.constant 0 : i32
    %2 = arith.cmpi ne, %1, %c0_i32_0 : i32
    scf.if %2 {
      %cst_10 = arith.constant 0.000000e+00 : f32
      %12 = vector.broadcast %cst_10 : f32 to vector<128x128xf32>
      %c0_11 = arith.constant 0 : index
      %c0_12 = arith.constant 0 : index
      %13 = vector.load %arg7[%c0_11, %c0_12] : memref<128x128xf32, #tpu.memory_space<vmem>>, vector<128x128xf32>
      tpu.vector_store %arg7[%c0_11, %c0_12], %12 {strides = array<i32>} : memref<128x128xf32, #tpu.memory_space<vmem>>, vector<128x128xf32>,
    } else {
    }
    %c0 = arith.constant 0 : index
    %c0_1 = arith.constant 0 : index
    %3 = vector.load %arg7[%c0, %c0_1] : memref<128x128xf32, #tpu.memory_space<vmem>>, vector<128x128xf32>
    %c0_2 = arith.constant 0 : index
    %c0_3 = arith.constant 0 : index
    %4 = vector.load %arg3[%c0_2, %c0_3] : memref<128x147xbf16, #tpu.memory_space<vmem>>, vector<128x147xbf16>
    %c0_4 = arith.constant 0 : index
    %c0_5 = arith.constant 0 : index
    %5 = vector.load %arg4[%c0_4, %c0_5] : memref<147x128xbf16, #tpu.memory_space<vmem>>, vector<147x128xbf16>
    %cst = arith.constant dense<0.000000e+00> : vector<128x128xf32>
    %6 = tpu.matmul %4, %5, %cst {dimension_numbers = #tpu.dot_dimension_numbers<[1], [0], [0], [1], [0, 0, 1, 1], [], []>} : vector<128x147xbf16>, vector<147x128xbf16>, vector<128x128xf32> -> vector<128x128xf32>
    %7 = arith.addf %3, %6 : vector<128x128xf32>
    %c0_6 = arith.constant 0 : index
    %c0_7 = arith.constant 0 : index
    %8 = vector.load %arg7[%c0_6, %c0_7] : memref<128x128xf32, #tpu.memory_space<vmem>>, vector<128x128xf32>
    tpu.vector_store %arg7[%c0_6, %c0_7], %7 {strides = array<i32>} : memref<128x128xf32, #tpu.memory_space<vmem>>, vector<128x128xf32>,
    %c0_i32_8 = arith.constant 0 : i32
    %9 = arith.cmpi eq, %arg2, %c0_i32_8 : i32
    %10 = arith.extui %9 : i1 to i32
    %c0_i32_9 = arith.constant 0 : i32
    %11 = arith.cmpi ne, %10, %c0_i32_9 : i32
    scf.if %11 {
      %c0_10 = arith.constant 0 : index
      %c0_11 = arith.constant 0 : index
      %12 = vector.load %arg7[%c0_10, %c0_11] : memref<128x128xf32, #tpu.memory_space<vmem>>, vector<128x128xf32>
      %c0_12 = arith.constant 0 : index
      %c0_13 = arith.constant 0 : index
      %13 = vector.load %arg5[%c0_12, %c0_13] : memref<1x128xf32, #tpu.memory_space<vmem>>, vector<1x128xf32>
      %14 = vector.broadcast %13 : vector<1x128xf32> to vector<128x128xf32>
      %15 = arith.addf %12, %14 : vector<128x128xf32>
      %cst_14 = arith.constant 0.000000e+00 : f32
      %16 = vector.broadcast %cst_14 : f32 to vector<128x128xf32>
      %17 = arith.maximumf %15, %16 : vector<128x128xf32>
      %18 = arith.truncf %17 : vector<128x128xf32> to vector<128x128xbf16>
      %c0_15 = arith.constant 0 : index
      %c0_16 = arith.constant 0 : index
      %19 = vector.load %arg6[%c0_15, %c0_16] : memref<128x128xbf16, #tpu.memory_space<vmem>>, vector<128x128xbf16>
      tpu.vector_store %arg6[%c0_15, %c0_16], %18 {strides = array<i32>} : memref<128x128xbf16, #tpu.memory_space<vmem>>, vector<128x128xbf16>,
    } else {
    }
    return
  }
  func.func @transform_0(%arg0: i32, %arg1: i32, %arg2: i32) -> (i32, i32) {
    %c0_i32 = arith.constant 0 : i32
    return %arg0, %arg2 : i32, i32
  }
  func.func @transform_1(%arg0: i32, %arg1: i32, %arg2: i32) -> (i32, i32) {
    %c0_i32 = arith.constant 0 : i32
    return %arg2, %arg1 : i32, i32
  }
  func.func @transform_2(%arg0: i32, %arg1: i32, %arg2: i32) -> (i32, i32) {
    %c0_i32 = arith.constant 0 : i32
    %c0_i32_0 = arith.constant 0 : i32
    return %c0_i32, %arg1 : i32, i32
  }
  func.func @transform_3(%arg0: i32, %arg1: i32, %arg2: i32) -> (i32, i32) {
    %c0_i32 = arith.constant 0 : i32
    return %arg0, %arg1 : i32, i32
  }
}

module attributes {stable_mosaic.version = 11 : i64} {
  func.func @_max9_kernel(%arg0: i32, %arg1: memref<32x128xbf16, #tpu.memory_space<vmem>>, %arg2: memref<32x128xbf16, #tpu.memory_space<vmem>>, %arg3: memref<32x128xbf16, #tpu.memory_space<vmem>>, %arg4: memref<32x128xbf16, #tpu.memory_space<vmem>>, %arg5: memref<32x128xbf16, #tpu.memory_space<vmem>>, %arg6: memref<32x128xbf16, #tpu.memory_space<vmem>>, %arg7: memref<32x128xbf16, #tpu.memory_space<vmem>>, %arg8: memref<32x128xbf16, #tpu.memory_space<vmem>>, %arg9: memref<32x128xbf16, #tpu.memory_space<vmem>>, %arg10: memref<32x128xbf16, #tpu.memory_space<vmem>>) attributes {dimension_semantics = [#tpu.dimension_semantics<parallel>], iteration_bounds = array<i64: 1>, scalar_prefetch = 0 : i64, scratch_operands = 0 : i64, tpu.core_type = #tpu.core_type<tc>, window_params = [{transform_indices = @transform_0, window_bounds = array<i64: 32, 128>}, {transform_indices = @transform_1, window_bounds = array<i64: 32, 128>}, {transform_indices = @transform_2, window_bounds = array<i64: 32, 128>}, {transform_indices = @transform_3, window_bounds = array<i64: 32, 128>}, {transform_indices = @transform_4, window_bounds = array<i64: 32, 128>}, {transform_indices = @transform_5, window_bounds = array<i64: 32, 128>}, {transform_indices = @transform_6, window_bounds = array<i64: 32, 128>}, {transform_indices = @transform_7, window_bounds = array<i64: 32, 128>}, {transform_indices = @transform_8, window_bounds = array<i64: 32, 128>}, {transform_indices = @transform_9, window_bounds = array<i64: 32, 128>}]} {
    %c0 = arith.constant 0 : index
    %c0_0 = arith.constant 0 : index
    %0 = vector.load %arg1[%c0, %c0_0] : memref<32x128xbf16, #tpu.memory_space<vmem>>, vector<32x128xbf16>
    %c0_1 = arith.constant 0 : index
    %c0_2 = arith.constant 0 : index
    %1 = vector.load %arg2[%c0_1, %c0_2] : memref<32x128xbf16, #tpu.memory_space<vmem>>, vector<32x128xbf16>
    %2 = arith.maximumf %0, %1 : vector<32x128xbf16>
    %c0_3 = arith.constant 0 : index
    %c0_4 = arith.constant 0 : index
    %3 = vector.load %arg3[%c0_3, %c0_4] : memref<32x128xbf16, #tpu.memory_space<vmem>>, vector<32x128xbf16>
    %4 = arith.maximumf %2, %3 : vector<32x128xbf16>
    %c0_5 = arith.constant 0 : index
    %c0_6 = arith.constant 0 : index
    %5 = vector.load %arg4[%c0_5, %c0_6] : memref<32x128xbf16, #tpu.memory_space<vmem>>, vector<32x128xbf16>
    %6 = arith.maximumf %4, %5 : vector<32x128xbf16>
    %c0_7 = arith.constant 0 : index
    %c0_8 = arith.constant 0 : index
    %7 = vector.load %arg5[%c0_7, %c0_8] : memref<32x128xbf16, #tpu.memory_space<vmem>>, vector<32x128xbf16>
    %8 = arith.maximumf %6, %7 : vector<32x128xbf16>
    %c0_9 = arith.constant 0 : index
    %c0_10 = arith.constant 0 : index
    %9 = vector.load %arg6[%c0_9, %c0_10] : memref<32x128xbf16, #tpu.memory_space<vmem>>, vector<32x128xbf16>
    %10 = arith.maximumf %8, %9 : vector<32x128xbf16>
    %c0_11 = arith.constant 0 : index
    %c0_12 = arith.constant 0 : index
    %11 = vector.load %arg7[%c0_11, %c0_12] : memref<32x128xbf16, #tpu.memory_space<vmem>>, vector<32x128xbf16>
    %12 = arith.maximumf %10, %11 : vector<32x128xbf16>
    %c0_13 = arith.constant 0 : index
    %c0_14 = arith.constant 0 : index
    %13 = vector.load %arg8[%c0_13, %c0_14] : memref<32x128xbf16, #tpu.memory_space<vmem>>, vector<32x128xbf16>
    %14 = arith.maximumf %12, %13 : vector<32x128xbf16>
    %c0_15 = arith.constant 0 : index
    %c0_16 = arith.constant 0 : index
    %15 = vector.load %arg9[%c0_15, %c0_16] : memref<32x128xbf16, #tpu.memory_space<vmem>>, vector<32x128xbf16>
    %16 = arith.maximumf %14, %15 : vector<32x128xbf16>
    %c0_17 = arith.constant 0 : index
    %c0_18 = arith.constant 0 : index
    %17 = vector.load %arg10[%c0_17, %c0_18] : memref<32x128xbf16, #tpu.memory_space<vmem>>, vector<32x128xbf16>
    tpu.vector_store %arg10[%c0_17, %c0_18], %16 {strides = array<i32>} : memref<32x128xbf16, #tpu.memory_space<vmem>>, vector<32x128xbf16>,
    return
  }
  func.func @transform_0(%arg0: i32) -> (i32, i32) {
    %c0_i32 = arith.constant 0 : i32
    %c0_i32_0 = arith.constant 0 : i32
    return %arg0, %c0_i32 : i32, i32
  }
  func.func @transform_1(%arg0: i32) -> (i32, i32) {
    %c0_i32 = arith.constant 0 : i32
    %c0_i32_0 = arith.constant 0 : i32
    return %arg0, %c0_i32 : i32, i32
  }
  func.func @transform_2(%arg0: i32) -> (i32, i32) {
    %c0_i32 = arith.constant 0 : i32
    %c0_i32_0 = arith.constant 0 : i32
    return %arg0, %c0_i32 : i32, i32
  }
  func.func @transform_3(%arg0: i32) -> (i32, i32) {
    %c0_i32 = arith.constant 0 : i32
    %c0_i32_0 = arith.constant 0 : i32
    return %arg0, %c0_i32 : i32, i32
  }
  func.func @transform_4(%arg0: i32) -> (i32, i32) {
    %c0_i32 = arith.constant 0 : i32
    %c0_i32_0 = arith.constant 0 : i32
    return %arg0, %c0_i32 : i32, i32
  }
  func.func @transform_5(%arg0: i32) -> (i32, i32) {
    %c0_i32 = arith.constant 0 : i32
    %c0_i32_0 = arith.constant 0 : i32
    return %arg0, %c0_i32 : i32, i32
  }
  func.func @transform_6(%arg0: i32) -> (i32, i32) {
    %c0_i32 = arith.constant 0 : i32
    %c0_i32_0 = arith.constant 0 : i32
    return %arg0, %c0_i32 : i32, i32
  }
  func.func @transform_7(%arg0: i32) -> (i32, i32) {
    %c0_i32 = arith.constant 0 : i32
    %c0_i32_0 = arith.constant 0 : i32
    return %arg0, %c0_i32 : i32, i32
  }
  func.func @transform_8(%arg0: i32) -> (i32, i32) {
    %c0_i32 = arith.constant 0 : i32
    %c0_i32_0 = arith.constant 0 : i32
    return %arg0, %c0_i32 : i32, i32
  }
  func.func @transform_9(%arg0: i32) -> (i32, i32) {
    %c0_i32 = arith.constant 0 : i32
    %c0_i32_0 = arith.constant 0 : i32
    return %arg0, %c0_i32 : i32, i32
  }
}

module attributes {stable_mosaic.version = 11 : i64} {
  func.func @_mm_kernel(%arg0: i32, %arg1: i32, %arg2: i32, %arg3: memref<32x128xbf16, #tpu.memory_space<vmem>>, %arg4: memref<128x128xbf16, #tpu.memory_space<vmem>>, %arg5: memref<1x128xf32, #tpu.memory_space<vmem>>, %arg6: memref<32x128xbf16, #tpu.memory_space<vmem>>, %arg7: memref<32x128xf32, #tpu.memory_space<vmem>>) attributes {dimension_semantics = [#tpu.dimension_semantics<parallel>, #tpu.dimension_semantics<parallel>, #tpu.dimension_semantics<arbitrary>], iteration_bounds = array<i64: 1, 1, 1>, scalar_prefetch = 0 : i64, scratch_operands = 1 : i64, tpu.core_type = #tpu.core_type<tc>, window_params = [{transform_indices = @transform_0, window_bounds = array<i64: 32, 128>}, {transform_indices = @transform_1, window_bounds = array<i64: 128, 128>}, {transform_indices = @transform_2, window_bounds = array<i64: 1, 128>}, {transform_indices = @transform_3, window_bounds = array<i64: 32, 128>}]} {
    %c0_i32 = arith.constant 0 : i32
    %0 = arith.cmpi eq, %arg2, %c0_i32 : i32
    %1 = arith.extui %0 : i1 to i32
    %c0_i32_0 = arith.constant 0 : i32
    %2 = arith.cmpi ne, %1, %c0_i32_0 : i32
    scf.if %2 {
      %cst_10 = arith.constant 0.000000e+00 : f32
      %12 = vector.broadcast %cst_10 : f32 to vector<32x128xf32>
      %c0_11 = arith.constant 0 : index
      %c0_12 = arith.constant 0 : index
      %13 = vector.load %arg7[%c0_11, %c0_12] : memref<32x128xf32, #tpu.memory_space<vmem>>, vector<32x128xf32>
      tpu.vector_store %arg7[%c0_11, %c0_12], %12 {strides = array<i32>} : memref<32x128xf32, #tpu.memory_space<vmem>>, vector<32x128xf32>,
    } else {
    }
    %c0 = arith.constant 0 : index
    %c0_1 = arith.constant 0 : index
    %3 = vector.load %arg7[%c0, %c0_1] : memref<32x128xf32, #tpu.memory_space<vmem>>, vector<32x128xf32>
    %c0_2 = arith.constant 0 : index
    %c0_3 = arith.constant 0 : index
    %4 = vector.load %arg3[%c0_2, %c0_3] : memref<32x128xbf16, #tpu.memory_space<vmem>>, vector<32x128xbf16>
    %c0_4 = arith.constant 0 : index
    %c0_5 = arith.constant 0 : index
    %5 = vector.load %arg4[%c0_4, %c0_5] : memref<128x128xbf16, #tpu.memory_space<vmem>>, vector<128x128xbf16>
    %cst = arith.constant dense<0.000000e+00> : vector<32x128xf32>
    %6 = tpu.matmul %4, %5, %cst {dimension_numbers = #tpu.dot_dimension_numbers<[1], [0], [0], [1], [0, 0, 1, 1], [], []>} : vector<32x128xbf16>, vector<128x128xbf16>, vector<32x128xf32> -> vector<32x128xf32>
    %7 = arith.addf %3, %6 : vector<32x128xf32>
    %c0_6 = arith.constant 0 : index
    %c0_7 = arith.constant 0 : index
    %8 = vector.load %arg7[%c0_6, %c0_7] : memref<32x128xf32, #tpu.memory_space<vmem>>, vector<32x128xf32>
    tpu.vector_store %arg7[%c0_6, %c0_7], %7 {strides = array<i32>} : memref<32x128xf32, #tpu.memory_space<vmem>>, vector<32x128xf32>,
    %c0_i32_8 = arith.constant 0 : i32
    %9 = arith.cmpi eq, %arg2, %c0_i32_8 : i32
    %10 = arith.extui %9 : i1 to i32
    %c0_i32_9 = arith.constant 0 : i32
    %11 = arith.cmpi ne, %10, %c0_i32_9 : i32
    scf.if %11 {
      %c0_10 = arith.constant 0 : index
      %c0_11 = arith.constant 0 : index
      %12 = vector.load %arg7[%c0_10, %c0_11] : memref<32x128xf32, #tpu.memory_space<vmem>>, vector<32x128xf32>
      %c0_12 = arith.constant 0 : index
      %c0_13 = arith.constant 0 : index
      %13 = vector.load %arg5[%c0_12, %c0_13] : memref<1x128xf32, #tpu.memory_space<vmem>>, vector<1x128xf32>
      %14 = vector.broadcast %13 : vector<1x128xf32> to vector<32x128xf32>
      %15 = arith.addf %12, %14 : vector<32x128xf32>
      %cst_14 = arith.constant 0.000000e+00 : f32
      %16 = vector.broadcast %cst_14 : f32 to vector<32x128xf32>
      %17 = arith.maximumf %15, %16 : vector<32x128xf32>
      %18 = arith.truncf %17 : vector<32x128xf32> to vector<32x128xbf16>
      %c0_15 = arith.constant 0 : index
      %c0_16 = arith.constant 0 : index
      %19 = vector.load %arg6[%c0_15, %c0_16] : memref<32x128xbf16, #tpu.memory_space<vmem>>, vector<32x128xbf16>
      tpu.vector_store %arg6[%c0_15, %c0_16], %18 {strides = array<i32>} : memref<32x128xbf16, #tpu.memory_space<vmem>>, vector<32x128xbf16>,
    } else {
    }
    return
  }
  func.func @transform_0(%arg0: i32, %arg1: i32, %arg2: i32) -> (i32, i32) {
    %c0_i32 = arith.constant 0 : i32
    return %arg0, %arg2 : i32, i32
  }
  func.func @transform_1(%arg0: i32, %arg1: i32, %arg2: i32) -> (i32, i32) {
    %c0_i32 = arith.constant 0 : i32
    return %arg2, %arg1 : i32, i32
  }
  func.func @transform_2(%arg0: i32, %arg1: i32, %arg2: i32) -> (i32, i32) {
    %c0_i32 = arith.constant 0 : i32
    %c0_i32_0 = arith.constant 0 : i32
    return %c0_i32, %arg1 : i32, i32
  }
  func.func @transform_3(%arg0: i32, %arg1: i32, %arg2: i32) -> (i32, i32) {
    %c0_i32 = arith.constant 0 : i32
    return %arg0, %arg1 : i32, i32
  }
}

module attributes {stable_mosaic.version = 11 : i64} {
  func.func @_group_conv_kernel(%arg0: i32, %arg1: i32, %arg2: memref<8x32x9xbf16, #tpu.memory_space<vmem>>, %arg3: memref<8x9x1xbf16, #tpu.memory_space<vmem>>, %arg4: memref<8x1x1xf32, #tpu.memory_space<vmem>>, %arg5: memref<8x32x1xbf16, #tpu.memory_space<vmem>>) attributes {dimension_semantics = [#tpu.dimension_semantics<parallel>, #tpu.dimension_semantics<parallel>], iteration_bounds = array<i64: 1, 4>, scalar_prefetch = 0 : i64, scratch_operands = 0 : i64, tpu.core_type = #tpu.core_type<tc>, window_params = [{transform_indices = @transform_0, window_bounds = array<i64: 8, 32, 9>}, {transform_indices = @transform_1, window_bounds = array<i64: 8, 9, 1>}, {transform_indices = @transform_2, window_bounds = array<i64: 8, 1, 1>}, {transform_indices = @transform_3, window_bounds = array<i64: 8, 32, 1>}]} {
    %c0 = arith.constant 0 : index
    %c0_0 = arith.constant 0 : index
    %c0_1 = arith.constant 0 : index
    %0 = vector.load %arg2[%c0, %c0_0, %c0_1] : memref<8x32x9xbf16, #tpu.memory_space<vmem>>, vector<1x32x9xbf16>
    %1 = vector.shape_cast %0 : vector<1x32x9xbf16> to vector<32x9xbf16>
    %c0_2 = arith.constant 0 : index
    %c0_3 = arith.constant 0 : index
    %c0_4 = arith.constant 0 : index
    %2 = vector.load %arg3[%c0_2, %c0_3, %c0_4] : memref<8x9x1xbf16, #tpu.memory_space<vmem>>, vector<1x9x1xbf16>
    %3 = vector.shape_cast %2 : vector<1x9x1xbf16> to vector<9x1xbf16>
    %cst = arith.constant dense<0.000000e+00> : vector<32x1xf32>
    %4 = tpu.matmul %1, %3, %cst {dimension_numbers = #tpu.dot_dimension_numbers<[1], [0], [0], [1], [0, 0, 1, 1], [], []>} : vector<32x9xbf16>, vector<9x1xbf16>, vector<32x1xf32> -> vector<32x1xf32>
    %c0_5 = arith.constant 0 : index
    %c0_6 = arith.constant 0 : index
    %c0_7 = arith.constant 0 : index
    %5 = vector.load %arg4[%c0_5, %c0_6, %c0_7] : memref<8x1x1xf32, #tpu.memory_space<vmem>>, vector<1x1x1xf32>
    %6 = vector.shape_cast %5 : vector<1x1x1xf32> to vector<1x1xf32>
    %7 = vector.broadcast %6 : vector<1x1xf32> to vector<32x1xf32>
    %8 = arith.addf %4, %7 : vector<32x1xf32>
    %cst_8 = arith.constant 0.000000e+00 : f32
    %9 = vector.broadcast %cst_8 : f32 to vector<32x1xf32>
    %10 = arith.maximumf %8, %9 : vector<32x1xf32>
    %11 = arith.truncf %10 : vector<32x1xf32> to vector<32x1xbf16>
    %c0_9 = arith.constant 0 : index
    %c0_10 = arith.constant 0 : index
    %c0_11 = arith.constant 0 : index
    %12 = vector.load %arg5[%c0_9, %c0_10, %c0_11] : memref<8x32x1xbf16, #tpu.memory_space<vmem>>, vector<1x32x1xbf16>
    %13 = vector.shape_cast %12 : vector<1x32x1xbf16> to vector<32x1xbf16>
    %14 = vector.shape_cast %11 : vector<32x1xbf16> to vector<1x32x1xbf16>
    tpu.vector_store %arg5[%c0_9, %c0_10, %c0_11], %14 {strides = array<i32>} : memref<8x32x1xbf16, #tpu.memory_space<vmem>>, vector<1x32x1xbf16>,
    %c1 = arith.constant 1 : index
    %c0_12 = arith.constant 0 : index
    %c0_13 = arith.constant 0 : index
    %15 = vector.load %arg2[%c1, %c0_12, %c0_13] : memref<8x32x9xbf16, #tpu.memory_space<vmem>>, vector<1x32x9xbf16>
    %16 = vector.shape_cast %15 : vector<1x32x9xbf16> to vector<32x9xbf16>
    %c1_14 = arith.constant 1 : index
    %c0_15 = arith.constant 0 : index
    %c0_16 = arith.constant 0 : index
    %17 = vector.load %arg3[%c1_14, %c0_15, %c0_16] : memref<8x9x1xbf16, #tpu.memory_space<vmem>>, vector<1x9x1xbf16>
    %18 = vector.shape_cast %17 : vector<1x9x1xbf16> to vector<9x1xbf16>
    %cst_17 = arith.constant dense<0.000000e+00> : vector<32x1xf32>
    %19 = tpu.matmul %16, %18, %cst_17 {dimension_numbers = #tpu.dot_dimension_numbers<[1], [0], [0], [1], [0, 0, 1, 1], [], []>} : vector<32x9xbf16>, vector<9x1xbf16>, vector<32x1xf32> -> vector<32x1xf32>
    %c1_18 = arith.constant 1 : index
    %c0_19 = arith.constant 0 : index
    %c0_20 = arith.constant 0 : index
    %20 = vector.load %arg4[%c1_18, %c0_19, %c0_20] : memref<8x1x1xf32, #tpu.memory_space<vmem>>, vector<1x1x1xf32>
    %21 = vector.shape_cast %20 : vector<1x1x1xf32> to vector<1x1xf32>
    %22 = vector.broadcast %21 : vector<1x1xf32> to vector<32x1xf32>
    %23 = arith.addf %19, %22 : vector<32x1xf32>
    %cst_21 = arith.constant 0.000000e+00 : f32
    %24 = vector.broadcast %cst_21 : f32 to vector<32x1xf32>
    %25 = arith.maximumf %23, %24 : vector<32x1xf32>
    %26 = arith.truncf %25 : vector<32x1xf32> to vector<32x1xbf16>
    %c1_22 = arith.constant 1 : index
    %c0_23 = arith.constant 0 : index
    %c0_24 = arith.constant 0 : index
    %27 = vector.load %arg5[%c1_22, %c0_23, %c0_24] : memref<8x32x1xbf16, #tpu.memory_space<vmem>>, vector<1x32x1xbf16>
    %28 = vector.shape_cast %27 : vector<1x32x1xbf16> to vector<32x1xbf16>
    %29 = vector.shape_cast %26 : vector<32x1xbf16> to vector<1x32x1xbf16>
    tpu.vector_store %arg5[%c1_22, %c0_23, %c0_24], %29 {strides = array<i32>} : memref<8x32x1xbf16, #tpu.memory_space<vmem>>, vector<1x32x1xbf16>,
    %c2 = arith.constant 2 : index
    %c0_25 = arith.constant 0 : index
    %c0_26 = arith.constant 0 : index
    %30 = vector.load %arg2[%c2, %c0_25, %c0_26] : memref<8x32x9xbf16, #tpu.memory_space<vmem>>, vector<1x32x9xbf16>
    %31 = vector.shape_cast %30 : vector<1x32x9xbf16> to vector<32x9xbf16>
    %c2_27 = arith.constant 2 : index
    %c0_28 = arith.constant 0 : index
    %c0_29 = arith.constant 0 : index
    %32 = vector.load %arg3[%c2_27, %c0_28, %c0_29] : memref<8x9x1xbf16, #tpu.memory_space<vmem>>, vector<1x9x1xbf16>
    %33 = vector.shape_cast %32 : vector<1x9x1xbf16> to vector<9x1xbf16>
    %cst_30 = arith.constant dense<0.000000e+00> : vector<32x1xf32>
    %34 = tpu.matmul %31, %33, %cst_30 {dimension_numbers = #tpu.dot_dimension_numbers<[1], [0], [0], [1], [0, 0, 1, 1], [], []>} : vector<32x9xbf16>, vector<9x1xbf16>, vector<32x1xf32> -> vector<32x1xf32>
    %c2_31 = arith.constant 2 : index
    %c0_32 = arith.constant 0 : index
    %c0_33 = arith.constant 0 : index
    %35 = vector.load %arg4[%c2_31, %c0_32, %c0_33] : memref<8x1x1xf32, #tpu.memory_space<vmem>>, vector<1x1x1xf32>
    %36 = vector.shape_cast %35 : vector<1x1x1xf32> to vector<1x1xf32>
    %37 = vector.broadcast %36 : vector<1x1xf32> to vector<32x1xf32>
    %38 = arith.addf %34, %37 : vector<32x1xf32>
    %cst_34 = arith.constant 0.000000e+00 : f32
    %39 = vector.broadcast %cst_34 : f32 to vector<32x1xf32>
    %40 = arith.maximumf %38, %39 : vector<32x1xf32>
    %41 = arith.truncf %40 : vector<32x1xf32> to vector<32x1xbf16>
    %c2_35 = arith.constant 2 : index
    %c0_36 = arith.constant 0 : index
    %c0_37 = arith.constant 0 : index
    %42 = vector.load %arg5[%c2_35, %c0_36, %c0_37] : memref<8x32x1xbf16, #tpu.memory_space<vmem>>, vector<1x32x1xbf16>
    %43 = vector.shape_cast %42 : vector<1x32x1xbf16> to vector<32x1xbf16>
    %44 = vector.shape_cast %41 : vector<32x1xbf16> to vector<1x32x1xbf16>
    tpu.vector_store %arg5[%c2_35, %c0_36, %c0_37], %44 {strides = array<i32>} : memref<8x32x1xbf16, #tpu.memory_space<vmem>>, vector<1x32x1xbf16>,
    %c3 = arith.constant 3 : index
    %c0_38 = arith.constant 0 : index
    %c0_39 = arith.constant 0 : index
    %45 = vector.load %arg2[%c3, %c0_38, %c0_39] : memref<8x32x9xbf16, #tpu.memory_space<vmem>>, vector<1x32x9xbf16>
    %46 = vector.shape_cast %45 : vector<1x32x9xbf16> to vector<32x9xbf16>
    %c3_40 = arith.constant 3 : index
    %c0_41 = arith.constant 0 : index
    %c0_42 = arith.constant 0 : index
    %47 = vector.load %arg3[%c3_40, %c0_41, %c0_42] : memref<8x9x1xbf16, #tpu.memory_space<vmem>>, vector<1x9x1xbf16>
    %48 = vector.shape_cast %47 : vector<1x9x1xbf16> to vector<9x1xbf16>
    %cst_43 = arith.constant dense<0.000000e+00> : vector<32x1xf32>
    %49 = tpu.matmul %46, %48, %cst_43 {dimension_numbers = #tpu.dot_dimension_numbers<[1], [0], [0], [1], [0, 0, 1, 1], [], []>} : vector<32x9xbf16>, vector<9x1xbf16>, vector<32x1xf32> -> vector<32x1xf32>
    %c3_44 = arith.constant 3 : index
    %c0_45 = arith.constant 0 : index
    %c0_46 = arith.constant 0 : index
    %50 = vector.load %arg4[%c3_44, %c0_45, %c0_46] : memref<8x1x1xf32, #tpu.memory_space<vmem>>, vector<1x1x1xf32>
    %51 = vector.shape_cast %50 : vector<1x1x1xf32> to vector<1x1xf32>
    %52 = vector.broadcast %51 : vector<1x1xf32> to vector<32x1xf32>
    %53 = arith.addf %49, %52 : vector<32x1xf32>
    %cst_47 = arith.constant 0.000000e+00 : f32
    %54 = vector.broadcast %cst_47 : f32 to vector<32x1xf32>
    %55 = arith.maximumf %53, %54 : vector<32x1xf32>
    %56 = arith.truncf %55 : vector<32x1xf32> to vector<32x1xbf16>
    %c3_48 = arith.constant 3 : index
    %c0_49 = arith.constant 0 : index
    %c0_50 = arith.constant 0 : index
    %57 = vector.load %arg5[%c3_48, %c0_49, %c0_50] : memref<8x32x1xbf16, #tpu.memory_space<vmem>>, vector<1x32x1xbf16>
    %58 = vector.shape_cast %57 : vector<1x32x1xbf16> to vector<32x1xbf16>
    %59 = vector.shape_cast %56 : vector<32x1xbf16> to vector<1x32x1xbf16>
    tpu.vector_store %arg5[%c3_48, %c0_49, %c0_50], %59 {strides = array<i32>} : memref<8x32x1xbf16, #tpu.memory_space<vmem>>, vector<1x32x1xbf16>,
    %c4 = arith.constant 4 : index
    %c0_51 = arith.constant 0 : index
    %c0_52 = arith.constant 0 : index
    %60 = vector.load %arg2[%c4, %c0_51, %c0_52] : memref<8x32x9xbf16, #tpu.memory_space<vmem>>, vector<1x32x9xbf16>
    %61 = vector.shape_cast %60 : vector<1x32x9xbf16> to vector<32x9xbf16>
    %c4_53 = arith.constant 4 : index
    %c0_54 = arith.constant 0 : index
    %c0_55 = arith.constant 0 : index
    %62 = vector.load %arg3[%c4_53, %c0_54, %c0_55] : memref<8x9x1xbf16, #tpu.memory_space<vmem>>, vector<1x9x1xbf16>
    %63 = vector.shape_cast %62 : vector<1x9x1xbf16> to vector<9x1xbf16>
    %cst_56 = arith.constant dense<0.000000e+00> : vector<32x1xf32>
    %64 = tpu.matmul %61, %63, %cst_56 {dimension_numbers = #tpu.dot_dimension_numbers<[1], [0], [0], [1], [0, 0, 1, 1], [], []>} : vector<32x9xbf16>, vector<9x1xbf16>, vector<32x1xf32> -> vector<32x1xf32>
    %c4_57 = arith.constant 4 : index
    %c0_58 = arith.constant 0 : index
    %c0_59 = arith.constant 0 : index
    %65 = vector.load %arg4[%c4_57, %c0_58, %c0_59] : memref<8x1x1xf32, #tpu.memory_space<vmem>>, vector<1x1x1xf32>
    %66 = vector.shape_cast %65 : vector<1x1x1xf32> to vector<1x1xf32>
    %67 = vector.broadcast %66 : vector<1x1xf32> to vector<32x1xf32>
    %68 = arith.addf %64, %67 : vector<32x1xf32>
    %cst_60 = arith.constant 0.000000e+00 : f32
    %69 = vector.broadcast %cst_60 : f32 to vector<32x1xf32>
    %70 = arith.maximumf %68, %69 : vector<32x1xf32>
    %71 = arith.truncf %70 : vector<32x1xf32> to vector<32x1xbf16>
    %c4_61 = arith.constant 4 : index
    %c0_62 = arith.constant 0 : index
    %c0_63 = arith.constant 0 : index
    %72 = vector.load %arg5[%c4_61, %c0_62, %c0_63] : memref<8x32x1xbf16, #tpu.memory_space<vmem>>, vector<1x32x1xbf16>
    %73 = vector.shape_cast %72 : vector<1x32x1xbf16> to vector<32x1xbf16>
    %74 = vector.shape_cast %71 : vector<32x1xbf16> to vector<1x32x1xbf16>
    tpu.vector_store %arg5[%c4_61, %c0_62, %c0_63], %74 {strides = array<i32>} : memref<8x32x1xbf16, #tpu.memory_space<vmem>>, vector<1x32x1xbf16>,
    %c5 = arith.constant 5 : index
    %c0_64 = arith.constant 0 : index
    %c0_65 = arith.constant 0 : index
    %75 = vector.load %arg2[%c5, %c0_64, %c0_65] : memref<8x32x9xbf16, #tpu.memory_space<vmem>>, vector<1x32x9xbf16>
    %76 = vector.shape_cast %75 : vector<1x32x9xbf16> to vector<32x9xbf16>
    %c5_66 = arith.constant 5 : index
    %c0_67 = arith.constant 0 : index
    %c0_68 = arith.constant 0 : index
    %77 = vector.load %arg3[%c5_66, %c0_67, %c0_68] : memref<8x9x1xbf16, #tpu.memory_space<vmem>>, vector<1x9x1xbf16>
    %78 = vector.shape_cast %77 : vector<1x9x1xbf16> to vector<9x1xbf16>
    %cst_69 = arith.constant dense<0.000000e+00> : vector<32x1xf32>
    %79 = tpu.matmul %76, %78, %cst_69 {dimension_numbers = #tpu.dot_dimension_numbers<[1], [0], [0], [1], [0, 0, 1, 1], [], []>} : vector<32x9xbf16>, vector<9x1xbf16>, vector<32x1xf32> -> vector<32x1xf32>
    %c5_70 = arith.constant 5 : index
    %c0_71 = arith.constant 0 : index
    %c0_72 = arith.constant 0 : index
    %80 = vector.load %arg4[%c5_70, %c0_71, %c0_72] : memref<8x1x1xf32, #tpu.memory_space<vmem>>, vector<1x1x1xf32>
    %81 = vector.shape_cast %80 : vector<1x1x1xf32> to vector<1x1xf32>
    %82 = vector.broadcast %81 : vector<1x1xf32> to vector<32x1xf32>
    %83 = arith.addf %79, %82 : vector<32x1xf32>
    %cst_73 = arith.constant 0.000000e+00 : f32
    %84 = vector.broadcast %cst_73 : f32 to vector<32x1xf32>
    %85 = arith.maximumf %83, %84 : vector<32x1xf32>
    %86 = arith.truncf %85 : vector<32x1xf32> to vector<32x1xbf16>
    %c5_74 = arith.constant 5 : index
    %c0_75 = arith.constant 0 : index
    %c0_76 = arith.constant 0 : index
    %87 = vector.load %arg5[%c5_74, %c0_75, %c0_76] : memref<8x32x1xbf16, #tpu.memory_space<vmem>>, vector<1x32x1xbf16>
    %88 = vector.shape_cast %87 : vector<1x32x1xbf16> to vector<32x1xbf16>
    %89 = vector.shape_cast %86 : vector<32x1xbf16> to vector<1x32x1xbf16>
    tpu.vector_store %arg5[%c5_74, %c0_75, %c0_76], %89 {strides = array<i32>} : memref<8x32x1xbf16, #tpu.memory_space<vmem>>, vector<1x32x1xbf16>,
    %c6 = arith.constant 6 : index
    %c0_77 = arith.constant 0 : index
    %c0_78 = arith.constant 0 : index
    %90 = vector.load %arg2[%c6, %c0_77, %c0_78] : memref<8x32x9xbf16, #tpu.memory_space<vmem>>, vector<1x32x9xbf16>
    %91 = vector.shape_cast %90 : vector<1x32x9xbf16> to vector<32x9xbf16>
    %c6_79 = arith.constant 6 : index
    %c0_80 = arith.constant 0 : index
    %c0_81 = arith.constant 0 : index
    %92 = vector.load %arg3[%c6_79, %c0_80, %c0_81] : memref<8x9x1xbf16, #tpu.memory_space<vmem>>, vector<1x9x1xbf16>
    %93 = vector.shape_cast %92 : vector<1x9x1xbf16> to vector<9x1xbf16>
    %cst_82 = arith.constant dense<0.000000e+00> : vector<32x1xf32>
    %94 = tpu.matmul %91, %93, %cst_82 {dimension_numbers = #tpu.dot_dimension_numbers<[1], [0], [0], [1], [0, 0, 1, 1], [], []>} : vector<32x9xbf16>, vector<9x1xbf16>, vector<32x1xf32> -> vector<32x1xf32>
    %c6_83 = arith.constant 6 : index
    %c0_84 = arith.constant 0 : index
    %c0_85 = arith.constant 0 : index
    %95 = vector.load %arg4[%c6_83, %c0_84, %c0_85] : memref<8x1x1xf32, #tpu.memory_space<vmem>>, vector<1x1x1xf32>
    %96 = vector.shape_cast %95 : vector<1x1x1xf32> to vector<1x1xf32>
    %97 = vector.broadcast %96 : vector<1x1xf32> to vector<32x1xf32>
    %98 = arith.addf %94, %97 : vector<32x1xf32>
    %cst_86 = arith.constant 0.000000e+00 : f32
    %99 = vector.broadcast %cst_86 : f32 to vector<32x1xf32>
    %100 = arith.maximumf %98, %99 : vector<32x1xf32>
    %101 = arith.truncf %100 : vector<32x1xf32> to vector<32x1xbf16>
    %c6_87 = arith.constant 6 : index
    %c0_88 = arith.constant 0 : index
    %c0_89 = arith.constant 0 : index
    %102 = vector.load %arg5[%c6_87, %c0_88, %c0_89] : memref<8x32x1xbf16, #tpu.memory_space<vmem>>, vector<1x32x1xbf16>
    %103 = vector.shape_cast %102 : vector<1x32x1xbf16> to vector<32x1xbf16>
    %104 = vector.shape_cast %101 : vector<32x1xbf16> to vector<1x32x1xbf16>
    tpu.vector_store %arg5[%c6_87, %c0_88, %c0_89], %104 {strides = array<i32>} : memref<8x32x1xbf16, #tpu.memory_space<vmem>>, vector<1x32x1xbf16>,
    %c7 = arith.constant 7 : index
    %c0_90 = arith.constant 0 : index
    %c0_91 = arith.constant 0 : index
    %105 = vector.load %arg2[%c7, %c0_90, %c0_91] : memref<8x32x9xbf16, #tpu.memory_space<vmem>>, vector<1x32x9xbf16>
    %106 = vector.shape_cast %105 : vector<1x32x9xbf16> to vector<32x9xbf16>
    %c7_92 = arith.constant 7 : index
    %c0_93 = arith.constant 0 : index
    %c0_94 = arith.constant 0 : index
    %107 = vector.load %arg3[%c7_92, %c0_93, %c0_94] : memref<8x9x1xbf16, #tpu.memory_space<vmem>>, vector<1x9x1xbf16>
    %108 = vector.shape_cast %107 : vector<1x9x1xbf16> to vector<9x1xbf16>
    %cst_95 = arith.constant dense<0.000000e+00> : vector<32x1xf32>
    %109 = tpu.matmul %106, %108, %cst_95 {dimension_numbers = #tpu.dot_dimension_numbers<[1], [0], [0], [1], [0, 0, 1, 1], [], []>} : vector<32x9xbf16>, vector<9x1xbf16>, vector<32x1xf32> -> vector<32x1xf32>
    %c7_96 = arith.constant 7 : index
    %c0_97 = arith.constant 0 : index
    %c0_98 = arith.constant 0 : index
    %110 = vector.load %arg4[%c7_96, %c0_97, %c0_98] : memref<8x1x1xf32, #tpu.memory_space<vmem>>, vector<1x1x1xf32>
    %111 = vector.shape_cast %110 : vector<1x1x1xf32> to vector<1x1xf32>
    %112 = vector.broadcast %111 : vector<1x1xf32> to vector<32x1xf32>
    %113 = arith.addf %109, %112 : vector<32x1xf32>
    %cst_99 = arith.constant 0.000000e+00 : f32
    %114 = vector.broadcast %cst_99 : f32 to vector<32x1xf32>
    %115 = arith.maximumf %113, %114 : vector<32x1xf32>
    %116 = arith.truncf %115 : vector<32x1xf32> to vector<32x1xbf16>
    %c7_100 = arith.constant 7 : index
    %c0_101 = arith.constant 0 : index
    %c0_102 = arith.constant 0 : index
    %117 = vector.load %arg5[%c7_100, %c0_101, %c0_102] : memref<8x32x1xbf16, #tpu.memory_space<vmem>>, vector<1x32x1xbf16>
    %118 = vector.shape_cast %117 : vector<1x32x1xbf16> to vector<32x1xbf16>
    %119 = vector.shape_cast %116 : vector<32x1xbf16> to vector<1x32x1xbf16>
    tpu.vector_store %arg5[%c7_100, %c0_101, %c0_102], %119 {strides = array<i32>} : memref<8x32x1xbf16, #tpu.memory_space<vmem>>, vector<1x32x1xbf16>,
    return
  }
  func.func @transform_0(%arg0: i32, %arg1: i32) -> (i32, i32, i32) {
    %c0_i32 = arith.constant 0 : i32
    %c0_i32_0 = arith.constant 0 : i32
    return %arg1, %arg0, %c0_i32 : i32, i32, i32
  }
  func.func @transform_1(%arg0: i32, %arg1: i32) -> (i32, i32, i32) {
    %c0_i32 = arith.constant 0 : i32
    %c0_i32_0 = arith.constant 0 : i32
    %c0_i32_1 = arith.constant 0 : i32
    return %arg1, %c0_i32, %c0_i32_0 : i32, i32, i32
  }
  func.func @transform_2(%arg0: i32, %arg1: i32) -> (i32, i32, i32) {
    %c0_i32 = arith.constant 0 : i32
    %c0_i32_0 = arith.constant 0 : i32
    %c0_i32_1 = arith.constant 0 : i32
    return %arg1, %c0_i32, %c0_i32_0 : i32, i32, i32
  }
  func.func @transform_3(%arg0: i32, %arg1: i32) -> (i32, i32, i32) {
    %c0_i32 = arith.constant 0 : i32
    %c0_i32_0 = arith.constant 0 : i32
    return %arg1, %arg0, %c0_i32 : i32, i32, i32
  }
}

module attributes {stable_mosaic.version = 11 : i64} {
  func.func @_mm_kernel(%arg0: i32, %arg1: i32, %arg2: i32, %arg3: memref<32x128xbf16, #tpu.memory_space<vmem>>, %arg4: memref<128x128xbf16, #tpu.memory_space<vmem>>, %arg5: memref<1x128xf32, #tpu.memory_space<vmem>>, %arg6: memref<32x128xbf16, #tpu.memory_space<vmem>>, %arg7: memref<32x128xf32, #tpu.memory_space<vmem>>) attributes {dimension_semantics = [#tpu.dimension_semantics<parallel>, #tpu.dimension_semantics<parallel>, #tpu.dimension_semantics<arbitrary>], iteration_bounds = array<i64: 1, 1, 1>, scalar_prefetch = 0 : i64, scratch_operands = 1 : i64, tpu.core_type = #tpu.core_type<tc>, window_params = [{transform_indices = @transform_0, window_bounds = array<i64: 32, 128>}, {transform_indices = @transform_1, window_bounds = array<i64: 128, 128>}, {transform_indices = @transform_2, window_bounds = array<i64: 1, 128>}, {transform_indices = @transform_3, window_bounds = array<i64: 32, 128>}]} {
    %c0_i32 = arith.constant 0 : i32
    %0 = arith.cmpi eq, %arg2, %c0_i32 : i32
    %1 = arith.extui %0 : i1 to i32
    %c0_i32_0 = arith.constant 0 : i32
    %2 = arith.cmpi ne, %1, %c0_i32_0 : i32
    scf.if %2 {
      %cst_10 = arith.constant 0.000000e+00 : f32
      %12 = vector.broadcast %cst_10 : f32 to vector<32x128xf32>
      %c0_11 = arith.constant 0 : index
      %c0_12 = arith.constant 0 : index
      %13 = vector.load %arg7[%c0_11, %c0_12] : memref<32x128xf32, #tpu.memory_space<vmem>>, vector<32x128xf32>
      tpu.vector_store %arg7[%c0_11, %c0_12], %12 {strides = array<i32>} : memref<32x128xf32, #tpu.memory_space<vmem>>, vector<32x128xf32>,
    } else {
    }
    %c0 = arith.constant 0 : index
    %c0_1 = arith.constant 0 : index
    %3 = vector.load %arg7[%c0, %c0_1] : memref<32x128xf32, #tpu.memory_space<vmem>>, vector<32x128xf32>
    %c0_2 = arith.constant 0 : index
    %c0_3 = arith.constant 0 : index
    %4 = vector.load %arg3[%c0_2, %c0_3] : memref<32x128xbf16, #tpu.memory_space<vmem>>, vector<32x128xbf16>
    %c0_4 = arith.constant 0 : index
    %c0_5 = arith.constant 0 : index
    %5 = vector.load %arg4[%c0_4, %c0_5] : memref<128x128xbf16, #tpu.memory_space<vmem>>, vector<128x128xbf16>
    %cst = arith.constant dense<0.000000e+00> : vector<32x128xf32>
    %6 = tpu.matmul %4, %5, %cst {dimension_numbers = #tpu.dot_dimension_numbers<[1], [0], [0], [1], [0, 0, 1, 1], [], []>} : vector<32x128xbf16>, vector<128x128xbf16>, vector<32x128xf32> -> vector<32x128xf32>
    %7 = arith.addf %3, %6 : vector<32x128xf32>
    %c0_6 = arith.constant 0 : index
    %c0_7 = arith.constant 0 : index
    %8 = vector.load %arg7[%c0_6, %c0_7] : memref<32x128xf32, #tpu.memory_space<vmem>>, vector<32x128xf32>
    tpu.vector_store %arg7[%c0_6, %c0_7], %7 {strides = array<i32>} : memref<32x128xf32, #tpu.memory_space<vmem>>, vector<32x128xf32>,
    %c0_i32_8 = arith.constant 0 : i32
    %9 = arith.cmpi eq, %arg2, %c0_i32_8 : i32
    %10 = arith.extui %9 : i1 to i32
    %c0_i32_9 = arith.constant 0 : i32
    %11 = arith.cmpi ne, %10, %c0_i32_9 : i32
    scf.if %11 {
      %c0_10 = arith.constant 0 : index
      %c0_11 = arith.constant 0 : index
      %12 = vector.load %arg7[%c0_10, %c0_11] : memref<32x128xf32, #tpu.memory_space<vmem>>, vector<32x128xf32>
      %c0_12 = arith.constant 0 : index
      %c0_13 = arith.constant 0 : index
      %13 = vector.load %arg5[%c0_12, %c0_13] : memref<1x128xf32, #tpu.memory_space<vmem>>, vector<1x128xf32>
      %14 = vector.broadcast %13 : vector<1x128xf32> to vector<32x128xf32>
      %15 = arith.addf %12, %14 : vector<32x128xf32>
      %16 = arith.truncf %15 : vector<32x128xf32> to vector<32x128xbf16>
      %c0_14 = arith.constant 0 : index
      %c0_15 = arith.constant 0 : index
      %17 = vector.load %arg6[%c0_14, %c0_15] : memref<32x128xbf16, #tpu.memory_space<vmem>>, vector<32x128xbf16>
      tpu.vector_store %arg6[%c0_14, %c0_15], %16 {strides = array<i32>} : memref<32x128xbf16, #tpu.memory_space<vmem>>, vector<32x128xbf16>,
    } else {
    }
    return
  }
  func.func @transform_0(%arg0: i32, %arg1: i32, %arg2: i32) -> (i32, i32) {
    %c0_i32 = arith.constant 0 : i32
    return %arg0, %arg2 : i32, i32
  }
  func.func @transform_1(%arg0: i32, %arg1: i32, %arg2: i32) -> (i32, i32) {
    %c0_i32 = arith.constant 0 : i32
    return %arg2, %arg1 : i32, i32
  }
  func.func @transform_2(%arg0: i32, %arg1: i32, %arg2: i32) -> (i32, i32) {
    %c0_i32 = arith.constant 0 : i32
    %c0_i32_0 = arith.constant 0 : i32
    return %c0_i32, %arg1 : i32, i32
  }
  func.func @transform_3(%arg0: i32, %arg1: i32, %arg2: i32) -> (i32, i32) {
    %c0_i32 = arith.constant 0 : i32
    return %arg0, %arg1 : i32, i32
  }
}

module attributes {stable_mosaic.version = 11 : i64} {
  func.func @_mm_kernel(%arg0: i32, %arg1: i32, %arg2: i32, %arg3: memref<32x32xbf16, #tpu.memory_space<vmem>>, %arg4: memref<32x128xbf16, #tpu.memory_space<vmem>>, %arg5: memref<1x128xf32, #tpu.memory_space<vmem>>, %arg6: memref<32x128xbf16, #tpu.memory_space<vmem>>, %arg7: memref<32x128xbf16, #tpu.memory_space<vmem>>, %arg8: memref<32x128xf32, #tpu.memory_space<vmem>>) attributes {dimension_semantics = [#tpu.dimension_semantics<parallel>, #tpu.dimension_semantics<parallel>, #tpu.dimension_semantics<arbitrary>], iteration_bounds = array<i64: 1, 1, 1>, scalar_prefetch = 0 : i64, scratch_operands = 1 : i64, tpu.core_type = #tpu.core_type<tc>, window_params = [{transform_indices = @transform_0, window_bounds = array<i64: 32, 32>}, {transform_indices = @transform_1, window_bounds = array<i64: 32, 128>}, {transform_indices = @transform_2, window_bounds = array<i64: 1, 128>}, {transform_indices = @transform_3, window_bounds = array<i64: 32, 128>}, {transform_indices = @transform_4, window_bounds = array<i64: 32, 128>}]} {
    %c0_i32 = arith.constant 0 : i32
    %0 = arith.cmpi eq, %arg2, %c0_i32 : i32
    %1 = arith.extui %0 : i1 to i32
    %c0_i32_0 = arith.constant 0 : i32
    %2 = arith.cmpi ne, %1, %c0_i32_0 : i32
    scf.if %2 {
      %cst_10 = arith.constant 0.000000e+00 : f32
      %12 = vector.broadcast %cst_10 : f32 to vector<32x128xf32>
      %c0_11 = arith.constant 0 : index
      %c0_12 = arith.constant 0 : index
      %13 = vector.load %arg8[%c0_11, %c0_12] : memref<32x128xf32, #tpu.memory_space<vmem>>, vector<32x128xf32>
      tpu.vector_store %arg8[%c0_11, %c0_12], %12 {strides = array<i32>} : memref<32x128xf32, #tpu.memory_space<vmem>>, vector<32x128xf32>,
    } else {
    }
    %c0 = arith.constant 0 : index
    %c0_1 = arith.constant 0 : index
    %3 = vector.load %arg8[%c0, %c0_1] : memref<32x128xf32, #tpu.memory_space<vmem>>, vector<32x128xf32>
    %c0_2 = arith.constant 0 : index
    %c0_3 = arith.constant 0 : index
    %4 = vector.load %arg3[%c0_2, %c0_3] : memref<32x32xbf16, #tpu.memory_space<vmem>>, vector<32x32xbf16>
    %c0_4 = arith.constant 0 : index
    %c0_5 = arith.constant 0 : index
    %5 = vector.load %arg4[%c0_4, %c0_5] : memref<32x128xbf16, #tpu.memory_space<vmem>>, vector<32x128xbf16>
    %cst = arith.constant dense<0.000000e+00> : vector<32x128xf32>
    %6 = tpu.matmul %4, %5, %cst {dimension_numbers = #tpu.dot_dimension_numbers<[1], [0], [0], [1], [0, 0, 1, 1], [], []>} : vector<32x32xbf16>, vector<32x128xbf16>, vector<32x128xf32> -> vector<32x128xf32>
    %7 = arith.addf %3, %6 : vector<32x128xf32>
    %c0_6 = arith.constant 0 : index
    %c0_7 = arith.constant 0 : index
    %8 = vector.load %arg8[%c0_6, %c0_7] : memref<32x128xf32, #tpu.memory_space<vmem>>, vector<32x128xf32>
    tpu.vector_store %arg8[%c0_6, %c0_7], %7 {strides = array<i32>} : memref<32x128xf32, #tpu.memory_space<vmem>>, vector<32x128xf32>,
    %c0_i32_8 = arith.constant 0 : i32
    %9 = arith.cmpi eq, %arg2, %c0_i32_8 : i32
    %10 = arith.extui %9 : i1 to i32
    %c0_i32_9 = arith.constant 0 : i32
    %11 = arith.cmpi ne, %10, %c0_i32_9 : i32
    scf.if %11 {
      %c0_10 = arith.constant 0 : index
      %c0_11 = arith.constant 0 : index
      %12 = vector.load %arg8[%c0_10, %c0_11] : memref<32x128xf32, #tpu.memory_space<vmem>>, vector<32x128xf32>
      %c0_12 = arith.constant 0 : index
      %c0_13 = arith.constant 0 : index
      %13 = vector.load %arg5[%c0_12, %c0_13] : memref<1x128xf32, #tpu.memory_space<vmem>>, vector<1x128xf32>
      %14 = vector.broadcast %13 : vector<1x128xf32> to vector<32x128xf32>
      %15 = arith.addf %12, %14 : vector<32x128xf32>
      %c0_14 = arith.constant 0 : index
      %c0_15 = arith.constant 0 : index
      %16 = vector.load %arg6[%c0_14, %c0_15] : memref<32x128xbf16, #tpu.memory_space<vmem>>, vector<32x128xbf16>
      %17 = arith.extf %16 : vector<32x128xbf16> to vector<32x128xf32>
      %18 = arith.addf %15, %17 : vector<32x128xf32>
      %cst_16 = arith.constant 0.000000e+00 : f32
      %19 = vector.broadcast %cst_16 : f32 to vector<32x128xf32>
      %20 = arith.maximumf %18, %19 : vector<32x128xf32>
      %21 = arith.truncf %20 : vector<32x128xf32> to vector<32x128xbf16>
      %c0_17 = arith.constant 0 : index
      %c0_18 = arith.constant 0 : index
      %22 = vector.load %arg7[%c0_17, %c0_18] : memref<32x128xbf16, #tpu.memory_space<vmem>>, vector<32x128xbf16>
      tpu.vector_store %arg7[%c0_17, %c0_18], %21 {strides = array<i32>} : memref<32x128xbf16, #tpu.memory_space<vmem>>, vector<32x128xbf16>,
    } else {
    }
    return
  }
  func.func @transform_0(%arg0: i32, %arg1: i32, %arg2: i32) -> (i32, i32) {
    %c0_i32 = arith.constant 0 : i32
    return %arg0, %arg2 : i32, i32
  }
  func.func @transform_1(%arg0: i32, %arg1: i32, %arg2: i32) -> (i32, i32) {
    %c0_i32 = arith.constant 0 : i32
    return %arg2, %arg1 : i32, i32
  }
  func.func @transform_2(%arg0: i32, %arg1: i32, %arg2: i32) -> (i32, i32) {
    %c0_i32 = arith.constant 0 : i32
    %c0_i32_0 = arith.constant 0 : i32
    return %c0_i32, %arg1 : i32, i32
  }
  func.func @transform_3(%arg0: i32, %arg1: i32, %arg2: i32) -> (i32, i32) {
    %c0_i32 = arith.constant 0 : i32
    return %arg0, %arg1 : i32, i32
  }
  func.func @transform_4(%arg0: i32, %arg1: i32, %arg2: i32) -> (i32, i32) {
    %c0_i32 = arith.constant 0 : i32
    return %arg0, %arg1 : i32, i32
  }
}

module attributes {stable_mosaic.version = 11 : i64} {
  func.func @_group_conv_kernel(%arg0: i32, %arg1: i32, %arg2: memref<8x8x18xbf16, #tpu.memory_space<vmem>>, %arg3: memref<8x18x2xbf16, #tpu.memory_space<vmem>>, %arg4: memref<8x1x2xf32, #tpu.memory_space<vmem>>, %arg5: memref<8x8x2xbf16, #tpu.memory_space<vmem>>) attributes {dimension_semantics = [#tpu.dimension_semantics<parallel>, #tpu.dimension_semantics<parallel>], iteration_bounds = array<i64: 1, 4>, scalar_prefetch = 0 : i64, scratch_operands = 0 : i64, tpu.core_type = #tpu.core_type<tc>, window_params = [{transform_indices = @transform_0, window_bounds = array<i64: 8, 8, 18>}, {transform_indices = @transform_1, window_bounds = array<i64: 8, 18, 2>}, {transform_indices = @transform_2, window_bounds = array<i64: 8, 1, 2>}, {transform_indices = @transform_3, window_bounds = array<i64: 8, 8, 2>}]} {
    %c0 = arith.constant 0 : index
    %c0_0 = arith.constant 0 : index
    %c0_1 = arith.constant 0 : index
    %0 = vector.load %arg2[%c0, %c0_0, %c0_1] : memref<8x8x18xbf16, #tpu.memory_space<vmem>>, vector<1x8x18xbf16>
    %1 = vector.shape_cast %0 : vector<1x8x18xbf16> to vector<8x18xbf16>
    %c0_2 = arith.constant 0 : index
    %c0_3 = arith.constant 0 : index
    %c0_4 = arith.constant 0 : index
    %2 = vector.load %arg3[%c0_2, %c0_3, %c0_4] : memref<8x18x2xbf16, #tpu.memory_space<vmem>>, vector<1x18x2xbf16>
    %3 = vector.shape_cast %2 : vector<1x18x2xbf16> to vector<18x2xbf16>
    %cst = arith.constant dense<0.000000e+00> : vector<8x2xf32>
    %4 = tpu.matmul %1, %3, %cst {dimension_numbers = #tpu.dot_dimension_numbers<[1], [0], [0], [1], [0, 0, 1, 1], [], []>} : vector<8x18xbf16>, vector<18x2xbf16>, vector<8x2xf32> -> vector<8x2xf32>
    %c0_5 = arith.constant 0 : index
    %c0_6 = arith.constant 0 : index
    %c0_7 = arith.constant 0 : index
    %5 = vector.load %arg4[%c0_5, %c0_6, %c0_7] : memref<8x1x2xf32, #tpu.memory_space<vmem>>, vector<1x1x2xf32>
    %6 = vector.shape_cast %5 : vector<1x1x2xf32> to vector<1x2xf32>
    %7 = vector.broadcast %6 : vector<1x2xf32> to vector<8x2xf32>
    %8 = arith.addf %4, %7 : vector<8x2xf32>
    %cst_8 = arith.constant 0.000000e+00 : f32
    %9 = vector.broadcast %cst_8 : f32 to vector<8x2xf32>
    %10 = arith.maximumf %8, %9 : vector<8x2xf32>
    %11 = arith.truncf %10 : vector<8x2xf32> to vector<8x2xbf16>
    %c0_9 = arith.constant 0 : index
    %c0_10 = arith.constant 0 : index
    %c0_11 = arith.constant 0 : index
    %12 = vector.load %arg5[%c0_9, %c0_10, %c0_11] : memref<8x8x2xbf16, #tpu.memory_space<vmem>>, vector<1x8x2xbf16>
    %13 = vector.shape_cast %12 : vector<1x8x2xbf16> to vector<8x2xbf16>
    %14 = vector.shape_cast %11 : vector<8x2xbf16> to vector<1x8x2xbf16>
    tpu.vector_store %arg5[%c0_9, %c0_10, %c0_11], %14 {strides = array<i32>} : memref<8x8x2xbf16, #tpu.memory_space<vmem>>, vector<1x8x2xbf16>,
    %c1 = arith.constant 1 : index
    %c0_12 = arith.constant 0 : index
    %c0_13 = arith.constant 0 : index
    %15 = vector.load %arg2[%c1, %c0_12, %c0_13] : memref<8x8x18xbf16, #tpu.memory_space<vmem>>, vector<1x8x18xbf16>
    %16 = vector.shape_cast %15 : vector<1x8x18xbf16> to vector<8x18xbf16>
    %c1_14 = arith.constant 1 : index
    %c0_15 = arith.constant 0 : index
    %c0_16 = arith.constant 0 : index
    %17 = vector.load %arg3[%c1_14, %c0_15, %c0_16] : memref<8x18x2xbf16, #tpu.memory_space<vmem>>, vector<1x18x2xbf16>
    %18 = vector.shape_cast %17 : vector<1x18x2xbf16> to vector<18x2xbf16>
    %cst_17 = arith.constant dense<0.000000e+00> : vector<8x2xf32>
    %19 = tpu.matmul %16, %18, %cst_17 {dimension_numbers = #tpu.dot_dimension_numbers<[1], [0], [0], [1], [0, 0, 1, 1], [], []>} : vector<8x18xbf16>, vector<18x2xbf16>, vector<8x2xf32> -> vector<8x2xf32>
    %c1_18 = arith.constant 1 : index
    %c0_19 = arith.constant 0 : index
    %c0_20 = arith.constant 0 : index
    %20 = vector.load %arg4[%c1_18, %c0_19, %c0_20] : memref<8x1x2xf32, #tpu.memory_space<vmem>>, vector<1x1x2xf32>
    %21 = vector.shape_cast %20 : vector<1x1x2xf32> to vector<1x2xf32>
    %22 = vector.broadcast %21 : vector<1x2xf32> to vector<8x2xf32>
    %23 = arith.addf %19, %22 : vector<8x2xf32>
    %cst_21 = arith.constant 0.000000e+00 : f32
    %24 = vector.broadcast %cst_21 : f32 to vector<8x2xf32>
    %25 = arith.maximumf %23, %24 : vector<8x2xf32>
    %26 = arith.truncf %25 : vector<8x2xf32> to vector<8x2xbf16>
    %c1_22 = arith.constant 1 : index
    %c0_23 = arith.constant 0 : index
    %c0_24 = arith.constant 0 : index
    %27 = vector.load %arg5[%c1_22, %c0_23, %c0_24] : memref<8x8x2xbf16, #tpu.memory_space<vmem>>, vector<1x8x2xbf16>
    %28 = vector.shape_cast %27 : vector<1x8x2xbf16> to vector<8x2xbf16>
    %29 = vector.shape_cast %26 : vector<8x2xbf16> to vector<1x8x2xbf16>
    tpu.vector_store %arg5[%c1_22, %c0_23, %c0_24], %29 {strides = array<i32>} : memref<8x8x2xbf16, #tpu.memory_space<vmem>>, vector<1x8x2xbf16>,
    %c2 = arith.constant 2 : index
    %c0_25 = arith.constant 0 : index
    %c0_26 = arith.constant 0 : index
    %30 = vector.load %arg2[%c2, %c0_25, %c0_26] : memref<8x8x18xbf16, #tpu.memory_space<vmem>>, vector<1x8x18xbf16>
    %31 = vector.shape_cast %30 : vector<1x8x18xbf16> to vector<8x18xbf16>
    %c2_27 = arith.constant 2 : index
    %c0_28 = arith.constant 0 : index
    %c0_29 = arith.constant 0 : index
    %32 = vector.load %arg3[%c2_27, %c0_28, %c0_29] : memref<8x18x2xbf16, #tpu.memory_space<vmem>>, vector<1x18x2xbf16>
    %33 = vector.shape_cast %32 : vector<1x18x2xbf16> to vector<18x2xbf16>
    %cst_30 = arith.constant dense<0.000000e+00> : vector<8x2xf32>
    %34 = tpu.matmul %31, %33, %cst_30 {dimension_numbers = #tpu.dot_dimension_numbers<[1], [0], [0], [1], [0, 0, 1, 1], [], []>} : vector<8x18xbf16>, vector<18x2xbf16>, vector<8x2xf32> -> vector<8x2xf32>
    %c2_31 = arith.constant 2 : index
    %c0_32 = arith.constant 0 : index
    %c0_33 = arith.constant 0 : index
    %35 = vector.load %arg4[%c2_31, %c0_32, %c0_33] : memref<8x1x2xf32, #tpu.memory_space<vmem>>, vector<1x1x2xf32>
    %36 = vector.shape_cast %35 : vector<1x1x2xf32> to vector<1x2xf32>
    %37 = vector.broadcast %36 : vector<1x2xf32> to vector<8x2xf32>
    %38 = arith.addf %34, %37 : vector<8x2xf32>
    %cst_34 = arith.constant 0.000000e+00 : f32
    %39 = vector.broadcast %cst_34 : f32 to vector<8x2xf32>
    %40 = arith.maximumf %38, %39 : vector<8x2xf32>
    %41 = arith.truncf %40 : vector<8x2xf32> to vector<8x2xbf16>
    %c2_35 = arith.constant 2 : index
    %c0_36 = arith.constant 0 : index
    %c0_37 = arith.constant 0 : index
    %42 = vector.load %arg5[%c2_35, %c0_36, %c0_37] : memref<8x8x2xbf16, #tpu.memory_space<vmem>>, vector<1x8x2xbf16>
    %43 = vector.shape_cast %42 : vector<1x8x2xbf16> to vector<8x2xbf16>
    %44 = vector.shape_cast %41 : vector<8x2xbf16> to vector<1x8x2xbf16>
    tpu.vector_store %arg5[%c2_35, %c0_36, %c0_37], %44 {strides = array<i32>} : memref<8x8x2xbf16, #tpu.memory_space<vmem>>, vector<1x8x2xbf16>,
    %c3 = arith.constant 3 : index
    %c0_38 = arith.constant 0 : index
    %c0_39 = arith.constant 0 : index
    %45 = vector.load %arg2[%c3, %c0_38, %c0_39] : memref<8x8x18xbf16, #tpu.memory_space<vmem>>, vector<1x8x18xbf16>
    %46 = vector.shape_cast %45 : vector<1x8x18xbf16> to vector<8x18xbf16>
    %c3_40 = arith.constant 3 : index
    %c0_41 = arith.constant 0 : index
    %c0_42 = arith.constant 0 : index
    %47 = vector.load %arg3[%c3_40, %c0_41, %c0_42] : memref<8x18x2xbf16, #tpu.memory_space<vmem>>, vector<1x18x2xbf16>
    %48 = vector.shape_cast %47 : vector<1x18x2xbf16> to vector<18x2xbf16>
    %cst_43 = arith.constant dense<0.000000e+00> : vector<8x2xf32>
    %49 = tpu.matmul %46, %48, %cst_43 {dimension_numbers = #tpu.dot_dimension_numbers<[1], [0], [0], [1], [0, 0, 1, 1], [], []>} : vector<8x18xbf16>, vector<18x2xbf16>, vector<8x2xf32> -> vector<8x2xf32>
    %c3_44 = arith.constant 3 : index
    %c0_45 = arith.constant 0 : index
    %c0_46 = arith.constant 0 : index
    %50 = vector.load %arg4[%c3_44, %c0_45, %c0_46] : memref<8x1x2xf32, #tpu.memory_space<vmem>>, vector<1x1x2xf32>
    %51 = vector.shape_cast %50 : vector<1x1x2xf32> to vector<1x2xf32>
    %52 = vector.broadcast %51 : vector<1x2xf32> to vector<8x2xf32>
    %53 = arith.addf %49, %52 : vector<8x2xf32>
    %cst_47 = arith.constant 0.000000e+00 : f32
    %54 = vector.broadcast %cst_47 : f32 to vector<8x2xf32>
    %55 = arith.maximumf %53, %54 : vector<8x2xf32>
    %56 = arith.truncf %55 : vector<8x2xf32> to vector<8x2xbf16>
    %c3_48 = arith.constant 3 : index
    %c0_49 = arith.constant 0 : index
    %c0_50 = arith.constant 0 : index
    %57 = vector.load %arg5[%c3_48, %c0_49, %c0_50] : memref<8x8x2xbf16, #tpu.memory_space<vmem>>, vector<1x8x2xbf16>
    %58 = vector.shape_cast %57 : vector<1x8x2xbf16> to vector<8x2xbf16>
    %59 = vector.shape_cast %56 : vector<8x2xbf16> to vector<1x8x2xbf16>
    tpu.vector_store %arg5[%c3_48, %c0_49, %c0_50], %59 {strides = array<i32>} : memref<8x8x2xbf16, #tpu.memory_space<vmem>>, vector<1x8x2xbf16>,
    %c4 = arith.constant 4 : index
    %c0_51 = arith.constant 0 : index
    %c0_52 = arith.constant 0 : index
    %60 = vector.load %arg2[%c4, %c0_51, %c0_52] : memref<8x8x18xbf16, #tpu.memory_space<vmem>>, vector<1x8x18xbf16>
    %61 = vector.shape_cast %60 : vector<1x8x18xbf16> to vector<8x18xbf16>
    %c4_53 = arith.constant 4 : index
    %c0_54 = arith.constant 0 : index
    %c0_55 = arith.constant 0 : index
    %62 = vector.load %arg3[%c4_53, %c0_54, %c0_55] : memref<8x18x2xbf16, #tpu.memory_space<vmem>>, vector<1x18x2xbf16>
    %63 = vector.shape_cast %62 : vector<1x18x2xbf16> to vector<18x2xbf16>
    %cst_56 = arith.constant dense<0.000000e+00> : vector<8x2xf32>
    %64 = tpu.matmul %61, %63, %cst_56 {dimension_numbers = #tpu.dot_dimension_numbers<[1], [0], [0], [1], [0, 0, 1, 1], [], []>} : vector<8x18xbf16>, vector<18x2xbf16>, vector<8x2xf32> -> vector<8x2xf32>
    %c4_57 = arith.constant 4 : index
    %c0_58 = arith.constant 0 : index
    %c0_59 = arith.constant 0 : index
    %65 = vector.load %arg4[%c4_57, %c0_58, %c0_59] : memref<8x1x2xf32, #tpu.memory_space<vmem>>, vector<1x1x2xf32>
    %66 = vector.shape_cast %65 : vector<1x1x2xf32> to vector<1x2xf32>
    %67 = vector.broadcast %66 : vector<1x2xf32> to vector<8x2xf32>
    %68 = arith.addf %64, %67 : vector<8x2xf32>
    %cst_60 = arith.constant 0.000000e+00 : f32
    %69 = vector.broadcast %cst_60 : f32 to vector<8x2xf32>
    %70 = arith.maximumf %68, %69 : vector<8x2xf32>
    %71 = arith.truncf %70 : vector<8x2xf32> to vector<8x2xbf16>
    %c4_61 = arith.constant 4 : index
    %c0_62 = arith.constant 0 : index
    %c0_63 = arith.constant 0 : index
    %72 = vector.load %arg5[%c4_61, %c0_62, %c0_63] : memref<8x8x2xbf16, #tpu.memory_space<vmem>>, vector<1x8x2xbf16>
    %73 = vector.shape_cast %72 : vector<1x8x2xbf16> to vector<8x2xbf16>
    %74 = vector.shape_cast %71 : vector<8x2xbf16> to vector<1x8x2xbf16>
    tpu.vector_store %arg5[%c4_61, %c0_62, %c0_63], %74 {strides = array<i32>} : memref<8x8x2xbf16, #tpu.memory_space<vmem>>, vector<1x8x2xbf16>,
    %c5 = arith.constant 5 : index
    %c0_64 = arith.constant 0 : index
    %c0_65 = arith.constant 0 : index
    %75 = vector.load %arg2[%c5, %c0_64, %c0_65] : memref<8x8x18xbf16, #tpu.memory_space<vmem>>, vector<1x8x18xbf16>
    %76 = vector.shape_cast %75 : vector<1x8x18xbf16> to vector<8x18xbf16>
    %c5_66 = arith.constant 5 : index
    %c0_67 = arith.constant 0 : index
    %c0_68 = arith.constant 0 : index
    %77 = vector.load %arg3[%c5_66, %c0_67, %c0_68] : memref<8x18x2xbf16, #tpu.memory_space<vmem>>, vector<1x18x2xbf16>
    %78 = vector.shape_cast %77 : vector<1x18x2xbf16> to vector<18x2xbf16>
    %cst_69 = arith.constant dense<0.000000e+00> : vector<8x2xf32>
    %79 = tpu.matmul %76, %78, %cst_69 {dimension_numbers = #tpu.dot_dimension_numbers<[1], [0], [0], [1], [0, 0, 1, 1], [], []>} : vector<8x18xbf16>, vector<18x2xbf16>, vector<8x2xf32> -> vector<8x2xf32>
    %c5_70 = arith.constant 5 : index
    %c0_71 = arith.constant 0 : index
    %c0_72 = arith.constant 0 : index
    %80 = vector.load %arg4[%c5_70, %c0_71, %c0_72] : memref<8x1x2xf32, #tpu.memory_space<vmem>>, vector<1x1x2xf32>
    %81 = vector.shape_cast %80 : vector<1x1x2xf32> to vector<1x2xf32>
    %82 = vector.broadcast %81 : vector<1x2xf32> to vector<8x2xf32>
    %83 = arith.addf %79, %82 : vector<8x2xf32>
    %cst_73 = arith.constant 0.000000e+00 : f32
    %84 = vector.broadcast %cst_73 : f32 to vector<8x2xf32>
    %85 = arith.maximumf %83, %84 : vector<8x2xf32>
    %86 = arith.truncf %85 : vector<8x2xf32> to vector<8x2xbf16>
    %c5_74 = arith.constant 5 : index
    %c0_75 = arith.constant 0 : index
    %c0_76 = arith.constant 0 : index
    %87 = vector.load %arg5[%c5_74, %c0_75, %c0_76] : memref<8x8x2xbf16, #tpu.memory_space<vmem>>, vector<1x8x2xbf16>
    %88 = vector.shape_cast %87 : vector<1x8x2xbf16> to vector<8x2xbf16>
    %89 = vector.shape_cast %86 : vector<8x2xbf16> to vector<1x8x2xbf16>
    tpu.vector_store %arg5[%c5_74, %c0_75, %c0_76], %89 {strides = array<i32>} : memref<8x8x2xbf16, #tpu.memory_space<vmem>>, vector<1x8x2xbf16>,
    %c6 = arith.constant 6 : index
    %c0_77 = arith.constant 0 : index
    %c0_78 = arith.constant 0 : index
    %90 = vector.load %arg2[%c6, %c0_77, %c0_78] : memref<8x8x18xbf16, #tpu.memory_space<vmem>>, vector<1x8x18xbf16>
    %91 = vector.shape_cast %90 : vector<1x8x18xbf16> to vector<8x18xbf16>
    %c6_79 = arith.constant 6 : index
    %c0_80 = arith.constant 0 : index
    %c0_81 = arith.constant 0 : index
    %92 = vector.load %arg3[%c6_79, %c0_80, %c0_81] : memref<8x18x2xbf16, #tpu.memory_space<vmem>>, vector<1x18x2xbf16>
    %93 = vector.shape_cast %92 : vector<1x18x2xbf16> to vector<18x2xbf16>
    %cst_82 = arith.constant dense<0.000000e+00> : vector<8x2xf32>
    %94 = tpu.matmul %91, %93, %cst_82 {dimension_numbers = #tpu.dot_dimension_numbers<[1], [0], [0], [1], [0, 0, 1, 1], [], []>} : vector<8x18xbf16>, vector<18x2xbf16>, vector<8x2xf32> -> vector<8x2xf32>
    %c6_83 = arith.constant 6 : index
    %c0_84 = arith.constant 0 : index
    %c0_85 = arith.constant 0 : index
    %95 = vector.load %arg4[%c6_83, %c0_84, %c0_85] : memref<8x1x2xf32, #tpu.memory_space<vmem>>, vector<1x1x2xf32>
    %96 = vector.shape_cast %95 : vector<1x1x2xf32> to vector<1x2xf32>
    %97 = vector.broadcast %96 : vector<1x2xf32> to vector<8x2xf32>
    %98 = arith.addf %94, %97 : vector<8x2xf32>
    %cst_86 = arith.constant 0.000000e+00 : f32
    %99 = vector.broadcast %cst_86 : f32 to vector<8x2xf32>
    %100 = arith.maximumf %98, %99 : vector<8x2xf32>
    %101 = arith.truncf %100 : vector<8x2xf32> to vector<8x2xbf16>
    %c6_87 = arith.constant 6 : index
    %c0_88 = arith.constant 0 : index
    %c0_89 = arith.constant 0 : index
    %102 = vector.load %arg5[%c6_87, %c0_88, %c0_89] : memref<8x8x2xbf16, #tpu.memory_space<vmem>>, vector<1x8x2xbf16>
    %103 = vector.shape_cast %102 : vector<1x8x2xbf16> to vector<8x2xbf16>
    %104 = vector.shape_cast %101 : vector<8x2xbf16> to vector<1x8x2xbf16>
    tpu.vector_store %arg5[%c6_87, %c0_88, %c0_89], %104 {strides = array<i32>} : memref<8x8x2xbf16, #tpu.memory_space<vmem>>, vector<1x8x2xbf16>,
    %c7 = arith.constant 7 : index
    %c0_90 = arith.constant 0 : index
    %c0_91 = arith.constant 0 : index
    %105 = vector.load %arg2[%c7, %c0_90, %c0_91] : memref<8x8x18xbf16, #tpu.memory_space<vmem>>, vector<1x8x18xbf16>
    %106 = vector.shape_cast %105 : vector<1x8x18xbf16> to vector<8x18xbf16>
    %c7_92 = arith.constant 7 : index
    %c0_93 = arith.constant 0 : index
    %c0_94 = arith.constant 0 : index
    %107 = vector.load %arg3[%c7_92, %c0_93, %c0_94] : memref<8x18x2xbf16, #tpu.memory_space<vmem>>, vector<1x18x2xbf16>
    %108 = vector.shape_cast %107 : vector<1x18x2xbf16> to vector<18x2xbf16>
    %cst_95 = arith.constant dense<0.000000e+00> : vector<8x2xf32>
    %109 = tpu.matmul %106, %108, %cst_95 {dimension_numbers = #tpu.dot_dimension_numbers<[1], [0], [0], [1], [0, 0, 1, 1], [], []>} : vector<8x18xbf16>, vector<18x2xbf16>, vector<8x2xf32> -> vector<8x2xf32>
    %c7_96 = arith.constant 7 : index
    %c0_97 = arith.constant 0 : index
    %c0_98 = arith.constant 0 : index
    %110 = vector.load %arg4[%c7_96, %c0_97, %c0_98] : memref<8x1x2xf32, #tpu.memory_space<vmem>>, vector<1x1x2xf32>
    %111 = vector.shape_cast %110 : vector<1x1x2xf32> to vector<1x2xf32>
    %112 = vector.broadcast %111 : vector<1x2xf32> to vector<8x2xf32>
    %113 = arith.addf %109, %112 : vector<8x2xf32>
    %cst_99 = arith.constant 0.000000e+00 : f32
    %114 = vector.broadcast %cst_99 : f32 to vector<8x2xf32>
    %115 = arith.maximumf %113, %114 : vector<8x2xf32>
    %116 = arith.truncf %115 : vector<8x2xf32> to vector<8x2xbf16>
    %c7_100 = arith.constant 7 : index
    %c0_101 = arith.constant 0 : index
    %c0_102 = arith.constant 0 : index
    %117 = vector.load %arg5[%c7_100, %c0_101, %c0_102] : memref<8x8x2xbf16, #tpu.memory_space<vmem>>, vector<1x8x2xbf16>
    %118 = vector.shape_cast %117 : vector<1x8x2xbf16> to vector<8x2xbf16>
    %119 = vector.shape_cast %116 : vector<8x2xbf16> to vector<1x8x2xbf16>
    tpu.vector_store %arg5[%c7_100, %c0_101, %c0_102], %119 {strides = array<i32>} : memref<8x8x2xbf16, #tpu.memory_space<vmem>>, vector<1x8x2xbf16>,
    return
  }
  func.func @transform_0(%arg0: i32, %arg1: i32) -> (i32, i32, i32) {
    %c0_i32 = arith.constant 0 : i32
    %c0_i32_0 = arith.constant 0 : i32
    return %arg1, %arg0, %c0_i32 : i32, i32, i32
  }
  func.func @transform_1(%arg0: i32, %arg1: i32) -> (i32, i32, i32) {
    %c0_i32 = arith.constant 0 : i32
    %c0_i32_0 = arith.constant 0 : i32
    %c0_i32_1 = arith.constant 0 : i32
    return %arg1, %c0_i32, %c0_i32_0 : i32, i32, i32
  }
  func.func @transform_2(%arg0: i32, %arg1: i32) -> (i32, i32, i32) {
    %c0_i32 = arith.constant 0 : i32
    %c0_i32_0 = arith.constant 0 : i32
    %c0_i32_1 = arith.constant 0 : i32
    return %arg1, %c0_i32, %c0_i32_0 : i32, i32, i32
  }
  func.func @transform_3(%arg0: i32, %arg1: i32) -> (i32, i32, i32) {
    %c0_i32 = arith.constant 0 : i32
    %c0_i32_0 = arith.constant 0 : i32
    return %arg1, %arg0, %c0_i32 : i32, i32, i32
  }
}

module attributes {stable_mosaic.version = 11 : i64} {
  func.func @_mm_kernel(%arg0: i32, %arg1: i32, %arg2: i32, %arg3: memref<8x128xbf16, #tpu.memory_space<vmem>>, %arg4: memref<128x128xbf16, #tpu.memory_space<vmem>>, %arg5: memref<1x128xf32, #tpu.memory_space<vmem>>, %arg6: memref<8x128xbf16, #tpu.memory_space<vmem>>, %arg7: memref<8x128xf32, #tpu.memory_space<vmem>>) attributes {dimension_semantics = [#tpu.dimension_semantics<parallel>, #tpu.dimension_semantics<parallel>, #tpu.dimension_semantics<arbitrary>], iteration_bounds = array<i64: 1, 1, 1>, scalar_prefetch = 0 : i64, scratch_operands = 1 : i64, tpu.core_type = #tpu.core_type<tc>, window_params = [{transform_indices = @transform_0, window_bounds = array<i64: 8, 128>}, {transform_indices = @transform_1, window_bounds = array<i64: 128, 128>}, {transform_indices = @transform_2, window_bounds = array<i64: 1, 128>}, {transform_indices = @transform_3, window_bounds = array<i64: 8, 128>}]} {
    %c0_i32 = arith.constant 0 : i32
    %0 = arith.cmpi eq, %arg2, %c0_i32 : i32
    %1 = arith.extui %0 : i1 to i32
    %c0_i32_0 = arith.constant 0 : i32
    %2 = arith.cmpi ne, %1, %c0_i32_0 : i32
    scf.if %2 {
      %cst_10 = arith.constant 0.000000e+00 : f32
      %12 = vector.broadcast %cst_10 : f32 to vector<8x128xf32>
      %c0_11 = arith.constant 0 : index
      %c0_12 = arith.constant 0 : index
      %13 = vector.load %arg7[%c0_11, %c0_12] : memref<8x128xf32, #tpu.memory_space<vmem>>, vector<8x128xf32>
      tpu.vector_store %arg7[%c0_11, %c0_12], %12 {strides = array<i32>} : memref<8x128xf32, #tpu.memory_space<vmem>>, vector<8x128xf32>,
    } else {
    }
    %c0 = arith.constant 0 : index
    %c0_1 = arith.constant 0 : index
    %3 = vector.load %arg7[%c0, %c0_1] : memref<8x128xf32, #tpu.memory_space<vmem>>, vector<8x128xf32>
    %c0_2 = arith.constant 0 : index
    %c0_3 = arith.constant 0 : index
    %4 = vector.load %arg3[%c0_2, %c0_3] : memref<8x128xbf16, #tpu.memory_space<vmem>>, vector<8x128xbf16>
    %c0_4 = arith.constant 0 : index
    %c0_5 = arith.constant 0 : index
    %5 = vector.load %arg4[%c0_4, %c0_5] : memref<128x128xbf16, #tpu.memory_space<vmem>>, vector<128x128xbf16>
    %cst = arith.constant dense<0.000000e+00> : vector<8x128xf32>
    %6 = tpu.matmul %4, %5, %cst {dimension_numbers = #tpu.dot_dimension_numbers<[1], [0], [0], [1], [0, 0, 1, 1], [], []>} : vector<8x128xbf16>, vector<128x128xbf16>, vector<8x128xf32> -> vector<8x128xf32>
    %7 = arith.addf %3, %6 : vector<8x128xf32>
    %c0_6 = arith.constant 0 : index
    %c0_7 = arith.constant 0 : index
    %8 = vector.load %arg7[%c0_6, %c0_7] : memref<8x128xf32, #tpu.memory_space<vmem>>, vector<8x128xf32>
    tpu.vector_store %arg7[%c0_6, %c0_7], %7 {strides = array<i32>} : memref<8x128xf32, #tpu.memory_space<vmem>>, vector<8x128xf32>,
    %c0_i32_8 = arith.constant 0 : i32
    %9 = arith.cmpi eq, %arg2, %c0_i32_8 : i32
    %10 = arith.extui %9 : i1 to i32
    %c0_i32_9 = arith.constant 0 : i32
    %11 = arith.cmpi ne, %10, %c0_i32_9 : i32
    scf.if %11 {
      %c0_10 = arith.constant 0 : index
      %c0_11 = arith.constant 0 : index
      %12 = vector.load %arg7[%c0_10, %c0_11] : memref<8x128xf32, #tpu.memory_space<vmem>>, vector<8x128xf32>
      %c0_12 = arith.constant 0 : index
      %c0_13 = arith.constant 0 : index
      %13 = vector.load %arg5[%c0_12, %c0_13] : memref<1x128xf32, #tpu.memory_space<vmem>>, vector<1x128xf32>
      %14 = vector.broadcast %13 : vector<1x128xf32> to vector<8x128xf32>
      %15 = arith.addf %12, %14 : vector<8x128xf32>
      %cst_14 = arith.constant 0.000000e+00 : f32
      %16 = vector.broadcast %cst_14 : f32 to vector<8x128xf32>
      %17 = arith.maximumf %15, %16 : vector<8x128xf32>
      %18 = arith.truncf %17 : vector<8x128xf32> to vector<8x128xbf16>
      %c0_15 = arith.constant 0 : index
      %c0_16 = arith.constant 0 : index
      %19 = vector.load %arg6[%c0_15, %c0_16] : memref<8x128xbf16, #tpu.memory_space<vmem>>, vector<8x128xbf16>
      tpu.vector_store %arg6[%c0_15, %c0_16], %18 {strides = array<i32>} : memref<8x128xbf16, #tpu.memory_space<vmem>>, vector<8x128xbf16>,
    } else {
    }
    return
  }
  func.func @transform_0(%arg0: i32, %arg1: i32, %arg2: i32) -> (i32, i32) {
    %c0_i32 = arith.constant 0 : i32
    return %arg0, %arg2 : i32, i32
  }
  func.func @transform_1(%arg0: i32, %arg1: i32, %arg2: i32) -> (i32, i32) {
    %c0_i32 = arith.constant 0 : i32
    return %arg2, %arg1 : i32, i32
  }
  func.func @transform_2(%arg0: i32, %arg1: i32, %arg2: i32) -> (i32, i32) {
    %c0_i32 = arith.constant 0 : i32
    %c0_i32_0 = arith.constant 0 : i32
    return %c0_i32, %arg1 : i32, i32
  }
  func.func @transform_3(%arg0: i32, %arg1: i32, %arg2: i32) -> (i32, i32) {
    %c0_i32 = arith.constant 0 : i32
    return %arg0, %arg1 : i32, i32
  }
}

module attributes {stable_mosaic.version = 11 : i64} {
  func.func @_mm_kernel(%arg0: i32, %arg1: i32, %arg2: i32, %arg3: memref<8x128xbf16, #tpu.memory_space<vmem>>, %arg4: memref<128x128xbf16, #tpu.memory_space<vmem>>, %arg5: memref<1x128xf32, #tpu.memory_space<vmem>>, %arg6: memref<8x128xbf16, #tpu.memory_space<vmem>>, %arg7: memref<8x128xf32, #tpu.memory_space<vmem>>) attributes {dimension_semantics = [#tpu.dimension_semantics<parallel>, #tpu.dimension_semantics<parallel>, #tpu.dimension_semantics<arbitrary>], iteration_bounds = array<i64: 1, 1, 1>, scalar_prefetch = 0 : i64, scratch_operands = 1 : i64, tpu.core_type = #tpu.core_type<tc>, window_params = [{transform_indices = @transform_0, window_bounds = array<i64: 8, 128>}, {transform_indices = @transform_1, window_bounds = array<i64: 128, 128>}, {transform_indices = @transform_2, window_bounds = array<i64: 1, 128>}, {transform_indices = @transform_3, window_bounds = array<i64: 8, 128>}]} {
    %c0_i32 = arith.constant 0 : i32
    %0 = arith.cmpi eq, %arg2, %c0_i32 : i32
    %1 = arith.extui %0 : i1 to i32
    %c0_i32_0 = arith.constant 0 : i32
    %2 = arith.cmpi ne, %1, %c0_i32_0 : i32
    scf.if %2 {
      %cst_10 = arith.constant 0.000000e+00 : f32
      %12 = vector.broadcast %cst_10 : f32 to vector<8x128xf32>
      %c0_11 = arith.constant 0 : index
      %c0_12 = arith.constant 0 : index
      %13 = vector.load %arg7[%c0_11, %c0_12] : memref<8x128xf32, #tpu.memory_space<vmem>>, vector<8x128xf32>
      tpu.vector_store %arg7[%c0_11, %c0_12], %12 {strides = array<i32>} : memref<8x128xf32, #tpu.memory_space<vmem>>, vector<8x128xf32>,
    } else {
    }
    %c0 = arith.constant 0 : index
    %c0_1 = arith.constant 0 : index
    %3 = vector.load %arg7[%c0, %c0_1] : memref<8x128xf32, #tpu.memory_space<vmem>>, vector<8x128xf32>
    %c0_2 = arith.constant 0 : index
    %c0_3 = arith.constant 0 : index
    %4 = vector.load %arg3[%c0_2, %c0_3] : memref<8x128xbf16, #tpu.memory_space<vmem>>, vector<8x128xbf16>
    %c0_4 = arith.constant 0 : index
    %c0_5 = arith.constant 0 : index
    %5 = vector.load %arg4[%c0_4, %c0_5] : memref<128x128xbf16, #tpu.memory_space<vmem>>, vector<128x128xbf16>
    %cst = arith.constant dense<0.000000e+00> : vector<8x128xf32>
    %6 = tpu.matmul %4, %5, %cst {dimension_numbers = #tpu.dot_dimension_numbers<[1], [0], [0], [1], [0, 0, 1, 1], [], []>} : vector<8x128xbf16>, vector<128x128xbf16>, vector<8x128xf32> -> vector<8x128xf32>
    %7 = arith.addf %3, %6 : vector<8x128xf32>
    %c0_6 = arith.constant 0 : index
    %c0_7 = arith.constant 0 : index
    %8 = vector.load %arg7[%c0_6, %c0_7] : memref<8x128xf32, #tpu.memory_space<vmem>>, vector<8x128xf32>
    tpu.vector_store %arg7[%c0_6, %c0_7], %7 {strides = array<i32>} : memref<8x128xf32, #tpu.memory_space<vmem>>, vector<8x128xf32>,
    %c0_i32_8 = arith.constant 0 : i32
    %9 = arith.cmpi eq, %arg2, %c0_i32_8 : i32
    %10 = arith.extui %9 : i1 to i32
    %c0_i32_9 = arith.constant 0 : i32
    %11 = arith.cmpi ne, %10, %c0_i32_9 : i32
    scf.if %11 {
      %c0_10 = arith.constant 0 : index
      %c0_11 = arith.constant 0 : index
      %12 = vector.load %arg7[%c0_10, %c0_11] : memref<8x128xf32, #tpu.memory_space<vmem>>, vector<8x128xf32>
      %c0_12 = arith.constant 0 : index
      %c0_13 = arith.constant 0 : index
      %13 = vector.load %arg5[%c0_12, %c0_13] : memref<1x128xf32, #tpu.memory_space<vmem>>, vector<1x128xf32>
      %14 = vector.broadcast %13 : vector<1x128xf32> to vector<8x128xf32>
      %15 = arith.addf %12, %14 : vector<8x128xf32>
      %16 = arith.truncf %15 : vector<8x128xf32> to vector<8x128xbf16>
      %c0_14 = arith.constant 0 : index
      %c0_15 = arith.constant 0 : index
      %17 = vector.load %arg6[%c0_14, %c0_15] : memref<8x128xbf16, #tpu.memory_space<vmem>>, vector<8x128xbf16>
      tpu.vector_store %arg6[%c0_14, %c0_15], %16 {strides = array<i32>} : memref<8x128xbf16, #tpu.memory_space<vmem>>, vector<8x128xbf16>,
    } else {
    }
    return
  }
  func.func @transform_0(%arg0: i32, %arg1: i32, %arg2: i32) -> (i32, i32) {
    %c0_i32 = arith.constant 0 : i32
    return %arg0, %arg2 : i32, i32
  }
  func.func @transform_1(%arg0: i32, %arg1: i32, %arg2: i32) -> (i32, i32) {
    %c0_i32 = arith.constant 0 : i32
    return %arg2, %arg1 : i32, i32
  }
  func.func @transform_2(%arg0: i32, %arg1: i32, %arg2: i32) -> (i32, i32) {
    %c0_i32 = arith.constant 0 : i32
    %c0_i32_0 = arith.constant 0 : i32
    return %c0_i32, %arg1 : i32, i32
  }
  func.func @transform_3(%arg0: i32, %arg1: i32, %arg2: i32) -> (i32, i32) {
    %c0_i32 = arith.constant 0 : i32
    return %arg0, %arg1 : i32, i32
  }
}

module attributes {stable_mosaic.version = 11 : i64} {
  func.func @_mm_kernel(%arg0: i32, %arg1: i32, %arg2: i32, %arg3: memref<8x64xbf16, #tpu.memory_space<vmem>>, %arg4: memref<64x128xbf16, #tpu.memory_space<vmem>>, %arg5: memref<1x128xf32, #tpu.memory_space<vmem>>, %arg6: memref<8x128xbf16, #tpu.memory_space<vmem>>, %arg7: memref<8x128xbf16, #tpu.memory_space<vmem>>, %arg8: memref<8x128xf32, #tpu.memory_space<vmem>>) attributes {dimension_semantics = [#tpu.dimension_semantics<parallel>, #tpu.dimension_semantics<parallel>, #tpu.dimension_semantics<arbitrary>], iteration_bounds = array<i64: 1, 1, 1>, scalar_prefetch = 0 : i64, scratch_operands = 1 : i64, tpu.core_type = #tpu.core_type<tc>, window_params = [{transform_indices = @transform_0, window_bounds = array<i64: 8, 64>}, {transform_indices = @transform_1, window_bounds = array<i64: 64, 128>}, {transform_indices = @transform_2, window_bounds = array<i64: 1, 128>}, {transform_indices = @transform_3, window_bounds = array<i64: 8, 128>}, {transform_indices = @transform_4, window_bounds = array<i64: 8, 128>}]} {
    %c0_i32 = arith.constant 0 : i32
    %0 = arith.cmpi eq, %arg2, %c0_i32 : i32
    %1 = arith.extui %0 : i1 to i32
    %c0_i32_0 = arith.constant 0 : i32
    %2 = arith.cmpi ne, %1, %c0_i32_0 : i32
    scf.if %2 {
      %cst_10 = arith.constant 0.000000e+00 : f32
      %12 = vector.broadcast %cst_10 : f32 to vector<8x128xf32>
      %c0_11 = arith.constant 0 : index
      %c0_12 = arith.constant 0 : index
      %13 = vector.load %arg8[%c0_11, %c0_12] : memref<8x128xf32, #tpu.memory_space<vmem>>, vector<8x128xf32>
      tpu.vector_store %arg8[%c0_11, %c0_12], %12 {strides = array<i32>} : memref<8x128xf32, #tpu.memory_space<vmem>>, vector<8x128xf32>,
    } else {
    }
    %c0 = arith.constant 0 : index
    %c0_1 = arith.constant 0 : index
    %3 = vector.load %arg8[%c0, %c0_1] : memref<8x128xf32, #tpu.memory_space<vmem>>, vector<8x128xf32>
    %c0_2 = arith.constant 0 : index
    %c0_3 = arith.constant 0 : index
    %4 = vector.load %arg3[%c0_2, %c0_3] : memref<8x64xbf16, #tpu.memory_space<vmem>>, vector<8x64xbf16>
    %c0_4 = arith.constant 0 : index
    %c0_5 = arith.constant 0 : index
    %5 = vector.load %arg4[%c0_4, %c0_5] : memref<64x128xbf16, #tpu.memory_space<vmem>>, vector<64x128xbf16>
    %cst = arith.constant dense<0.000000e+00> : vector<8x128xf32>
    %6 = tpu.matmul %4, %5, %cst {dimension_numbers = #tpu.dot_dimension_numbers<[1], [0], [0], [1], [0, 0, 1, 1], [], []>} : vector<8x64xbf16>, vector<64x128xbf16>, vector<8x128xf32> -> vector<8x128xf32>
    %7 = arith.addf %3, %6 : vector<8x128xf32>
    %c0_6 = arith.constant 0 : index
    %c0_7 = arith.constant 0 : index
    %8 = vector.load %arg8[%c0_6, %c0_7] : memref<8x128xf32, #tpu.memory_space<vmem>>, vector<8x128xf32>
    tpu.vector_store %arg8[%c0_6, %c0_7], %7 {strides = array<i32>} : memref<8x128xf32, #tpu.memory_space<vmem>>, vector<8x128xf32>,
    %c0_i32_8 = arith.constant 0 : i32
    %9 = arith.cmpi eq, %arg2, %c0_i32_8 : i32
    %10 = arith.extui %9 : i1 to i32
    %c0_i32_9 = arith.constant 0 : i32
    %11 = arith.cmpi ne, %10, %c0_i32_9 : i32
    scf.if %11 {
      %c0_10 = arith.constant 0 : index
      %c0_11 = arith.constant 0 : index
      %12 = vector.load %arg8[%c0_10, %c0_11] : memref<8x128xf32, #tpu.memory_space<vmem>>, vector<8x128xf32>
      %c0_12 = arith.constant 0 : index
      %c0_13 = arith.constant 0 : index
      %13 = vector.load %arg5[%c0_12, %c0_13] : memref<1x128xf32, #tpu.memory_space<vmem>>, vector<1x128xf32>
      %14 = vector.broadcast %13 : vector<1x128xf32> to vector<8x128xf32>
      %15 = arith.addf %12, %14 : vector<8x128xf32>
      %c0_14 = arith.constant 0 : index
      %c0_15 = arith.constant 0 : index
      %16 = vector.load %arg6[%c0_14, %c0_15] : memref<8x128xbf16, #tpu.memory_space<vmem>>, vector<8x128xbf16>
      %17 = arith.extf %16 : vector<8x128xbf16> to vector<8x128xf32>
      %18 = arith.addf %15, %17 : vector<8x128xf32>
      %cst_16 = arith.constant 0.000000e+00 : f32
      %19 = vector.broadcast %cst_16 : f32 to vector<8x128xf32>
      %20 = arith.maximumf %18, %19 : vector<8x128xf32>
      %21 = arith.truncf %20 : vector<8x128xf32> to vector<8x128xbf16>
      %c0_17 = arith.constant 0 : index
      %c0_18 = arith.constant 0 : index
      %22 = vector.load %arg7[%c0_17, %c0_18] : memref<8x128xbf16, #tpu.memory_space<vmem>>, vector<8x128xbf16>
      tpu.vector_store %arg7[%c0_17, %c0_18], %21 {strides = array<i32>} : memref<8x128xbf16, #tpu.memory_space<vmem>>, vector<8x128xbf16>,
    } else {
    }
    return
  }
  func.func @transform_0(%arg0: i32, %arg1: i32, %arg2: i32) -> (i32, i32) {
    %c0_i32 = arith.constant 0 : i32
    return %arg0, %arg2 : i32, i32
  }
  func.func @transform_1(%arg0: i32, %arg1: i32, %arg2: i32) -> (i32, i32) {
    %c0_i32 = arith.constant 0 : i32
    return %arg2, %arg1 : i32, i32
  }
  func.func @transform_2(%arg0: i32, %arg1: i32, %arg2: i32) -> (i32, i32) {
    %c0_i32 = arith.constant 0 : i32
    %c0_i32_0 = arith.constant 0 : i32
    return %c0_i32, %arg1 : i32, i32
  }
  func.func @transform_3(%arg0: i32, %arg1: i32, %arg2: i32) -> (i32, i32) {
    %c0_i32 = arith.constant 0 : i32
    return %arg0, %arg1 : i32, i32
  }
  func.func @transform_4(%arg0: i32, %arg1: i32, %arg2: i32) -> (i32, i32) {
    %c0_i32 = arith.constant 0 : i32
    return %arg0, %arg1 : i32, i32
  }
}

module attributes {stable_mosaic.version = 11 : i64} {
  func.func @_group_conv_kernel(%arg0: i32, %arg1: i32, %arg2: memref<8x2x36xbf16, #tpu.memory_space<vmem>>, %arg3: memref<8x36x4xbf16, #tpu.memory_space<vmem>>, %arg4: memref<8x1x4xf32, #tpu.memory_space<vmem>>, %arg5: memref<8x2x4xbf16, #tpu.memory_space<vmem>>) attributes {dimension_semantics = [#tpu.dimension_semantics<parallel>, #tpu.dimension_semantics<parallel>], iteration_bounds = array<i64: 1, 4>, scalar_prefetch = 0 : i64, scratch_operands = 0 : i64, tpu.core_type = #tpu.core_type<tc>, window_params = [{transform_indices = @transform_0, window_bounds = array<i64: 8, 2, 36>}, {transform_indices = @transform_1, window_bounds = array<i64: 8, 36, 4>}, {transform_indices = @transform_2, window_bounds = array<i64: 8, 1, 4>}, {transform_indices = @transform_3, window_bounds = array<i64: 8, 2, 4>}]} {
    %c0 = arith.constant 0 : index
    %c0_0 = arith.constant 0 : index
    %c0_1 = arith.constant 0 : index
    %0 = vector.load %arg2[%c0, %c0_0, %c0_1] : memref<8x2x36xbf16, #tpu.memory_space<vmem>>, vector<1x2x36xbf16>
    %1 = vector.shape_cast %0 : vector<1x2x36xbf16> to vector<2x36xbf16>
    %c0_2 = arith.constant 0 : index
    %c0_3 = arith.constant 0 : index
    %c0_4 = arith.constant 0 : index
    %2 = vector.load %arg3[%c0_2, %c0_3, %c0_4] : memref<8x36x4xbf16, #tpu.memory_space<vmem>>, vector<1x36x4xbf16>
    %3 = vector.shape_cast %2 : vector<1x36x4xbf16> to vector<36x4xbf16>
    %cst = arith.constant dense<0.000000e+00> : vector<2x4xf32>
    %4 = tpu.matmul %1, %3, %cst {dimension_numbers = #tpu.dot_dimension_numbers<[1], [0], [0], [1], [0, 0, 1, 1], [], []>} : vector<2x36xbf16>, vector<36x4xbf16>, vector<2x4xf32> -> vector<2x4xf32>
    %c0_5 = arith.constant 0 : index
    %c0_6 = arith.constant 0 : index
    %c0_7 = arith.constant 0 : index
    %5 = vector.load %arg4[%c0_5, %c0_6, %c0_7] : memref<8x1x4xf32, #tpu.memory_space<vmem>>, vector<1x1x4xf32>
    %6 = vector.shape_cast %5 : vector<1x1x4xf32> to vector<1x4xf32>
    %7 = vector.broadcast %6 : vector<1x4xf32> to vector<2x4xf32>
    %8 = arith.addf %4, %7 : vector<2x4xf32>
    %cst_8 = arith.constant 0.000000e+00 : f32
    %9 = vector.broadcast %cst_8 : f32 to vector<2x4xf32>
    %10 = arith.maximumf %8, %9 : vector<2x4xf32>
    %11 = arith.truncf %10 : vector<2x4xf32> to vector<2x4xbf16>
    %c0_9 = arith.constant 0 : index
    %c0_10 = arith.constant 0 : index
    %c0_11 = arith.constant 0 : index
    %12 = vector.load %arg5[%c0_9, %c0_10, %c0_11] : memref<8x2x4xbf16, #tpu.memory_space<vmem>>, vector<1x2x4xbf16>
    %13 = vector.shape_cast %12 : vector<1x2x4xbf16> to vector<2x4xbf16>
    %14 = vector.shape_cast %11 : vector<2x4xbf16> to vector<1x2x4xbf16>
    tpu.vector_store %arg5[%c0_9, %c0_10, %c0_11], %14 {strides = array<i32>} : memref<8x2x4xbf16, #tpu.memory_space<vmem>>, vector<1x2x4xbf16>,
    %c1 = arith.constant 1 : index
    %c0_12 = arith.constant 0 : index
    %c0_13 = arith.constant 0 : index
    %15 = vector.load %arg2[%c1, %c0_12, %c0_13] : memref<8x2x36xbf16, #tpu.memory_space<vmem>>, vector<1x2x36xbf16>
    %16 = vector.shape_cast %15 : vector<1x2x36xbf16> to vector<2x36xbf16>
    %c1_14 = arith.constant 1 : index
    %c0_15 = arith.constant 0 : index
    %c0_16 = arith.constant 0 : index
    %17 = vector.load %arg3[%c1_14, %c0_15, %c0_16] : memref<8x36x4xbf16, #tpu.memory_space<vmem>>, vector<1x36x4xbf16>
    %18 = vector.shape_cast %17 : vector<1x36x4xbf16> to vector<36x4xbf16>
    %cst_17 = arith.constant dense<0.000000e+00> : vector<2x4xf32>
    %19 = tpu.matmul %16, %18, %cst_17 {dimension_numbers = #tpu.dot_dimension_numbers<[1], [0], [0], [1], [0, 0, 1, 1], [], []>} : vector<2x36xbf16>, vector<36x4xbf16>, vector<2x4xf32> -> vector<2x4xf32>
    %c1_18 = arith.constant 1 : index
    %c0_19 = arith.constant 0 : index
    %c0_20 = arith.constant 0 : index
    %20 = vector.load %arg4[%c1_18, %c0_19, %c0_20] : memref<8x1x4xf32, #tpu.memory_space<vmem>>, vector<1x1x4xf32>
    %21 = vector.shape_cast %20 : vector<1x1x4xf32> to vector<1x4xf32>
    %22 = vector.broadcast %21 : vector<1x4xf32> to vector<2x4xf32>
    %23 = arith.addf %19, %22 : vector<2x4xf32>
    %cst_21 = arith.constant 0.000000e+00 : f32
    %24 = vector.broadcast %cst_21 : f32 to vector<2x4xf32>
    %25 = arith.maximumf %23, %24 : vector<2x4xf32>
    %26 = arith.truncf %25 : vector<2x4xf32> to vector<2x4xbf16>
    %c1_22 = arith.constant 1 : index
    %c0_23 = arith.constant 0 : index
    %c0_24 = arith.constant 0 : index
    %27 = vector.load %arg5[%c1_22, %c0_23, %c0_24] : memref<8x2x4xbf16, #tpu.memory_space<vmem>>, vector<1x2x4xbf16>
    %28 = vector.shape_cast %27 : vector<1x2x4xbf16> to vector<2x4xbf16>
    %29 = vector.shape_cast %26 : vector<2x4xbf16> to vector<1x2x4xbf16>
    tpu.vector_store %arg5[%c1_22, %c0_23, %c0_24], %29 {strides = array<i32>} : memref<8x2x4xbf16, #tpu.memory_space<vmem>>, vector<1x2x4xbf16>,
    %c2 = arith.constant 2 : index
    %c0_25 = arith.constant 0 : index
    %c0_26 = arith.constant 0 : index
    %30 = vector.load %arg2[%c2, %c0_25, %c0_26] : memref<8x2x36xbf16, #tpu.memory_space<vmem>>, vector<1x2x36xbf16>
    %31 = vector.shape_cast %30 : vector<1x2x36xbf16> to vector<2x36xbf16>
    %c2_27 = arith.constant 2 : index
    %c0_28 = arith.constant 0 : index
    %c0_29 = arith.constant 0 : index
    %32 = vector.load %arg3[%c2_27, %c0_28, %c0_29] : memref<8x36x4xbf16, #tpu.memory_space<vmem>>, vector<1x36x4xbf16>
    %33 = vector.shape_cast %32 : vector<1x36x4xbf16> to vector<36x4xbf16>
    %cst_30 = arith.constant dense<0.000000e+00> : vector<2x4xf32>
    %34 = tpu.matmul %31, %33, %cst_30 {dimension_numbers = #tpu.dot_dimension_numbers<[1], [0], [0], [1], [0, 0, 1, 1], [], []>} : vector<2x36xbf16>, vector<36x4xbf16>, vector<2x4xf32> -> vector<2x4xf32>
    %c2_31 = arith.constant 2 : index
    %c0_32 = arith.constant 0 : index
    %c0_33 = arith.constant 0 : index
    %35 = vector.load %arg4[%c2_31, %c0_32, %c0_33] : memref<8x1x4xf32, #tpu.memory_space<vmem>>, vector<1x1x4xf32>
    %36 = vector.shape_cast %35 : vector<1x1x4xf32> to vector<1x4xf32>
    %37 = vector.broadcast %36 : vector<1x4xf32> to vector<2x4xf32>
    %38 = arith.addf %34, %37 : vector<2x4xf32>
    %cst_34 = arith.constant 0.000000e+00 : f32
    %39 = vector.broadcast %cst_34 : f32 to vector<2x4xf32>
    %40 = arith.maximumf %38, %39 : vector<2x4xf32>
    %41 = arith.truncf %40 : vector<2x4xf32> to vector<2x4xbf16>
    %c2_35 = arith.constant 2 : index
    %c0_36 = arith.constant 0 : index
    %c0_37 = arith.constant 0 : index
    %42 = vector.load %arg5[%c2_35, %c0_36, %c0_37] : memref<8x2x4xbf16, #tpu.memory_space<vmem>>, vector<1x2x4xbf16>
    %43 = vector.shape_cast %42 : vector<1x2x4xbf16> to vector<2x4xbf16>
    %44 = vector.shape_cast %41 : vector<2x4xbf16> to vector<1x2x4xbf16>
    tpu.vector_store %arg5[%c2_35, %c0_36, %c0_37], %44 {strides = array<i32>} : memref<8x2x4xbf16, #tpu.memory_space<vmem>>, vector<1x2x4xbf16>,
    %c3 = arith.constant 3 : index
    %c0_38 = arith.constant 0 : index
    %c0_39 = arith.constant 0 : index
    %45 = vector.load %arg2[%c3, %c0_38, %c0_39] : memref<8x2x36xbf16, #tpu.memory_space<vmem>>, vector<1x2x36xbf16>
    %46 = vector.shape_cast %45 : vector<1x2x36xbf16> to vector<2x36xbf16>
    %c3_40 = arith.constant 3 : index
    %c0_41 = arith.constant 0 : index
    %c0_42 = arith.constant 0 : index
    %47 = vector.load %arg3[%c3_40, %c0_41, %c0_42] : memref<8x36x4xbf16, #tpu.memory_space<vmem>>, vector<1x36x4xbf16>
    %48 = vector.shape_cast %47 : vector<1x36x4xbf16> to vector<36x4xbf16>
    %cst_43 = arith.constant dense<0.000000e+00> : vector<2x4xf32>
    %49 = tpu.matmul %46, %48, %cst_43 {dimension_numbers = #tpu.dot_dimension_numbers<[1], [0], [0], [1], [0, 0, 1, 1], [], []>} : vector<2x36xbf16>, vector<36x4xbf16>, vector<2x4xf32> -> vector<2x4xf32>
    %c3_44 = arith.constant 3 : index
    %c0_45 = arith.constant 0 : index
    %c0_46 = arith.constant 0 : index
    %50 = vector.load %arg4[%c3_44, %c0_45, %c0_46] : memref<8x1x4xf32, #tpu.memory_space<vmem>>, vector<1x1x4xf32>
    %51 = vector.shape_cast %50 : vector<1x1x4xf32> to vector<1x4xf32>
    %52 = vector.broadcast %51 : vector<1x4xf32> to vector<2x4xf32>
    %53 = arith.addf %49, %52 : vector<2x4xf32>
    %cst_47 = arith.constant 0.000000e+00 : f32
    %54 = vector.broadcast %cst_47 : f32 to vector<2x4xf32>
    %55 = arith.maximumf %53, %54 : vector<2x4xf32>
    %56 = arith.truncf %55 : vector<2x4xf32> to vector<2x4xbf16>
    %c3_48 = arith.constant 3 : index
    %c0_49 = arith.constant 0 : index
    %c0_50 = arith.constant 0 : index
    %57 = vector.load %arg5[%c3_48, %c0_49, %c0_50] : memref<8x2x4xbf16, #tpu.memory_space<vmem>>, vector<1x2x4xbf16>
    %58 = vector.shape_cast %57 : vector<1x2x4xbf16> to vector<2x4xbf16>
    %59 = vector.shape_cast %56 : vector<2x4xbf16> to vector<1x2x4xbf16>
    tpu.vector_store %arg5[%c3_48, %c0_49, %c0_50], %59 {strides = array<i32>} : memref<8x2x4xbf16, #tpu.memory_space<vmem>>, vector<1x2x4xbf16>,
    %c4 = arith.constant 4 : index
    %c0_51 = arith.constant 0 : index
    %c0_52 = arith.constant 0 : index
    %60 = vector.load %arg2[%c4, %c0_51, %c0_52] : memref<8x2x36xbf16, #tpu.memory_space<vmem>>, vector<1x2x36xbf16>
    %61 = vector.shape_cast %60 : vector<1x2x36xbf16> to vector<2x36xbf16>
    %c4_53 = arith.constant 4 : index
    %c0_54 = arith.constant 0 : index
    %c0_55 = arith.constant 0 : index
    %62 = vector.load %arg3[%c4_53, %c0_54, %c0_55] : memref<8x36x4xbf16, #tpu.memory_space<vmem>>, vector<1x36x4xbf16>
    %63 = vector.shape_cast %62 : vector<1x36x4xbf16> to vector<36x4xbf16>
    %cst_56 = arith.constant dense<0.000000e+00> : vector<2x4xf32>
    %64 = tpu.matmul %61, %63, %cst_56 {dimension_numbers = #tpu.dot_dimension_numbers<[1], [0], [0], [1], [0, 0, 1, 1], [], []>} : vector<2x36xbf16>, vector<36x4xbf16>, vector<2x4xf32> -> vector<2x4xf32>
    %c4_57 = arith.constant 4 : index
    %c0_58 = arith.constant 0 : index
    %c0_59 = arith.constant 0 : index
    %65 = vector.load %arg4[%c4_57, %c0_58, %c0_59] : memref<8x1x4xf32, #tpu.memory_space<vmem>>, vector<1x1x4xf32>
    %66 = vector.shape_cast %65 : vector<1x1x4xf32> to vector<1x4xf32>
    %67 = vector.broadcast %66 : vector<1x4xf32> to vector<2x4xf32>
    %68 = arith.addf %64, %67 : vector<2x4xf32>
    %cst_60 = arith.constant 0.000000e+00 : f32
    %69 = vector.broadcast %cst_60 : f32 to vector<2x4xf32>
    %70 = arith.maximumf %68, %69 : vector<2x4xf32>
    %71 = arith.truncf %70 : vector<2x4xf32> to vector<2x4xbf16>
    %c4_61 = arith.constant 4 : index
    %c0_62 = arith.constant 0 : index
    %c0_63 = arith.constant 0 : index
    %72 = vector.load %arg5[%c4_61, %c0_62, %c0_63] : memref<8x2x4xbf16, #tpu.memory_space<vmem>>, vector<1x2x4xbf16>
    %73 = vector.shape_cast %72 : vector<1x2x4xbf16> to vector<2x4xbf16>
    %74 = vector.shape_cast %71 : vector<2x4xbf16> to vector<1x2x4xbf16>
    tpu.vector_store %arg5[%c4_61, %c0_62, %c0_63], %74 {strides = array<i32>} : memref<8x2x4xbf16, #tpu.memory_space<vmem>>, vector<1x2x4xbf16>,
    %c5 = arith.constant 5 : index
    %c0_64 = arith.constant 0 : index
    %c0_65 = arith.constant 0 : index
    %75 = vector.load %arg2[%c5, %c0_64, %c0_65] : memref<8x2x36xbf16, #tpu.memory_space<vmem>>, vector<1x2x36xbf16>
    %76 = vector.shape_cast %75 : vector<1x2x36xbf16> to vector<2x36xbf16>
    %c5_66 = arith.constant 5 : index
    %c0_67 = arith.constant 0 : index
    %c0_68 = arith.constant 0 : index
    %77 = vector.load %arg3[%c5_66, %c0_67, %c0_68] : memref<8x36x4xbf16, #tpu.memory_space<vmem>>, vector<1x36x4xbf16>
    %78 = vector.shape_cast %77 : vector<1x36x4xbf16> to vector<36x4xbf16>
    %cst_69 = arith.constant dense<0.000000e+00> : vector<2x4xf32>
    %79 = tpu.matmul %76, %78, %cst_69 {dimension_numbers = #tpu.dot_dimension_numbers<[1], [0], [0], [1], [0, 0, 1, 1], [], []>} : vector<2x36xbf16>, vector<36x4xbf16>, vector<2x4xf32> -> vector<2x4xf32>
    %c5_70 = arith.constant 5 : index
    %c0_71 = arith.constant 0 : index
    %c0_72 = arith.constant 0 : index
    %80 = vector.load %arg4[%c5_70, %c0_71, %c0_72] : memref<8x1x4xf32, #tpu.memory_space<vmem>>, vector<1x1x4xf32>
    %81 = vector.shape_cast %80 : vector<1x1x4xf32> to vector<1x4xf32>
    %82 = vector.broadcast %81 : vector<1x4xf32> to vector<2x4xf32>
    %83 = arith.addf %79, %82 : vector<2x4xf32>
    %cst_73 = arith.constant 0.000000e+00 : f32
    %84 = vector.broadcast %cst_73 : f32 to vector<2x4xf32>
    %85 = arith.maximumf %83, %84 : vector<2x4xf32>
    %86 = arith.truncf %85 : vector<2x4xf32> to vector<2x4xbf16>
    %c5_74 = arith.constant 5 : index
    %c0_75 = arith.constant 0 : index
    %c0_76 = arith.constant 0 : index
    %87 = vector.load %arg5[%c5_74, %c0_75, %c0_76] : memref<8x2x4xbf16, #tpu.memory_space<vmem>>, vector<1x2x4xbf16>
    %88 = vector.shape_cast %87 : vector<1x2x4xbf16> to vector<2x4xbf16>
    %89 = vector.shape_cast %86 : vector<2x4xbf16> to vector<1x2x4xbf16>
    tpu.vector_store %arg5[%c5_74, %c0_75, %c0_76], %89 {strides = array<i32>} : memref<8x2x4xbf16, #tpu.memory_space<vmem>>, vector<1x2x4xbf16>,
    %c6 = arith.constant 6 : index
    %c0_77 = arith.constant 0 : index
    %c0_78 = arith.constant 0 : index
    %90 = vector.load %arg2[%c6, %c0_77, %c0_78] : memref<8x2x36xbf16, #tpu.memory_space<vmem>>, vector<1x2x36xbf16>
    %91 = vector.shape_cast %90 : vector<1x2x36xbf16> to vector<2x36xbf16>
    %c6_79 = arith.constant 6 : index
    %c0_80 = arith.constant 0 : index
    %c0_81 = arith.constant 0 : index
    %92 = vector.load %arg3[%c6_79, %c0_80, %c0_81] : memref<8x36x4xbf16, #tpu.memory_space<vmem>>, vector<1x36x4xbf16>
    %93 = vector.shape_cast %92 : vector<1x36x4xbf16> to vector<36x4xbf16>
    %cst_82 = arith.constant dense<0.000000e+00> : vector<2x4xf32>
    %94 = tpu.matmul %91, %93, %cst_82 {dimension_numbers = #tpu.dot_dimension_numbers<[1], [0], [0], [1], [0, 0, 1, 1], [], []>} : vector<2x36xbf16>, vector<36x4xbf16>, vector<2x4xf32> -> vector<2x4xf32>
    %c6_83 = arith.constant 6 : index
    %c0_84 = arith.constant 0 : index
    %c0_85 = arith.constant 0 : index
    %95 = vector.load %arg4[%c6_83, %c0_84, %c0_85] : memref<8x1x4xf32, #tpu.memory_space<vmem>>, vector<1x1x4xf32>
    %96 = vector.shape_cast %95 : vector<1x1x4xf32> to vector<1x4xf32>
    %97 = vector.broadcast %96 : vector<1x4xf32> to vector<2x4xf32>
    %98 = arith.addf %94, %97 : vector<2x4xf32>
    %cst_86 = arith.constant 0.000000e+00 : f32
    %99 = vector.broadcast %cst_86 : f32 to vector<2x4xf32>
    %100 = arith.maximumf %98, %99 : vector<2x4xf32>
    %101 = arith.truncf %100 : vector<2x4xf32> to vector<2x4xbf16>
    %c6_87 = arith.constant 6 : index
    %c0_88 = arith.constant 0 : index
    %c0_89 = arith.constant 0 : index
    %102 = vector.load %arg5[%c6_87, %c0_88, %c0_89] : memref<8x2x4xbf16, #tpu.memory_space<vmem>>, vector<1x2x4xbf16>
    %103 = vector.shape_cast %102 : vector<1x2x4xbf16> to vector<2x4xbf16>
    %104 = vector.shape_cast %101 : vector<2x4xbf16> to vector<1x2x4xbf16>
    tpu.vector_store %arg5[%c6_87, %c0_88, %c0_89], %104 {strides = array<i32>} : memref<8x2x4xbf16, #tpu.memory_space<vmem>>, vector<1x2x4xbf16>,
    %c7 = arith.constant 7 : index
    %c0_90 = arith.constant 0 : index
    %c0_91 = arith.constant 0 : index
    %105 = vector.load %arg2[%c7, %c0_90, %c0_91] : memref<8x2x36xbf16, #tpu.memory_space<vmem>>, vector<1x2x36xbf16>
    %106 = vector.shape_cast %105 : vector<1x2x36xbf16> to vector<2x36xbf16>
    %c7_92 = arith.constant 7 : index
    %c0_93 = arith.constant 0 : index
    %c0_94 = arith.constant 0 : index
    %107 = vector.load %arg3[%c7_92, %c0_93, %c0_94] : memref<8x36x4xbf16, #tpu.memory_space<vmem>>, vector<1x36x4xbf16>
    %108 = vector.shape_cast %107 : vector<1x36x4xbf16> to vector<36x4xbf16>
    %cst_95 = arith.constant dense<0.000000e+00> : vector<2x4xf32>
    %109 = tpu.matmul %106, %108, %cst_95 {dimension_numbers = #tpu.dot_dimension_numbers<[1], [0], [0], [1], [0, 0, 1, 1], [], []>} : vector<2x36xbf16>, vector<36x4xbf16>, vector<2x4xf32> -> vector<2x4xf32>
    %c7_96 = arith.constant 7 : index
    %c0_97 = arith.constant 0 : index
    %c0_98 = arith.constant 0 : index
    %110 = vector.load %arg4[%c7_96, %c0_97, %c0_98] : memref<8x1x4xf32, #tpu.memory_space<vmem>>, vector<1x1x4xf32>
    %111 = vector.shape_cast %110 : vector<1x1x4xf32> to vector<1x4xf32>
    %112 = vector.broadcast %111 : vector<1x4xf32> to vector<2x4xf32>
    %113 = arith.addf %109, %112 : vector<2x4xf32>
    %cst_99 = arith.constant 0.000000e+00 : f32
    %114 = vector.broadcast %cst_99 : f32 to vector<2x4xf32>
    %115 = arith.maximumf %113, %114 : vector<2x4xf32>
    %116 = arith.truncf %115 : vector<2x4xf32> to vector<2x4xbf16>
    %c7_100 = arith.constant 7 : index
    %c0_101 = arith.constant 0 : index
    %c0_102 = arith.constant 0 : index
    %117 = vector.load %arg5[%c7_100, %c0_101, %c0_102] : memref<8x2x4xbf16, #tpu.memory_space<vmem>>, vector<1x2x4xbf16>
    %118 = vector.shape_cast %117 : vector<1x2x4xbf16> to vector<2x4xbf16>
    %119 = vector.shape_cast %116 : vector<2x4xbf16> to vector<1x2x4xbf16>
    tpu.vector_store %arg5[%c7_100, %c0_101, %c0_102], %119 {strides = array<i32>} : memref<8x2x4xbf16, #tpu.memory_space<vmem>>, vector<1x2x4xbf16>,
    return
  }
  func.func @transform_0(%arg0: i32, %arg1: i32) -> (i32, i32, i32) {
    %c0_i32 = arith.constant 0 : i32
    %c0_i32_0 = arith.constant 0 : i32
    return %arg1, %arg0, %c0_i32 : i32, i32, i32
  }
  func.func @transform_1(%arg0: i32, %arg1: i32) -> (i32, i32, i32) {
    %c0_i32 = arith.constant 0 : i32
    %c0_i32_0 = arith.constant 0 : i32
    %c0_i32_1 = arith.constant 0 : i32
    return %arg1, %c0_i32, %c0_i32_0 : i32, i32, i32
  }
  func.func @transform_2(%arg0: i32, %arg1: i32) -> (i32, i32, i32) {
    %c0_i32 = arith.constant 0 : i32
    %c0_i32_0 = arith.constant 0 : i32
    %c0_i32_1 = arith.constant 0 : i32
    return %arg1, %c0_i32, %c0_i32_0 : i32, i32, i32
  }
  func.func @transform_3(%arg0: i32, %arg1: i32) -> (i32, i32, i32) {
    %c0_i32 = arith.constant 0 : i32
    %c0_i32_0 = arith.constant 0 : i32
    return %arg1, %arg0, %c0_i32 : i32, i32, i32
  }
}

module attributes {stable_mosaic.version = 11 : i64} {
  func.func @_mm_kernel(%arg0: i32, %arg1: i32, %arg2: i32, %arg3: memref<2x256xbf16, #tpu.memory_space<vmem>>, %arg4: memref<256x128xbf16, #tpu.memory_space<vmem>>, %arg5: memref<1x128xf32, #tpu.memory_space<vmem>>, %arg6: memref<2x128xbf16, #tpu.memory_space<vmem>>, %arg7: memref<2x128xf32, #tpu.memory_space<vmem>>) attributes {dimension_semantics = [#tpu.dimension_semantics<parallel>, #tpu.dimension_semantics<parallel>, #tpu.dimension_semantics<arbitrary>], iteration_bounds = array<i64: 1, 2, 1>, scalar_prefetch = 0 : i64, scratch_operands = 1 : i64, tpu.core_type = #tpu.core_type<tc>, window_params = [{transform_indices = @transform_0, window_bounds = array<i64: 2, 256>}, {transform_indices = @transform_1, window_bounds = array<i64: 256, 128>}, {transform_indices = @transform_2, window_bounds = array<i64: 1, 128>}, {transform_indices = @transform_3, window_bounds = array<i64: 2, 128>}]} {
    %c0_i32 = arith.constant 0 : i32
    %0 = arith.cmpi eq, %arg2, %c0_i32 : i32
    %1 = arith.extui %0 : i1 to i32
    %c0_i32_0 = arith.constant 0 : i32
    %2 = arith.cmpi ne, %1, %c0_i32_0 : i32
    scf.if %2 {
      %cst_10 = arith.constant 0.000000e+00 : f32
      %12 = vector.broadcast %cst_10 : f32 to vector<2x128xf32>
      %c0_11 = arith.constant 0 : index
      %c0_12 = arith.constant 0 : index
      %13 = vector.load %arg7[%c0_11, %c0_12] : memref<2x128xf32, #tpu.memory_space<vmem>>, vector<2x128xf32>
      tpu.vector_store %arg7[%c0_11, %c0_12], %12 {strides = array<i32>} : memref<2x128xf32, #tpu.memory_space<vmem>>, vector<2x128xf32>,
    } else {
    }
    %c0 = arith.constant 0 : index
    %c0_1 = arith.constant 0 : index
    %3 = vector.load %arg7[%c0, %c0_1] : memref<2x128xf32, #tpu.memory_space<vmem>>, vector<2x128xf32>
    %c0_2 = arith.constant 0 : index
    %c0_3 = arith.constant 0 : index
    %4 = vector.load %arg3[%c0_2, %c0_3] : memref<2x256xbf16, #tpu.memory_space<vmem>>, vector<2x256xbf16>
    %c0_4 = arith.constant 0 : index
    %c0_5 = arith.constant 0 : index
    %5 = vector.load %arg4[%c0_4, %c0_5] : memref<256x128xbf16, #tpu.memory_space<vmem>>, vector<256x128xbf16>
    %cst = arith.constant dense<0.000000e+00> : vector<2x128xf32>
    %6 = tpu.matmul %4, %5, %cst {dimension_numbers = #tpu.dot_dimension_numbers<[1], [0], [0], [1], [0, 0, 1, 1], [], []>} : vector<2x256xbf16>, vector<256x128xbf16>, vector<2x128xf32> -> vector<2x128xf32>
    %7 = arith.addf %3, %6 : vector<2x128xf32>
    %c0_6 = arith.constant 0 : index
    %c0_7 = arith.constant 0 : index
    %8 = vector.load %arg7[%c0_6, %c0_7] : memref<2x128xf32, #tpu.memory_space<vmem>>, vector<2x128xf32>
    tpu.vector_store %arg7[%c0_6, %c0_7], %7 {strides = array<i32>} : memref<2x128xf32, #tpu.memory_space<vmem>>, vector<2x128xf32>,
    %c0_i32_8 = arith.constant 0 : i32
    %9 = arith.cmpi eq, %arg2, %c0_i32_8 : i32
    %10 = arith.extui %9 : i1 to i32
    %c0_i32_9 = arith.constant 0 : i32
    %11 = arith.cmpi ne, %10, %c0_i32_9 : i32
    scf.if %11 {
      %c0_10 = arith.constant 0 : index
      %c0_11 = arith.constant 0 : index
      %12 = vector.load %arg7[%c0_10, %c0_11] : memref<2x128xf32, #tpu.memory_space<vmem>>, vector<2x128xf32>
      %c0_12 = arith.constant 0 : index
      %c0_13 = arith.constant 0 : index
      %13 = vector.load %arg5[%c0_12, %c0_13] : memref<1x128xf32, #tpu.memory_space<vmem>>, vector<1x128xf32>
      %14 = vector.broadcast %13 : vector<1x128xf32> to vector<2x128xf32>
      %15 = arith.addf %12, %14 : vector<2x128xf32>
      %cst_14 = arith.constant 0.000000e+00 : f32
      %16 = vector.broadcast %cst_14 : f32 to vector<2x128xf32>
      %17 = arith.maximumf %15, %16 : vector<2x128xf32>
      %18 = arith.truncf %17 : vector<2x128xf32> to vector<2x128xbf16>
      %c0_15 = arith.constant 0 : index
      %c0_16 = arith.constant 0 : index
      %19 = vector.load %arg6[%c0_15, %c0_16] : memref<2x128xbf16, #tpu.memory_space<vmem>>, vector<2x128xbf16>
      tpu.vector_store %arg6[%c0_15, %c0_16], %18 {strides = array<i32>} : memref<2x128xbf16, #tpu.memory_space<vmem>>, vector<2x128xbf16>,
    } else {
    }
    return
  }
  func.func @transform_0(%arg0: i32, %arg1: i32, %arg2: i32) -> (i32, i32) {
    %c0_i32 = arith.constant 0 : i32
    return %arg0, %arg2 : i32, i32
  }
  func.func @transform_1(%arg0: i32, %arg1: i32, %arg2: i32) -> (i32, i32) {
    %c0_i32 = arith.constant 0 : i32
    return %arg2, %arg1 : i32, i32
  }
  func.func @transform_2(%arg0: i32, %arg1: i32, %arg2: i32) -> (i32, i32) {
    %c0_i32 = arith.constant 0 : i32
    %c0_i32_0 = arith.constant 0 : i32
    return %c0_i32, %arg1 : i32, i32
  }
  func.func @transform_3(%arg0: i32, %arg1: i32, %arg2: i32) -> (i32, i32) {
    %c0_i32 = arith.constant 0 : i32
    return %arg0, %arg1 : i32, i32
  }
}

module attributes {stable_mosaic.version = 11 : i64} {
  func.func @_mm_kernel(%arg0: i32, %arg1: i32, %arg2: i32, %arg3: memref<2x128xbf16, #tpu.memory_space<vmem>>, %arg4: memref<128x128xbf16, #tpu.memory_space<vmem>>, %arg5: memref<1x128xf32, #tpu.memory_space<vmem>>, %arg6: memref<2x128xbf16, #tpu.memory_space<vmem>>, %arg7: memref<2x128xbf16, #tpu.memory_space<vmem>>, %arg8: memref<2x128xf32, #tpu.memory_space<vmem>>) attributes {dimension_semantics = [#tpu.dimension_semantics<parallel>, #tpu.dimension_semantics<parallel>, #tpu.dimension_semantics<arbitrary>], iteration_bounds = array<i64: 1, 2, 1>, scalar_prefetch = 0 : i64, scratch_operands = 1 : i64, tpu.core_type = #tpu.core_type<tc>, window_params = [{transform_indices = @transform_0, window_bounds = array<i64: 2, 128>}, {transform_indices = @transform_1, window_bounds = array<i64: 128, 128>}, {transform_indices = @transform_2, window_bounds = array<i64: 1, 128>}, {transform_indices = @transform_3, window_bounds = array<i64: 2, 128>}, {transform_indices = @transform_4, window_bounds = array<i64: 2, 128>}]} {
    %c0_i32 = arith.constant 0 : i32
    %0 = arith.cmpi eq, %arg2, %c0_i32 : i32
    %1 = arith.extui %0 : i1 to i32
    %c0_i32_0 = arith.constant 0 : i32
    %2 = arith.cmpi ne, %1, %c0_i32_0 : i32
    scf.if %2 {
      %cst_10 = arith.constant 0.000000e+00 : f32
      %12 = vector.broadcast %cst_10 : f32 to vector<2x128xf32>
      %c0_11 = arith.constant 0 : index
      %c0_12 = arith.constant 0 : index
      %13 = vector.load %arg8[%c0_11, %c0_12] : memref<2x128xf32, #tpu.memory_space<vmem>>, vector<2x128xf32>
      tpu.vector_store %arg8[%c0_11, %c0_12], %12 {strides = array<i32>} : memref<2x128xf32, #tpu.memory_space<vmem>>, vector<2x128xf32>,
    } else {
    }
    %c0 = arith.constant 0 : index
    %c0_1 = arith.constant 0 : index
    %3 = vector.load %arg8[%c0, %c0_1] : memref<2x128xf32, #tpu.memory_space<vmem>>, vector<2x128xf32>
    %c0_2 = arith.constant 0 : index
    %c0_3 = arith.constant 0 : index
    %4 = vector.load %arg3[%c0_2, %c0_3] : memref<2x128xbf16, #tpu.memory_space<vmem>>, vector<2x128xbf16>
    %c0_4 = arith.constant 0 : index
    %c0_5 = arith.constant 0 : index
    %5 = vector.load %arg4[%c0_4, %c0_5] : memref<128x128xbf16, #tpu.memory_space<vmem>>, vector<128x128xbf16>
    %cst = arith.constant dense<0.000000e+00> : vector<2x128xf32>
    %6 = tpu.matmul %4, %5, %cst {dimension_numbers = #tpu.dot_dimension_numbers<[1], [0], [0], [1], [0, 0, 1, 1], [], []>} : vector<2x128xbf16>, vector<128x128xbf16>, vector<2x128xf32> -> vector<2x128xf32>
    %7 = arith.addf %3, %6 : vector<2x128xf32>
    %c0_6 = arith.constant 0 : index
    %c0_7 = arith.constant 0 : index
    %8 = vector.load %arg8[%c0_6, %c0_7] : memref<2x128xf32, #tpu.memory_space<vmem>>, vector<2x128xf32>
    tpu.vector_store %arg8[%c0_6, %c0_7], %7 {strides = array<i32>} : memref<2x128xf32, #tpu.memory_space<vmem>>, vector<2x128xf32>,
    %c0_i32_8 = arith.constant 0 : i32
    %9 = arith.cmpi eq, %arg2, %c0_i32_8 : i32
    %10 = arith.extui %9 : i1 to i32
    %c0_i32_9 = arith.constant 0 : i32
    %11 = arith.cmpi ne, %10, %c0_i32_9 : i32
    scf.if %11 {
      %c0_10 = arith.constant 0 : index
      %c0_11 = arith.constant 0 : index
      %12 = vector.load %arg8[%c0_10, %c0_11] : memref<2x128xf32, #tpu.memory_space<vmem>>, vector<2x128xf32>
      %c0_12 = arith.constant 0 : index
      %c0_13 = arith.constant 0 : index
      %13 = vector.load %arg5[%c0_12, %c0_13] : memref<1x128xf32, #tpu.memory_space<vmem>>, vector<1x128xf32>
      %14 = vector.broadcast %13 : vector<1x128xf32> to vector<2x128xf32>
      %15 = arith.addf %12, %14 : vector<2x128xf32>
      %c0_14 = arith.constant 0 : index
      %c0_15 = arith.constant 0 : index
      %16 = vector.load %arg6[%c0_14, %c0_15] : memref<2x128xbf16, #tpu.memory_space<vmem>>, vector<2x128xbf16>
      %17 = arith.extf %16 : vector<2x128xbf16> to vector<2x128xf32>
      %18 = arith.addf %15, %17 : vector<2x128xf32>
      %cst_16 = arith.constant 0.000000e+00 : f32
      %19 = vector.broadcast %cst_16 : f32 to vector<2x128xf32>
      %20 = arith.maximumf %18, %19 : vector<2x128xf32>
      %21 = arith.truncf %20 : vector<2x128xf32> to vector<2x128xbf16>
      %c0_17 = arith.constant 0 : index
      %c0_18 = arith.constant 0 : index
      %22 = vector.load %arg7[%c0_17, %c0_18] : memref<2x128xbf16, #tpu.memory_space<vmem>>, vector<2x128xbf16>
      tpu.vector_store %arg7[%c0_17, %c0_18], %21 {strides = array<i32>} : memref<2x128xbf16, #tpu.memory_space<vmem>>, vector<2x128xbf16>,
    } else {
    }
    return
  }
  func.func @transform_0(%arg0: i32, %arg1: i32, %arg2: i32) -> (i32, i32) {
    %c0_i32 = arith.constant 0 : i32
    return %arg0, %arg2 : i32, i32
  }
  func.func @transform_1(%arg0: i32, %arg1: i32, %arg2: i32) -> (i32, i32) {
    %c0_i32 = arith.constant 0 : i32
    return %arg2, %arg1 : i32, i32
  }
  func.func @transform_2(%arg0: i32, %arg1: i32, %arg2: i32) -> (i32, i32) {
    %c0_i32 = arith.constant 0 : i32
    %c0_i32_0 = arith.constant 0 : i32
    return %c0_i32, %arg1 : i32, i32
  }
  func.func @transform_3(%arg0: i32, %arg1: i32, %arg2: i32) -> (i32, i32) {
    %c0_i32 = arith.constant 0 : i32
    return %arg0, %arg1 : i32, i32
  }
  func.func @transform_4(%arg0: i32, %arg1: i32, %arg2: i32) -> (i32, i32) {
    %c0_i32 = arith.constant 0 : i32
    return %arg0, %arg1 : i32, i32
  }
}

module attributes {stable_mosaic.version = 11 : i64} {
  func.func @_mm_kernel(%arg0: i32, %arg1: i32, %arg2: i32, %arg3: memref<2x128xbf16, #tpu.memory_space<vmem>>, %arg4: memref<128x128xbf16, #tpu.memory_space<vmem>>, %arg5: memref<1x128xf32, #tpu.memory_space<vmem>>, %arg6: memref<2x128xbf16, #tpu.memory_space<vmem>>, %arg7: memref<2x128xf32, #tpu.memory_space<vmem>>) attributes {dimension_semantics = [#tpu.dimension_semantics<parallel>, #tpu.dimension_semantics<parallel>, #tpu.dimension_semantics<arbitrary>], iteration_bounds = array<i64: 1, 2, 1>, scalar_prefetch = 0 : i64, scratch_operands = 1 : i64, tpu.core_type = #tpu.core_type<tc>, window_params = [{transform_indices = @transform_0, window_bounds = array<i64: 2, 128>}, {transform_indices = @transform_1, window_bounds = array<i64: 128, 128>}, {transform_indices = @transform_2, window_bounds = array<i64: 1, 128>}, {transform_indices = @transform_3, window_bounds = array<i64: 2, 128>}]} {
    %c0_i32 = arith.constant 0 : i32
    %0 = arith.cmpi eq, %arg2, %c0_i32 : i32
    %1 = arith.extui %0 : i1 to i32
    %c0_i32_0 = arith.constant 0 : i32
    %2 = arith.cmpi ne, %1, %c0_i32_0 : i32
    scf.if %2 {
      %cst_10 = arith.constant 0.000000e+00 : f32
      %12 = vector.broadcast %cst_10 : f32 to vector<2x128xf32>
      %c0_11 = arith.constant 0 : index
      %c0_12 = arith.constant 0 : index
      %13 = vector.load %arg7[%c0_11, %c0_12] : memref<2x128xf32, #tpu.memory_space<vmem>>, vector<2x128xf32>
      tpu.vector_store %arg7[%c0_11, %c0_12], %12 {strides = array<i32>} : memref<2x128xf32, #tpu.memory_space<vmem>>, vector<2x128xf32>,
    } else {
    }
    %c0 = arith.constant 0 : index
    %c0_1 = arith.constant 0 : index
    %3 = vector.load %arg7[%c0, %c0_1] : memref<2x128xf32, #tpu.memory_space<vmem>>, vector<2x128xf32>
    %c0_2 = arith.constant 0 : index
    %c0_3 = arith.constant 0 : index
    %4 = vector.load %arg3[%c0_2, %c0_3] : memref<2x128xbf16, #tpu.memory_space<vmem>>, vector<2x128xbf16>
    %c0_4 = arith.constant 0 : index
    %c0_5 = arith.constant 0 : index
    %5 = vector.load %arg4[%c0_4, %c0_5] : memref<128x128xbf16, #tpu.memory_space<vmem>>, vector<128x128xbf16>
    %cst = arith.constant dense<0.000000e+00> : vector<2x128xf32>
    %6 = tpu.matmul %4, %5, %cst {dimension_numbers = #tpu.dot_dimension_numbers<[1], [0], [0], [1], [0, 0, 1, 1], [], []>} : vector<2x128xbf16>, vector<128x128xbf16>, vector<2x128xf32> -> vector<2x128xf32>
    %7 = arith.addf %3, %6 : vector<2x128xf32>
    %c0_6 = arith.constant 0 : index
    %c0_7 = arith.constant 0 : index
    %8 = vector.load %arg7[%c0_6, %c0_7] : memref<2x128xf32, #tpu.memory_space<vmem>>, vector<2x128xf32>
    tpu.vector_store %arg7[%c0_6, %c0_7], %7 {strides = array<i32>} : memref<2x128xf32, #tpu.memory_space<vmem>>, vector<2x128xf32>,
    %c0_i32_8 = arith.constant 0 : i32
    %9 = arith.cmpi eq, %arg2, %c0_i32_8 : i32
    %10 = arith.extui %9 : i1 to i32
    %c0_i32_9 = arith.constant 0 : i32
    %11 = arith.cmpi ne, %10, %c0_i32_9 : i32
    scf.if %11 {
      %c0_10 = arith.constant 0 : index
      %c0_11 = arith.constant 0 : index
      %12 = vector.load %arg7[%c0_10, %c0_11] : memref<2x128xf32, #tpu.memory_space<vmem>>, vector<2x128xf32>
      %c0_12 = arith.constant 0 : index
      %c0_13 = arith.constant 0 : index
      %13 = vector.load %arg5[%c0_12, %c0_13] : memref<1x128xf32, #tpu.memory_space<vmem>>, vector<1x128xf32>
      %14 = vector.broadcast %13 : vector<1x128xf32> to vector<2x128xf32>
      %15 = arith.addf %12, %14 : vector<2x128xf32>
      %16 = arith.truncf %15 : vector<2x128xf32> to vector<2x128xbf16>
      %c0_14 = arith.constant 0 : index
      %c0_15 = arith.constant 0 : index
      %17 = vector.load %arg6[%c0_14, %c0_15] : memref<2x128xbf16, #tpu.memory_space<vmem>>, vector<2x128xbf16>
      tpu.vector_store %arg6[%c0_14, %c0_15], %16 {strides = array<i32>} : memref<2x128xbf16, #tpu.memory_space<vmem>>, vector<2x128xbf16>,
    } else {
    }
    return
  }
  func.func @transform_0(%arg0: i32, %arg1: i32, %arg2: i32) -> (i32, i32) {
    %c0_i32 = arith.constant 0 : i32
    return %arg0, %arg2 : i32, i32
  }
  func.func @transform_1(%arg0: i32, %arg1: i32, %arg2: i32) -> (i32, i32) {
    %c0_i32 = arith.constant 0 : i32
    return %arg2, %arg1 : i32, i32
  }
  func.func @transform_2(%arg0: i32, %arg1: i32, %arg2: i32) -> (i32, i32) {
    %c0_i32 = arith.constant 0 : i32
    %c0_i32_0 = arith.constant 0 : i32
    return %c0_i32, %arg1 : i32, i32
  }
  func.func @transform_3(%arg0: i32, %arg1: i32, %arg2: i32) -> (i32, i32) {
    %c0_i32 = arith.constant 0 : i32
    return %arg0, %arg1 : i32, i32
  }
}

module attributes {stable_mosaic.version = 11 : i64} {
  func.func @_mm_kernel(%arg0: i32, %arg1: i32, %arg2: i32, %arg3: memref<2x256xbf16, #tpu.memory_space<vmem>>, %arg4: memref<256x128xbf16, #tpu.memory_space<vmem>>, %arg5: memref<1x128xf32, #tpu.memory_space<vmem>>, %arg6: memref<2x128xbf16, #tpu.memory_space<vmem>>, %arg7: memref<2x128xf32, #tpu.memory_space<vmem>>) attributes {dimension_semantics = [#tpu.dimension_semantics<parallel>, #tpu.dimension_semantics<parallel>, #tpu.dimension_semantics<arbitrary>], iteration_bounds = array<i64: 1, 4, 1>, scalar_prefetch = 0 : i64, scratch_operands = 1 : i64, tpu.core_type = #tpu.core_type<tc>, window_params = [{transform_indices = @transform_0, window_bounds = array<i64: 2, 256>}, {transform_indices = @transform_1, window_bounds = array<i64: 256, 128>}, {transform_indices = @transform_2, window_bounds = array<i64: 1, 128>}, {transform_indices = @transform_3, window_bounds = array<i64: 2, 128>}]} {
    %c0_i32 = arith.constant 0 : i32
    %0 = arith.cmpi eq, %arg2, %c0_i32 : i32
    %1 = arith.extui %0 : i1 to i32
    %c0_i32_0 = arith.constant 0 : i32
    %2 = arith.cmpi ne, %1, %c0_i32_0 : i32
    scf.if %2 {
      %cst_10 = arith.constant 0.000000e+00 : f32
      %12 = vector.broadcast %cst_10 : f32 to vector<2x128xf32>
      %c0_11 = arith.constant 0 : index
      %c0_12 = arith.constant 0 : index
      %13 = vector.load %arg7[%c0_11, %c0_12] : memref<2x128xf32, #tpu.memory_space<vmem>>, vector<2x128xf32>
      tpu.vector_store %arg7[%c0_11, %c0_12], %12 {strides = array<i32>} : memref<2x128xf32, #tpu.memory_space<vmem>>, vector<2x128xf32>,
    } else {
    }
    %c0 = arith.constant 0 : index
    %c0_1 = arith.constant 0 : index
    %3 = vector.load %arg7[%c0, %c0_1] : memref<2x128xf32, #tpu.memory_space<vmem>>, vector<2x128xf32>
    %c0_2 = arith.constant 0 : index
    %c0_3 = arith.constant 0 : index
    %4 = vector.load %arg3[%c0_2, %c0_3] : memref<2x256xbf16, #tpu.memory_space<vmem>>, vector<2x256xbf16>
    %c0_4 = arith.constant 0 : index
    %c0_5 = arith.constant 0 : index
    %5 = vector.load %arg4[%c0_4, %c0_5] : memref<256x128xbf16, #tpu.memory_space<vmem>>, vector<256x128xbf16>
    %cst = arith.constant dense<0.000000e+00> : vector<2x128xf32>
    %6 = tpu.matmul %4, %5, %cst {dimension_numbers = #tpu.dot_dimension_numbers<[1], [0], [0], [1], [0, 0, 1, 1], [], []>} : vector<2x256xbf16>, vector<256x128xbf16>, vector<2x128xf32> -> vector<2x128xf32>
    %7 = arith.addf %3, %6 : vector<2x128xf32>
    %c0_6 = arith.constant 0 : index
    %c0_7 = arith.constant 0 : index
    %8 = vector.load %arg7[%c0_6, %c0_7] : memref<2x128xf32, #tpu.memory_space<vmem>>, vector<2x128xf32>
    tpu.vector_store %arg7[%c0_6, %c0_7], %7 {strides = array<i32>} : memref<2x128xf32, #tpu.memory_space<vmem>>, vector<2x128xf32>,
    %c0_i32_8 = arith.constant 0 : i32
    %9 = arith.cmpi eq, %arg2, %c0_i32_8 : i32
    %10 = arith.extui %9 : i1 to i32
    %c0_i32_9 = arith.constant 0 : i32
    %11 = arith.cmpi ne, %10, %c0_i32_9 : i32
    scf.if %11 {
      %c0_10 = arith.constant 0 : index
      %c0_11 = arith.constant 0 : index
      %12 = vector.load %arg7[%c0_10, %c0_11] : memref<2x128xf32, #tpu.memory_space<vmem>>, vector<2x128xf32>
      %c0_12 = arith.constant 0 : index
      %c0_13 = arith.constant 0 : index
      %13 = vector.load %arg5[%c0_12, %c0_13] : memref<1x128xf32, #tpu.memory_space<vmem>>, vector<1x128xf32>
      %14 = vector.broadcast %13 : vector<1x128xf32> to vector<2x128xf32>
      %15 = arith.addf %12, %14 : vector<2x128xf32>
      %16 = arith.truncf %15 : vector<2x128xf32> to vector<2x128xbf16>
      %c0_14 = arith.constant 0 : index
      %c0_15 = arith.constant 0 : index
      %17 = vector.load %arg6[%c0_14, %c0_15] : memref<2x128xbf16, #tpu.memory_space<vmem>>, vector<2x128xbf16>
      tpu.vector_store %arg6[%c0_14, %c0_15], %16 {strides = array<i32>} : memref<2x128xbf16, #tpu.memory_space<vmem>>, vector<2x128xbf16>,
    } else {
    }
    return
  }
  func.func @transform_0(%arg0: i32, %arg1: i32, %arg2: i32) -> (i32, i32) {
    %c0_i32 = arith.constant 0 : i32
    return %arg0, %arg2 : i32, i32
  }
  func.func @transform_1(%arg0: i32, %arg1: i32, %arg2: i32) -> (i32, i32) {
    %c0_i32 = arith.constant 0 : i32
    return %arg2, %arg1 : i32, i32
  }
  func.func @transform_2(%arg0: i32, %arg1: i32, %arg2: i32) -> (i32, i32) {
    %c0_i32 = arith.constant 0 : i32
    %c0_i32_0 = arith.constant 0 : i32
    return %c0_i32, %arg1 : i32, i32
  }
  func.func @transform_3(%arg0: i32, %arg1: i32, %arg2: i32) -> (i32, i32) {
    %c0_i32 = arith.constant 0 : i32
    return %arg0, %arg1 : i32, i32
  }
}

module attributes {stable_mosaic.version = 11 : i64} {
  func.func @_group_conv_kernel(%arg0: i32, %arg1: i32, %arg2: memref<8x2x72xbf16, #tpu.memory_space<vmem>>, %arg3: memref<8x72x8xbf16, #tpu.memory_space<vmem>>, %arg4: memref<8x1x8xf32, #tpu.memory_space<vmem>>, %arg5: memref<8x2x8xbf16, #tpu.memory_space<vmem>>) attributes {dimension_semantics = [#tpu.dimension_semantics<parallel>, #tpu.dimension_semantics<parallel>], iteration_bounds = array<i64: 1, 4>, scalar_prefetch = 0 : i64, scratch_operands = 0 : i64, tpu.core_type = #tpu.core_type<tc>, window_params = [{transform_indices = @transform_0, window_bounds = array<i64: 8, 2, 72>}, {transform_indices = @transform_1, window_bounds = array<i64: 8, 72, 8>}, {transform_indices = @transform_2, window_bounds = array<i64: 8, 1, 8>}, {transform_indices = @transform_3, window_bounds = array<i64: 8, 2, 8>}]} {
    %c0 = arith.constant 0 : index
    %c0_0 = arith.constant 0 : index
    %c0_1 = arith.constant 0 : index
    %0 = vector.load %arg2[%c0, %c0_0, %c0_1] : memref<8x2x72xbf16, #tpu.memory_space<vmem>>, vector<1x2x72xbf16>
    %1 = vector.shape_cast %0 : vector<1x2x72xbf16> to vector<2x72xbf16>
    %c0_2 = arith.constant 0 : index
    %c0_3 = arith.constant 0 : index
    %c0_4 = arith.constant 0 : index
    %2 = vector.load %arg3[%c0_2, %c0_3, %c0_4] : memref<8x72x8xbf16, #tpu.memory_space<vmem>>, vector<1x72x8xbf16>
    %3 = vector.shape_cast %2 : vector<1x72x8xbf16> to vector<72x8xbf16>
    %cst = arith.constant dense<0.000000e+00> : vector<2x8xf32>
    %4 = tpu.matmul %1, %3, %cst {dimension_numbers = #tpu.dot_dimension_numbers<[1], [0], [0], [1], [0, 0, 1, 1], [], []>} : vector<2x72xbf16>, vector<72x8xbf16>, vector<2x8xf32> -> vector<2x8xf32>
    %c0_5 = arith.constant 0 : index
    %c0_6 = arith.constant 0 : index
    %c0_7 = arith.constant 0 : index
    %5 = vector.load %arg4[%c0_5, %c0_6, %c0_7] : memref<8x1x8xf32, #tpu.memory_space<vmem>>, vector<1x1x8xf32>
    %6 = vector.shape_cast %5 : vector<1x1x8xf32> to vector<1x8xf32>
    %7 = vector.broadcast %6 : vector<1x8xf32> to vector<2x8xf32>
    %8 = arith.addf %4, %7 : vector<2x8xf32>
    %cst_8 = arith.constant 0.000000e+00 : f32
    %9 = vector.broadcast %cst_8 : f32 to vector<2x8xf32>
    %10 = arith.maximumf %8, %9 : vector<2x8xf32>
    %11 = arith.truncf %10 : vector<2x8xf32> to vector<2x8xbf16>
    %c0_9 = arith.constant 0 : index
    %c0_10 = arith.constant 0 : index
    %c0_11 = arith.constant 0 : index
    %12 = vector.load %arg5[%c0_9, %c0_10, %c0_11] : memref<8x2x8xbf16, #tpu.memory_space<vmem>>, vector<1x2x8xbf16>
    %13 = vector.shape_cast %12 : vector<1x2x8xbf16> to vector<2x8xbf16>
    %14 = vector.shape_cast %11 : vector<2x8xbf16> to vector<1x2x8xbf16>
    tpu.vector_store %arg5[%c0_9, %c0_10, %c0_11], %14 {strides = array<i32>} : memref<8x2x8xbf16, #tpu.memory_space<vmem>>, vector<1x2x8xbf16>,
    %c1 = arith.constant 1 : index
    %c0_12 = arith.constant 0 : index
    %c0_13 = arith.constant 0 : index
    %15 = vector.load %arg2[%c1, %c0_12, %c0_13] : memref<8x2x72xbf16, #tpu.memory_space<vmem>>, vector<1x2x72xbf16>
    %16 = vector.shape_cast %15 : vector<1x2x72xbf16> to vector<2x72xbf16>
    %c1_14 = arith.constant 1 : index
    %c0_15 = arith.constant 0 : index
    %c0_16 = arith.constant 0 : index
    %17 = vector.load %arg3[%c1_14, %c0_15, %c0_16] : memref<8x72x8xbf16, #tpu.memory_space<vmem>>, vector<1x72x8xbf16>
    %18 = vector.shape_cast %17 : vector<1x72x8xbf16> to vector<72x8xbf16>
    %cst_17 = arith.constant dense<0.000000e+00> : vector<2x8xf32>
    %19 = tpu.matmul %16, %18, %cst_17 {dimension_numbers = #tpu.dot_dimension_numbers<[1], [0], [0], [1], [0, 0, 1, 1], [], []>} : vector<2x72xbf16>, vector<72x8xbf16>, vector<2x8xf32> -> vector<2x8xf32>
    %c1_18 = arith.constant 1 : index
    %c0_19 = arith.constant 0 : index
    %c0_20 = arith.constant 0 : index
    %20 = vector.load %arg4[%c1_18, %c0_19, %c0_20] : memref<8x1x8xf32, #tpu.memory_space<vmem>>, vector<1x1x8xf32>
    %21 = vector.shape_cast %20 : vector<1x1x8xf32> to vector<1x8xf32>
    %22 = vector.broadcast %21 : vector<1x8xf32> to vector<2x8xf32>
    %23 = arith.addf %19, %22 : vector<2x8xf32>
    %cst_21 = arith.constant 0.000000e+00 : f32
    %24 = vector.broadcast %cst_21 : f32 to vector<2x8xf32>
    %25 = arith.maximumf %23, %24 : vector<2x8xf32>
    %26 = arith.truncf %25 : vector<2x8xf32> to vector<2x8xbf16>
    %c1_22 = arith.constant 1 : index
    %c0_23 = arith.constant 0 : index
    %c0_24 = arith.constant 0 : index
    %27 = vector.load %arg5[%c1_22, %c0_23, %c0_24] : memref<8x2x8xbf16, #tpu.memory_space<vmem>>, vector<1x2x8xbf16>
    %28 = vector.shape_cast %27 : vector<1x2x8xbf16> to vector<2x8xbf16>
    %29 = vector.shape_cast %26 : vector<2x8xbf16> to vector<1x2x8xbf16>
    tpu.vector_store %arg5[%c1_22, %c0_23, %c0_24], %29 {strides = array<i32>} : memref<8x2x8xbf16, #tpu.memory_space<vmem>>, vector<1x2x8xbf16>,
    %c2 = arith.constant 2 : index
    %c0_25 = arith.constant 0 : index
    %c0_26 = arith.constant 0 : index
    %30 = vector.load %arg2[%c2, %c0_25, %c0_26] : memref<8x2x72xbf16, #tpu.memory_space<vmem>>, vector<1x2x72xbf16>
    %31 = vector.shape_cast %30 : vector<1x2x72xbf16> to vector<2x72xbf16>
    %c2_27 = arith.constant 2 : index
    %c0_28 = arith.constant 0 : index
    %c0_29 = arith.constant 0 : index
    %32 = vector.load %arg3[%c2_27, %c0_28, %c0_29] : memref<8x72x8xbf16, #tpu.memory_space<vmem>>, vector<1x72x8xbf16>
    %33 = vector.shape_cast %32 : vector<1x72x8xbf16> to vector<72x8xbf16>
    %cst_30 = arith.constant dense<0.000000e+00> : vector<2x8xf32>
    %34 = tpu.matmul %31, %33, %cst_30 {dimension_numbers = #tpu.dot_dimension_numbers<[1], [0], [0], [1], [0, 0, 1, 1], [], []>} : vector<2x72xbf16>, vector<72x8xbf16>, vector<2x8xf32> -> vector<2x8xf32>
    %c2_31 = arith.constant 2 : index
    %c0_32 = arith.constant 0 : index
    %c0_33 = arith.constant 0 : index
    %35 = vector.load %arg4[%c2_31, %c0_32, %c0_33] : memref<8x1x8xf32, #tpu.memory_space<vmem>>, vector<1x1x8xf32>
    %36 = vector.shape_cast %35 : vector<1x1x8xf32> to vector<1x8xf32>
    %37 = vector.broadcast %36 : vector<1x8xf32> to vector<2x8xf32>
    %38 = arith.addf %34, %37 : vector<2x8xf32>
    %cst_34 = arith.constant 0.000000e+00 : f32
    %39 = vector.broadcast %cst_34 : f32 to vector<2x8xf32>
    %40 = arith.maximumf %38, %39 : vector<2x8xf32>
    %41 = arith.truncf %40 : vector<2x8xf32> to vector<2x8xbf16>
    %c2_35 = arith.constant 2 : index
    %c0_36 = arith.constant 0 : index
    %c0_37 = arith.constant 0 : index
    %42 = vector.load %arg5[%c2_35, %c0_36, %c0_37] : memref<8x2x8xbf16, #tpu.memory_space<vmem>>, vector<1x2x8xbf16>
    %43 = vector.shape_cast %42 : vector<1x2x8xbf16> to vector<2x8xbf16>
    %44 = vector.shape_cast %41 : vector<2x8xbf16> to vector<1x2x8xbf16>
    tpu.vector_store %arg5[%c2_35, %c0_36, %c0_37], %44 {strides = array<i32>} : memref<8x2x8xbf16, #tpu.memory_space<vmem>>, vector<1x2x8xbf16>,
    %c3 = arith.constant 3 : index
    %c0_38 = arith.constant 0 : index
    %c0_39 = arith.constant 0 : index
    %45 = vector.load %arg2[%c3, %c0_38, %c0_39] : memref<8x2x72xbf16, #tpu.memory_space<vmem>>, vector<1x2x72xbf16>
    %46 = vector.shape_cast %45 : vector<1x2x72xbf16> to vector<2x72xbf16>
    %c3_40 = arith.constant 3 : index
    %c0_41 = arith.constant 0 : index
    %c0_42 = arith.constant 0 : index
    %47 = vector.load %arg3[%c3_40, %c0_41, %c0_42] : memref<8x72x8xbf16, #tpu.memory_space<vmem>>, vector<1x72x8xbf16>
    %48 = vector.shape_cast %47 : vector<1x72x8xbf16> to vector<72x8xbf16>
    %cst_43 = arith.constant dense<0.000000e+00> : vector<2x8xf32>
    %49 = tpu.matmul %46, %48, %cst_43 {dimension_numbers = #tpu.dot_dimension_numbers<[1], [0], [0], [1], [0, 0, 1, 1], [], []>} : vector<2x72xbf16>, vector<72x8xbf16>, vector<2x8xf32> -> vector<2x8xf32>
    %c3_44 = arith.constant 3 : index
    %c0_45 = arith.constant 0 : index
    %c0_46 = arith.constant 0 : index
    %50 = vector.load %arg4[%c3_44, %c0_45, %c0_46] : memref<8x1x8xf32, #tpu.memory_space<vmem>>, vector<1x1x8xf32>
    %51 = vector.shape_cast %50 : vector<1x1x8xf32> to vector<1x8xf32>
    %52 = vector.broadcast %51 : vector<1x8xf32> to vector<2x8xf32>
    %53 = arith.addf %49, %52 : vector<2x8xf32>
    %cst_47 = arith.constant 0.000000e+00 : f32
    %54 = vector.broadcast %cst_47 : f32 to vector<2x8xf32>
    %55 = arith.maximumf %53, %54 : vector<2x8xf32>
    %56 = arith.truncf %55 : vector<2x8xf32> to vector<2x8xbf16>
    %c3_48 = arith.constant 3 : index
    %c0_49 = arith.constant 0 : index
    %c0_50 = arith.constant 0 : index
    %57 = vector.load %arg5[%c3_48, %c0_49, %c0_50] : memref<8x2x8xbf16, #tpu.memory_space<vmem>>, vector<1x2x8xbf16>
    %58 = vector.shape_cast %57 : vector<1x2x8xbf16> to vector<2x8xbf16>
    %59 = vector.shape_cast %56 : vector<2x8xbf16> to vector<1x2x8xbf16>
    tpu.vector_store %arg5[%c3_48, %c0_49, %c0_50], %59 {strides = array<i32>} : memref<8x2x8xbf16, #tpu.memory_space<vmem>>, vector<1x2x8xbf16>,
    %c4 = arith.constant 4 : index
    %c0_51 = arith.constant 0 : index
    %c0_52 = arith.constant 0 : index
    %60 = vector.load %arg2[%c4, %c0_51, %c0_52] : memref<8x2x72xbf16, #tpu.memory_space<vmem>>, vector<1x2x72xbf16>
    %61 = vector.shape_cast %60 : vector<1x2x72xbf16> to vector<2x72xbf16>
    %c4_53 = arith.constant 4 : index
    %c0_54 = arith.constant 0 : index
    %c0_55 = arith.constant 0 : index
    %62 = vector.load %arg3[%c4_53, %c0_54, %c0_55] : memref<8x72x8xbf16, #tpu.memory_space<vmem>>, vector<1x72x8xbf16>
    %63 = vector.shape_cast %62 : vector<1x72x8xbf16> to vector<72x8xbf16>
    %cst_56 = arith.constant dense<0.000000e+00> : vector<2x8xf32>
    %64 = tpu.matmul %61, %63, %cst_56 {dimension_numbers = #tpu.dot_dimension_numbers<[1], [0], [0], [1], [0, 0, 1, 1], [], []>} : vector<2x72xbf16>, vector<72x8xbf16>, vector<2x8xf32> -> vector<2x8xf32>
    %c4_57 = arith.constant 4 : index
    %c0_58 = arith.constant 0 : index
    %c0_59 = arith.constant 0 : index
    %65 = vector.load %arg4[%c4_57, %c0_58, %c0_59] : memref<8x1x8xf32, #tpu.memory_space<vmem>>, vector<1x1x8xf32>
    %66 = vector.shape_cast %65 : vector<1x1x8xf32> to vector<1x8xf32>
    %67 = vector.broadcast %66 : vector<1x8xf32> to vector<2x8xf32>
    %68 = arith.addf %64, %67 : vector<2x8xf32>
    %cst_60 = arith.constant 0.000000e+00 : f32
    %69 = vector.broadcast %cst_60 : f32 to vector<2x8xf32>
    %70 = arith.maximumf %68, %69 : vector<2x8xf32>
    %71 = arith.truncf %70 : vector<2x8xf32> to vector<2x8xbf16>
    %c4_61 = arith.constant 4 : index
    %c0_62 = arith.constant 0 : index
    %c0_63 = arith.constant 0 : index
    %72 = vector.load %arg5[%c4_61, %c0_62, %c0_63] : memref<8x2x8xbf16, #tpu.memory_space<vmem>>, vector<1x2x8xbf16>
    %73 = vector.shape_cast %72 : vector<1x2x8xbf16> to vector<2x8xbf16>
    %74 = vector.shape_cast %71 : vector<2x8xbf16> to vector<1x2x8xbf16>
    tpu.vector_store %arg5[%c4_61, %c0_62, %c0_63], %74 {strides = array<i32>} : memref<8x2x8xbf16, #tpu.memory_space<vmem>>, vector<1x2x8xbf16>,
    %c5 = arith.constant 5 : index
    %c0_64 = arith.constant 0 : index
    %c0_65 = arith.constant 0 : index
    %75 = vector.load %arg2[%c5, %c0_64, %c0_65] : memref<8x2x72xbf16, #tpu.memory_space<vmem>>, vector<1x2x72xbf16>
    %76 = vector.shape_cast %75 : vector<1x2x72xbf16> to vector<2x72xbf16>
    %c5_66 = arith.constant 5 : index
    %c0_67 = arith.constant 0 : index
    %c0_68 = arith.constant 0 : index
    %77 = vector.load %arg3[%c5_66, %c0_67, %c0_68] : memref<8x72x8xbf16, #tpu.memory_space<vmem>>, vector<1x72x8xbf16>
    %78 = vector.shape_cast %77 : vector<1x72x8xbf16> to vector<72x8xbf16>
    %cst_69 = arith.constant dense<0.000000e+00> : vector<2x8xf32>
    %79 = tpu.matmul %76, %78, %cst_69 {dimension_numbers = #tpu.dot_dimension_numbers<[1], [0], [0], [1], [0, 0, 1, 1], [], []>} : vector<2x72xbf16>, vector<72x8xbf16>, vector<2x8xf32> -> vector<2x8xf32>
    %c5_70 = arith.constant 5 : index
    %c0_71 = arith.constant 0 : index
    %c0_72 = arith.constant 0 : index
    %80 = vector.load %arg4[%c5_70, %c0_71, %c0_72] : memref<8x1x8xf32, #tpu.memory_space<vmem>>, vector<1x1x8xf32>
    %81 = vector.shape_cast %80 : vector<1x1x8xf32> to vector<1x8xf32>
    %82 = vector.broadcast %81 : vector<1x8xf32> to vector<2x8xf32>
    %83 = arith.addf %79, %82 : vector<2x8xf32>
    %cst_73 = arith.constant 0.000000e+00 : f32
    %84 = vector.broadcast %cst_73 : f32 to vector<2x8xf32>
    %85 = arith.maximumf %83, %84 : vector<2x8xf32>
    %86 = arith.truncf %85 : vector<2x8xf32> to vector<2x8xbf16>
    %c5_74 = arith.constant 5 : index
    %c0_75 = arith.constant 0 : index
    %c0_76 = arith.constant 0 : index
    %87 = vector.load %arg5[%c5_74, %c0_75, %c0_76] : memref<8x2x8xbf16, #tpu.memory_space<vmem>>, vector<1x2x8xbf16>
    %88 = vector.shape_cast %87 : vector<1x2x8xbf16> to vector<2x8xbf16>
    %89 = vector.shape_cast %86 : vector<2x8xbf16> to vector<1x2x8xbf16>
    tpu.vector_store %arg5[%c5_74, %c0_75, %c0_76], %89 {strides = array<i32>} : memref<8x2x8xbf16, #tpu.memory_space<vmem>>, vector<1x2x8xbf16>,
    %c6 = arith.constant 6 : index
    %c0_77 = arith.constant 0 : index
    %c0_78 = arith.constant 0 : index
    %90 = vector.load %arg2[%c6, %c0_77, %c0_78] : memref<8x2x72xbf16, #tpu.memory_space<vmem>>, vector<1x2x72xbf16>
    %91 = vector.shape_cast %90 : vector<1x2x72xbf16> to vector<2x72xbf16>
    %c6_79 = arith.constant 6 : index
    %c0_80 = arith.constant 0 : index
    %c0_81 = arith.constant 0 : index
    %92 = vector.load %arg3[%c6_79, %c0_80, %c0_81] : memref<8x72x8xbf16, #tpu.memory_space<vmem>>, vector<1x72x8xbf16>
    %93 = vector.shape_cast %92 : vector<1x72x8xbf16> to vector<72x8xbf16>
    %cst_82 = arith.constant dense<0.000000e+00> : vector<2x8xf32>
    %94 = tpu.matmul %91, %93, %cst_82 {dimension_numbers = #tpu.dot_dimension_numbers<[1], [0], [0], [1], [0, 0, 1, 1], [], []>} : vector<2x72xbf16>, vector<72x8xbf16>, vector<2x8xf32> -> vector<2x8xf32>
    %c6_83 = arith.constant 6 : index
    %c0_84 = arith.constant 0 : index
    %c0_85 = arith.constant 0 : index
    %95 = vector.load %arg4[%c6_83, %c0_84, %c0_85] : memref<8x1x8xf32, #tpu.memory_space<vmem>>, vector<1x1x8xf32>
    %96 = vector.shape_cast %95 : vector<1x1x8xf32> to vector<1x8xf32>
    %97 = vector.broadcast %96 : vector<1x8xf32> to vector<2x8xf32>
    %98 = arith.addf %94, %97 : vector<2x8xf32>
    %cst_86 = arith.constant 0.000000e+00 : f32
    %99 = vector.broadcast %cst_86 : f32 to vector<2x8xf32>
    %100 = arith.maximumf %98, %99 : vector<2x8xf32>
    %101 = arith.truncf %100 : vector<2x8xf32> to vector<2x8xbf16>
    %c6_87 = arith.constant 6 : index
    %c0_88 = arith.constant 0 : index
    %c0_89 = arith.constant 0 : index
    %102 = vector.load %arg5[%c6_87, %c0_88, %c0_89] : memref<8x2x8xbf16, #tpu.memory_space<vmem>>, vector<1x2x8xbf16>
    %103 = vector.shape_cast %102 : vector<1x2x8xbf16> to vector<2x8xbf16>
    %104 = vector.shape_cast %101 : vector<2x8xbf16> to vector<1x2x8xbf16>
    tpu.vector_store %arg5[%c6_87, %c0_88, %c0_89], %104 {strides = array<i32>} : memref<8x2x8xbf16, #tpu.memory_space<vmem>>, vector<1x2x8xbf16>,
    %c7 = arith.constant 7 : index
    %c0_90 = arith.constant 0 : index
    %c0_91 = arith.constant 0 : index
    %105 = vector.load %arg2[%c7, %c0_90, %c0_91] : memref<8x2x72xbf16, #tpu.memory_space<vmem>>, vector<1x2x72xbf16>
    %106 = vector.shape_cast %105 : vector<1x2x72xbf16> to vector<2x72xbf16>
    %c7_92 = arith.constant 7 : index
    %c0_93 = arith.constant 0 : index
    %c0_94 = arith.constant 0 : index
    %107 = vector.load %arg3[%c7_92, %c0_93, %c0_94] : memref<8x72x8xbf16, #tpu.memory_space<vmem>>, vector<1x72x8xbf16>
    %108 = vector.shape_cast %107 : vector<1x72x8xbf16> to vector<72x8xbf16>
    %cst_95 = arith.constant dense<0.000000e+00> : vector<2x8xf32>
    %109 = tpu.matmul %106, %108, %cst_95 {dimension_numbers = #tpu.dot_dimension_numbers<[1], [0], [0], [1], [0, 0, 1, 1], [], []>} : vector<2x72xbf16>, vector<72x8xbf16>, vector<2x8xf32> -> vector<2x8xf32>
    %c7_96 = arith.constant 7 : index
    %c0_97 = arith.constant 0 : index
    %c0_98 = arith.constant 0 : index
    %110 = vector.load %arg4[%c7_96, %c0_97, %c0_98] : memref<8x1x8xf32, #tpu.memory_space<vmem>>, vector<1x1x8xf32>
    %111 = vector.shape_cast %110 : vector<1x1x8xf32> to vector<1x8xf32>
    %112 = vector.broadcast %111 : vector<1x8xf32> to vector<2x8xf32>
    %113 = arith.addf %109, %112 : vector<2x8xf32>
    %cst_99 = arith.constant 0.000000e+00 : f32
    %114 = vector.broadcast %cst_99 : f32 to vector<2x8xf32>
    %115 = arith.maximumf %113, %114 : vector<2x8xf32>
    %116 = arith.truncf %115 : vector<2x8xf32> to vector<2x8xbf16>
    %c7_100 = arith.constant 7 : index
    %c0_101 = arith.constant 0 : index
    %c0_102 = arith.constant 0 : index
    %117 = vector.load %arg5[%c7_100, %c0_101, %c0_102] : memref<8x2x8xbf16, #tpu.memory_space<vmem>>, vector<1x2x8xbf16>
    %118 = vector.shape_cast %117 : vector<1x2x8xbf16> to vector<2x8xbf16>
    %119 = vector.shape_cast %116 : vector<2x8xbf16> to vector<1x2x8xbf16>
    tpu.vector_store %arg5[%c7_100, %c0_101, %c0_102], %119 {strides = array<i32>} : memref<8x2x8xbf16, #tpu.memory_space<vmem>>, vector<1x2x8xbf16>,
    return
  }
  func.func @transform_0(%arg0: i32, %arg1: i32) -> (i32, i32, i32) {
    %c0_i32 = arith.constant 0 : i32
    %c0_i32_0 = arith.constant 0 : i32
    return %arg1, %arg0, %c0_i32 : i32, i32, i32
  }
  func.func @transform_1(%arg0: i32, %arg1: i32) -> (i32, i32, i32) {
    %c0_i32 = arith.constant 0 : i32
    %c0_i32_0 = arith.constant 0 : i32
    %c0_i32_1 = arith.constant 0 : i32
    return %arg1, %c0_i32, %c0_i32_0 : i32, i32, i32
  }
  func.func @transform_2(%arg0: i32, %arg1: i32) -> (i32, i32, i32) {
    %c0_i32 = arith.constant 0 : i32
    %c0_i32_0 = arith.constant 0 : i32
    %c0_i32_1 = arith.constant 0 : i32
    return %arg1, %c0_i32, %c0_i32_0 : i32, i32, i32
  }
  func.func @transform_3(%arg0: i32, %arg1: i32) -> (i32, i32, i32) {
    %c0_i32 = arith.constant 0 : i32
    %c0_i32_0 = arith.constant 0 : i32
    return %arg1, %arg0, %c0_i32 : i32, i32, i32
  }
}

module attributes {stable_mosaic.version = 11 : i64} {
  func.func @_mm_kernel(%arg0: i32, %arg1: i32, %arg2: i32, %arg3: memref<2x256xbf16, #tpu.memory_space<vmem>>, %arg4: memref<256x128xbf16, #tpu.memory_space<vmem>>, %arg5: memref<1x128xf32, #tpu.memory_space<vmem>>, %arg6: memref<2x128xbf16, #tpu.memory_space<vmem>>, %arg7: memref<2x128xbf16, #tpu.memory_space<vmem>>, %arg8: memref<2x128xf32, #tpu.memory_space<vmem>>) attributes {dimension_semantics = [#tpu.dimension_semantics<parallel>, #tpu.dimension_semantics<parallel>, #tpu.dimension_semantics<arbitrary>], iteration_bounds = array<i64: 1, 4, 1>, scalar_prefetch = 0 : i64, scratch_operands = 1 : i64, tpu.core_type = #tpu.core_type<tc>, window_params = [{transform_indices = @transform_0, window_bounds = array<i64: 2, 256>}, {transform_indices = @transform_1, window_bounds = array<i64: 256, 128>}, {transform_indices = @transform_2, window_bounds = array<i64: 1, 128>}, {transform_indices = @transform_3, window_bounds = array<i64: 2, 128>}, {transform_indices = @transform_4, window_bounds = array<i64: 2, 128>}]} {
    %c0_i32 = arith.constant 0 : i32
    %0 = arith.cmpi eq, %arg2, %c0_i32 : i32
    %1 = arith.extui %0 : i1 to i32
    %c0_i32_0 = arith.constant 0 : i32
    %2 = arith.cmpi ne, %1, %c0_i32_0 : i32
    scf.if %2 {
      %cst_10 = arith.constant 0.000000e+00 : f32
      %12 = vector.broadcast %cst_10 : f32 to vector<2x128xf32>
      %c0_11 = arith.constant 0 : index
      %c0_12 = arith.constant 0 : index
      %13 = vector.load %arg8[%c0_11, %c0_12] : memref<2x128xf32, #tpu.memory_space<vmem>>, vector<2x128xf32>
      tpu.vector_store %arg8[%c0_11, %c0_12], %12 {strides = array<i32>} : memref<2x128xf32, #tpu.memory_space<vmem>>, vector<2x128xf32>,
    } else {
    }
    %c0 = arith.constant 0 : index
    %c0_1 = arith.constant 0 : index
    %3 = vector.load %arg8[%c0, %c0_1] : memref<2x128xf32, #tpu.memory_space<vmem>>, vector<2x128xf32>
    %c0_2 = arith.constant 0 : index
    %c0_3 = arith.constant 0 : index
    %4 = vector.load %arg3[%c0_2, %c0_3] : memref<2x256xbf16, #tpu.memory_space<vmem>>, vector<2x256xbf16>
    %c0_4 = arith.constant 0 : index
    %c0_5 = arith.constant 0 : index
    %5 = vector.load %arg4[%c0_4, %c0_5] : memref<256x128xbf16, #tpu.memory_space<vmem>>, vector<256x128xbf16>
    %cst = arith.constant dense<0.000000e+00> : vector<2x128xf32>
    %6 = tpu.matmul %4, %5, %cst {dimension_numbers = #tpu.dot_dimension_numbers<[1], [0], [0], [1], [0, 0, 1, 1], [], []>} : vector<2x256xbf16>, vector<256x128xbf16>, vector<2x128xf32> -> vector<2x128xf32>
    %7 = arith.addf %3, %6 : vector<2x128xf32>
    %c0_6 = arith.constant 0 : index
    %c0_7 = arith.constant 0 : index
    %8 = vector.load %arg8[%c0_6, %c0_7] : memref<2x128xf32, #tpu.memory_space<vmem>>, vector<2x128xf32>
    tpu.vector_store %arg8[%c0_6, %c0_7], %7 {strides = array<i32>} : memref<2x128xf32, #tpu.memory_space<vmem>>, vector<2x128xf32>,
    %c0_i32_8 = arith.constant 0 : i32
    %9 = arith.cmpi eq, %arg2, %c0_i32_8 : i32
    %10 = arith.extui %9 : i1 to i32
    %c0_i32_9 = arith.constant 0 : i32
    %11 = arith.cmpi ne, %10, %c0_i32_9 : i32
    scf.if %11 {
      %c0_10 = arith.constant 0 : index
      %c0_11 = arith.constant 0 : index
      %12 = vector.load %arg8[%c0_10, %c0_11] : memref<2x128xf32, #tpu.memory_space<vmem>>, vector<2x128xf32>
      %c0_12 = arith.constant 0 : index
      %c0_13 = arith.constant 0 : index
      %13 = vector.load %arg5[%c0_12, %c0_13] : memref<1x128xf32, #tpu.memory_space<vmem>>, vector<1x128xf32>
      %14 = vector.broadcast %13 : vector<1x128xf32> to vector<2x128xf32>
      %15 = arith.addf %12, %14 : vector<2x128xf32>
      %c0_14 = arith.constant 0 : index
      %c0_15 = arith.constant 0 : index
      %16 = vector.load %arg6[%c0_14, %c0_15] : memref<2x128xbf16, #tpu.memory_space<vmem>>, vector<2x128xbf16>
      %17 = arith.extf %16 : vector<2x128xbf16> to vector<2x128xf32>
      %18 = arith.addf %15, %17 : vector<2x128xf32>
      %cst_16 = arith.constant 0.000000e+00 : f32
      %19 = vector.broadcast %cst_16 : f32 to vector<2x128xf32>
      %20 = arith.maximumf %18, %19 : vector<2x128xf32>
      %21 = arith.truncf %20 : vector<2x128xf32> to vector<2x128xbf16>
      %c0_17 = arith.constant 0 : index
      %c0_18 = arith.constant 0 : index
      %22 = vector.load %arg7[%c0_17, %c0_18] : memref<2x128xbf16, #tpu.memory_space<vmem>>, vector<2x128xbf16>
      tpu.vector_store %arg7[%c0_17, %c0_18], %21 {strides = array<i32>} : memref<2x128xbf16, #tpu.memory_space<vmem>>, vector<2x128xbf16>,
    } else {
    }
    return
  }
  func.func @transform_0(%arg0: i32, %arg1: i32, %arg2: i32) -> (i32, i32) {
    %c0_i32 = arith.constant 0 : i32
    return %arg0, %arg2 : i32, i32
  }
  func.func @transform_1(%arg0: i32, %arg1: i32, %arg2: i32) -> (i32, i32) {
    %c0_i32 = arith.constant 0 : i32
    return %arg2, %arg1 : i32, i32
  }
  func.func @transform_2(%arg0: i32, %arg1: i32, %arg2: i32) -> (i32, i32) {
    %c0_i32 = arith.constant 0 : i32
    %c0_i32_0 = arith.constant 0 : i32
    return %c0_i32, %arg1 : i32, i32
  }
  func.func @transform_3(%arg0: i32, %arg1: i32, %arg2: i32) -> (i32, i32) {
    %c0_i32 = arith.constant 0 : i32
    return %arg0, %arg1 : i32, i32
  }
  func.func @transform_4(%arg0: i32, %arg1: i32, %arg2: i32) -> (i32, i32) {
    %c0_i32 = arith.constant 0 : i32
    return %arg0, %arg1 : i32, i32
  }
}

module attributes {stable_mosaic.version = 11 : i64} {
  func.func @_avgpool_fc_kernel(%arg0: i32, %arg1: memref<1x1x512xbf16, #tpu.memory_space<vmem>>, %arg2: memref<512x128xbf16, #tpu.memory_space<vmem>>, %arg3: memref<1x128xf32, #tpu.memory_space<vmem>>, %arg4: memref<1x1x128xf32, #tpu.memory_space<vmem>>) attributes {dimension_semantics = [#tpu.dimension_semantics<parallel>], iteration_bounds = array<i64: 2>, scalar_prefetch = 0 : i64, scratch_operands = 0 : i64, tpu.core_type = #tpu.core_type<tc>, window_params = [{transform_indices = @transform_0, window_bounds = array<i64: 1, 1, 512>}, {pipeline_mode = #tpu.pipeline_mode<synchronous>, transform_indices = @transform_1, window_bounds = array<i64: 512, 128>}, {pipeline_mode = #tpu.pipeline_mode<synchronous>, transform_indices = @transform_2, window_bounds = array<i64: 1, 128>}, {transform_indices = @transform_3, window_bounds = array<i64: 1, 1, 128>}]} {
    %c0 = arith.constant 0 : index
    %c0_0 = arith.constant 0 : index
    %c0_1 = arith.constant 0 : index
    %0 = vector.load %arg1[%c0, %c0_0, %c0_1] : memref<1x1x512xbf16, #tpu.memory_space<vmem>>, vector<1x1x512xbf16>
    %1 = vector.shape_cast %0 : vector<1x1x512xbf16> to vector<1x512xbf16>
    %2 = arith.extf %1 : vector<1x512xbf16> to vector<1x512xf32>
    %cst = arith.constant dense<0.000000e+00> : vector<512xf32>
    %3 = vector.multi_reduction <add>, %2, %cst [0] : vector<1x512xf32> to vector<512xf32>
    %4 = vector.shape_cast %3 : vector<512xf32> to vector<1x512xf32>
    %cst_2 = arith.constant 1.000000e+00 : f32
    %5 = vector.broadcast %cst_2 : f32 to vector<1x512xf32>
    %6 = arith.divf %4, %5 : vector<1x512xf32>
    %7 = arith.truncf %6 : vector<1x512xf32> to vector<1x512xbf16>
    %c0_3 = arith.constant 0 : index
    %c0_4 = arith.constant 0 : index
    %8 = vector.load %arg2[%c0_3, %c0_4] : memref<512x128xbf16, #tpu.memory_space<vmem>>, vector<512x128xbf16>
    %cst_5 = arith.constant dense<0.000000e+00> : vector<1x128xf32>
    %9 = tpu.matmul %7, %8, %cst_5 {dimension_numbers = #tpu.dot_dimension_numbers<[1], [0], [0], [1], [0, 0, 1, 1], [], []>} : vector<1x512xbf16>, vector<512x128xbf16>, vector<1x128xf32> -> vector<1x128xf32>
    %c0_6 = arith.constant 0 : index
    %c0_7 = arith.constant 0 : index
    %10 = vector.load %arg3[%c0_6, %c0_7] : memref<1x128xf32, #tpu.memory_space<vmem>>, vector<1x128xf32>
    %11 = arith.addf %9, %10 : vector<1x128xf32>
    %c0_8 = arith.constant 0 : index
    %c0_9 = arith.constant 0 : index
    %c0_10 = arith.constant 0 : index
    %12 = vector.load %arg4[%c0_8, %c0_9, %c0_10] : memref<1x1x128xf32, #tpu.memory_space<vmem>>, vector<1x1x128xf32>
    %13 = vector.shape_cast %12 : vector<1x1x128xf32> to vector<1x128xf32>
    %14 = vector.shape_cast %11 : vector<1x128xf32> to vector<1x1x128xf32>
    tpu.vector_store %arg4[%c0_8, %c0_9, %c0_10], %14 {strides = array<i32>} : memref<1x1x128xf32, #tpu.memory_space<vmem>>, vector<1x1x128xf32>,
    return
  }
  func.func @transform_0(%arg0: i32) -> (i32, i32, i32) {
    %c0_i32 = arith.constant 0 : i32
    %c0_i32_0 = arith.constant 0 : i32
    %c0_i32_1 = arith.constant 0 : i32
    return %arg0, %c0_i32, %c0_i32_0 : i32, i32, i32
  }
  func.func @transform_1(%arg0: i32) -> (i32, i32) {
    %c0_i32 = arith.constant 0 : i32
    %c0_i32_0 = arith.constant 0 : i32
    %c0_i32_1 = arith.constant 0 : i32
    return %c0_i32, %c0_i32_0 : i32, i32
  }
  func.func @transform_2(%arg0: i32) -> (i32, i32) {
    %c0_i32 = arith.constant 0 : i32
    %c0_i32_0 = arith.constant 0 : i32
    %c0_i32_1 = arith.constant 0 : i32
    return %c0_i32, %c0_i32_0 : i32, i32
  }
  func.func @transform_3(%arg0: i32) -> (i32, i32, i32) {
    %c0_i32 = arith.constant 0 : i32
    %c0_i32_0 = arith.constant 0 : i32
    %c0_i32_1 = arith.constant 0 : i32
    return %arg0, %c0_i32, %c0_i32_0 : i32, i32, i32
  }
}

</mosaic_0001>

<bundles_post_ra>
// kernel: sws_resnext_forward.20
= control target key start
LH: loop header
LB: loop body
LE: loop exit
PB: predicated region body
PF: predicated region fallthrough
CT: control target
= control target key end

     0   :  { %s285_s0 = inlined_call_operand.vmem [shape: bf16[32,128], index: 0, kind: input, shape index: {}]   ;;  %s286_s1 = inlined_call_operand.vmem [shape: bf16[32,128], index: 1, kind: input, shape index: {}]   ;;  %s287_s2 = inlined_call_operand.vmem [shape: bf16[32,128], index: 2, kind: input, shape index: {}]   ;;  %s288_s3 = inlined_call_operand.vmem [shape: bf16[32,128], index: 3, kind: input, shape index: {}]   ;;  %s289_s4 = inlined_call_operand.vmem [shape: bf16[32,128], index: 4, kind: input, shape index: {}]   ;;  %s290_s5 = inlined_call_operand.vmem [shape: bf16[32,128], index: 5, kind: input, shape index: {}]   ;;  %s291_s6 = inlined_call_operand.vmem [shape: bf16[32,128], index: 6, kind: input, shape index: {}]   ;;  %s292_s7 = inlined_call_operand.vmem [shape: bf16[32,128], index: 7, kind: input, shape index: {}]   ;;  %s293_s8 = inlined_call_operand.vmem [shape: bf16[32,128], index: 8, kind: input, shape index: {}]   ;;  %s294_s9 = inlined_call_operand.vmem [shape: bf16[32,128], index: 9, kind: output, shape index: {}]  }
   0x1   :  { %v32_v0 = vld [vmem:[%s285_s0] sm:$0xf]  ;;  %v33_v1 = vld [vmem:[%s285_s0 + $0x4] sm:$0xf]  ;;  %v34_v18 = vld [vmem:[%s285_s0 + $0x8] sm:$0xf] }
   0x2   :  { %v36_v2 = vld [vmem:[%s286_s1] sm:$0xf]  ;;  %v37_v3 = vld [vmem:[%s286_s1 + $0x4] sm:$0xf]  ;;  %v35_v19 = vld [vmem:[%s285_s0 + $0xc] sm:$0xf] }
   0x3   :  { %v40_v4 = vmax.bf16 %v36_v2, %v32_v0  ;;  %v44_v5 = vld [vmem:[%s287_s2] sm:$0xf]  ;;  %v45_v6 = vld [vmem:[%s287_s2 + $0x4] sm:$0xf]  ;;  %v41_v7 = vmax.bf16 %v37_v3, %v33_v1  ;;  %v38_v20 = vld [vmem:[%s286_s1 + $0x8] sm:$0xf] }
   0x4   :  { %v52_v8 = vld [vmem:[%s288_s3] sm:$0xf]  ;;  %v53_v10 = vld [vmem:[%s288_s3 + $0x4] sm:$0xf]  ;;  %v39_v22 = vld [vmem:[%s286_s1 + $0xc] sm:$0xf]  ;;  %v42_v23 = vmax.bf16 %v38_v20, %v34_v18 }
   0x5   :  { %v48_v9 = vmax.bf16 %v44_v5, %v40_v4  ;;  %v49_v11 = vmax.bf16 %v45_v6, %v41_v7  ;;  %v60_v12 = vld [vmem:[%s289_s4] sm:$0xf]  ;;  %v61_v14 = vld [vmem:[%s289_s4 + $0x4] sm:$0xf]  ;;  %v46_v24 = vld [vmem:[%s287_s2 + $0x8] sm:$0xf]  ;;  %v43_v28 = vmax.bf16 %v39_v22, %v35_v19 }
   0x6   :  { %v68_v15 = vld [vmem:[%s290_s5] sm:$0xf]  ;;  %v69_v16 = vld [vmem:[%s290_s5 + $0x4] sm:$0xf]  ;;  %v47_v25 = vld [vmem:[%s287_s2 + $0xc] sm:$0xf]  ;;  %v50_v32 = vmax.bf16 %v46_v24, %v42_v23 }
   0x7   :  { %v56_v13 = vmax.bf16 %v52_v8, %v48_v9  ;;  %v57_v17 = vmax.bf16 %v53_v10, %v49_v11  ;;  %v76_v27 = vld [vmem:[%s291_s6] sm:$0xf]  ;;  %v54_v29 = vld [vmem:[%s288_s3 + $0x8] sm:$0xf]  ;;  %v77_v31 = vld [vmem:[%s291_s6 + $0x4] sm:$0xf]  ;;  %v51_v36 = vmax.bf16 %v47_v25, %v43_v28 }
   0x8   :  { %v55_v33 = vld [vmem:[%s288_s3 + $0xc] sm:$0xf]  ;;  %v84_v35 = vld [vmem:[%s292_s7] sm:$0xf]  ;;  %v62_v37 = vld [vmem:[%s289_s4 + $0x8] sm:$0xf]  ;;  %v58_v40 = vmax.bf16 %v54_v29, %v50_v32 }
   0x9   :  { %v64_v21 = vmax.bf16 %v60_v12, %v56_v13  ;;  %v65_v26 = vmax.bf16 %v61_v14, %v57_v17  ;;  %v85_v39 = vld [vmem:[%s292_s7 + $0x4] sm:$0xf]  ;;  %v63_v41 = vld [vmem:[%s289_s4 + $0xc] sm:$0xf]  ;;  %v92_v43 = vld [vmem:[%s293_s8] sm:$0xf]  ;;  %v59_v44 = vmax.bf16 %v55_v33, %v51_v36 }
   0xa   :  { %v70_v45 = vld [vmem:[%s290_s5 + $0x8] sm:$0xf]  ;;  %v93_v47 = vld [vmem:[%s293_s8 + $0x4] sm:$0xf]  ;;  %v66_v48 = vmax.bf16 %v62_v37, %v58_v40  ;;  %v71_v49 = vld [vmem:[%s290_s5 + $0xc] sm:$0xf] }
   0xb   :  { %v72_v30 = vmax.bf16 %v68_v15, %v64_v21  ;;  %v73_v34 = vmax.bf16 %v69_v16, %v65_v26  ;;  %v67_v51 = vmax.bf16 %v63_v41, %v59_v44  ;;  %v78_v52 = vld [vmem:[%s291_s6 + $0x8] sm:$0xf]  ;;  %v79_v55 = vld [vmem:[%s291_s6 + $0xc] sm:$0xf] }
   0xc   :  { %v74_v54 = vmax.bf16 %v70_v45, %v66_v48  ;;  %v86_v58 = vld [vmem:[%s292_s7 + $0x8] sm:$0xf]  ;;  %v87_v60 = vld [vmem:[%s292_s7 + $0xc] sm:$0xf] }
   0xd   :  { %v80_v38 = vmax.bf16 %v76_v27, %v72_v30  ;;  %v81_v42 = vmax.bf16 %v77_v31, %v73_v34  ;;  %v75_v57 = vmax.bf16 %v71_v49, %v67_v51  ;;  %v94_v63 = vld [vmem:[%s293_s8 + $0x8] sm:$0xf]  ;;  %v95_v1 = vld [vmem:[%s293_s8 + $0xc] sm:$0xf] }
   0xe   :  { %v82_v59 = vmax.bf16 %v78_v52, %v74_v54 }
   0xf   :  { %v88_v46 = vmax.bf16 %v84_v35, %v80_v38  ;;  %v89_v50 = vmax.bf16 %v85_v39, %v81_v42  ;;  %v83_v62 = vmax.bf16 %v79_v55, %v75_v57 }
  0x10   :  { %v90_v0 = vmax.bf16 %v86_v58, %v82_v59 }
  0x11   :  { %v96_v53 = vmax.bf16 %v92_v43, %v88_v46  ;;  %v97_v56 = vmax.bf16 %v93_v47, %v89_v50  ;;  %v91_v2 = vmax.bf16 %v87_v60, %v83_v62 }
  0x12   :  { %v98_v3 = vmax.bf16 %v94_v63, %v90_v0 }
  0x13   :  { %v118_v61 = vcombine.low %v96_v53, %v97_v56  ;;  %v99_v4 = vmax.bf16 %v95_v1, %v91_v2 }
  0x15   :  { %112 = vst [vmem:[%s294_s9] sm:$0xff] %v118_v61   ;;  %v119_v5 = vcombine.low %v98_v3, %v99_v4 }
  0x17   :  { %120 = vst [vmem:[%s294_s9 + $0x8] sm:$0xff] %v119_v5  }

// kernel: sws_resnext_forward.19
= control target key start
LH: loop header
LB: loop body
LE: loop exit
PB: predicated region body
PF: predicated region fallthrough
CT: control target
= control target key end

     0   :  { %v688_v0 = vmov 0   ;;  %vm215_vm0 = vcmask 154624   ;;  %vm240_vm1 = vcmask 1040384   ;;  %vm241_vm2 = vcmask 1041408   ;;  %s841_s1 = inlined_call_operand.vmem [shape: bf16[147,128], index: 1, kind: input, shape index: {}]   ;;  %s842_s0 = inlined_call_operand.vmem [shape: bf16[128,147], index: 0, kind: input, shape index: {}]   ;;  %s843_s2 = inlined_call_operand.vmem [shape: f32[1,128], index: 2, kind: input, shape index: {}]   ;;  %s844_s3 = inlined_call_operand.vmem [shape: bf16[128,128], index: 3, kind: output, shape index: {}]  }
   0x1   :  { %247 = vmatprep.subr.bf16.mxu0 %v688_v0  ;;  %632 = vmatprep.subr.bf16.mxu1 %v688_v0  ;;  %v654_v1 = vld [vmem:[%s841_s1 + $0x38] sm:$0xff]   ;;  %v655_v2 = vld [vmem:[%s841_s1 + $0x30] sm:$0xff]   ;;  %v656_v3 = vld [vmem:[%s841_s1 + $0x28] sm:$0xff]   ;;  %v689_v10 = vmov 65535  }
   0x2   :  { %248 = vmatpush1.bf16.msra.mxu0 %v654_v1  ;;  %642 = vmatpush1.bf16.msra.mxu1 %v654_v1  ;;  %v657_v4 = vld [vmem:[%s841_s1 + $0x20] sm:$0xff]   ;;  %v658_v7 = vld [vmem:[%s841_s1 + $0x18] sm:$0xff]   ;;  %v659_v8 = vld [vmem:[%s841_s1 + $0x10] sm:$0xff]   ;;  %v242_v11 = vsel %vm240_vm1, 4294967295, %v689_v10 }
   0x3   :  { %249 = vmatprep.subr.bf16.mxu0 %v688_v0  ;;  %633 = vmatprep.subr.bf16.mxu1 %v688_v0  ;;  %v666_v5 = vld [vmem:[%s842_s0 + $0x4] ss:$8 sps:$4 sm:$0xff]   ;;  %v662_v13 = vld [vmem:[%s841_s1 + $0x48] ss:$0 sps:$4 sm:$0x33]   ;;  %v243_v14 = vsel %vm241_vm2, %v242_v11, 0 }
   0x4   :  { %544 = vmatprep.mubr.msk.bf16.mxu0 %vm215_vm0, %v666_v5  ;;  %v669_v6 = vld [vmem:[%s842_s0 + $0x44] ss:$8 sps:$4 sm:$0xff]   ;;  %v245_v15 = vand.u32 %v662_v13, %v243_v14  ;;  %v664_v17 = vld [vmem:[%s842_s0] ss:$8 sps:$4 sm:$0xff]   ;;  %v670_v19 = vld [vmem:[%s842_s0 + $0x14] ss:$8 sps:$4 sm:$0xff]  }
   0x5   :  { %548 = vmatprep.mubr.msk.bf16.mxu1 %vm215_vm0, %v669_v6  ;;  %v660_v9 = vld [vmem:[%s841_s1 + $0x8] sm:$0xff]   ;;  %v661_v12 = vld [vmem:[%s841_s1] sm:$0xff]   ;;  %v672_v20 = vld [vmem:[%s842_s0 + $0x54] ss:$8 sps:$4 sm:$0xff]  }
   0x6   :  { %250 = vmatpush1.bf16.msra.mxu0 %v655_v2  ;;  %643 = vmatpush1.bf16.msra.mxu1 %v655_v2  ;;  %v663_v16 = vld [vmem:[%s841_s1 + $0x40] sm:$0xff]   ;;  %v674_v21 = vld [vmem:[%s842_s0 + $0x10] ss:$8 sps:$4 sm:$0xff]   ;;  %v682_v27 = vld [vmem:[%s842_s0 + $0x34] ss:$8 sps:$4 sm:$0xff]  }
   0x7   :  { %251 = vmatprep.subr.bf16.mxu0 %v688_v0  ;;  %634 = vmatprep.subr.bf16.mxu1 %v688_v0  ;;  %v667_v18 = vld [vmem:[%s842_s0 + $0x40] ss:$8 sps:$4 sm:$0xff]   ;;  %v675_v22 = vld [vmem:[%s842_s0 + $0x50] ss:$8 sps:$4 sm:$0xff]   ;;  %v676_v23 = vld [vmem:[%s842_s0 + $0x24] ss:$8 sps:$4 sm:$0xff]  }
   0x8   :  { %v678_v24 = vld [vmem:[%s842_s0 + $0x64] ss:$8 sps:$4 sm:$0xff]   ;;  %v680_v25 = vld [vmem:[%s842_s0 + $0x20] ss:$8 sps:$4 sm:$0xff]   ;;  %v684_v28 = vld [vmem:[%s842_s0 + $0x74] ss:$8 sps:$4 sm:$0xff]  }
   0x9   :  { %v681_v26 = vld [vmem:[%s842_s0 + $0x60] ss:$8 sps:$4 sm:$0xff]   ;;  %v686_v29 = vld [vmem:[%s842_s0 + $0x30] ss:$8 sps:$4 sm:$0xff]  }
   0xa   :  { %252 = vmatpush1.bf16.msra.mxu0 %v656_v3  ;;  %644 = vmatpush1.bf16.msra.mxu1 %v656_v3  ;;  %v687_v30 = vld [vmem:[%s842_s0 + $0x70] ss:$8 sps:$4 sm:$0xff]   ;;  %v799_v32 = vld [vmem:[%s843_s2] ss:$0 sm:$0xff] }
   0xb   :  { %253 = vmatprep.subr.bf16.mxu0 %v688_v0  ;;  %635 = vmatprep.subr.bf16.mxu1 %v688_v0 }
   0xe   :  { %254 = vmatpush1.bf16.msra.mxu0 %v657_v4  ;;  %645 = vmatpush1.bf16.msra.mxu1 %v657_v4 }
   0xf   :  { %255 = vmatprep.subr.bf16.mxu0 %v688_v0  ;;  %636 = vmatprep.subr.bf16.mxu1 %v688_v0 }
  0x12   :  { %256 = vmatpush1.bf16.msra.mxu0 %v658_v7  ;;  %646 = vmatpush1.bf16.msra.mxu1 %v658_v7 }
  0x13   :  { %257 = vmatprep.subr.bf16.mxu0 %v688_v0  ;;  %637 = vmatprep.subr.bf16.mxu1 %v688_v0 }
  0x16   :  { %258 = vmatpush1.bf16.msra.mxu0 %v659_v8  ;;  %647 = vmatpush1.bf16.msra.mxu1 %v659_v8 }
  0x17   :  { %259 = vmatprep.subr.bf16.mxu0 %v688_v0  ;;  %638 = vmatprep.subr.bf16.mxu1 %v688_v0 }
  0x1a   :  { %260 = vmatpush1.bf16.msra.mxu0 %v660_v9  ;;  %648 = vmatpush1.bf16.msra.mxu1 %v660_v9 }
  0x1b   :  { %261 = vmatprep.subr.bf16.mxu0 %v688_v0  ;;  %639 = vmatprep.subr.bf16.mxu1 %v688_v0 }
  0x1e   :  { %262 = vmatpush1.bf16.msra.mxu0 %v661_v12  ;;  %649 = vmatpush1.bf16.msra.mxu1 %v661_v12 }
  0x1f   :  { %275 = vmatprep.subr.bf16.mxu0 %v688_v0  ;;  %640 = vmatprep.subr.bf16.mxu1 %v688_v0 }
  0x22   :  { %276 = vmatpush2.bf16.msra.mxu0 %v245_v15  ;;  %650 = vmatpush2.bf16.msra.mxu1 %v245_v15 }
  0x23   :  { %277 = vmatprep.subr.bf16.mxu0 %v688_v0  ;;  %641 = vmatprep.subr.bf16.mxu1 %v688_v0 }
  0x26   :  { %278 = vmatpush2.bf16.msra.mxu0 %v663_v16  ;;  %651 = vmatpush2.bf16.msra.mxu1 %v663_v16 }
  0x29   :  { %280 = vmatmul.mubr.bf16.vlgmr.msra.gmra.mxu0 %v664_v17  ;;  %312 = vmatmul.mubr.bf16.vlgmr.msra.gmra.mxu1 %v667_v18 }
  0x2a   :  { %545 = vmatprep.mubr.msk.bf16.mxu0 %vm215_vm0, %v670_v19  ;;  %549 = vmatprep.mubr.msk.bf16.mxu1 %vm215_vm0, %v672_v20 }
  0x31   :  { %288 = vmatmul.mubr.bf16.gmra.mxu0 %v674_v21  ;;  %320 = vmatmul.mubr.bf16.gmra.mxu1 %v675_v22 }
  0x32   :  { %546 = vmatprep.mubr.msk.bf16.mxu0 %vm215_vm0, %v676_v23  ;;  %550 = vmatprep.mubr.msk.bf16.mxu1 %vm215_vm0, %v678_v24 }
  0x39   :  { %296 = vmatmul.mubr.bf16.gmra.mxu0 %v680_v25  ;;  %328 = vmatmul.mubr.bf16.gmra.mxu1 %v681_v26 }
  0x3a   :  { %547 = vmatprep.mubr.msk.bf16.mxu0 %vm215_vm0, %v682_v27  ;;  %551 = vmatprep.mubr.msk.bf16.mxu1 %vm215_vm0, %v684_v28 }
  0x41   :  { %304 = vmatmul.mubr.bf16.gmra.mxu0 %v686_v29  ;;  %336 = vmatmul.mubr.bf16.gmra.mxu1 %v687_v30 }
  0xe9   :  { %v281_v31 = vpop.f32.mrf.mxu0  ;;  %v313_v33 = vpop.f32.mrf.mxu1 }
  0xea   :  { %v402_v36 = vadd.f32 %v799_v32, %v281_v31  ;;  %v410_v37 = vadd.f32 %v799_v32, %v313_v33 }
  0xeb   :  { %v283_v34 = vpop.f32.mrf.mxu0  ;;  %v315_v35 = vpop.f32.mrf.mxu1 }
  0xec   :  { %v418_v44 = vmax.f32 %v402_v36, 0.0  ;;  %v426_v45 = vmax.f32 %v410_v37, 0.0 }
  0xed   :  { %v284_v38 = vpop.f32.mrf.mxu0  ;;  %v316_v39 = vpop.f32.mrf.mxu1 }
  0xee   :  { %v403_v40 = vadd.f32 %v799_v32, %v284_v38  ;;  %v411_v41 = vadd.f32 %v799_v32, %v316_v39 }
  0xef   :  { %v286_v42 = vpop.f32.mrf.mxu0  ;;  %v318_v43 = vpop.f32.mrf.mxu1 }
  0xf0   :  { %v419_v46 = vmax.f32 %v403_v40, 0.0  ;;  %v427_v47 = vmax.f32 %v411_v41, 0.0 }
  0xf1   :  { %v289_v48 = vpop.f32.mrf.mxu0  ;;  %v321_v49 = vpop.f32.mrf.mxu1 }
  0xf2   :  { %v588_v50 = vpack.c.bf16 %v419_v46, %v418_v44  ;;  %v608_v51 = vpack.c.bf16 %v427_v47, %v426_v45  ;;  %v404_v54 = vadd.f32 %v799_v32, %v289_v48  ;;  %v412_v55 = vadd.f32 %v799_v32, %v321_v49 }
  0xf3   :  { %v291_v52 = vpop.f32.mrf.mxu0  ;;  %v323_v53 = vpop.f32.mrf.mxu1 }
  0xf4   :  { %589 = vst [vmem:[%s844_s3] sm:$0xff] %v588_v50   ;;  %628 = vst [vmem:[%s844_s3 + $0x20] sm:$0xff] %v608_v51   ;;  %v420_v62 = vmax.f32 %v404_v54, 0.0  ;;  %v428_v63 = vmax.f32 %v412_v55, 0.0 }
  0xf5   :  { %v292_v56 = vpop.f32.mrf.mxu0  ;;  %v324_v57 = vpop.f32.mrf.mxu1 }
  0xf6   :  { %v405_v58 = vadd.f32 %v799_v32, %v292_v56  ;;  %v413_v59 = vadd.f32 %v799_v32, %v324_v57 }
  0xf7   :  { %v294_v60 = vpop.f32.mrf.mxu0  ;;  %v326_v61 = vpop.f32.mrf.mxu1 }
  0xf8   :  { %v421_v0 = vmax.f32 %v405_v58, 0.0  ;;  %v429_v1 = vmax.f32 %v413_v59, 0.0 }
  0xf9   :  { %v297_v2 = vpop.f32.mrf.mxu0  ;;  %v329_v3 = vpop.f32.mrf.mxu1 }
  0xfa   :  { %v593_v4 = vpack.c.bf16 %v421_v0, %v420_v62  ;;  %v613_v5 = vpack.c.bf16 %v429_v1, %v428_v63  ;;  %v406_v8 = vadd.f32 %v799_v32, %v297_v2  ;;  %v414_v9 = vadd.f32 %v799_v32, %v329_v3 }
  0xfb   :  { %v299_v6 = vpop.f32.mrf.mxu0  ;;  %v331_v7 = vpop.f32.mrf.mxu1 }
  0xfc   :  { %625 = vst [vmem:[%s844_s3 + $0x8] sm:$0xff] %v593_v4   ;;  %629 = vst [vmem:[%s844_s3 + $0x28] sm:$0xff] %v613_v5   ;;  %v422_v16 = vmax.f32 %v406_v8, 0.0  ;;  %v430_v17 = vmax.f32 %v414_v9, 0.0 }
  0xfd   :  { %v300_v10 = vpop.f32.mrf.mxu0  ;;  %v332_v11 = vpop.f32.mrf.mxu1 }
  0xfe   :  { %v407_v12 = vadd.f32 %v799_v32, %v300_v10  ;;  %v415_v13 = vadd.f32 %v799_v32, %v332_v11 }
  0xff   :  { %v302_v14 = vpop.f32.mrf.mxu0  ;;  %v334_v15 = vpop.f32.mrf.mxu1 }
 0x100   :  { %v423_v18 = vmax.f32 %v407_v12, 0.0  ;;  %v431_v19 = vmax.f32 %v415_v13, 0.0 }
 0x101   :  { %v305_v20 = vpop.f32.mrf.mxu0  ;;  %v337_v21 = vpop.f32.mrf.mxu1 }
 0x102   :  { %v598_v22 = vpack.c.bf16 %v423_v18, %v422_v16  ;;  %v618_v23 = vpack.c.bf16 %v431_v19, %v430_v17  ;;  %v408_v26 = vadd.f32 %v799_v32, %v305_v20  ;;  %v416_v27 = vadd.f32 %v799_v32, %v337_v21 }
 0x103   :  { %v307_v24 = vpop.f32.mrf.mxu0  ;;  %v339_v25 = vpop.f32.mrf.mxu1 }
 0x104   :  { %626 = vst [vmem:[%s844_s3 + $0x10] sm:$0xff] %v598_v22   ;;  %630 = vst [vmem:[%s844_s3 + $0x30] sm:$0xff] %v618_v23   ;;  %v424_v35 = vmax.f32 %v408_v26, 0.0  ;;  %v432_v36 = vmax.f32 %v416_v27, 0.0 }
 0x105   :  { %v308_v28 = vpop.f32.mrf.mxu0  ;;  %v340_v29 = vpop.f32.mrf.mxu1 }
 0x106   :  { %v409_v30 = vadd.f32 %v799_v32, %v308_v28  ;;  %v417_v31 = vadd.f32 %v799_v32, %v340_v29 }
 0x107   :  { %v310_v33 = vpop.f32.mrf.mxu0  ;;  %v342_v34 = vpop.f32.mrf.mxu1 }
 0x108   :  { %v425_v37 = vmax.f32 %v409_v30, 0.0  ;;  %v433_v38 = vmax.f32 %v417_v31, 0.0 }
 0x10a   :  { %v603_v39 = vpack.c.bf16 %v425_v37, %v424_v35  ;;  %v623_v40 = vpack.c.bf16 %v433_v38, %v432_v36 }
 0x10c   :  { %627 = vst [vmem:[%s844_s3 + $0x18] sm:$0xff] %v603_v39   ;;  %631 = vst [vmem:[%s844_s3 + $0x38] sm:$0xff] %v623_v40  }

// kernel: sws_resnext_forward.21
= control target key start
LH: loop header
LB: loop body
LE: loop exit
PB: predicated region body
PF: predicated region fallthrough
CT: control target
= control target key end

     0   :  { %s339_s1 = inlined_call_operand.vmem [shape: bf16[128,128], index: 1, kind: input, shape index: {}]   ;;  %s340_s0 = inlined_call_operand.vmem [shape: bf16[32,128], index: 0, kind: input, shape index: {}]   ;;  %s341_s2 = inlined_call_operand.vmem [shape: f32[1,128], index: 2, kind: input, shape index: {}]   ;;  %s342_s3 = inlined_call_operand.vmem [shape: bf16[32,128], index: 3, kind: output, shape index: {}]  }
   0x1   :  { %v270_v0 = vld [vmem:[%s339_s1 + $0x38] sm:$0xff]   ;;  %v271_v1 = vld [vmem:[%s339_s1 + $0x30] sm:$0xff]   ;;  %v272_v2 = vld [vmem:[%s339_s1 + $0x28] sm:$0xff]  }
   0x2   :  { %250 = vmatprep.subr.bf16.mxu0 %v270_v0  ;;  %v273_v3 = vld [vmem:[%s339_s1 + $0x20] sm:$0xff]   ;;  %v274_v5 = vld [vmem:[%s339_s1 + $0x18] sm:$0xff]   ;;  %v275_v6 = vld [vmem:[%s339_s1 + $0x10] sm:$0xff]  }
   0x3   :  { %251 = vmatpush3.bf16.msra.mxu0 %v270_v0  ;;  %v278_v4 = vld [vmem:[%s340_s0] sm:$0xff]   ;;  %v276_v7 = vld [vmem:[%s339_s1 + $0x8] sm:$0xff]  }
   0x4   :  { %252 = vmatprep.subr.bf16.mxu0 %v271_v1  ;;  %266 = vmatprep.mubr.bf16.mxu0 %v278_v4  ;;  %v277_v8 = vld [vmem:[%s339_s1] sm:$0xff]   ;;  %v279_v9 = vld [vmem:[%s340_s0 + $0x8] sm:$0xff]  }
   0x5   :  { %v220_v11 = vld [vmem:[%s341_s2] ss:$0 sm:$0xff] }
   0x7   :  { %253 = vmatpush3.bf16.msra.mxu0 %v271_v1 }
   0x8   :  { %254 = vmatprep.subr.bf16.mxu0 %v272_v2 }
   0xb   :  { %255 = vmatpush3.bf16.msra.mxu0 %v272_v2 }
   0xc   :  { %256 = vmatprep.subr.bf16.mxu0 %v273_v3 }
   0xf   :  { %257 = vmatpush3.bf16.msra.mxu0 %v273_v3 }
  0x10   :  { %258 = vmatprep.subr.bf16.mxu0 %v274_v5 }
  0x13   :  { %259 = vmatpush3.bf16.msra.mxu0 %v274_v5 }
  0x14   :  { %260 = vmatprep.subr.bf16.mxu0 %v275_v6 }
  0x17   :  { %261 = vmatpush3.bf16.msra.mxu0 %v275_v6 }
  0x18   :  { %262 = vmatprep.subr.bf16.mxu0 %v276_v7 }
  0x1b   :  { %263 = vmatpush3.bf16.msra.mxu0 %v276_v7 }
  0x1c   :  { %264 = vmatprep.subr.bf16.mxu0 %v277_v8 }
  0x1f   :  { %265 = vmatpush3.bf16.msra.mxu0 %v277_v8 }
  0x22   :  { %267 = vmatmul.mubr.bf16.vlgmr.msra.gmra.mxu0 %v279_v9 }
  0xe2   :  { %v268_v10 = vpop.f32.mrf.mxu0 }
  0xe3   :  { %v180_v13 = vadd.f32 %v268_v10, %v220_v11 }
  0xe4   :  { %v141_v12 = vpop.f32.mrf.mxu0 }
  0xe5   :  { %v178_v15 = vadd.f32 %v220_v11, %v141_v12  ;;  %v184_v18 = vmax.f32 %v180_v13, 0.0 }
  0xe6   :  { %v269_v14 = vpop.f32.mrf.mxu0 }
  0xe7   :  { %v181_v16 = vadd.f32 %v269_v14, %v220_v11  ;;  %v182_v21 = vmax.f32 %v178_v15, 0.0 }
  0xe8   :  { %v144_v17 = vpop.f32.mrf.mxu0 }
  0xe9   :  { %v185_v19 = vmax.f32 %v181_v16, 0.0  ;;  %v179_v20 = vadd.f32 %v220_v11, %v144_v17 }
  0xeb   :  { %v237_v22 = vpack.c.bf16 %v185_v19, %v184_v18  ;;  %v183_v23 = vmax.f32 %v179_v20, 0.0 }
  0xed   :  { %239 = vst [vmem:[%s342_s3 + $0x8] sm:$0xff] %v237_v22   ;;  %v232_v24 = vpack.c.bf16 %v183_v23, %v182_v21 }
  0xef   :  { %233 = vst [vmem:[%s342_s3] sm:$0xff] %v232_v24  }

// kernel: sws_resnext_forward.22
= control target key start
LH: loop header
LB: loop body
LE: loop exit
PB: predicated region body
PF: predicated region fallthrough
CT: control target
= control target key end

     0   :  { %s1663_s12 = smov 0   ;;  %s1665_s13 = smov 0   ;;  %s1831_s0 = inlined_call_operand.vmem [shape: bf16[32,32,9], index: 0, kind: input, shape index: {}]   ;;  %s1832_s1 = inlined_call_operand.vmem [shape: bf16[32,9,1], index: 1, kind: input, shape index: {}]   ;;  %s1833_s2 = inlined_call_operand.vmem [shape: f32[32,1,1], index: 2, kind: input, shape index: {}]   ;;  %s1834_s3 = inlined_call_operand.vmem [shape: bf16[32,32,1], index: 3, kind: output, shape index: {}]  }
   0x1   :  { %s1667_s14 = smov 0  }
   0x2 LB: > { %s22_s15 = sadd.s32 1, %s1636_s13  ;;  %p1292_p0 = scmp.ge.s32.totalorder %s1640_s14, 1  ;;  %s1640_s14 = sphi %s1667_s14, %s13_s14   ;;  %s1636_s13 = sphi %s1665_s13, %s1836_s13   ;;  %s1632_s12 = sphi %s1663_s12, %s1835_s12  }
   0x3   : > { %p23_p1 = scmp.ge.s32.totalorder %s22_s15, 4  ;;  %p182_p2 = scmp.lt.s32.totalorder %s1640_s14, 5 }
   0x5   : > { %s1838_s15 = smov (%p23_p1, %s22_s15), 0  ;;  %p183_p3 = pnand %p1292_p0, %p182_p2 }
   0x6   : > { %s1293_s16 = sshll.u32 (!%p183_p3), %s1632_s12, 3 }
   0x7   : > { %186 = sbr.rel (%p183_p3) target bundleno = 252 (0xfc), region = 32  ;;  %p228_p4 = scmp.lt.s32.totalorder (!%p183_p3), %s1293_s16, 31 }
   0xc   : > { %vm298_vm0 = vcmask 1043456   ;;  %s1840_s16 = smov (!%p228_p4, %s1293_s16), 31  ;;  %vm299_vm1 = vcmask 1044480   ;;  %v1642_v0 = vmov 65535   ;;  %vm291_vm2 = vcmask 72704  }
   0xd   : > { %v300_v1 = vsel %vm298_vm0, 4294967295, %v1642_v0  ;;  %s1462_s17 = sshll.u32 %s1840_s16, 4  ;;  %s1463_s18 = sshll.u32 %s1840_s16, 3  ;;  %vm374_vm3 = vcmask 3072  }
   0xe   : > { %s1690_s21 = scalar_lea.vmem %s1831_s0, %s1462_s17  ;;  %s1695_s24 = scalar_lea.vmem %s1832_s1, %s1463_s18  ;;  %v301_v2 = vsel %vm299_vm1, %v300_v1, 0 }
   0xf   : > { %v1594_v3 = vld [vmem:[%s1695_s24] sm:$0x1f]   ;;  %v1595_v4 = vld [vmem:[%s1695_s24 + $0x8] sm:$0x1f]   ;;  %v1597_v8 = vld [vmem:[%s1690_s21 + $0x10] sm:$0xff]   ;;  %s1741_s27 = scalar_lea.vmem %s1833_s2, %s1840_s16  ;;  %s1750_s30 = scalar_lea.vmem %s1834_s3, %s1462_s17 }
  0x10   : > { %v303_v5 = vand.u32 %v1594_v3, %v301_v2  ;;  %v1596_v6 = vld [vmem:[%s1690_s21] sm:$0xff]   ;;  %v417_v7 = vand.u32 %v1595_v4, %v301_v2  ;;  %v1598_v9 = vld [vmem:[%s1690_s21 + $0x8] sm:$0xff]   ;;  %v1599_v10 = vld [vmem:[%s1690_s21 + $0x18] sm:$0xff]   ;;  %1529 = vmatprep.mubr.msk.bf16.mxu1 %vm291_vm2, %v1597_v8 }
  0x11   : > { %1523 = vmatprep.mubr.msk.bf16.mxu0 %vm291_vm2, %v1596_v6  ;;  %v1600_v11 = vld [vmem:[%s1695_s24 + $0x10] sm:$0x1f]   ;;  %v1601_v12 = vld [vmem:[%s1695_s24 + $0x18] sm:$0x1f]   ;;  %v1602_v14 = vld [vmem:[%s1690_s21 + $0x20] sm:$0xff]  }
  0x12   : > { %1521 = vmatprep.subr.bf16.mxu0 %v303_v5  ;;  %1527 = vmatprep.subr.bf16.mxu1 %v417_v7  ;;  %v531_v13 = vand.u32 %v1600_v11, %v301_v2  ;;  %v645_v15 = vand.u32 %v1601_v12, %v301_v2  ;;  %v1603_v16 = vld [vmem:[%s1690_s21 + $0x30] sm:$0xff]   ;;  %v1604_v17 = vld [vmem:[%s1690_s21 + $0x28] sm:$0xff]   ;;  %v1605_v18 = vld [vmem:[%s1690_s21 + $0x38] sm:$0xff]  }
  0x13   : > { %1522 = vmatpush3.bf16.msra.mxu0 %v303_v5  ;;  %1528 = vmatpush3.bf16.msra.mxu1 %v417_v7  ;;  %v1606_v19 = vld [vmem:[%s1695_s24 + $0x20] sm:$0x1f]   ;;  %v1607_v20 = vld [vmem:[%s1695_s24 + $0x28] sm:$0x1f]   ;;  %v1609_v24 = vld [vmem:[%s1690_s21 + $0x50] sm:$0xff]  }
  0x14   : > { %1533 = vmatprep.subr.bf16.mxu0 %v531_v13  ;;  %1539 = vmatprep.subr.bf16.mxu1 %v645_v15  ;;  %v759_v21 = vand.u32 %v1606_v19, %v301_v2  ;;  %v1608_v22 = vld [vmem:[%s1690_s21 + $0x40] sm:$0xff]   ;;  %v873_v23 = vand.u32 %v1607_v20, %v301_v2  ;;  %v1612_v25 = vld [vmem:[%s1695_s24 + $0x30] sm:$0x1f]   ;;  %v1613_v26 = vld [vmem:[%s1695_s24 + $0x38] sm:$0x1f]  }
  0x15   : > { %v1610_v27 = vld [vmem:[%s1690_s21 + $0x48] sm:$0xff]   ;;  %v987_v28 = vand.u32 %v1612_v25, %v301_v2  ;;  %v1611_v29 = vld [vmem:[%s1690_s21 + $0x58] sm:$0xff]   ;;  %v1101_v30 = vand.u32 %v1613_v26, %v301_v2  ;;  %v1614_v31 = vld [vmem:[%s1690_s21 + $0x60] sm:$0xff]  }
  0x16   : > { %1524 = vmatmul.mubr.msk.bf16.vlgmr.msra.gmra.mxu0 %vm291_vm2, %v1598_v9  ;;  %1530 = vmatmul.mubr.msk.bf16.vlgmr.msra.gmra.mxu1 %vm291_vm2, %v1599_v10  ;;  %v1615_v32 = vld [vmem:[%s1690_s21 + $0x70] sm:$0xff]   ;;  %v1616_v33 = vld [vmem:[%s1690_s21 + $0x68] sm:$0xff]   ;;  %v1617_v34 = vld [vmem:[%s1690_s21 + $0x78] sm:$0xff]  }
  0x17   : > { %1535 = vmatprep.mubr.msk.bf16.mxu0 %vm291_vm2, %v1602_v14  ;;  %1534 = vmatpush3.bf16.msra.mxu0 %v531_v13  ;;  %v1303_v35 = vld [vmem:[%s1741_s27] ss:$0 sm:$0xff]  ;;  %v1320_v36 = vld [vmem:[%s1741_s27 + $0x1] ss:$0 sm:$0xff]  ;;  %v1341_v56 = vld [vmem:[%s1741_s27 + $0x2] ss:$0 sm:$0xff] }
  0x18   : > { %1540 = vmatpush3.bf16.msra.mxu1 %v645_v15  ;;  %1541 = vmatprep.mubr.msk.bf16.mxu1 %vm291_vm2, %v1603_v16  ;;  %v1362_v61 = vld [vmem:[%s1741_s27 + $0x3] ss:$0 sm:$0xff]  ;;  %v1383_v26 = vld [vmem:[%s1741_s27 + $0x4] ss:$0 sm:$0xff] }
  0x19   : > { %1545 = vmatprep.subr.bf16.mxu0 %v759_v21  ;;  %1551 = vmatprep.subr.bf16.mxu1 %v873_v23 }
  0x1e   : > { %1536 = vmatmul.mubr.msk.bf16.vlgmr.msra.gmra.mxu0 %vm291_vm2, %v1604_v17  ;;  %1542 = vmatmul.mubr.msk.bf16.vlgmr.msra.gmra.mxu1 %vm291_vm2, %v1605_v18 }
  0x1f   : > { %1546 = vmatpush3.bf16.msra.mxu0 %v759_v21  ;;  %1552 = vmatpush3.bf16.msra.mxu1 %v873_v23 }
  0x20   : > { %1547 = vmatprep.mubr.msk.bf16.mxu0 %vm291_vm2, %v1608_v22  ;;  %1553 = vmatprep.mubr.msk.bf16.mxu1 %vm291_vm2, %v1609_v24 }
  0x21   : > { %1557 = vmatprep.subr.bf16.mxu0 %v987_v28  ;;  %1563 = vmatprep.subr.bf16.mxu1 %v1101_v30 }
  0x26   : > { %1548 = vmatmul.mubr.msk.bf16.vlgmr.msra.gmra.mxu0 %vm291_vm2, %v1610_v27  ;;  %1554 = vmatmul.mubr.msk.bf16.vlgmr.msra.gmra.mxu1 %vm291_vm2, %v1611_v29 }
  0x27   : > { %1558 = vmatpush3.bf16.msra.mxu0 %v987_v28  ;;  %1564 = vmatpush3.bf16.msra.mxu1 %v1101_v30 }
  0x28   : > { %1559 = vmatprep.mubr.msk.bf16.mxu0 %vm291_vm2, %v1614_v31  ;;  %1565 = vmatprep.mubr.msk.bf16.mxu1 %vm291_vm2, %v1615_v32  ;;  %v1404_v31 = vld [vmem:[%s1741_s27 + $0x5] ss:$0 sm:$0xff] }
  0x2e   : > { %1560 = vmatmul.mubr.msk.bf16.vlgmr.msra.gmra.mxu0 %vm291_vm2, %v1616_v33  ;;  %1566 = vmatmul.mubr.msk.bf16.vlgmr.msra.gmra.mxu1 %vm291_vm2, %v1617_v34 }
  0xd6   : > { %v1525_v37 = vpop.f32.mrf.mxu0  ;;  %v1531_v39 = vpop.f32.mrf.mxu1 }
  0xd7   : > { %v348_v38 = vadd.f32 %v1525_v37, %v1303_v35  ;;  %v462_v40 = vadd.f32 %v1531_v39, %v1320_v36 }
  0xd8   : > { %v339_v41 = vpop.f32.mrf.mxu0  ;;  %v453_v44 = vpop.f32.mrf.mxu1 }
  0xd9   : > { %v356_v42 = vmax.f32 %v348_v38, 0.0  ;;  %v340_v43 = vadd.f32 %v1303_v35, %v339_v41  ;;  %v470_v45 = vmax.f32 %v462_v40, 0.0  ;;  %v454_v46 = vadd.f32 %v1320_v36, %v453_v44 }
  0xda   : > { %v1526_v47 = vpop.f32.mrf.mxu0  ;;  %v1532_v51 = vpop.f32.mrf.mxu1 }
  0xdb   : > { %v1467_v48 = vpack.c.bf16 %v356_v42, %v356_v42  ;;  %v354_v49 = vmax.f32 %v340_v43, 0.0  ;;  %v351_v50 = vadd.f32 %v1526_v47, %v1303_v35  ;;  %v1471_v52 = vpack.c.bf16 %v470_v45, %v470_v45 }
  0xdc   : > { %v468_v53 = vmax.f32 %v454_v46, 0.0  ;;  %v465_v54 = vadd.f32 %v1532_v51, %v1320_v36  ;;  %v342_v55 = vpop.f32.mrf.mxu0  ;;  %v456_v60 = vpop.f32.mrf.mxu1 }
  0xdd   : > { %377 = vst.msk [vmem:[%s1750_s30 + $0x8] sm:$0xf] %vm374_vm3, %v1467_v48  ;;  %v1465_v57 = vpack.c.bf16 %v354_v49, %v354_v49  ;;  %v357_v58 = vmax.f32 %v351_v50, 0.0  ;;  %v343_v59 = vadd.f32 %v1303_v35, %v342_v55  ;;  %1332 = vst.msk [vmem:[%s1750_s30 + $0x18] sm:$0xf] %vm374_vm3, %v1471_v52  ;;  %v457_v0 = vadd.f32 %v1320_v36, %v456_v60 }
  0xde   : > { %v1469_v62 = vpack.c.bf16 %v468_v53, %v468_v53  ;;  %v471_v63 = vmax.f32 %v465_v54, 0.0  ;;  %v1537_v1 = vpop.f32.mrf.mxu0  ;;  %v1543_v5 = vpop.f32.mrf.mxu1  ;;  %v1425_v60 = vld [vmem:[%s1741_s27 + $0x6] ss:$0 sm:$0xff] }
  0xdf   : > { %375 = vst.msk [vmem:[%s1750_s30] sm:$0xf] %vm374_vm3, %v1465_v57  ;;  %v1468_v2 = vpack.c.bf16 %v357_v58, %v357_v58  ;;  %v355_v3 = vmax.f32 %v343_v59, 0.0  ;;  %v576_v4 = vadd.f32 %v1537_v1, %v1341_v56  ;;  %v469_v7 = vmax.f32 %v457_v0, 0.0  ;;  %v1446_v1 = vld [vmem:[%s1741_s27 + $0x7] ss:$0 sm:$0xff] }
  0xe0   : > { %1330 = vst.msk [vmem:[%s1750_s30 + $0x10] sm:$0xf] %vm374_vm3, %v1469_v62  ;;  %v1472_v6 = vpack.c.bf16 %v471_v63, %v471_v63  ;;  %v690_v8 = vadd.f32 %v1543_v5, %v1362_v61  ;;  %v567_v9 = vpop.f32.mrf.mxu0  ;;  %v681_v13 = vpop.f32.mrf.mxu1 }
  0xe1   : > { %378 = vst.msk [vmem:[%s1750_s30 + $0xc] sm:$0xf] %vm374_vm3, %v1468_v2  ;;  %v1466_v10 = vpack.c.bf16 %v355_v3, %v355_v3  ;;  %v584_v11 = vmax.f32 %v576_v4, 0.0  ;;  %v568_v12 = vadd.f32 %v1341_v56, %v567_v9  ;;  %v1470_v14 = vpack.c.bf16 %v469_v7, %v469_v7 }
  0xe2   : > { %1333 = vst.msk [vmem:[%s1750_s30 + $0x1c] sm:$0xf] %vm374_vm3, %v1472_v6  ;;  %v698_v15 = vmax.f32 %v690_v8, 0.0  ;;  %v682_v16 = vadd.f32 %v1362_v61, %v681_v13  ;;  %v1538_v17 = vpop.f32.mrf.mxu0  ;;  %v1544_v21 = vpop.f32.mrf.mxu1 }
  0xe3   : > { %376 = vst.msk [vmem:[%s1750_s30 + $0x4] sm:$0xf] %vm374_vm3, %v1466_v10  ;;  %v1475_v18 = vpack.c.bf16 %v584_v11, %v584_v11  ;;  %v582_v19 = vmax.f32 %v568_v12, 0.0  ;;  %v579_v20 = vadd.f32 %v1538_v17, %v1341_v56  ;;  %1331 = vst.msk [vmem:[%s1750_s30 + $0x14] sm:$0xf] %vm374_vm3, %v1470_v14  ;;  %v693_v24 = vadd.f32 %v1544_v21, %v1362_v61 }
  0xe4   : > { %v1479_v22 = vpack.c.bf16 %v698_v15, %v698_v15  ;;  %v696_v23 = vmax.f32 %v682_v16, 0.0  ;;  %v570_v25 = vpop.f32.mrf.mxu0  ;;  %v684_v30 = vpop.f32.mrf.mxu1 }
  0xe5   : > { %1353 = vst.msk [vmem:[%s1750_s30 + $0x28] sm:$0xf] %vm374_vm3, %v1475_v18  ;;  %v1473_v27 = vpack.c.bf16 %v582_v19, %v582_v19  ;;  %v585_v28 = vmax.f32 %v579_v20, 0.0  ;;  %v571_v29 = vadd.f32 %v1341_v56, %v570_v25  ;;  %v699_v33 = vmax.f32 %v693_v24, 0.0 }
  0xe6   : > { %1374 = vst.msk [vmem:[%s1750_s30 + $0x38] sm:$0xf] %vm374_vm3, %v1479_v22  ;;  %v1477_v32 = vpack.c.bf16 %v696_v23, %v696_v23  ;;  %v685_v34 = vadd.f32 %v1362_v61, %v684_v30  ;;  %v1549_v35 = vpop.f32.mrf.mxu0  ;;  %v1555_v39 = vpop.f32.mrf.mxu1 }
  0xe7   : > { %1351 = vst.msk [vmem:[%s1750_s30 + $0x20] sm:$0xf] %vm374_vm3, %v1473_v27  ;;  %v1476_v36 = vpack.c.bf16 %v585_v28, %v585_v28  ;;  %v583_v37 = vmax.f32 %v571_v29, 0.0  ;;  %v804_v38 = vadd.f32 %v1549_v35, %v1383_v26  ;;  %v1480_v40 = vpack.c.bf16 %v699_v33, %v699_v33 }
  0xe8   : > { %1372 = vst.msk [vmem:[%s1750_s30 + $0x30] sm:$0xf] %vm374_vm3, %v1477_v32  ;;  %v697_v41 = vmax.f32 %v685_v34, 0.0  ;;  %v918_v42 = vadd.f32 %v1555_v39, %v1404_v31  ;;  %v795_v43 = vpop.f32.mrf.mxu0  ;;  %v909_v47 = vpop.f32.mrf.mxu1 }
  0xe9   : > { %1354 = vst.msk [vmem:[%s1750_s30 + $0x2c] sm:$0xf] %vm374_vm3, %v1476_v36  ;;  %v1474_v44 = vpack.c.bf16 %v583_v37, %v583_v37  ;;  %v812_v45 = vmax.f32 %v804_v38, 0.0  ;;  %v796_v46 = vadd.f32 %v1383_v26, %v795_v43  ;;  %1375 = vst.msk [vmem:[%s1750_s30 + $0x3c] sm:$0xf] %vm374_vm3, %v1480_v40  ;;  %v910_v50 = vadd.f32 %v1404_v31, %v909_v47 }
  0xea   : > { %v1478_v48 = vpack.c.bf16 %v697_v41, %v697_v41  ;;  %v926_v49 = vmax.f32 %v918_v42, 0.0  ;;  %v1550_v51 = vpop.f32.mrf.mxu0  ;;  %v1556_v55 = vpop.f32.mrf.mxu1 }
  0xeb   : > { %1352 = vst.msk [vmem:[%s1750_s30 + $0x24] sm:$0xf] %vm374_vm3, %v1474_v44  ;;  %v1483_v52 = vpack.c.bf16 %v812_v45, %v812_v45  ;;  %v810_v53 = vmax.f32 %v796_v46, 0.0  ;;  %v807_v54 = vadd.f32 %v1550_v51, %v1383_v26  ;;  %v924_v57 = vmax.f32 %v910_v50, 0.0 }
  0xec   : > { %1373 = vst.msk [vmem:[%s1750_s30 + $0x34] sm:$0xf] %vm374_vm3, %v1478_v48  ;;  %v1487_v56 = vpack.c.bf16 %v926_v49, %v926_v49  ;;  %v921_v58 = vadd.f32 %v1556_v55, %v1404_v31  ;;  %v798_v59 = vpop.f32.mrf.mxu0  ;;  %v912_v0 = vpop.f32.mrf.mxu1 }
  0xed   : > { %1395 = vst.msk [vmem:[%s1750_s30 + $0x48] sm:$0xf] %vm374_vm3, %v1483_v52  ;;  %v1481_v61 = vpack.c.bf16 %v810_v53, %v810_v53  ;;  %v813_v62 = vmax.f32 %v807_v54, 0.0  ;;  %v799_v63 = vadd.f32 %v1383_v26, %v798_v59  ;;  %v1485_v2 = vpack.c.bf16 %v924_v57, %v924_v57 }
  0xee   : > { %1416 = vst.msk [vmem:[%s1750_s30 + $0x58] sm:$0xf] %vm374_vm3, %v1487_v56  ;;  %v927_v3 = vmax.f32 %v921_v58, 0.0  ;;  %v913_v4 = vadd.f32 %v1404_v31, %v912_v0  ;;  %v1561_v5 = vpop.f32.mrf.mxu0  ;;  %v1567_v9 = vpop.f32.mrf.mxu1 }
  0xef   : > { %1393 = vst.msk [vmem:[%s1750_s30 + $0x40] sm:$0xf] %vm374_vm3, %v1481_v61  ;;  %v1484_v6 = vpack.c.bf16 %v813_v62, %v813_v62  ;;  %v811_v7 = vmax.f32 %v799_v63, 0.0  ;;  %v1032_v8 = vadd.f32 %v1561_v5, %v1425_v60  ;;  %1414 = vst.msk [vmem:[%s1750_s30 + $0x50] sm:$0xf] %vm374_vm3, %v1485_v2  ;;  %v1146_v12 = vadd.f32 %v1567_v9, %v1446_v1 }
  0xf0   : > { %v1488_v10 = vpack.c.bf16 %v927_v3, %v927_v3  ;;  %v925_v11 = vmax.f32 %v913_v4, 0.0  ;;  %v1023_v13 = vpop.f32.mrf.mxu0  ;;  %v1137_v17 = vpop.f32.mrf.mxu1 }
  0xf1   : > { %1396 = vst.msk [vmem:[%s1750_s30 + $0x4c] sm:$0xf] %vm374_vm3, %v1484_v6  ;;  %v1482_v14 = vpack.c.bf16 %v811_v7, %v811_v7  ;;  %v1040_v15 = vmax.f32 %v1032_v8, 0.0  ;;  %v1024_v16 = vadd.f32 %v1425_v60, %v1023_v13  ;;  %v1154_v19 = vmax.f32 %v1146_v12, 0.0 }
  0xf2   : > { %1417 = vst.msk [vmem:[%s1750_s30 + $0x5c] sm:$0xf] %vm374_vm3, %v1488_v10  ;;  %v1486_v18 = vpack.c.bf16 %v925_v11, %v925_v11  ;;  %v1138_v20 = vadd.f32 %v1446_v1, %v1137_v17  ;;  %v1562_v21 = vpop.f32.mrf.mxu0  ;;  %v1568_v25 = vpop.f32.mrf.mxu1 }
  0xf3   : > { %1394 = vst.msk [vmem:[%s1750_s30 + $0x44] sm:$0xf] %vm374_vm3, %v1482_v14  ;;  %v1491_v22 = vpack.c.bf16 %v1040_v15, %v1040_v15  ;;  %v1038_v23 = vmax.f32 %v1024_v16, 0.0  ;;  %v1035_v24 = vadd.f32 %v1562_v21, %v1425_v60  ;;  %v1495_v26 = vpack.c.bf16 %v1154_v19, %v1154_v19 }
  0xf4   : > { %1415 = vst.msk [vmem:[%s1750_s30 + $0x54] sm:$0xf] %vm374_vm3, %v1486_v18  ;;  %v1152_v27 = vmax.f32 %v1138_v20, 0.0  ;;  %v1149_v28 = vadd.f32 %v1568_v25, %v1446_v1  ;;  %v1026_v29 = vpop.f32.mrf.mxu0  ;;  %v1140_v33 = vpop.f32.mrf.mxu1 }
  0xf5   : > { %1437 = vst.msk [vmem:[%s1750_s30 + $0x68] sm:$0xf] %vm374_vm3, %v1491_v22  ;;  %v1489_v30 = vpack.c.bf16 %v1038_v23, %v1038_v23  ;;  %v1041_v31 = vmax.f32 %v1035_v24, 0.0  ;;  %v1027_v32 = vadd.f32 %v1425_v60, %v1026_v29  ;;  %1458 = vst.msk [vmem:[%s1750_s30 + $0x78] sm:$0xf] %vm374_vm3, %v1495_v26  ;;  %v1141_v36 = vadd.f32 %v1446_v1, %v1140_v33 }
  0xf6   : > { %v1493_v34 = vpack.c.bf16 %v1152_v27, %v1152_v27  ;;  %v1155_v35 = vmax.f32 %v1149_v28, 0.0 }
  0xf7   : > { %1435 = vst.msk [vmem:[%s1750_s30 + $0x60] sm:$0xf] %vm374_vm3, %v1489_v30  ;;  %v1492_v37 = vpack.c.bf16 %v1041_v31, %v1041_v31  ;;  %v1039_v38 = vmax.f32 %v1027_v32, 0.0  ;;  %v1153_v40 = vmax.f32 %v1141_v36, 0.0 }
  0xf8   : > { %1456 = vst.msk [vmem:[%s1750_s30 + $0x70] sm:$0xf] %vm374_vm3, %v1493_v34  ;;  %v1496_v39 = vpack.c.bf16 %v1155_v35, %v1155_v35 }
  0xf9   : > { %1438 = vst.msk [vmem:[%s1750_s30 + $0x6c] sm:$0xf] %vm374_vm3, %v1492_v37  ;;  %v1490_v41 = vpack.c.bf16 %v1039_v38, %v1039_v38  ;;  %v1494_v42 = vpack.c.bf16 %v1153_v40, %v1153_v40 }
  0xfa   : > { %1459 = vst.msk [vmem:[%s1750_s30 + $0x7c] sm:$0xf] %vm374_vm3, %v1496_v39 }
  0xfb   : > { %1436 = vst.msk [vmem:[%s1750_s30 + $0x64] sm:$0xf] %vm374_vm3, %v1490_v41  ;;  %1457 = vst.msk [vmem:[%s1750_s30 + $0x74] sm:$0xf] %vm374_vm3, %v1494_v42 }
  0xfc PF: > { %s13_s14 = sadd.s32 1, %s1640_s14   ;;  %s1835_s12 = smov %s1636_s13 }
  0xfd   : > { %p10_p5 = scmp.ge.s32.totalorder %s13_s14, 6   ;;  %s1836_s13 = smov %s1838_s15 }
  0xff   :  { %12 = sbr.rel (!%p10_p5) target bundleno = 2 (0x2), region = 96 }

// kernel: sws_resnext_forward.23
= control target key start
LH: loop header
LB: loop body
LE: loop exit
PB: predicated region body
PF: predicated region fallthrough
CT: control target
= control target key end

     0   :  { %s335_s1 = inlined_call_operand.vmem [shape: bf16[128,128], index: 1, kind: input, shape index: {}]   ;;  %s336_s0 = inlined_call_operand.vmem [shape: bf16[32,128], index: 0, kind: input, shape index: {}]   ;;  %s337_s2 = inlined_call_operand.vmem [shape: f32[1,128], index: 2, kind: input, shape index: {}]   ;;  %s338_s3 = inlined_call_operand.vmem [shape: bf16[32,128], index: 3, kind: output, shape index: {}]  }
   0x1   :  { %v266_v0 = vld [vmem:[%s335_s1 + $0x38] sm:$0xff]   ;;  %v267_v1 = vld [vmem:[%s335_s1 + $0x30] sm:$0xff]   ;;  %v268_v2 = vld [vmem:[%s335_s1 + $0x28] sm:$0xff]  }
   0x2   :  { %246 = vmatprep.subr.bf16.mxu0 %v266_v0  ;;  %v269_v3 = vld [vmem:[%s335_s1 + $0x20] sm:$0xff]   ;;  %v270_v5 = vld [vmem:[%s335_s1 + $0x18] sm:$0xff]   ;;  %v271_v6 = vld [vmem:[%s335_s1 + $0x10] sm:$0xff]  }
   0x3   :  { %247 = vmatpush3.bf16.msra.mxu0 %v266_v0  ;;  %v274_v4 = vld [vmem:[%s336_s0] sm:$0xff]   ;;  %v272_v7 = vld [vmem:[%s335_s1 + $0x8] sm:$0xff]  }
   0x4   :  { %248 = vmatprep.subr.bf16.mxu0 %v267_v1  ;;  %262 = vmatprep.mubr.bf16.mxu0 %v274_v4  ;;  %v273_v8 = vld [vmem:[%s335_s1] sm:$0xff]   ;;  %v275_v9 = vld [vmem:[%s336_s0 + $0x8] sm:$0xff]  }
   0x5   :  { %v216_v11 = vld [vmem:[%s337_s2] ss:$0 sm:$0xff] }
   0x7   :  { %249 = vmatpush3.bf16.msra.mxu0 %v267_v1 }
   0x8   :  { %250 = vmatprep.subr.bf16.mxu0 %v268_v2 }
   0xb   :  { %251 = vmatpush3.bf16.msra.mxu0 %v268_v2 }
   0xc   :  { %252 = vmatprep.subr.bf16.mxu0 %v269_v3 }
   0xf   :  { %253 = vmatpush3.bf16.msra.mxu0 %v269_v3 }
  0x10   :  { %254 = vmatprep.subr.bf16.mxu0 %v270_v5 }
  0x13   :  { %255 = vmatpush3.bf16.msra.mxu0 %v270_v5 }
  0x14   :  { %256 = vmatprep.subr.bf16.mxu0 %v271_v6 }
  0x17   :  { %257 = vmatpush3.bf16.msra.mxu0 %v271_v6 }
  0x18   :  { %258 = vmatprep.subr.bf16.mxu0 %v272_v7 }
  0x1b   :  { %259 = vmatpush3.bf16.msra.mxu0 %v272_v7 }
  0x1c   :  { %260 = vmatprep.subr.bf16.mxu0 %v273_v8 }
  0x1f   :  { %261 = vmatpush3.bf16.msra.mxu0 %v273_v8 }
  0x22   :  { %263 = vmatmul.mubr.bf16.vlgmr.msra.gmra.mxu0 %v275_v9 }
  0xe2   :  { %v264_v10 = vpop.f32.mrf.mxu0 }
  0xe3   :  { %v180_v14 = vadd.f32 %v264_v10, %v216_v11 }
  0xe4   :  { %v141_v12 = vpop.f32.mrf.mxu0 }
  0xe5   :  { %v178_v17 = vadd.f32 %v216_v11, %v141_v12 }
  0xe6   :  { %v265_v13 = vpop.f32.mrf.mxu0 }
  0xe7   :  { %v181_v15 = vadd.f32 %v265_v13, %v216_v11 }
  0xe8   :  { %v144_v16 = vpop.f32.mrf.mxu0 }
  0xe9   :  { %v233_v18 = vpack.c.bf16 %v181_v15, %v180_v14  ;;  %v179_v19 = vadd.f32 %v216_v11, %v144_v16 }
  0xeb   :  { %235 = vst [vmem:[%s338_s3 + $0x8] sm:$0xff] %v233_v18   ;;  %v228_v20 = vpack.c.bf16 %v179_v19, %v178_v17 }
  0xed   :  { %229 = vst [vmem:[%s338_s3] sm:$0xff] %v228_v20  }

// kernel: sws_resnext_forward.24
= control target key start
LH: loop header
LB: loop body
LE: loop exit
PB: predicated region body
PF: predicated region fallthrough
CT: control target
= control target key end

     0   :  { %vm60_vm0 = vcmask 261120   ;;  %s285_s1 = inlined_call_operand.vmem [shape: bf16[32,128], index: 1, kind: input, shape index: {}]   ;;  %s286_s0 = inlined_call_operand.vmem [shape: bf16[32,32], index: 0, kind: input, shape index: {}]   ;;  %s287_s2 = inlined_call_operand.vmem [shape: f32[1,128], index: 2, kind: input, shape index: {}]   ;;  %s288_s3 = inlined_call_operand.vmem [shape: bf16[32,128], index: 3, kind: input, shape index: {}]   ;;  %s289_s4 = inlined_call_operand.vmem [shape: bf16[32,128], index: 4, kind: output, shape index: {}]  }
   0x1   :  { %v229_v0 = vld [vmem:[%s285_s1 + $0x8] sm:$0xff]   ;;  %v230_v1 = vld [vmem:[%s285_s1] sm:$0xff]  }
   0x2   :  { %221 = vmatprep.subr.bf16.mxu0 %v229_v0  ;;  %v231_v2 = vld [vmem:[%s286_s0] sm:$0xff]   ;;  %v232_v3 = vld [vmem:[%s286_s0 + $0x8] sm:$0xff]  }
   0x3   :  { %222 = vmatpush3.bf16.msra.mxu0 %v229_v0  ;;  %225 = vmatprep.mubr.msk.bf16.mxu0 %vm60_vm0, %v231_v2  ;;  %v188_v4 = vld [vmem:[%s287_s2] ss:$0 sm:$0xff]  ;;  %v215_v5 = vld [vmem:[%s288_s3 + $0x8] sm:$0xff]  }
   0x4   :  { %223 = vmatprep.subr.bf16.mxu0 %v230_v1  ;;  %v198_v7 = vld [vmem:[%s288_s3] sm:$0xff]   ;;  %v203_v9 = vunpack.c.l.bf16 %v215_v5  ;;  %v204_v13 = vunpack.c.h.bf16 %v215_v5 }
   0x5   :  { %v199_v12 = vunpack.c.l.bf16 %v198_v7  ;;  %v200_v17 = vunpack.c.h.bf16 %v198_v7 }
   0x7   :  { %224 = vmatpush3.bf16.msra.mxu0 %v230_v1 }
   0xa   :  { %226 = vmatmul.mubr.msk.bf16.vlgmr.msra.gmra.mxu0 %vm60_vm0, %v232_v3 }
  0xca   :  { %v227_v6 = vpop.f32.mrf.mxu0 }
  0xcb   :  { %v140_v8 = vadd.f32 %v227_v6, %v188_v4 }
  0xcc   :  { %v101_v10 = vpop.f32.mrf.mxu0 }
  0xcd   :  { %v138_v11 = vadd.f32 %v188_v4, %v101_v10  ;;  %v152_v15 = vadd.f32 %v203_v9, %v140_v8 }
  0xce   :  { %v228_v14 = vpop.f32.mrf.mxu0 }
  0xcf   :  { %v141_v16 = vadd.f32 %v228_v14, %v188_v4  ;;  %v150_v19 = vadd.f32 %v199_v12, %v138_v11  ;;  %v156_v22 = vmax.f32 %v152_v15, 0.0 }
  0xd0   :  { %v104_v18 = vpop.f32.mrf.mxu0 }
  0xd1   :  { %v153_v20 = vadd.f32 %v204_v13, %v141_v16  ;;  %v139_v21 = vadd.f32 %v188_v4, %v104_v18  ;;  %v154_v25 = vmax.f32 %v150_v19, 0.0 }
  0xd3   :  { %v157_v23 = vmax.f32 %v153_v20, 0.0  ;;  %v151_v24 = vadd.f32 %v200_v17, %v139_v21 }
  0xd5   :  { %v213_v26 = vpack.c.bf16 %v157_v23, %v156_v22  ;;  %v155_v27 = vmax.f32 %v151_v24, 0.0 }
  0xd7   :  { %216 = vst [vmem:[%s289_s4 + $0x8] sm:$0xff] %v213_v26   ;;  %v208_v28 = vpack.c.bf16 %v155_v27, %v154_v25 }
  0xd9   :  { %209 = vst [vmem:[%s289_s4] sm:$0xff] %v208_v28  }

// kernel: sws_resnext_forward.29
= control target key start
LH: loop header
LB: loop body
LE: loop exit
PB: predicated region body
PF: predicated region fallthrough
CT: control target
= control target key end

     0   :  { %v195_v0 = vmov 0.0   ;;  %vm196_vm0 = vmmov 0   ;;  %s250_s1 = inlined_call_operand.vmem [shape: bf16[128,128], index: 1, kind: input, shape index: {}]   ;;  %s251_s0 = inlined_call_operand.vmem [shape: bf16[8,128], index: 0, kind: input, shape index: {}]   ;;  %s252_s2 = inlined_call_operand.vmem [shape: f32[1,128], index: 2, kind: input, shape index: {}]   ;;  %s253_s3 = inlined_call_operand.vmem [shape: bf16[8,128], index: 3, kind: output, shape index: {}]  }
   0x1   :  { %165 = vmatprep.subr.bf16.mxu0 %v195_v0  ;;  %v187_v1 = vld [vmem:[%s250_s1 + $0x38] sm:$0xff]   ;;  %181 = vmatprep.mubr.msk.bf16.mxu0 %vm196_vm0, %v195_v0  ;;  %v188_v2 = vld [vmem:[%s250_s1 + $0x30] sm:$0xff]   ;;  %v189_v3 = vld [vmem:[%s250_s1 + $0x28] sm:$0xff]  }
   0x2   :  { %166 = vmatpush3.bf16.msra.mxu0 %v187_v1  ;;  %v190_v4 = vld [vmem:[%s250_s1 + $0x20] sm:$0xff]   ;;  %v191_v5 = vld [vmem:[%s250_s1 + $0x18] sm:$0xff]   ;;  %v192_v6 = vld [vmem:[%s250_s1 + $0x10] sm:$0xff]  }
   0x3   :  { %167 = vmatprep.subr.bf16.mxu0 %v195_v0  ;;  %v193_v7 = vld [vmem:[%s250_s1 + $0x8] sm:$0xff]   ;;  %v194_v8 = vld [vmem:[%s250_s1] sm:$0xff]  }
   0x4   :  { %v21_v9 = vld [vmem:[%s251_s0] sm:$0xf] }
   0x5   :  { %v155_v10 = vld [vmem:[%s252_s2] ss:$0 sm:$0xff] }
   0x6   :  { %168 = vmatpush3.bf16.msra.mxu0 %v188_v2 }
   0x7   :  { %169 = vmatprep.subr.bf16.mxu0 %v195_v0 }
   0xa   :  { %170 = vmatpush3.bf16.msra.mxu0 %v189_v3 }
   0xb   :  { %171 = vmatprep.subr.bf16.mxu0 %v195_v0 }
   0xe   :  { %172 = vmatpush3.bf16.msra.mxu0 %v190_v4 }
   0xf   :  { %173 = vmatprep.subr.bf16.mxu0 %v195_v0 }
  0x12   :  { %174 = vmatpush3.bf16.msra.mxu0 %v191_v5 }
  0x13   :  { %175 = vmatprep.subr.bf16.mxu0 %v195_v0 }
  0x16   :  { %176 = vmatpush3.bf16.msra.mxu0 %v192_v6 }
  0x17   :  { %177 = vmatprep.subr.bf16.mxu0 %v195_v0 }
  0x1a   :  { %178 = vmatpush3.bf16.msra.mxu0 %v193_v7 }
  0x1b   :  { %179 = vmatprep.subr.bf16.mxu0 %v195_v0 }
  0x1e   :  { %180 = vmatpush3.bf16.msra.mxu0 %v194_v8 }
  0x21   :  { %182 = vmatmul.mubr.bf16.vlgmr.msra.gmra.mxu0 %v21_v9 }
  0xe1   :  { %v120_v11 = vpop.f32.mrf.mxu0 }
  0xe2   :  { %v139_v12 = vadd.f32 %v155_v10, %v120_v11 }
  0xe3   :  { %v183_v13 = vpop.f32.mrf.mxu0 }
  0xe4   :  { %v140_v14 = vmax.f32 %v139_v12, 0.0 }
  0xe5   :  { %v123_v15 = vpop.f32.mrf.mxu0 }
  0xe6   :  { %v141_v16 = vpack.c.bf16 %v140_v14, %v140_v14 }
  0xe7   :  { %v184_v17 = vpop.f32.mrf.mxu0 }
  0xe8   :  { %142 = vst [vmem:[%s253_s3] sm:$0xf] %v141_v16 }

// kernel: sws_resnext_forward.27
= control target key start
LH: loop header
LB: loop body
LE: loop exit
PB: predicated region body
PF: predicated region fallthrough
CT: control target
= control target key end

     0   :  { %v194_v0 = vmov 0.0   ;;  %vm195_vm0 = vmmov 0   ;;  %s249_s1 = inlined_call_operand.vmem [shape: bf16[128,128], index: 1, kind: input, shape index: {}]   ;;  %s250_s0 = inlined_call_operand.vmem [shape: bf16[8,128], index: 0, kind: input, shape index: {}]   ;;  %s251_s2 = inlined_call_operand.vmem [shape: f32[1,128], index: 2, kind: input, shape index: {}]   ;;  %s252_s3 = inlined_call_operand.vmem [shape: bf16[8,128], index: 3, kind: output, shape index: {}]  }
   0x1   :  { %164 = vmatprep.subr.bf16.mxu0 %v194_v0  ;;  %v186_v1 = vld [vmem:[%s249_s1 + $0x38] sm:$0xff]   ;;  %180 = vmatprep.mubr.msk.bf16.mxu0 %vm195_vm0, %v194_v0  ;;  %v187_v2 = vld [vmem:[%s249_s1 + $0x30] sm:$0xff]   ;;  %v188_v3 = vld [vmem:[%s249_s1 + $0x28] sm:$0xff]  }
   0x2   :  { %165 = vmatpush3.bf16.msra.mxu0 %v186_v1  ;;  %v189_v4 = vld [vmem:[%s249_s1 + $0x20] sm:$0xff]   ;;  %v190_v5 = vld [vmem:[%s249_s1 + $0x18] sm:$0xff]   ;;  %v191_v6 = vld [vmem:[%s249_s1 + $0x10] sm:$0xff]  }
   0x3   :  { %166 = vmatprep.subr.bf16.mxu0 %v194_v0  ;;  %v192_v7 = vld [vmem:[%s249_s1 + $0x8] sm:$0xff]   ;;  %v193_v8 = vld [vmem:[%s249_s1] sm:$0xff]  }
   0x4   :  { %v21_v9 = vld [vmem:[%s250_s0] sm:$0xf] }
   0x5   :  { %v154_v10 = vld [vmem:[%s251_s2] ss:$0 sm:$0xff] }
   0x6   :  { %167 = vmatpush3.bf16.msra.mxu0 %v187_v2 }
   0x7   :  { %168 = vmatprep.subr.bf16.mxu0 %v194_v0 }
   0xa   :  { %169 = vmatpush3.bf16.msra.mxu0 %v188_v3 }
   0xb   :  { %170 = vmatprep.subr.bf16.mxu0 %v194_v0 }
   0xe   :  { %171 = vmatpush3.bf16.msra.mxu0 %v189_v4 }
   0xf   :  { %172 = vmatprep.subr.bf16.mxu0 %v194_v0 }
  0x12   :  { %173 = vmatpush3.bf16.msra.mxu0 %v190_v5 }
  0x13   :  { %174 = vmatprep.subr.bf16.mxu0 %v194_v0 }
  0x16   :  { %175 = vmatpush3.bf16.msra.mxu0 %v191_v6 }
  0x17   :  { %176 = vmatprep.subr.bf16.mxu0 %v194_v0 }
  0x1a   :  { %177 = vmatpush3.bf16.msra.mxu0 %v192_v7 }
  0x1b   :  { %178 = vmatprep.subr.bf16.mxu0 %v194_v0 }
  0x1e   :  { %179 = vmatpush3.bf16.msra.mxu0 %v193_v8 }
  0x21   :  { %181 = vmatmul.mubr.bf16.vlgmr.msra.gmra.mxu0 %v21_v9 }
  0xe1   :  { %v120_v11 = vpop.f32.mrf.mxu0 }
  0xe2   :  { %v139_v12 = vadd.f32 %v154_v10, %v120_v11 }
  0xe3   :  { %v182_v13 = vpop.f32.mrf.mxu0 }
  0xe4   :  { %v140_v14 = vpack.c.bf16 %v139_v12, %v139_v12 }
  0xe5   :  { %v123_v15 = vpop.f32.mrf.mxu0 }
  0xe6   :  { %141 = vst [vmem:[%s252_s3] sm:$0xf] %v140_v14 }
  0xe7   :  { %v183_v16 = vpop.f32.mrf.mxu0 }

// kernel: sws_resnext_forward.28
= control target key start
LH: loop header
LB: loop body
LE: loop exit
PB: predicated region body
PF: predicated region fallthrough
CT: control target
= control target key end

     0   :  { %v154_v0 = vmov 0.0   ;;  %vm155_vm0 = vmmov 0   ;;  %vm57_vm1 = vcmask 523264   ;;  %s205_s1 = inlined_call_operand.vmem [shape: bf16[64,128], index: 1, kind: input, shape index: {}]   ;;  %s206_s0 = inlined_call_operand.vmem [shape: bf16[8,64], index: 0, kind: input, shape index: {}]   ;;  %s207_s3 = inlined_call_operand.vmem [shape: bf16[8,128], index: 3, kind: input, shape index: {}]   ;;  %s208_s2 = inlined_call_operand.vmem [shape: f32[1,128], index: 2, kind: input, shape index: {}]   ;;  %s209_s4 = inlined_call_operand.vmem [shape: bf16[8,128], index: 4, kind: output, shape index: {}]  }
   0x1   :  { %136 = vmatprep.subr.bf16.mxu0 %v154_v0  ;;  %v150_v1 = vld [vmem:[%s205_s1 + $0x18] sm:$0xff]   ;;  %144 = vmatprep.mubr.msk.bf16.mxu0 %vm155_vm0, %v154_v0  ;;  %v151_v2 = vld [vmem:[%s205_s1 + $0x10] sm:$0xff]   ;;  %v152_v3 = vld [vmem:[%s205_s1 + $0x8] sm:$0xff]  }
   0x2   :  { %137 = vmatpush3.bf16.msra.mxu0 %v150_v1  ;;  %v153_v4 = vld [vmem:[%s205_s1] sm:$0xff]  }
   0x3   :  { %138 = vmatprep.subr.bf16.mxu0 %v154_v0  ;;  %v24_v5 = vld [vmem:[%s206_s0] sm:$0xf] }
   0x4   :  { %v115_v6 = vld [vmem:[%s207_s3] sm:$0xf] }
   0x5   :  { %v130_v7 = vld [vmem:[%s208_s2] ss:$0 sm:$0xff]  ;;  %v116_v8 = vunpack.c.l.bf16 %v115_v6 }
   0x6   :  { %139 = vmatpush3.bf16.msra.mxu0 %v151_v2 }
   0x7   :  { %140 = vmatprep.subr.bf16.mxu0 %v154_v0 }
   0xa   :  { %141 = vmatpush3.bf16.msra.mxu0 %v152_v3 }
   0xb   :  { %142 = vmatprep.subr.bf16.mxu0 %v154_v0 }
   0xe   :  { %143 = vmatpush3.bf16.msra.mxu0 %v153_v4 }
  0x11   :  { %145 = vmatmul.mubr.msk.bf16.vlgmr.msra.gmra.mxu0 %vm57_vm1, %v24_v5 }
  0xd1   :  { %v95_v9 = vpop.f32.mrf.mxu0 }
  0xd2   :  { %v114_v10 = vadd.f32 %v130_v7, %v95_v9 }
  0xd3   :  { %v146_v11 = vpop.f32.mrf.mxu0 }
  0xd4   :  { %v117_v12 = vadd.f32 %v116_v8, %v114_v10 }
  0xd5   :  { %v98_v13 = vpop.f32.mrf.mxu0 }
  0xd6   :  { %v118_v14 = vmax.f32 %v117_v12, 0.0 }
  0xd7   :  { %v147_v15 = vpop.f32.mrf.mxu0 }
  0xd8   :  { %v119_v16 = vpack.c.bf16 %v118_v14, %v118_v14 }
  0xda   :  { %120 = vst [vmem:[%s209_s4] sm:$0xf] %v119_v16 }

// kernel: sws_resnext_forward.26
= control target key start
LH: loop header
LB: loop body
LE: loop exit
PB: predicated region body
PF: predicated region fallthrough
CT: control target
= control target key end

     0   :  { %s1197_s12 = smov 0   ;;  %s1199_s13 = smov 0   ;;  %s1349_s0 = inlined_call_operand.vmem [shape: bf16[32,8,18], index: 0, kind: input, shape index: {}]   ;;  %s1350_s1 = inlined_call_operand.vmem [shape: bf16[32,18,2], index: 1, kind: input, shape index: {}]   ;;  %s1351_s2 = inlined_call_operand.vmem [shape: f32[32,1,2], index: 2, kind: input, shape index: {}]   ;;  %s1352_s3 = inlined_call_operand.vmem [shape: bf16[32,8,2], index: 3, kind: output, shape index: {}]  }
   0x1   :  { %s1201_s14 = smov 0  }
   0x2 LB: > { %s22_s15 = sadd.s32 1, %s1169_s13  ;;  %p936_p0 = scmp.ge.s32.totalorder %s1173_s14, 1  ;;  %s1173_s14 = sphi %s1201_s14, %s13_s14   ;;  %s1169_s13 = sphi %s1199_s13, %s1354_s13   ;;  %s1165_s12 = sphi %s1197_s12, %s1353_s12  }
   0x3   : > { %p23_p1 = scmp.ge.s32.totalorder %s22_s15, 4  ;;  %p179_p2 = scmp.lt.s32.totalorder %s1173_s14, 5 }
   0x5   : > { %s1356_s15 = smov (%p23_p1, %s22_s15), 0  ;;  %p180_p3 = pnand %p936_p0, %p179_p2 }
   0x6   : > { %s937_s16 = sshll.u32 (!%p180_p3), %s1165_s12, 3 }
   0x7   : > { %183 = sbr.rel (%p180_p3) target bundleno = 249 (0xf9), region = 32  ;;  %p220_p4 = scmp.lt.s32.totalorder (!%p180_p3), %s937_s16, 31 }
   0xc   : > { %v1175_v0 = vmov 0.0   ;;  %vm1176_vm0 = vmmov 0   ;;  %s1358_s16 = smov (!%p220_p4, %s937_s16), 31  ;;  %vm274_vm1 = vcmask 1040384   ;;  %vm270_vm2 = vcmask 146432  }
   0xd   : > { %1044 = vmatprep.subr.bf16.mxu0 %v1175_v0  ;;  %1052 = vmatprep.subr.bf16.mxu1 %v1175_v0  ;;  %s1108_s17 = smul.u32 12, %s1358_s16  ;;  %s938_s21 = sshll.u32 %s1358_s16, 2  ;;  %vm320_vm3 = vcmask 11264  }
   0xe   : > { %1048 = vmatprep.mubr.msk.bf16.mxu0 %vm1176_vm0, %v1175_v0  ;;  %1056 = vmatprep.mubr.msk.bf16.mxu1 %vm1176_vm0, %v1175_v0  ;;  %s1240_s24 = scalar_lea.vmem %s1349_s0, %s938_s21  ;;  %s1307_s27 = scalar_lea.vmem %s1351_s2, %s1358_s16 }
   0xf   : > { %s1227_s20 = scalar_lea.vmem %s1350_s1, %s1108_s17  ;;  %v250_v9 = vld [vmem:[%s1240_s24] sm:$0xf]  ;;  %v948_v10 = vld [vmem:[%s1240_s24 + $0x4] sm:$0xf]  ;;  %v958_v17 = vld [vmem:[%s1240_s24 + $0x8] sm:$0xf]  ;;  %s1316_s30 = scalar_lea.vmem %s1352_s3, %s938_s21 }
  0x10   : > { %v1135_v1 = vld [vmem:[%s1227_s20 + $0x8] ss:$0 sps:$4 sm:$0x11]   ;;  %v1136_v2 = vld [vmem:[%s1227_s20 + $0x14] ss:$0 sps:$4 sm:$0x11]  }
  0x11   : > { %v276_v3 = vsel %vm274_vm1, %v1135_v1, 0  ;;  %v349_v4 = vsel %vm274_vm1, %v1136_v2, 0  ;;  %v1137_v5 = vld [vmem:[%s1227_s20] sm:$0xff]   ;;  %v1138_v6 = vld [vmem:[%s1227_s20 + $0xc] sm:$0xff]   ;;  %v1141_v13 = vld [vmem:[%s1227_s20 + $0x18] sm:$0xff]  }
  0x12   : > { %1045 = vmatpush3.bf16.msra.mxu0 %v276_v3  ;;  %1053 = vmatpush3.bf16.msra.mxu1 %v349_v4  ;;  %v1139_v7 = vld [vmem:[%s1227_s20 + $0x20] ss:$0 sps:$4 sm:$0x11]   ;;  %v1140_v8 = vld [vmem:[%s1227_s20 + $0x2c] ss:$0 sps:$4 sm:$0x11]  }
  0x13   : > { %1046 = vmatprep.subr.bf16.mxu0 %v1175_v0  ;;  %1054 = vmatprep.subr.bf16.mxu1 %v1175_v0  ;;  %v422_v11 = vsel %vm274_vm1, %v1139_v7, 0  ;;  %v495_v12 = vsel %vm274_vm1, %v1140_v8, 0  ;;  %v1143_v14 = vld [vmem:[%s1227_s20 + $0x38] ss:$0 sps:$4 sm:$0x11]   ;;  %v1142_v15 = vld [vmem:[%s1227_s20 + $0x24] sm:$0xff]  }
  0x14   : > { %v1144_v16 = vld [vmem:[%s1227_s20 + $0x44] ss:$0 sps:$4 sm:$0x11]   ;;  %v968_v18 = vld [vmem:[%s1240_s24 + $0xc] sm:$0xf]  ;;  %v568_v19 = vsel %vm274_vm1, %v1143_v14, 0 }
  0x15   : > { %v641_v20 = vsel %vm274_vm1, %v1144_v16, 0  ;;  %v1145_v21 = vld [vmem:[%s1227_s20 + $0x30] sm:$0xff]   ;;  %v1146_v22 = vld [vmem:[%s1227_s20 + $0x3c] sm:$0xff]   ;;  %v1149_v29 = vld [vmem:[%s1227_s20 + $0x48] sm:$0xff]  }
  0x16   : > { %1047 = vmatpush3.bf16.msra.mxu0 %v1137_v5  ;;  %1055 = vmatpush3.bf16.msra.mxu1 %v1138_v6  ;;  %v1147_v23 = vld [vmem:[%s1227_s20 + $0x50] ss:$0 sps:$4 sm:$0x11]   ;;  %v1148_v24 = vld [vmem:[%s1227_s20 + $0x5c] ss:$0 sps:$4 sm:$0x11]  }
  0x17   : > { %1060 = vmatprep.subr.bf16.mxu0 %v1175_v0  ;;  %1068 = vmatprep.subr.bf16.mxu1 %v1175_v0  ;;  %v978_v25 = vld [vmem:[%s1240_s24 + $0x10] sm:$0xf]  ;;  %v988_v26 = vld [vmem:[%s1240_s24 + $0x14] sm:$0xf]  ;;  %v714_v27 = vsel %vm274_vm1, %v1147_v23, 0  ;;  %v787_v28 = vsel %vm274_vm1, %v1148_v24, 0 }
  0x18   : > { %v1150_v30 = vld [vmem:[%s1227_s20 + $0x54] sm:$0xff]   ;;  %v1008_v32 = vld [vmem:[%s1240_s24 + $0x1c] sm:$0xf]  ;;  %v944_v33 = vld [vmem:[%s1307_s27] ss:$0 sm:$0xff] }
  0x19   : > { %1049 = vmatmul.mubr.msk.bf16.vlgmr.msra.gmra.mxu0 %vm270_vm2, %v250_v9  ;;  %1057 = vmatmul.mubr.msk.bf16.vlgmr.msra.gmra.mxu1 %vm270_vm2, %v948_v10  ;;  %v998_v31 = vld [vmem:[%s1240_s24 + $0x18] sm:$0xf]  ;;  %v953_v34 = vld [vmem:[%s1307_s27 + $0x1] ss:$0 sm:$0xff]  ;;  %v963_v48 = vld [vmem:[%s1307_s27 + $0x2] ss:$0 sm:$0xff] }
  0x1a   : > { %1061 = vmatpush3.bf16.msra.mxu0 %v422_v11  ;;  %1069 = vmatpush3.bf16.msra.mxu1 %v495_v12  ;;  %v973_v50 = vld [vmem:[%s1307_s27 + $0x3] ss:$0 sm:$0xff]  ;;  %v993_v2 = vld [vmem:[%s1307_s27 + $0x5] ss:$0 sm:$0xff]  ;;  %v1003_v16 = vld [vmem:[%s1307_s27 + $0x6] ss:$0 sm:$0xff] }
  0x1b   : > { %1062 = vmatprep.subr.bf16.mxu0 %v1175_v0  ;;  %1070 = vmatprep.subr.bf16.mxu1 %v1175_v0 }
  0x1c   : > { %1064 = vmatprep.mubr.msk.bf16.mxu0 %vm1176_vm0, %v1175_v0  ;;  %1072 = vmatprep.mubr.msk.bf16.mxu1 %vm1176_vm0, %v1175_v0 }
  0x1e   : > { %1063 = vmatpush3.bf16.msra.mxu0 %v1141_v13  ;;  %1071 = vmatpush3.bf16.msra.mxu1 %v1142_v15 }
  0x1f   : > { %1076 = vmatprep.subr.bf16.mxu0 %v1175_v0  ;;  %1084 = vmatprep.subr.bf16.mxu1 %v1175_v0 }
  0x21   : > { %1065 = vmatmul.mubr.msk.bf16.vlgmr.msra.gmra.mxu0 %vm270_vm2, %v958_v17  ;;  %1073 = vmatmul.mubr.msk.bf16.vlgmr.msra.gmra.mxu1 %vm270_vm2, %v968_v18  ;;  %v1013_v18 = vld [vmem:[%s1307_s27 + $0x7] ss:$0 sm:$0xff] }
  0x22   : > { %1077 = vmatpush3.bf16.msra.mxu0 %v568_v19  ;;  %1085 = vmatpush3.bf16.msra.mxu1 %v641_v20 }
  0x23   : > { %1078 = vmatprep.subr.bf16.mxu0 %v1175_v0  ;;  %1086 = vmatprep.subr.bf16.mxu1 %v1175_v0 }
  0x24   : > { %1080 = vmatprep.mubr.msk.bf16.mxu0 %vm1176_vm0, %v1175_v0  ;;  %1088 = vmatprep.mubr.msk.bf16.mxu1 %vm1176_vm0, %v1175_v0 }
  0x26   : > { %1079 = vmatpush3.bf16.msra.mxu0 %v1145_v21  ;;  %1087 = vmatpush3.bf16.msra.mxu1 %v1146_v22 }
  0x27   : > { %1092 = vmatprep.subr.bf16.mxu0 %v1175_v0  ;;  %1100 = vmatprep.subr.bf16.mxu1 %v1175_v0 }
  0x29   : > { %1081 = vmatmul.mubr.msk.bf16.vlgmr.msra.gmra.mxu0 %vm270_vm2, %v978_v25  ;;  %1089 = vmatmul.mubr.msk.bf16.vlgmr.msra.gmra.mxu1 %vm270_vm2, %v988_v26 }
  0x2a   : > { %1093 = vmatpush3.bf16.msra.mxu0 %v714_v27  ;;  %1101 = vmatpush3.bf16.msra.mxu1 %v787_v28 }
  0x2b   : > { %1094 = vmatprep.subr.bf16.mxu0 %v1175_v0  ;;  %1102 = vmatprep.subr.bf16.mxu1 %v1175_v0 }
  0x2c   : > { %1096 = vmatprep.mubr.msk.bf16.mxu0 %vm1176_vm0, %v1175_v0  ;;  %1104 = vmatprep.mubr.msk.bf16.mxu1 %vm1176_vm0, %v1175_v0  ;;  %v983_v0 = vld [vmem:[%s1307_s27 + $0x4] ss:$0 sm:$0xff] }
  0x2e   : > { %1095 = vmatpush3.bf16.msra.mxu0 %v1149_v29  ;;  %1103 = vmatpush3.bf16.msra.mxu1 %v1150_v30 }
  0x31   : > { %1097 = vmatmul.mubr.msk.bf16.vlgmr.msra.gmra.mxu0 %vm270_vm2, %v998_v31  ;;  %1105 = vmatmul.mubr.msk.bf16.vlgmr.msra.gmra.mxu1 %vm270_vm2, %v1008_v32 }
  0xd9   : > { %v312_v35 = vpop.f32.mrf.mxu0  ;;  %v385_v37 = vpop.f32.mrf.mxu1 }
  0xda   : > { %v313_v36 = vadd.f32 %v944_v33, %v312_v35  ;;  %v386_v38 = vadd.f32 %v953_v34, %v385_v37 }
  0xdb   : > { %v1050_v39 = vpop.f32.mrf.mxu0  ;;  %v1058_v41 = vpop.f32.mrf.mxu1 }
  0xdc   : > { %v318_v40 = vmax.f32 %v313_v36, 0.0  ;;  %v391_v42 = vmax.f32 %v386_v38, 0.0 }
  0xdd   : > { %v315_v43 = vpop.f32.mrf.mxu0  ;;  %v388_v45 = vpop.f32.mrf.mxu1 }
  0xde   : > { %v319_v44 = vpack.c.bf16 %v318_v40, %v318_v40  ;;  %v392_v46 = vpack.c.bf16 %v391_v42, %v391_v42 }
  0xdf   : > { %v1051_v47 = vpop.f32.mrf.mxu0  ;;  %v1059_v49 = vpop.f32.mrf.mxu1 }
  0xe0   : > { %321 = vst.msk [vmem:[%s1316_s30] sm:$0xf] %vm320_vm3, %v319_v44  ;;  %957 = vst.msk [vmem:[%s1316_s30 + $0x4] sm:$0xf] %vm320_vm3, %v392_v46 }
  0xe1   : > { %v458_v51 = vpop.f32.mrf.mxu0  ;;  %v531_v53 = vpop.f32.mrf.mxu1 }
  0xe2   : > { %v459_v52 = vadd.f32 %v963_v48, %v458_v51  ;;  %v532_v54 = vadd.f32 %v973_v50, %v531_v53 }
  0xe3   : > { %v1066_v55 = vpop.f32.mrf.mxu0  ;;  %v1074_v57 = vpop.f32.mrf.mxu1 }
  0xe4   : > { %v464_v56 = vmax.f32 %v459_v52, 0.0  ;;  %v537_v58 = vmax.f32 %v532_v54, 0.0 }
  0xe5   : > { %v461_v59 = vpop.f32.mrf.mxu0  ;;  %v534_v61 = vpop.f32.mrf.mxu1 }
  0xe6   : > { %v465_v60 = vpack.c.bf16 %v464_v56, %v464_v56  ;;  %v538_v62 = vpack.c.bf16 %v537_v58, %v537_v58 }
  0xe7   : > { %v1067_v63 = vpop.f32.mrf.mxu0  ;;  %v1075_v1 = vpop.f32.mrf.mxu1 }
  0xe8   : > { %967 = vst.msk [vmem:[%s1316_s30 + $0x8] sm:$0xf] %vm320_vm3, %v465_v60  ;;  %977 = vst.msk [vmem:[%s1316_s30 + $0xc] sm:$0xf] %vm320_vm3, %v538_v62 }
  0xe9   : > { %v604_v3 = vpop.f32.mrf.mxu0  ;;  %v677_v5 = vpop.f32.mrf.mxu1 }
  0xea   : > { %v605_v4 = vadd.f32 %v983_v0, %v604_v3  ;;  %v678_v6 = vadd.f32 %v993_v2, %v677_v5 }
  0xeb   : > { %v1082_v7 = vpop.f32.mrf.mxu0  ;;  %v1090_v9 = vpop.f32.mrf.mxu1 }
  0xec   : > { %v610_v8 = vmax.f32 %v605_v4, 0.0  ;;  %v683_v10 = vmax.f32 %v678_v6, 0.0 }
  0xed   : > { %v607_v11 = vpop.f32.mrf.mxu0  ;;  %v680_v13 = vpop.f32.mrf.mxu1 }
  0xee   : > { %v611_v12 = vpack.c.bf16 %v610_v8, %v610_v8  ;;  %v684_v14 = vpack.c.bf16 %v683_v10, %v683_v10 }
  0xef   : > { %v1083_v15 = vpop.f32.mrf.mxu0  ;;  %v1091_v17 = vpop.f32.mrf.mxu1 }
  0xf0   : > { %987 = vst.msk [vmem:[%s1316_s30 + $0x10] sm:$0xf] %vm320_vm3, %v611_v12  ;;  %997 = vst.msk [vmem:[%s1316_s30 + $0x14] sm:$0xf] %vm320_vm3, %v684_v14 }
  0xf1   : > { %v750_v19 = vpop.f32.mrf.mxu0  ;;  %v823_v21 = vpop.f32.mrf.mxu1 }
  0xf2   : > { %v751_v20 = vadd.f32 %v1003_v16, %v750_v19  ;;  %v824_v22 = vadd.f32 %v1013_v18, %v823_v21 }
  0xf3   : > { %v1098_v23 = vpop.f32.mrf.mxu0  ;;  %v1106_v25 = vpop.f32.mrf.mxu1 }
  0xf4   : > { %v756_v24 = vmax.f32 %v751_v20, 0.0  ;;  %v829_v26 = vmax.f32 %v824_v22, 0.0 }
  0xf5   : > { %v753_v27 = vpop.f32.mrf.mxu0  ;;  %v826_v29 = vpop.f32.mrf.mxu1 }
  0xf6   : > { %v757_v28 = vpack.c.bf16 %v756_v24, %v756_v24  ;;  %v830_v30 = vpack.c.bf16 %v829_v26, %v829_v26 }
  0xf7   : > { %v1099_v31 = vpop.f32.mrf.mxu0  ;;  %v1107_v32 = vpop.f32.mrf.mxu1 }
  0xf8   : > { %1007 = vst.msk [vmem:[%s1316_s30 + $0x18] sm:$0xf] %vm320_vm3, %v757_v28  ;;  %1017 = vst.msk [vmem:[%s1316_s30 + $0x1c] sm:$0xf] %vm320_vm3, %v830_v30 }
  0xf9 PF: > { %s13_s14 = sadd.s32 1, %s1173_s14   ;;  %s1353_s12 = smov %s1169_s13 }
  0xfa   : > { %p10_p5 = scmp.ge.s32.totalorder %s13_s14, 6   ;;  %s1354_s13 = smov %s1356_s15 }
  0xfc   :  { %12 = sbr.rel (!%p10_p5) target bundleno = 2 (0x2), region = 96 }

// kernel: sws_resnext_forward.33
= control target key start
LH: loop header
LB: loop body
LE: loop exit
PB: predicated region body
PF: predicated region fallthrough
CT: control target
= control target key end

     0   :  { %s915_s12 = smov 0   ;;  %s917_s13 = smov 0   ;;  %s1073_s0 = inlined_call_operand.vmem [shape: bf16[2,256], index: 0, kind: input, shape index: {}]   ;;  %s1074_s1 = inlined_call_operand.vmem [shape: bf16[256,256], index: 1, kind: input, shape index: {}]   ;;  %s1075_s2 = inlined_call_operand.vmem [shape: f32[1,256], index: 2, kind: input, shape index: {}]   ;;  %s1076_s3 = inlined_call_operand.vmem [shape: bf16[2,256], index: 3, kind: output, shape index: {}]  }
   0x1   :  { %s919_s14 = smov 0   ;;  %s921_s15 = smov 0  }
   0x2   :  { %s923_s16 = smov 0  }
   0x3 LB: > { %s28_s17 = sadd.s32 1, %s887_s15  ;;  %p76_p1 = scmp.ne.s32.totalorder %s879_s13, %s875_s12  ;;  %s891_s16 = sphi %s923_s16, %s13_s16   ;;  %s887_s15 = sphi %s921_s15, %s1080_s15   ;;  %s883_s14 = sphi %s919_s14, %s1079_s14   ;;  %s879_s13 = sphi %s917_s13, %s1078_s13   ;;  %s875_s12 = sphi %s915_s12, %s1077_s12  }
   0x4   : > { %p30_p0 = scmp.ge.s32.totalorder %s28_s17, 2  ;;  %p77_p2 = scmp.eq.s32.totalorder %s891_s16, 0 }
   0x5   : > { %s69_s19 = sadd.s32 1, %s879_s13  ;;  %p748_p5 = scmp.ge.s32.totalorder %s891_s16, 2 }
   0x6   : > { %s1082_s17 = smov (%p30_p0, %s28_s17), 0  ;;  %p78_p3 = por %p77_p2, %p76_p1 }
   0x7   : > { %s65_s18 = ssub.s32 %s887_s15, %s1082_s17  ;;  %168 = sbr.rel (%p748_p5) target bundleno = 37 (0x25), region = 20 }
   0x8   : > { %p67_p4 = scmp.eq.s32.totalorder %s65_s18, 0 }
   0xa   : > { %s950_s20 = scalar_select %p67_p4, %s879_s13, %s69_s19  }
   0xc   : > { %171 = sbr.rel (!%p78_p3) target bundleno = 37 (0x25), region = 24  ;;  %s173_s21 = sand.u32 (%p78_p3), 1, %s879_s13  }
   0xd   : > { %s750_s22 = sshll.u32 (%p78_p3), %s887_s15, 2  ;;  %s749_s23 = sshll.u32 (%p78_p3), %s173_s21, 7 }
   0xe   : > { %s958_s26 = scalar_lea.vmem (%p78_p3), %s1074_s1, %s750_s22  ;;  %s962_s27 = scalar_lea.vmem (%p78_p3), [#allocation3], %s749_s23 }
   0xf   : > { %v197_v0 = vld [vmem:[%s958_s26] sm:$0xf] (%p78_p3)  ;;  %v199_v1 = vld [vmem:[%s958_s26 + $0x8] sm:$0xf] (%p78_p3)  ;;  %v201_v2 = vld [vmem:[%s958_s26 + $0x10] sm:$0xf] (%p78_p3) }
  0x10   : > { %198 = vst [vmem:[%s962_s27] sm:$0xf] (%p78_p3), %v197_v0  ;;  %200 = vst [vmem:[%s962_s27 + $0x4] sm:$0xf] (%p78_p3), %v199_v1  ;;  %v203_v3 = vld [vmem:[%s958_s26 + $0x18] sm:$0xf] (%p78_p3) }
  0x11   : > { %v205_v4 = vld [vmem:[%s958_s26 + $0x20] sm:$0xf]  ;;  %202 = vst [vmem:[%s962_s27 + $0x8] sm:$0xf] %v201_v2  ;;  %204 = vst [vmem:[%s962_s27 + $0xc] sm:$0xf] %v203_v3 }
  0x12   : > { %206 = vst [vmem:[%s962_s27 + $0x10] sm:$0xf] %v205_v4  ;;  %v207_v5 = vld [vmem:[%s958_s26 + $0x28] sm:$0xf]  ;;  %v209_v6 = vld [vmem:[%s958_s26 + $0x30] sm:$0xf] }
  0x13   : > { %v211_v7 = vld [vmem:[%s958_s26 + $0x38] sm:$0xf]  ;;  %208 = vst [vmem:[%s962_s27 + $0x14] sm:$0xf] %v207_v5  ;;  %210 = vst [vmem:[%s962_s27 + $0x18] sm:$0xf] %v209_v6 }
  0x14   : > { %212 = vst [vmem:[%s962_s27 + $0x1c] sm:$0xf] %v211_v7  ;;  %v213_v8 = vld [vmem:[%s958_s26 + $0x40] sm:$0xf]  ;;  %v215_v9 = vld [vmem:[%s958_s26 + $0x48] sm:$0xf] }
  0x15   : > { %v217_v10 = vld [vmem:[%s958_s26 + $0x50] sm:$0xf]  ;;  %214 = vst [vmem:[%s962_s27 + $0x20] sm:$0xf] %v213_v8  ;;  %216 = vst [vmem:[%s962_s27 + $0x24] sm:$0xf] %v215_v9 }
  0x16   : > { %218 = vst [vmem:[%s962_s27 + $0x28] sm:$0xf] %v217_v10  ;;  %v219_v11 = vld [vmem:[%s958_s26 + $0x58] sm:$0xf]  ;;  %v221_v12 = vld [vmem:[%s958_s26 + $0x60] sm:$0xf] }
  0x17   : > { %v223_v13 = vld [vmem:[%s958_s26 + $0x68] sm:$0xf]  ;;  %220 = vst [vmem:[%s962_s27 + $0x2c] sm:$0xf] %v219_v11  ;;  %222 = vst [vmem:[%s962_s27 + $0x30] sm:$0xf] %v221_v12 }
  0x18   : > { %224 = vst [vmem:[%s962_s27 + $0x34] sm:$0xf] %v223_v13  ;;  %v225_v14 = vld [vmem:[%s958_s26 + $0x70] sm:$0xf]  ;;  %v227_v15 = vld [vmem:[%s958_s26 + $0x78] sm:$0xf] }
  0x19   : > { %v229_v16 = vld [vmem:[%s958_s26 + $0x80] sm:$0xf]  ;;  %226 = vst [vmem:[%s962_s27 + $0x38] sm:$0xf] %v225_v14  ;;  %228 = vst [vmem:[%s962_s27 + $0x3c] sm:$0xf] %v227_v15 }
  0x1a   : > { %230 = vst [vmem:[%s962_s27 + $0x40] sm:$0xf] %v229_v16  ;;  %v231_v17 = vld [vmem:[%s958_s26 + $0x88] sm:$0xf]  ;;  %v233_v18 = vld [vmem:[%s958_s26 + $0x90] sm:$0xf] }
  0x1b   : > { %v235_v19 = vld [vmem:[%s958_s26 + $0x98] sm:$0xf]  ;;  %232 = vst [vmem:[%s962_s27 + $0x44] sm:$0xf] %v231_v17  ;;  %234 = vst [vmem:[%s962_s27 + $0x48] sm:$0xf] %v233_v18 }
  0x1c   : > { %236 = vst [vmem:[%s962_s27 + $0x4c] sm:$0xf] %v235_v19  ;;  %v237_v20 = vld [vmem:[%s958_s26 + $0xa0] sm:$0xf]  ;;  %v239_v21 = vld [vmem:[%s958_s26 + $0xa8] sm:$0xf] }
  0x1d   : > { %v241_v22 = vld [vmem:[%s958_s26 + $0xb0] sm:$0xf]  ;;  %238 = vst [vmem:[%s962_s27 + $0x50] sm:$0xf] %v237_v20  ;;  %240 = vst [vmem:[%s962_s27 + $0x54] sm:$0xf] %v239_v21 }
  0x1e   : > { %242 = vst [vmem:[%s962_s27 + $0x58] sm:$0xf] %v241_v22  ;;  %v243_v23 = vld [vmem:[%s958_s26 + $0xb8] sm:$0xf]  ;;  %v245_v24 = vld [vmem:[%s958_s26 + $0xc0] sm:$0xf] }
  0x1f   : > { %v247_v25 = vld [vmem:[%s958_s26 + $0xc8] sm:$0xf]  ;;  %244 = vst [vmem:[%s962_s27 + $0x5c] sm:$0xf] %v243_v23  ;;  %246 = vst [vmem:[%s962_s27 + $0x60] sm:$0xf] %v245_v24 }
  0x20   : > { %248 = vst [vmem:[%s962_s27 + $0x64] sm:$0xf] %v247_v25  ;;  %v249_v26 = vld [vmem:[%s958_s26 + $0xd0] sm:$0xf]  ;;  %v251_v27 = vld [vmem:[%s958_s26 + $0xd8] sm:$0xf] }
  0x21   : > { %v253_v28 = vld [vmem:[%s958_s26 + $0xe0] sm:$0xf]  ;;  %250 = vst [vmem:[%s962_s27 + $0x68] sm:$0xf] %v249_v26  ;;  %252 = vst [vmem:[%s962_s27 + $0x6c] sm:$0xf] %v251_v27 }
  0x22   : > { %254 = vst [vmem:[%s962_s27 + $0x70] sm:$0xf] %v253_v28  ;;  %v255_v29 = vld [vmem:[%s958_s26 + $0xe8] sm:$0xf]  ;;  %v257_v30 = vld [vmem:[%s958_s26 + $0xf0] sm:$0xf] }
  0x23   : > { %v259_v31 = vld [vmem:[%s958_s26 + $0xf8] sm:$0xf]  ;;  %256 = vst [vmem:[%s962_s27 + $0x74] sm:$0xf] %v255_v29  ;;  %258 = vst [vmem:[%s962_s27 + $0x78] sm:$0xf] %v257_v30 }
  0x24   : > { %260 = vst [vmem:[%s962_s27 + $0x7c] sm:$0xf] %v259_v31 }
  0x25 PF: > { %p751_p6 = scmp.ge.s32.totalorder %s891_s16, 1  ;;  %p353_p7 = scmp.lt.s32.totalorder %s891_s16, 3 }
  0x27   : > { %p354_p8 = pnand %p751_p6, %p353_p7 }
  0x28   : > { %s360_s28 = sand.u32 (!%p354_p8), 1, %s875_s12   ;;  %p406_p9 = scmp.lt.s32.totalorder (!%p354_p8), %s883_s14, 1 }
  0x29   : > { %357 = sbr.rel (%p354_p8) target bundleno = 294 (0x126), region = 69  ;;  %s752_s4 = sshll.u32 (!%p354_p8), %s360_s28, 7 }
  0x2a   : > { %s1032_s5 = scalar_lea.vmem (!%p354_p8), [#allocation3], %s752_s4 }
  0x2e   : > { %v753_v32 = vld.sshfl [vmem:[%s1073_s0] sm:$0x11 pattern:$0x75316420]  ;;  %v468_v33 = vlaneseq  ;;  %v893_v34 = vmov 1966171168  }
  0x2f   : > { %v466_v35 = vunpack.c.l.s4 %v893_v34  ;;  %v837_v37 = vld [vmem:[%s1032_s5 + $0x78] sm:$0xff]   ;;  %v464_v39 = vcombine.high %v753_v32, %v753_v32  ;;  %v839_v41 = vld [vmem:[%s1032_s5 + $0x70] sm:$0xff]   ;;  %v841_v44 = vld [vmem:[%s1032_s5 + $0x68] sm:$0xff]   ;;  %v894_v58 = vmov 0.0   ;;  %s1084_s14 = smov (!%p406_p9, %s883_s14), 1 }
  0x30   : > { %v469_v36 = vshrl.u32 %v468_v33, 7  ;;  %v838_v38 = vld [vmem:[%s1032_s5 + $0x38] sm:$0xff]   ;;  %773 = vmatprep.subr.bf16.mxu0 %v837_v37  ;;  %v840_v42 = vld [vmem:[%s1032_s5 + $0x30] sm:$0xff]   ;;  %v842_v46 = vld [vmem:[%s1032_s5 + $0x28] sm:$0xff]   ;;  %421 = vst [vmem:[#allocation2] sm:$0x3] %v894_v58  ;;  %s408_s8 = scalar_lea.vmem %s1075_s2, %s1084_s14  ;;  %s415_s11 = scalar_lea.vmem %s1076_s3, %s1084_s14 }
  0x31   : > { %v467_v40 = vunpack.c.0.s8 %v466_v35  ;;  %774 = vmatpush3.bf16.msra.mxu0 %v838_v38  ;;  %v843_v47 = vld [vmem:[%s1032_s5 + $0x60] sm:$0xff]   ;;  %v845_v49 = vld [vmem:[%s1032_s5 + $0x58] sm:$0xff]   ;;  %v847_v51 = vld [vmem:[%s1032_s5 + $0x50] sm:$0xff]  }
  0x32   : > { %775 = vmatprep.subr.bf16.mxu0 %v839_v41  ;;  %v844_v48 = vld [vmem:[%s1032_s5 + $0x20] sm:$0xff]   ;;  %v846_v50 = vld [vmem:[%s1032_s5 + $0x18] sm:$0xff]   ;;  %v848_v52 = vld [vmem:[%s1032_s5 + $0x10] sm:$0xff]  }
  0x33   : > { %v470_v43 = vsub.s32 %v467_v40, %v469_v36  ;;  %v849_v53 = vld [vmem:[%s1032_s5 + $0x48] sm:$0xff]   ;;  %v851_v55 = vld [vmem:[%s1032_s5 + $0x40] sm:$0xff]   ;;  %v770_v2 = vld [vmem:[%s408_s8] ss:$0 sm:$0xff] }
  0x34   : > { %v850_v54 = vld [vmem:[%s1032_s5 + $0x8] sm:$0xff]   ;;  %v852_v56 = vld [vmem:[%s1032_s5] sm:$0xff]  }
  0x35   : > { %v478_v45 = vrot.slane %v464_v39, %v470_v43  ;;  %776 = vmatpush3.bf16.msra.mxu0 %v840_v42  ;;  %v471_v57 = vrot.slane %v753_v32, %v470_v43 }
  0x36   : > { %777 = vmatprep.subr.bf16.mxu0 %v841_v44 }
  0x37   : > { %609 = vmatprep.mubr.bf16.mxu0 %v478_v45  ;;  %v422_v60 = vld [vmem:[#allocation2] sm:$0x3] }
  0x39   : > { %778 = vmatpush3.bf16.msra.mxu0 %v842_v46 }
  0x3a   : > { %779 = vmatprep.subr.bf16.mxu0 %v843_v47 }
  0x3d   : > { %780 = vmatpush3.bf16.msra.mxu0 %v844_v48 }
  0x3e   : > { %781 = vmatprep.subr.bf16.mxu0 %v845_v49 }
  0x41   : > { %782 = vmatpush3.bf16.msra.mxu0 %v846_v50 }
  0x42   : > { %783 = vmatprep.subr.bf16.mxu0 %v847_v51 }
  0x45   : > { %784 = vmatpush3.bf16.msra.mxu0 %v848_v52 }
  0x46   : > { %785 = vmatprep.subr.bf16.mxu0 %v849_v53 }
  0x49   : > { %786 = vmatpush3.bf16.msra.mxu0 %v850_v54 }
  0x4a   : > { %787 = vmatprep.subr.bf16.mxu0 %v851_v55 }
  0x4d   : > { %788 = vmatpush3.bf16.msra.mxu0 %v852_v56 }
  0x50   : > { %610 = vmatmul.mubr.bf16.vlgmr.msra.gmra.mxu0 %v471_v57 }
 0x110   : > { %v789_v59 = vpop.f32.mrf.mxu0 }
 0x112   : > { %v790_v61 = vpop.f32.mrf.mxu0 }
 0x113   : > { %v791_v62 = vadd.f32 %v790_v61, %v789_v59 }
 0x114   : > { %v792_v63 = vpop.f32.mrf.mxu0 }
 0x115   : > { %v617_v0 = vadd.f32 %v791_v62, %v422_v60 }
 0x116   : > { %v793_v1 = vpop.f32.mrf.mxu0 }
 0x117   : > { %618 = vst [vmem:[#allocation2] sm:$0x3] %v617_v0 }
 0x11e   : > { %v622_v3 = vld [vmem:[#allocation2] sm:$0x3] }
 0x11f   : > { %v630_v4 = vadd.f32 %v770_v2, %v622_v3 }
 0x121   : > { %v631_v5 = vmax.f32 %v630_v4, 0.0 }
 0x123   : > { %v632_v6 = vpack.c.bf16 %v631_v5, %v631_v5 }
 0x125   : > { %633 = vst [vmem:[%s415_s11] sm:$0x1] %v632_v6 }
 0x126 PF: > { %s13_s16 = sadd.s32 1, %s891_s16   ;;  %s1077_s12 = smov %s879_s13 }
 0x127   : > { %p10_p10 = scmp.ge.s32.totalorder %s13_s16, 4   ;;  %s1078_s13 = smov %s950_s20 }
 0x128   : > { %s1079_s14 = smov %s887_s15  ;;  %s1080_s15 = smov %s1082_s17 }
 0x129   :  { %12 = sbr.rel (!%p10_p10) target bundleno = 3 (0x3), region = 122 }

// kernel: sws_resnext_forward.31
= control target key start
LH: loop header
LB: loop body
LE: loop exit
PB: predicated region body
PF: predicated region fallthrough
CT: control target
= control target key end

     0   :  { %s740_s12 = smov 0   ;;  %s742_s13 = smov 0   ;;  %s830_s0 = inlined_call_operand.vmem [shape: bf16[2,128], index: 0, kind: input, shape index: {}]   ;;  %s831_s1 = inlined_call_operand.vmem [shape: bf16[128,256], index: 1, kind: input, shape index: {}]   ;;  %s832_s2 = inlined_call_operand.vmem [shape: f32[1,256], index: 2, kind: input, shape index: {}]   ;;  %s833_s3 = inlined_call_operand.vmem [shape: bf16[2,256], index: 3, kind: output, shape index: {}]  }
   0x1   :  { %s744_s14 = smov 0   ;;  %s746_s15 = smov 0  }
   0x2   :  { %s748_s16 = smov 0  }
   0x3 LB: > { %s28_s17 = sadd.s32 1, %s712_s15  ;;  %p76_p1 = scmp.ne.s32.totalorder %s704_s13, %s700_s12  ;;  %s716_s16 = sphi %s748_s16, %s13_s16   ;;  %s712_s15 = sphi %s746_s15, %s837_s15   ;;  %s708_s14 = sphi %s744_s14, %s836_s14   ;;  %s704_s13 = sphi %s742_s13, %s835_s13   ;;  %s700_s12 = sphi %s740_s12, %s834_s12  }
   0x4   : > { %p30_p0 = scmp.ge.s32.totalorder %s28_s17, 2  ;;  %p77_p2 = scmp.eq.s32.totalorder %s716_s16, 0 }
   0x5   : > { %s69_s19 = sadd.s32 1, %s704_s13  ;;  %p583_p5 = scmp.ge.s32.totalorder %s716_s16, 2 }
   0x6   : > { %s839_s17 = smov (%p30_p0, %s28_s17), 0  ;;  %p78_p3 = por %p77_p2, %p76_p1 }
   0x7   : > { %s65_s18 = ssub.s32 %s712_s15, %s839_s17  ;;  %165 = sbr.rel (%p583_p5) target bundleno = 26 (0x1a), region = 20 }
   0x8   : > { %p67_p4 = scmp.eq.s32.totalorder %s65_s18, 0 }
   0xa   : > { %s775_s20 = scalar_select %p67_p4, %s704_s13, %s69_s19  }
   0xc   : > { %168 = sbr.rel (!%p78_p3) target bundleno = 26 (0x1a), region = 24  ;;  %s170_s21 = sand.u32 (%p78_p3), 1, %s704_s13  }
   0xd   : > { %s585_s22 = sshll.u32 (%p78_p3), %s712_s15, 2  ;;  %s584_s23 = sshll.u32 (%p78_p3), %s170_s21, 6 }
   0xe   : > { %s783_s26 = scalar_lea.vmem (%p78_p3), %s831_s1, %s585_s22  ;;  %s172_s27 = scalar_lea.vmem (%p78_p3), [#allocation3], %s584_s23 }
   0xf   : > { %v194_v0 = vld [vmem:[%s783_s26] sm:$0xf] (%p78_p3)  ;;  %v196_v1 = vld [vmem:[%s783_s26 + $0x8] sm:$0xf] (%p78_p3)  ;;  %v198_v2 = vld [vmem:[%s783_s26 + $0x10] sm:$0xf] (%p78_p3) }
  0x10   : > { %195 = vst [vmem:[%s172_s27] sm:$0xf] (%p78_p3), %v194_v0  ;;  %197 = vst [vmem:[%s172_s27 + $0x4] sm:$0xf] (%p78_p3), %v196_v1  ;;  %v200_v3 = vld [vmem:[%s783_s26 + $0x18] sm:$0xf] (%p78_p3) }
  0x11   : > { %v202_v4 = vld [vmem:[%s783_s26 + $0x20] sm:$0xf]  ;;  %199 = vst [vmem:[%s172_s27 + $0x8] sm:$0xf] %v198_v2  ;;  %201 = vst [vmem:[%s172_s27 + $0xc] sm:$0xf] %v200_v3 }
  0x12   : > { %203 = vst [vmem:[%s172_s27 + $0x10] sm:$0xf] %v202_v4  ;;  %v204_v5 = vld [vmem:[%s783_s26 + $0x28] sm:$0xf]  ;;  %v206_v6 = vld [vmem:[%s783_s26 + $0x30] sm:$0xf] }
  0x13   : > { %v208_v7 = vld [vmem:[%s783_s26 + $0x38] sm:$0xf]  ;;  %205 = vst [vmem:[%s172_s27 + $0x14] sm:$0xf] %v204_v5  ;;  %207 = vst [vmem:[%s172_s27 + $0x18] sm:$0xf] %v206_v6 }
  0x14   : > { %209 = vst [vmem:[%s172_s27 + $0x1c] sm:$0xf] %v208_v7  ;;  %v210_v8 = vld [vmem:[%s783_s26 + $0x40] sm:$0xf]  ;;  %v212_v9 = vld [vmem:[%s783_s26 + $0x48] sm:$0xf] }
  0x15   : > { %v214_v10 = vld [vmem:[%s783_s26 + $0x50] sm:$0xf]  ;;  %211 = vst [vmem:[%s172_s27 + $0x20] sm:$0xf] %v210_v8  ;;  %213 = vst [vmem:[%s172_s27 + $0x24] sm:$0xf] %v212_v9 }
  0x16   : > { %215 = vst [vmem:[%s172_s27 + $0x28] sm:$0xf] %v214_v10  ;;  %v216_v11 = vld [vmem:[%s783_s26 + $0x58] sm:$0xf]  ;;  %v218_v12 = vld [vmem:[%s783_s26 + $0x60] sm:$0xf] }
  0x17   : > { %v220_v13 = vld [vmem:[%s783_s26 + $0x68] sm:$0xf]  ;;  %217 = vst [vmem:[%s172_s27 + $0x2c] sm:$0xf] %v216_v11  ;;  %219 = vst [vmem:[%s172_s27 + $0x30] sm:$0xf] %v218_v12 }
  0x18   : > { %221 = vst [vmem:[%s172_s27 + $0x34] sm:$0xf] %v220_v13  ;;  %v222_v14 = vld [vmem:[%s783_s26 + $0x70] sm:$0xf]  ;;  %v224_v15 = vld [vmem:[%s783_s26 + $0x78] sm:$0xf] }
  0x19   : > { %223 = vst [vmem:[%s172_s27 + $0x38] sm:$0xf] %v222_v14  ;;  %225 = vst [vmem:[%s172_s27 + $0x3c] sm:$0xf] %v224_v15 }
  0x1a PF: > { %p586_p6 = scmp.ge.s32.totalorder %s716_s16, 1  ;;  %p286_p7 = scmp.lt.s32.totalorder %s716_s16, 3 }
  0x1c   : > { %p287_p8 = pnand %p586_p6, %p286_p7 }
  0x1d   : > { %s293_s28 = sand.u32 (!%p287_p8), 1, %s700_s12   ;;  %p334_p9 = scmp.lt.s32.totalorder (!%p287_p8), %s708_s14, 1 }
  0x1e   : > { %290 = sbr.rel (%p287_p8) target bundleno = 276 (0x114), region = 69  ;;  %s587_s29 = sshll.u32 (!%p287_p8), %s293_s28, 6 }
  0x1f   : > { %s295_s30 = scalar_lea.vmem (!%p287_p8), [#allocation3], %s587_s29 }
  0x23   : > { %v718_v16 = vmov 0.0   ;;  %vm719_vm0 = vmmov 0   ;;  %v670_v17 = vld [vmem:[%s295_s30 + $0x38] sm:$0xff]   ;;  %v671_v18 = vld [vmem:[%s295_s30 + $0x30] sm:$0xff]   ;;  %v672_v19 = vld [vmem:[%s295_s30 + $0x28] sm:$0xff]   ;;  %s841_s14 = smov (!%p334_p9, %s708_s14), 1 }
  0x24   : > { %608 = vmatprep.subr.bf16.mxu0 %v718_v16  ;;  %349 = vst [vmem:[#allocation2] sm:$0x3] %v718_v16  ;;  %624 = vmatprep.mubr.msk.bf16.mxu0 %vm719_vm0, %v718_v16  ;;  %v673_v20 = vld [vmem:[%s295_s30 + $0x20] sm:$0xff]   ;;  %v674_v21 = vld [vmem:[%s295_s30 + $0x18] sm:$0xff]   ;;  %v675_v22 = vld [vmem:[%s295_s30 + $0x10] sm:$0xff]   ;;  %s336_s8 = scalar_lea.vmem %s832_s2, %s841_s14  ;;  %s343_s11 = scalar_lea.vmem %s833_s3, %s841_s14 }
  0x25   : > { %609 = vmatpush3.bf16.msra.mxu0 %v670_v17  ;;  %v676_v23 = vld [vmem:[%s295_s30 + $0x8] sm:$0xff]   ;;  %v677_v24 = vld [vmem:[%s295_s30] sm:$0xff]   ;;  %v351_v25 = vld [vmem:[%s830_s0] sm:$0x1] }
  0x26   : > { %610 = vmatprep.subr.bf16.mxu0 %v718_v16  ;;  %v596_v32 = vld [vmem:[%s336_s8] ss:$0 sm:$0xff] }
  0x29   : > { %611 = vmatpush3.bf16.msra.mxu0 %v671_v18 }
  0x2a   : > { %612 = vmatprep.subr.bf16.mxu0 %v718_v16 }
  0x2b   : > { %v350_v26 = vld [vmem:[#allocation2] sm:$0x3] }
  0x2d   : > { %613 = vmatpush3.bf16.msra.mxu0 %v672_v19 }
  0x2e   : > { %614 = vmatprep.subr.bf16.mxu0 %v718_v16 }
  0x31   : > { %615 = vmatpush3.bf16.msra.mxu0 %v673_v20 }
  0x32   : > { %616 = vmatprep.subr.bf16.mxu0 %v718_v16 }
  0x35   : > { %617 = vmatpush3.bf16.msra.mxu0 %v674_v21 }
  0x36   : > { %618 = vmatprep.subr.bf16.mxu0 %v718_v16 }
  0x39   : > { %619 = vmatpush3.bf16.msra.mxu0 %v675_v22 }
  0x3a   : > { %620 = vmatprep.subr.bf16.mxu0 %v718_v16 }
  0x3d   : > { %621 = vmatpush3.bf16.msra.mxu0 %v676_v23 }
  0x3e   : > { %622 = vmatprep.subr.bf16.mxu0 %v718_v16 }
  0x41   : > { %623 = vmatpush3.bf16.msra.mxu0 %v677_v24 }
  0x44   : > { %625 = vmatmul.mubr.bf16.vlgmr.msra.gmra.mxu0 %v351_v25 }
 0x104   : > { %v450_v27 = vpop.f32.mrf.mxu0 }
 0x105   : > { %v456_v28 = vadd.f32 %v450_v27, %v350_v26 }
 0x106   : > { %v626_v29 = vpop.f32.mrf.mxu0 }
 0x107   : > { %457 = vst [vmem:[#allocation2] sm:$0x3] %v456_v28 }
 0x108   : > { %v453_v30 = vpop.f32.mrf.mxu0 }
 0x10a   : > { %v627_v31 = vpop.f32.mrf.mxu0 }
 0x10e   : > { %v461_v33 = vld [vmem:[#allocation2] sm:$0x3] }
 0x10f   : > { %v469_v34 = vadd.f32 %v596_v32, %v461_v33 }
 0x111   : > { %v470_v35 = vpack.c.bf16 %v469_v34, %v469_v34 }
 0x113   : > { %471 = vst [vmem:[%s343_s11] sm:$0x1] %v470_v35 }
 0x114 PF: > { %s13_s16 = sadd.s32 1, %s716_s16   ;;  %s834_s12 = smov %s704_s13 }
 0x115   : > { %p10_p10 = scmp.ge.s32.totalorder %s13_s16, 4   ;;  %s835_s13 = smov %s775_s20 }
 0x116   : > { %s836_s14 = smov %s712_s15  ;;  %s837_s15 = smov %s839_s17 }
 0x117   :  { %12 = sbr.rel (!%p10_p10) target bundleno = 3 (0x3), region = 122 }

// kernel: sws_resnext_forward.32
= control target key start
LH: loop header
LB: loop body
LE: loop exit
PB: predicated region body
PF: predicated region fallthrough
CT: control target
= control target key end

     0   :  { %s819_s15 = smov 0   ;;  %s821_s16 = smov 0   ;;  %s912_s0 = inlined_call_operand.vmem [shape: bf16[2,128], index: 0, kind: input, shape index: {}]   ;;  %s913_s1 = inlined_call_operand.vmem [shape: bf16[128,256], index: 1, kind: input, shape index: {}]   ;;  %s914_s2 = inlined_call_operand.vmem [shape: f32[1,256], index: 2, kind: input, shape index: {}]   ;;  %s915_s3 = inlined_call_operand.vmem [shape: bf16[2,256], index: 3, kind: input, shape index: {}]   ;;  %s916_s4 = inlined_call_operand.vmem [shape: bf16[2,256], index: 4, kind: output, shape index: {}]  }
   0x1   :  { %s823_s17 = smov 0   ;;  %s825_s18 = smov 0  }
   0x2   :  { %s827_s19 = smov 0  }
   0x3 LB: > { %s29_s20 = sadd.s32 1, %s786_s18  ;;  %p77_p1 = scmp.ne.s32.totalorder %s778_s16, %s774_s15  ;;  %s790_s19 = sphi %s827_s19, %s14_s19   ;;  %s786_s18 = sphi %s825_s18, %s920_s18   ;;  %s782_s17 = sphi %s823_s17, %s919_s17   ;;  %s778_s16 = sphi %s821_s16, %s918_s16   ;;  %s774_s15 = sphi %s819_s15, %s917_s15  }
   0x4   : > { %p31_p0 = scmp.ge.s32.totalorder %s29_s20, 2  ;;  %p78_p2 = scmp.eq.s32.totalorder %s790_s19, 0 }
   0x5   : > { %s70_s22 = sadd.s32 1, %s778_s16  ;;  %p657_p5 = scmp.ge.s32.totalorder %s790_s19, 2 }
   0x6   : > { %s922_s20 = smov (%p31_p0, %s29_s20), 0  ;;  %p79_p3 = por %p78_p2, %p77_p1 }
   0x7   : > { %s66_s21 = ssub.s32 %s786_s18, %s922_s20  ;;  %194 = sbr.rel (%p657_p5) target bundleno = 26 (0x1a), region = 20 }
   0x8   : > { %p68_p4 = scmp.eq.s32.totalorder %s66_s21, 0 }
   0xa   : > { %s854_s23 = scalar_select %p68_p4, %s778_s16, %s70_s22  }
   0xc   : > { %197 = sbr.rel (!%p79_p3) target bundleno = 26 (0x1a), region = 24  ;;  %s199_s24 = sand.u32 (%p79_p3), 1, %s778_s16  }
   0xd   : > { %s659_s25 = sshll.u32 (%p79_p3), %s786_s18, 2  ;;  %s658_s26 = sshll.u32 (%p79_p3), %s199_s24, 6 }
   0xe   : > { %s862_s29 = scalar_lea.vmem (%p79_p3), %s913_s1, %s659_s25  ;;  %s201_s30 = scalar_lea.vmem (%p79_p3), [#allocation3], %s658_s26 }
   0xf   : > { %v223_v0 = vld [vmem:[%s862_s29] sm:$0xf] (%p79_p3)  ;;  %v225_v1 = vld [vmem:[%s862_s29 + $0x8] sm:$0xf] (%p79_p3)  ;;  %v227_v2 = vld [vmem:[%s862_s29 + $0x10] sm:$0xf] (%p79_p3) }
  0x10   : > { %224 = vst [vmem:[%s201_s30] sm:$0xf] (%p79_p3), %v223_v0  ;;  %226 = vst [vmem:[%s201_s30 + $0x4] sm:$0xf] (%p79_p3), %v225_v1  ;;  %v229_v3 = vld [vmem:[%s862_s29 + $0x18] sm:$0xf] (%p79_p3) }
  0x11   : > { %v231_v4 = vld [vmem:[%s862_s29 + $0x20] sm:$0xf]  ;;  %228 = vst [vmem:[%s201_s30 + $0x8] sm:$0xf] %v227_v2  ;;  %230 = vst [vmem:[%s201_s30 + $0xc] sm:$0xf] %v229_v3 }
  0x12   : > { %232 = vst [vmem:[%s201_s30 + $0x10] sm:$0xf] %v231_v4  ;;  %v233_v5 = vld [vmem:[%s862_s29 + $0x28] sm:$0xf]  ;;  %v235_v6 = vld [vmem:[%s862_s29 + $0x30] sm:$0xf] }
  0x13   : > { %v237_v7 = vld [vmem:[%s862_s29 + $0x38] sm:$0xf]  ;;  %234 = vst [vmem:[%s201_s30 + $0x14] sm:$0xf] %v233_v5  ;;  %236 = vst [vmem:[%s201_s30 + $0x18] sm:$0xf] %v235_v6 }
  0x14   : > { %238 = vst [vmem:[%s201_s30 + $0x1c] sm:$0xf] %v237_v7  ;;  %v239_v8 = vld [vmem:[%s862_s29 + $0x40] sm:$0xf]  ;;  %v241_v9 = vld [vmem:[%s862_s29 + $0x48] sm:$0xf] }
  0x15   : > { %v243_v10 = vld [vmem:[%s862_s29 + $0x50] sm:$0xf]  ;;  %240 = vst [vmem:[%s201_s30 + $0x20] sm:$0xf] %v239_v8  ;;  %242 = vst [vmem:[%s201_s30 + $0x24] sm:$0xf] %v241_v9 }
  0x16   : > { %244 = vst [vmem:[%s201_s30 + $0x28] sm:$0xf] %v243_v10  ;;  %v245_v11 = vld [vmem:[%s862_s29 + $0x58] sm:$0xf]  ;;  %v247_v12 = vld [vmem:[%s862_s29 + $0x60] sm:$0xf] }
  0x17   : > { %v249_v13 = vld [vmem:[%s862_s29 + $0x68] sm:$0xf]  ;;  %246 = vst [vmem:[%s201_s30 + $0x2c] sm:$0xf] %v245_v11  ;;  %248 = vst [vmem:[%s201_s30 + $0x30] sm:$0xf] %v247_v12 }
  0x18   : > { %250 = vst [vmem:[%s201_s30 + $0x34] sm:$0xf] %v249_v13  ;;  %v251_v14 = vld [vmem:[%s862_s29 + $0x70] sm:$0xf]  ;;  %v253_v15 = vld [vmem:[%s862_s29 + $0x78] sm:$0xf] }
  0x19   : > { %252 = vst [vmem:[%s201_s30 + $0x38] sm:$0xf] %v251_v14  ;;  %254 = vst [vmem:[%s201_s30 + $0x3c] sm:$0xf] %v253_v15 }
  0x1a PF: > { %p660_p6 = scmp.ge.s32.totalorder %s790_s19, 1  ;;  %p325_p7 = scmp.lt.s32.totalorder %s790_s19, 3 }
  0x1c   : > { %p326_p8 = pnand %p660_p6, %p325_p7 }
  0x1d   : > { %s332_s5 = sand.u32 (!%p326_p8), 1, %s774_s15   ;;  %p382_p9 = scmp.lt.s32.totalorder (!%p326_p8), %s782_s17, 1 }
  0x1e   : > { %329 = sbr.rel (%p326_p8) target bundleno = 280 (0x118), region = 73  ;;  %s661_s6 = sshll.u32 (!%p326_p8), %s332_s5, 6 }
  0x1f   : > { %s334_s7 = scalar_lea.vmem (!%p326_p8), [#allocation3], %s661_s6 }
  0x23   : > { %v792_v16 = vmov 0.0   ;;  %vm793_vm0 = vmmov 0   ;;  %v744_v17 = vld [vmem:[%s334_s7 + $0x38] sm:$0xff]   ;;  %v745_v18 = vld [vmem:[%s334_s7 + $0x30] sm:$0xff]   ;;  %v746_v19 = vld [vmem:[%s334_s7 + $0x28] sm:$0xff]   ;;  %s924_s17 = smov (!%p382_p9, %s782_s17), 1 }
  0x24   : > { %682 = vmatprep.subr.bf16.mxu0 %v792_v16  ;;  %404 = vst [vmem:[#allocation2] sm:$0x3] %v792_v16  ;;  %698 = vmatprep.mubr.msk.bf16.mxu0 %vm793_vm0, %v792_v16  ;;  %v747_v20 = vld [vmem:[%s334_s7 + $0x20] sm:$0xff]   ;;  %v748_v21 = vld [vmem:[%s334_s7 + $0x18] sm:$0xff]   ;;  %v749_v22 = vld [vmem:[%s334_s7 + $0x10] sm:$0xff]   ;;  %s391_s12 = scalar_lea.vmem %s915_s3, %s924_s17  ;;  %s384_s15 = scalar_lea.vmem %s914_s2, %s924_s17 }
  0x25   : > { %683 = vmatpush3.bf16.msra.mxu0 %v744_v17  ;;  %v750_v23 = vld [vmem:[%s334_s7 + $0x8] sm:$0xff]   ;;  %v751_v24 = vld [vmem:[%s334_s7] sm:$0xff]   ;;  %v406_v25 = vld [vmem:[%s912_s0] sm:$0x1]  ;;  %s398_s24 = scalar_lea.vmem %s916_s4, %s924_s17 }
  0x26   : > { %684 = vmatprep.subr.bf16.mxu0 %v792_v16  ;;  %v525_v31 = vld [vmem:[%s391_s12] sm:$0x1] }
  0x27   : > { %v670_v33 = vld [vmem:[%s384_s15] ss:$0 sm:$0xff]  ;;  %v526_v34 = vunpack.c.l.bf16 %v525_v31 }
  0x29   : > { %685 = vmatpush3.bf16.msra.mxu0 %v745_v18 }
  0x2a   : > { %686 = vmatprep.subr.bf16.mxu0 %v792_v16 }
  0x2b   : > { %v405_v26 = vld [vmem:[#allocation2] sm:$0x3] }
  0x2d   : > { %687 = vmatpush3.bf16.msra.mxu0 %v746_v19 }
  0x2e   : > { %688 = vmatprep.subr.bf16.mxu0 %v792_v16 }
  0x31   : > { %689 = vmatpush3.bf16.msra.mxu0 %v747_v20 }
  0x32   : > { %690 = vmatprep.subr.bf16.mxu0 %v792_v16 }
  0x35   : > { %691 = vmatpush3.bf16.msra.mxu0 %v748_v21 }
  0x36   : > { %692 = vmatprep.subr.bf16.mxu0 %v792_v16 }
  0x39   : > { %693 = vmatpush3.bf16.msra.mxu0 %v749_v22 }
  0x3a   : > { %694 = vmatprep.subr.bf16.mxu0 %v792_v16 }
  0x3d   : > { %695 = vmatpush3.bf16.msra.mxu0 %v750_v23 }
  0x3e   : > { %696 = vmatprep.subr.bf16.mxu0 %v792_v16 }
  0x41   : > { %697 = vmatpush3.bf16.msra.mxu0 %v751_v24 }
  0x44   : > { %699 = vmatmul.mubr.bf16.vlgmr.msra.gmra.mxu0 %v406_v25 }
 0x104   : > { %v505_v27 = vpop.f32.mrf.mxu0 }
 0x105   : > { %v511_v28 = vadd.f32 %v505_v27, %v405_v26 }
 0x106   : > { %v700_v29 = vpop.f32.mrf.mxu0 }
 0x107   : > { %512 = vst [vmem:[#allocation2] sm:$0x3] %v511_v28 }
 0x108   : > { %v508_v30 = vpop.f32.mrf.mxu0 }
 0x10a   : > { %v701_v32 = vpop.f32.mrf.mxu0 }
 0x10e   : > { %v516_v35 = vld [vmem:[#allocation2] sm:$0x3] }
 0x10f   : > { %v524_v36 = vadd.f32 %v670_v33, %v516_v35 }
 0x111   : > { %v527_v37 = vadd.f32 %v526_v34, %v524_v36 }
 0x113   : > { %v528_v38 = vmax.f32 %v527_v37, 0.0 }
 0x115   : > { %v529_v39 = vpack.c.bf16 %v528_v38, %v528_v38 }
 0x117   : > { %530 = vst [vmem:[%s398_s24] sm:$0x1] %v529_v39 }
 0x118 PF: > { %s14_s19 = sadd.s32 1, %s790_s19   ;;  %s917_s15 = smov %s778_s16 }
 0x119   : > { %p11_p10 = scmp.ge.s32.totalorder %s14_s19, 4   ;;  %s918_s16 = smov %s854_s23 }
 0x11a   : > { %s919_s17 = smov %s786_s18  ;;  %s920_s18 = smov %s922_s20 }
 0x11b   :  { %13 = sbr.rel (!%p11_p10) target bundleno = 3 (0x3), region = 129 }

// kernel: sws_resnext_forward.30
= control target key start
LH: loop header
LB: loop body
LE: loop exit
PB: predicated region body
PF: predicated region fallthrough
CT: control target
= control target key end

     0   :  { %s1299_s12 = smov 0   ;;  %s1301_s13 = smov 0   ;;  %s1464_s0 = inlined_call_operand.vmem [shape: bf16[32,2,36], index: 0, kind: input, shape index: {}]   ;;  %s1465_s1 = inlined_call_operand.vmem [shape: bf16[32,36,4], index: 1, kind: input, shape index: {}]   ;;  %s1466_s2 = inlined_call_operand.vmem [shape: f32[32,1,4], index: 2, kind: input, shape index: {}]   ;;  %s1467_s3 = inlined_call_operand.vmem [shape: bf16[32,2,4], index: 3, kind: output, shape index: {}]  }
   0x1   :  { %s1303_s14 = smov 0  }
   0x2 LB: > { %s22_s15 = sadd.s32 1, %s1271_s13  ;;  %p986_p0 = scmp.ge.s32.totalorder %s1275_s14, 1  ;;  %s1275_s14 = sphi %s1303_s14, %s13_s14   ;;  %s1271_s13 = sphi %s1301_s13, %s1469_s13   ;;  %s1267_s12 = sphi %s1299_s12, %s1468_s12  }
   0x3   : > { %p23_p1 = scmp.ge.s32.totalorder %s22_s15, 4  ;;  %p178_p2 = scmp.lt.s32.totalorder %s1275_s14, 5 }
   0x5   : > { %s1471_s15 = smov (%p23_p1, %s22_s15), 0  ;;  %p179_p3 = pnand %p986_p0, %p178_p2 }
   0x6   : > { %s987_s16 = sshll.u32 (!%p179_p3), %s1267_s12, 3 }
   0x7   : > { %182 = sbr.rel (%p179_p3) target bundleno = 265 (0x109), region = 32  ;;  %p217_p4 = scmp.lt.s32.totalorder (!%p179_p3), %s987_s16, 31 }
   0xc   : > { %v1277_v0 = vmov 0.0   ;;  %vm1278_vm0 = vmmov 0   ;;  %s1473_s16 = smov (!%p217_p4, %s987_s16), 31  ;;  %vm277_vm1 = vcmask 1041408   ;;  %vm273_vm2 = vcmask 293888  }
   0xd   : > { %1122 = vmatprep.subr.bf16.mxu0 %v1277_v0  ;;  %1132 = vmatprep.subr.bf16.mxu1 %v1277_v0  ;;  %s1202_s17 = smul.u32 20, %s1473_s16  ;;  %s1348_s23 = scalar_lea.vmem %s1464_s0, %s1473_s16  ;;  %vm323_vm3 = vcmask 24576  }
   0xe   : > { %1128 = vmatprep.mubr.msk.bf16.mxu0 %vm1278_vm0, %v1277_v0  ;;  %1138 = vmatprep.mubr.msk.bf16.mxu1 %vm1278_vm0, %v1277_v0  ;;  %v245_v11 = vld [vmem:[%s1348_s23] sm:$0x1]  ;;  %v997_v12 = vld [vmem:[%s1348_s23 + $0x1] sm:$0x1]  ;;  %v1010_v21 = vld [vmem:[%s1348_s23 + $0x2] sm:$0x1]  ;;  %s1423_s26 = scalar_lea.vmem %s1466_s2, %s1473_s16  ;;  %s1431_s29 = scalar_lea.vmem %s1467_s3, %s1473_s16 }
   0xf   : > { %s1329_s20 = scalar_lea.vmem %s1465_s1, %s1202_s17  ;;  %v1023_v22 = vld [vmem:[%s1348_s23 + $0x3] sm:$0x1]  ;;  %v1036_v31 = vld [vmem:[%s1348_s23 + $0x4] sm:$0x1]  ;;  %v1049_v32 = vld [vmem:[%s1348_s23 + $0x5] sm:$0x1] }
  0x10   : > { %v1229_v1 = vld [vmem:[%s1329_s20 + $0x10] ss:$0 sps:$4 sm:$0x33]   ;;  %v1230_v2 = vld [vmem:[%s1329_s20 + $0x24] ss:$0 sps:$4 sm:$0x33]  }
  0x11   : > { %v279_v3 = vsel %vm277_vm1, %v1229_v1, 0  ;;  %v1231_v4 = vld [vmem:[%s1329_s20 + $0x8] sm:$0xff]   ;;  %v360_v5 = vsel %vm277_vm1, %v1230_v2, 0  ;;  %v1232_v6 = vld [vmem:[%s1329_s20 + $0x1c] sm:$0xff]   ;;  %v1234_v10 = vld [vmem:[%s1329_s20 + $0x14] sm:$0xff]  }
  0x12   : > { %1123 = vmatpush3.bf16.msra.mxu0 %v279_v3  ;;  %1133 = vmatpush3.bf16.msra.mxu1 %v360_v5  ;;  %v1235_v7 = vld [vmem:[%s1329_s20 + $0x38] ss:$0 sps:$4 sm:$0x33]   ;;  %v1233_v8 = vld [vmem:[%s1329_s20] sm:$0xff]   ;;  %v1237_v15 = vld [vmem:[%s1329_s20 + $0x30] sm:$0xff]  }
  0x13   : > { %1124 = vmatprep.subr.bf16.mxu0 %v1277_v0  ;;  %1134 = vmatprep.subr.bf16.mxu1 %v1277_v0  ;;  %v1236_v9 = vld [vmem:[%s1329_s20 + $0x4c] ss:$0 sps:$4 sm:$0x33]   ;;  %v441_v13 = vsel %vm277_vm1, %v1235_v7, 0  ;;  %v1238_v16 = vld [vmem:[%s1329_s20 + $0x44] sm:$0xff]   ;;  %v1240_v20 = vld [vmem:[%s1329_s20 + $0x3c] sm:$0xff]  }
  0x14   : > { %v522_v14 = vsel %vm277_vm1, %v1236_v9, 0  ;;  %v1241_v17 = vld [vmem:[%s1329_s20 + $0x60] ss:$0 sps:$4 sm:$0x33]   ;;  %v1239_v18 = vld [vmem:[%s1329_s20 + $0x28] sm:$0xff]   ;;  %v1243_v25 = vld [vmem:[%s1329_s20 + $0x58] sm:$0xff]  }
  0x15   : > { %v1242_v19 = vld [vmem:[%s1329_s20 + $0x74] ss:$0 sps:$4 sm:$0x33]   ;;  %v603_v23 = vsel %vm277_vm1, %v1241_v17, 0  ;;  %v1244_v26 = vld [vmem:[%s1329_s20 + $0x6c] sm:$0xff]   ;;  %v1246_v28 = vld [vmem:[%s1329_s20 + $0x64] sm:$0xff]  }
  0x16   : > { %1125 = vmatpush3.bf16.msra.mxu0 %v1231_v4  ;;  %1135 = vmatpush3.bf16.msra.mxu1 %v1232_v6  ;;  %v684_v24 = vsel %vm277_vm1, %v1242_v19, 0  ;;  %v1245_v27 = vld [vmem:[%s1329_s20 + $0x50] sm:$0xff]   ;;  %v1247_v29 = vld [vmem:[%s1329_s20 + $0x88] ss:$0 sps:$4 sm:$0x33]   ;;  %v1249_v35 = vld [vmem:[%s1329_s20 + $0x80] sm:$0xff]  }
  0x17   : > { %1126 = vmatprep.subr.bf16.mxu0 %v1277_v0  ;;  %1136 = vmatprep.subr.bf16.mxu1 %v1277_v0  ;;  %v1248_v30 = vld [vmem:[%s1329_s20 + $0x9c] ss:$0 sps:$4 sm:$0x33]   ;;  %v765_v33 = vsel %vm277_vm1, %v1247_v29, 0  ;;  %v1250_v36 = vld [vmem:[%s1329_s20 + $0x94] sm:$0xff]   ;;  %v1252_v38 = vld [vmem:[%s1329_s20 + $0x8c] sm:$0xff]  }
  0x18   : > { %v846_v34 = vsel %vm277_vm1, %v1248_v30, 0  ;;  %v1251_v37 = vld [vmem:[%s1329_s20 + $0x78] sm:$0xff]   ;;  %v1062_v39 = vld [vmem:[%s1348_s23 + $0x6] sm:$0x1]  ;;  %v1075_v40 = vld [vmem:[%s1348_s23 + $0x7] sm:$0x1] }
  0x19   : > { %v992_v41 = vld [vmem:[%s1423_s26] ss:$0 sm:$0xff]  ;;  %v1004_v42 = vld [vmem:[%s1423_s26 + $0x1] ss:$0 sm:$0xff]  ;;  %v1017_v57 = vld [vmem:[%s1423_s26 + $0x2] ss:$0 sm:$0xff] }
  0x1a   : > { %1127 = vmatpush3.bf16.msra.mxu0 %v1233_v8  ;;  %1137 = vmatpush3.bf16.msra.mxu1 %v1234_v10  ;;  %v1030_v58 = vld [vmem:[%s1423_s26 + $0x3] ss:$0 sm:$0xff]  ;;  %v1043_v9 = vld [vmem:[%s1423_s26 + $0x4] ss:$0 sm:$0xff]  ;;  %v1056_v10 = vld [vmem:[%s1423_s26 + $0x5] ss:$0 sm:$0xff] }
  0x1b   : > { %1142 = vmatprep.subr.bf16.mxu0 %v1277_v0  ;;  %1152 = vmatprep.subr.bf16.mxu1 %v1277_v0 }
  0x1d   : > { %1129 = vmatmul.mubr.msk.bf16.vlgmr.msra.gmra.mxu0 %vm273_vm2, %v245_v11  ;;  %1139 = vmatmul.mubr.msk.bf16.vlgmr.msra.gmra.mxu1 %vm273_vm2, %v997_v12 }
  0x1e   : > { %1143 = vmatpush3.bf16.msra.mxu0 %v441_v13  ;;  %1153 = vmatpush3.bf16.msra.mxu1 %v522_v14 }
  0x1f   : > { %1144 = vmatprep.subr.bf16.mxu0 %v1277_v0  ;;  %1154 = vmatprep.subr.bf16.mxu1 %v1277_v0 }
  0x20   : > { %1148 = vmatprep.mubr.msk.bf16.mxu0 %vm1278_vm0, %v1277_v0  ;;  %1158 = vmatprep.mubr.msk.bf16.mxu1 %vm1278_vm0, %v1277_v0 }
  0x22   : > { %1145 = vmatpush3.bf16.msra.mxu0 %v1237_v15  ;;  %1155 = vmatpush3.bf16.msra.mxu1 %v1238_v16 }
  0x23   : > { %1146 = vmatprep.subr.bf16.mxu0 %v1277_v0  ;;  %1156 = vmatprep.subr.bf16.mxu1 %v1277_v0 }
  0x26   : > { %1147 = vmatpush3.bf16.msra.mxu0 %v1239_v18  ;;  %1157 = vmatpush3.bf16.msra.mxu1 %v1240_v20 }
  0x27   : > { %1162 = vmatprep.subr.bf16.mxu0 %v1277_v0  ;;  %1172 = vmatprep.subr.bf16.mxu1 %v1277_v0 }
  0x29   : > { %1149 = vmatmul.mubr.msk.bf16.vlgmr.msra.gmra.mxu0 %vm273_vm2, %v1010_v21  ;;  %1159 = vmatmul.mubr.msk.bf16.vlgmr.msra.gmra.mxu1 %vm273_vm2, %v1023_v22 }
  0x2a   : > { %1163 = vmatpush3.bf16.msra.mxu0 %v603_v23  ;;  %1173 = vmatpush3.bf16.msra.mxu1 %v684_v24 }
  0x2b   : > { %1164 = vmatprep.subr.bf16.mxu0 %v1277_v0  ;;  %1174 = vmatprep.subr.bf16.mxu1 %v1277_v0 }
  0x2c   : > { %1168 = vmatprep.mubr.msk.bf16.mxu0 %vm1278_vm0, %v1277_v0  ;;  %1178 = vmatprep.mubr.msk.bf16.mxu1 %vm1278_vm0, %v1277_v0 }
  0x2e   : > { %1165 = vmatpush3.bf16.msra.mxu0 %v1243_v25  ;;  %1175 = vmatpush3.bf16.msra.mxu1 %v1244_v26  ;;  %v1069_v25 = vld [vmem:[%s1423_s26 + $0x6] ss:$0 sm:$0xff]  ;;  %v1082_v26 = vld [vmem:[%s1423_s26 + $0x7] ss:$0 sm:$0xff] }
  0x2f   : > { %1166 = vmatprep.subr.bf16.mxu0 %v1277_v0  ;;  %1176 = vmatprep.subr.bf16.mxu1 %v1277_v0 }
  0x32   : > { %1167 = vmatpush3.bf16.msra.mxu0 %v1245_v27  ;;  %1177 = vmatpush3.bf16.msra.mxu1 %v1246_v28 }
  0x33   : > { %1182 = vmatprep.subr.bf16.mxu0 %v1277_v0  ;;  %1192 = vmatprep.subr.bf16.mxu1 %v1277_v0 }
  0x35   : > { %1169 = vmatmul.mubr.msk.bf16.vlgmr.msra.gmra.mxu0 %vm273_vm2, %v1036_v31  ;;  %1179 = vmatmul.mubr.msk.bf16.vlgmr.msra.gmra.mxu1 %vm273_vm2, %v1049_v32 }
  0x36   : > { %1183 = vmatpush3.bf16.msra.mxu0 %v765_v33  ;;  %1193 = vmatpush3.bf16.msra.mxu1 %v846_v34 }
  0x37   : > { %1184 = vmatprep.subr.bf16.mxu0 %v1277_v0  ;;  %1194 = vmatprep.subr.bf16.mxu1 %v1277_v0 }
  0x38   : > { %1188 = vmatprep.mubr.msk.bf16.mxu0 %vm1278_vm0, %v1277_v0  ;;  %1198 = vmatprep.mubr.msk.bf16.mxu1 %vm1278_vm0, %v1277_v0 }
  0x3a   : > { %1185 = vmatpush3.bf16.msra.mxu0 %v1249_v35  ;;  %1195 = vmatpush3.bf16.msra.mxu1 %v1250_v36 }
  0x3b   : > { %1186 = vmatprep.subr.bf16.mxu0 %v1277_v0  ;;  %1196 = vmatprep.subr.bf16.mxu1 %v1277_v0 }
  0x3e   : > { %1187 = vmatpush3.bf16.msra.mxu0 %v1251_v37  ;;  %1197 = vmatpush3.bf16.msra.mxu1 %v1252_v38 }
  0x41   : > { %1189 = vmatmul.mubr.msk.bf16.vlgmr.msra.gmra.mxu0 %vm273_vm2, %v1062_v39  ;;  %1199 = vmatmul.mubr.msk.bf16.vlgmr.msra.gmra.mxu1 %vm273_vm2, %v1075_v40 }
  0xdd   : > { %v315_v43 = vpop.f32.mrf.mxu0  ;;  %v396_v45 = vpop.f32.mrf.mxu1 }
  0xde   : > { %v316_v44 = vadd.f32 %v992_v41, %v315_v43  ;;  %v397_v46 = vadd.f32 %v1004_v42, %v396_v45 }
  0xdf   : > { %v1130_v47 = vpop.f32.mrf.mxu0  ;;  %v1140_v49 = vpop.f32.mrf.mxu1 }
  0xe0   : > { %v321_v48 = vmax.f32 %v316_v44, 0.0  ;;  %v402_v50 = vmax.f32 %v397_v46, 0.0 }
  0xe1   : > { %v318_v51 = vpop.f32.mrf.mxu0  ;;  %v399_v53 = vpop.f32.mrf.mxu1 }
  0xe2   : > { %v322_v52 = vpack.c.bf16 %v321_v48, %v321_v48  ;;  %v403_v54 = vpack.c.bf16 %v402_v50, %v402_v50 }
  0xe3   : > { %v1131_v55 = vpop.f32.mrf.mxu0  ;;  %v1141_v56 = vpop.f32.mrf.mxu1 }
  0xe4   : > { %324 = vst.msk [vmem:[%s1431_s29] sm:$0x1] %vm323_vm3, %v322_v52  ;;  %1009 = vst.msk [vmem:[%s1431_s29 + $0x1] sm:$0x1] %vm323_vm3, %v403_v54 }
  0xe9   : > { %v477_v59 = vpop.f32.mrf.mxu0  ;;  %v558_v61 = vpop.f32.mrf.mxu1 }
  0xea   : > { %v478_v60 = vadd.f32 %v1017_v57, %v477_v59  ;;  %v559_v62 = vadd.f32 %v1030_v58, %v558_v61 }
  0xeb   : > { %v1150_v63 = vpop.f32.mrf.mxu0  ;;  %v1160_v1 = vpop.f32.mrf.mxu1 }
  0xec   : > { %v483_v0 = vmax.f32 %v478_v60, 0.0  ;;  %v564_v2 = vmax.f32 %v559_v62, 0.0 }
  0xed   : > { %v480_v3 = vpop.f32.mrf.mxu0  ;;  %v561_v5 = vpop.f32.mrf.mxu1 }
  0xee   : > { %v484_v4 = vpack.c.bf16 %v483_v0, %v483_v0  ;;  %v565_v6 = vpack.c.bf16 %v564_v2, %v564_v2 }
  0xef   : > { %v1151_v7 = vpop.f32.mrf.mxu0  ;;  %v1161_v8 = vpop.f32.mrf.mxu1 }
  0xf0   : > { %1022 = vst.msk [vmem:[%s1431_s29 + $0x2] sm:$0x1] %vm323_vm3, %v484_v4  ;;  %1035 = vst.msk [vmem:[%s1431_s29 + $0x3] sm:$0x1] %vm323_vm3, %v565_v6 }
  0xf5   : > { %v639_v11 = vpop.f32.mrf.mxu0  ;;  %v720_v13 = vpop.f32.mrf.mxu1 }
  0xf6   : > { %v640_v12 = vadd.f32 %v1043_v9, %v639_v11  ;;  %v721_v14 = vadd.f32 %v1056_v10, %v720_v13 }
  0xf7   : > { %v1170_v15 = vpop.f32.mrf.mxu0  ;;  %v1180_v17 = vpop.f32.mrf.mxu1 }
  0xf8   : > { %v645_v16 = vmax.f32 %v640_v12, 0.0  ;;  %v726_v18 = vmax.f32 %v721_v14, 0.0 }
  0xf9   : > { %v642_v19 = vpop.f32.mrf.mxu0  ;;  %v723_v21 = vpop.f32.mrf.mxu1 }
  0xfa   : > { %v646_v20 = vpack.c.bf16 %v645_v16, %v645_v16  ;;  %v727_v22 = vpack.c.bf16 %v726_v18, %v726_v18 }
  0xfb   : > { %v1171_v23 = vpop.f32.mrf.mxu0  ;;  %v1181_v24 = vpop.f32.mrf.mxu1 }
  0xfc   : > { %1048 = vst.msk [vmem:[%s1431_s29 + $0x4] sm:$0x1] %vm323_vm3, %v646_v20  ;;  %1061 = vst.msk [vmem:[%s1431_s29 + $0x5] sm:$0x1] %vm323_vm3, %v727_v22 }
 0x101   : > { %v801_v27 = vpop.f32.mrf.mxu0  ;;  %v882_v29 = vpop.f32.mrf.mxu1 }
 0x102   : > { %v802_v28 = vadd.f32 %v1069_v25, %v801_v27  ;;  %v883_v30 = vadd.f32 %v1082_v26, %v882_v29 }
 0x103   : > { %v1190_v31 = vpop.f32.mrf.mxu0  ;;  %v1200_v33 = vpop.f32.mrf.mxu1 }
 0x104   : > { %v807_v32 = vmax.f32 %v802_v28, 0.0  ;;  %v888_v34 = vmax.f32 %v883_v30, 0.0 }
 0x105   : > { %v804_v35 = vpop.f32.mrf.mxu0  ;;  %v885_v37 = vpop.f32.mrf.mxu1 }
 0x106   : > { %v808_v36 = vpack.c.bf16 %v807_v32, %v807_v32  ;;  %v889_v38 = vpack.c.bf16 %v888_v34, %v888_v34 }
 0x107   : > { %v1191_v39 = vpop.f32.mrf.mxu0  ;;  %v1201_v40 = vpop.f32.mrf.mxu1 }
 0x108   : > { %1074 = vst.msk [vmem:[%s1431_s29 + $0x6] sm:$0x1] %vm323_vm3, %v808_v36  ;;  %1087 = vst.msk [vmem:[%s1431_s29 + $0x7] sm:$0x1] %vm323_vm3, %v889_v38 }
 0x109 PF: > { %s13_s14 = sadd.s32 1, %s1275_s14   ;;  %s1468_s12 = smov %s1271_s13 }
 0x10a   : > { %p10_p5 = scmp.ge.s32.totalorder %s13_s14, 6   ;;  %s1469_s13 = smov %s1471_s15 }
 0x10c   :  { %12 = sbr.rel (!%p10_p5) target bundleno = 2 (0x2), region = 96 }

// kernel: sws_resnext_forward.35
= control target key start
LH: loop header
LB: loop body
LE: loop exit
PB: predicated region body
PF: predicated region fallthrough
CT: control target
= control target key end

     0   :  { %s914_s12 = smov 0   ;;  %s916_s13 = smov 0   ;;  %s1072_s0 = inlined_call_operand.vmem [shape: bf16[2,256], index: 0, kind: input, shape index: {}]   ;;  %s1073_s1 = inlined_call_operand.vmem [shape: bf16[256,512], index: 1, kind: input, shape index: {}]   ;;  %s1074_s2 = inlined_call_operand.vmem [shape: f32[1,512], index: 2, kind: input, shape index: {}]   ;;  %s1075_s3 = inlined_call_operand.vmem [shape: bf16[2,512], index: 3, kind: output, shape index: {}]  }
   0x1   :  { %s918_s14 = smov 0   ;;  %s920_s15 = smov 0  }
   0x2   :  { %s922_s16 = smov 0  }
   0x3 LB: > { %s28_s17 = sadd.s32 1, %s886_s15  ;;  %p76_p1 = scmp.ne.s32.totalorder %s878_s13, %s874_s12  ;;  %s890_s16 = sphi %s922_s16, %s13_s16   ;;  %s886_s15 = sphi %s920_s15, %s1079_s15   ;;  %s882_s14 = sphi %s918_s14, %s1078_s14   ;;  %s878_s13 = sphi %s916_s13, %s1077_s13   ;;  %s874_s12 = sphi %s914_s12, %s1076_s12  }
   0x4   : > { %p30_p0 = scmp.ge.s32.totalorder %s28_s17, 4  ;;  %p77_p2 = scmp.eq.s32.totalorder %s890_s16, 0 }
   0x5   : > { %s69_s19 = sadd.s32 1, %s878_s13  ;;  %p747_p5 = scmp.ge.s32.totalorder %s890_s16, 4 }
   0x6   : > { %s1081_s17 = smov (%p30_p0, %s28_s17), 0  ;;  %p78_p3 = por %p77_p2, %p76_p1 }
   0x7   : > { %s65_s18 = ssub.s32 %s886_s15, %s1081_s17  ;;  %168 = sbr.rel (%p747_p5) target bundleno = 37 (0x25), region = 20 }
   0x8   : > { %p67_p4 = scmp.eq.s32.totalorder %s65_s18, 0 }
   0xa   : > { %s949_s20 = scalar_select %p67_p4, %s878_s13, %s69_s19  }
   0xc   : > { %171 = sbr.rel (!%p78_p3) target bundleno = 37 (0x25), region = 24  ;;  %s173_s21 = sand.u32 (%p78_p3), 1, %s878_s13  }
   0xd   : > { %s749_s22 = sshll.u32 (%p78_p3), %s886_s15, 2  ;;  %s748_s23 = sshll.u32 (%p78_p3), %s173_s21, 7 }
   0xe   : > { %s957_s26 = scalar_lea.vmem (%p78_p3), %s1073_s1, %s749_s22  ;;  %s961_s27 = scalar_lea.vmem (%p78_p3), [#allocation3], %s748_s23 }
   0xf   : > { %v197_v0 = vld [vmem:[%s957_s26] sm:$0xf] (%p78_p3)  ;;  %v199_v1 = vld [vmem:[%s957_s26 + $0x10] sm:$0xf] (%p78_p3) }
  0x10   : > { %198 = vst [vmem:[%s961_s27] sm:$0xf] (%p78_p3), %v197_v0  ;;  %200 = vst [vmem:[%s961_s27 + $0x4] sm:$0xf] (%p78_p3), %v199_v1  ;;  %v201_v2 = vld [vmem:[%s957_s26 + $0x20] sm:$0xf] (%p78_p3) }
  0x11   : > { %v203_v3 = vld [vmem:[%s957_s26 + $0x30] sm:$0xf]  ;;  %v205_v4 = vld [vmem:[%s957_s26 + $0x40] sm:$0xf]  ;;  %202 = vst [vmem:[%s961_s27 + $0x8] sm:$0xf] %v201_v2 }
  0x12   : > { %204 = vst [vmem:[%s961_s27 + $0xc] sm:$0xf] %v203_v3  ;;  %206 = vst [vmem:[%s961_s27 + $0x10] sm:$0xf] %v205_v4  ;;  %v207_v5 = vld [vmem:[%s957_s26 + $0x50] sm:$0xf] }
  0x13   : > { %v209_v6 = vld [vmem:[%s957_s26 + $0x60] sm:$0xf]  ;;  %v211_v7 = vld [vmem:[%s957_s26 + $0x70] sm:$0xf]  ;;  %208 = vst [vmem:[%s961_s27 + $0x14] sm:$0xf] %v207_v5 }
  0x14   : > { %210 = vst [vmem:[%s961_s27 + $0x18] sm:$0xf] %v209_v6  ;;  %212 = vst [vmem:[%s961_s27 + $0x1c] sm:$0xf] %v211_v7  ;;  %v213_v8 = vld [vmem:[%s957_s26 + $0x80] sm:$0xf] }
  0x15   : > { %v215_v9 = vld [vmem:[%s957_s26 + $0x90] sm:$0xf]  ;;  %v217_v10 = vld [vmem:[%s957_s26 + $0xa0] sm:$0xf]  ;;  %214 = vst [vmem:[%s961_s27 + $0x20] sm:$0xf] %v213_v8 }
  0x16   : > { %216 = vst [vmem:[%s961_s27 + $0x24] sm:$0xf] %v215_v9  ;;  %218 = vst [vmem:[%s961_s27 + $0x28] sm:$0xf] %v217_v10  ;;  %v219_v11 = vld [vmem:[%s957_s26 + $0xb0] sm:$0xf] }
  0x17   : > { %v221_v12 = vld [vmem:[%s957_s26 + $0xc0] sm:$0xf]  ;;  %v223_v13 = vld [vmem:[%s957_s26 + $0xd0] sm:$0xf]  ;;  %220 = vst [vmem:[%s961_s27 + $0x2c] sm:$0xf] %v219_v11 }
  0x18   : > { %222 = vst [vmem:[%s961_s27 + $0x30] sm:$0xf] %v221_v12  ;;  %224 = vst [vmem:[%s961_s27 + $0x34] sm:$0xf] %v223_v13  ;;  %v225_v14 = vld [vmem:[%s957_s26 + $0xe0] sm:$0xf] }
  0x19   : > { %v227_v15 = vld [vmem:[%s957_s26 + $0xf0] sm:$0xf]  ;;  %v229_v16 = vld [vmem:[%s957_s26 + $0x100] sm:$0xf]  ;;  %226 = vst [vmem:[%s961_s27 + $0x38] sm:$0xf] %v225_v14 }
  0x1a   : > { %228 = vst [vmem:[%s961_s27 + $0x3c] sm:$0xf] %v227_v15  ;;  %230 = vst [vmem:[%s961_s27 + $0x40] sm:$0xf] %v229_v16  ;;  %v231_v17 = vld [vmem:[%s957_s26 + $0x110] sm:$0xf] }
  0x1b   : > { %v233_v18 = vld [vmem:[%s957_s26 + $0x120] sm:$0xf]  ;;  %v235_v19 = vld [vmem:[%s957_s26 + $0x130] sm:$0xf]  ;;  %232 = vst [vmem:[%s961_s27 + $0x44] sm:$0xf] %v231_v17 }
  0x1c   : > { %234 = vst [vmem:[%s961_s27 + $0x48] sm:$0xf] %v233_v18  ;;  %236 = vst [vmem:[%s961_s27 + $0x4c] sm:$0xf] %v235_v19  ;;  %v237_v20 = vld [vmem:[%s957_s26 + $0x140] sm:$0xf] }
  0x1d   : > { %v239_v21 = vld [vmem:[%s957_s26 + $0x150] sm:$0xf]  ;;  %v241_v22 = vld [vmem:[%s957_s26 + $0x160] sm:$0xf]  ;;  %238 = vst [vmem:[%s961_s27 + $0x50] sm:$0xf] %v237_v20 }
  0x1e   : > { %240 = vst [vmem:[%s961_s27 + $0x54] sm:$0xf] %v239_v21  ;;  %242 = vst [vmem:[%s961_s27 + $0x58] sm:$0xf] %v241_v22  ;;  %v243_v23 = vld [vmem:[%s957_s26 + $0x170] sm:$0xf] }
  0x1f   : > { %v245_v24 = vld [vmem:[%s957_s26 + $0x180] sm:$0xf]  ;;  %v247_v25 = vld [vmem:[%s957_s26 + $0x190] sm:$0xf]  ;;  %244 = vst [vmem:[%s961_s27 + $0x5c] sm:$0xf] %v243_v23 }
  0x20   : > { %246 = vst [vmem:[%s961_s27 + $0x60] sm:$0xf] %v245_v24  ;;  %248 = vst [vmem:[%s961_s27 + $0x64] sm:$0xf] %v247_v25  ;;  %v249_v26 = vld [vmem:[%s957_s26 + $0x1a0] sm:$0xf] }
  0x21   : > { %v251_v27 = vld [vmem:[%s957_s26 + $0x1b0] sm:$0xf]  ;;  %v253_v28 = vld [vmem:[%s957_s26 + $0x1c0] sm:$0xf]  ;;  %250 = vst [vmem:[%s961_s27 + $0x68] sm:$0xf] %v249_v26 }
  0x22   : > { %252 = vst [vmem:[%s961_s27 + $0x6c] sm:$0xf] %v251_v27  ;;  %254 = vst [vmem:[%s961_s27 + $0x70] sm:$0xf] %v253_v28  ;;  %v255_v29 = vld [vmem:[%s957_s26 + $0x1d0] sm:$0xf] }
  0x23   : > { %v257_v30 = vld [vmem:[%s957_s26 + $0x1e0] sm:$0xf]  ;;  %v259_v31 = vld [vmem:[%s957_s26 + $0x1f0] sm:$0xf]  ;;  %256 = vst [vmem:[%s961_s27 + $0x74] sm:$0xf] %v255_v29 }
  0x24   : > { %258 = vst [vmem:[%s961_s27 + $0x78] sm:$0xf] %v257_v30  ;;  %260 = vst [vmem:[%s961_s27 + $0x7c] sm:$0xf] %v259_v31 }
  0x25 PF: > { %p750_p6 = scmp.ge.s32.totalorder %s890_s16, 1  ;;  %p353_p7 = scmp.lt.s32.totalorder %s890_s16, 5 }
  0x27   : > { %p354_p8 = pnand %p750_p6, %p353_p7 }
  0x28   : > { %s360_s28 = sand.u32 (!%p354_p8), 1, %s874_s12   ;;  %p406_p9 = scmp.lt.s32.totalorder (!%p354_p8), %s882_s14, 3 }
  0x29   : > { %357 = sbr.rel (%p354_p8) target bundleno = 292 (0x124), region = 69  ;;  %s751_s4 = sshll.u32 (!%p354_p8), %s360_s28, 7 }
  0x2a   : > { %s1031_s5 = scalar_lea.vmem (!%p354_p8), [#allocation3], %s751_s4 }
  0x2e   : > { %v752_v32 = vld.sshfl [vmem:[%s1072_s0] sm:$0x11 pattern:$0x75316420]  ;;  %v468_v33 = vlaneseq  ;;  %v892_v34 = vmov 1966171168  }
  0x2f   : > { %v466_v35 = vunpack.c.l.s4 %v892_v34  ;;  %v836_v37 = vld [vmem:[%s1031_s5 + $0x78] sm:$0xff]   ;;  %v464_v39 = vcombine.high %v752_v32, %v752_v32  ;;  %v838_v41 = vld [vmem:[%s1031_s5 + $0x70] sm:$0xff]   ;;  %v840_v44 = vld [vmem:[%s1031_s5 + $0x68] sm:$0xff]   ;;  %v893_v58 = vmov 0.0   ;;  %s1083_s14 = smov (!%p406_p9, %s882_s14), 3 }
  0x30   : > { %v469_v36 = vshrl.u32 %v468_v33, 7  ;;  %v837_v38 = vld [vmem:[%s1031_s5 + $0x38] sm:$0xff]   ;;  %772 = vmatprep.subr.bf16.mxu0 %v836_v37  ;;  %v839_v42 = vld [vmem:[%s1031_s5 + $0x30] sm:$0xff]   ;;  %v841_v46 = vld [vmem:[%s1031_s5 + $0x28] sm:$0xff]   ;;  %421 = vst [vmem:[#allocation2] sm:$0x3] %v893_v58  ;;  %s408_s8 = scalar_lea.vmem %s1074_s2, %s1083_s14  ;;  %s415_s11 = scalar_lea.vmem %s1075_s3, %s1083_s14 }
  0x31   : > { %v467_v40 = vunpack.c.0.s8 %v466_v35  ;;  %773 = vmatpush3.bf16.msra.mxu0 %v837_v38  ;;  %v842_v47 = vld [vmem:[%s1031_s5 + $0x60] sm:$0xff]   ;;  %v844_v49 = vld [vmem:[%s1031_s5 + $0x58] sm:$0xff]   ;;  %v846_v51 = vld [vmem:[%s1031_s5 + $0x50] sm:$0xff]  }
  0x32   : > { %774 = vmatprep.subr.bf16.mxu0 %v838_v41  ;;  %v843_v48 = vld [vmem:[%s1031_s5 + $0x20] sm:$0xff]   ;;  %v845_v50 = vld [vmem:[%s1031_s5 + $0x18] sm:$0xff]   ;;  %v847_v52 = vld [vmem:[%s1031_s5 + $0x10] sm:$0xff]  }
  0x33   : > { %v470_v43 = vsub.s32 %v467_v40, %v469_v36  ;;  %v848_v53 = vld [vmem:[%s1031_s5 + $0x48] sm:$0xff]   ;;  %v850_v55 = vld [vmem:[%s1031_s5 + $0x40] sm:$0xff]   ;;  %v769_v2 = vld [vmem:[%s408_s8] ss:$0 sm:$0xff] }
  0x34   : > { %v849_v54 = vld [vmem:[%s1031_s5 + $0x8] sm:$0xff]   ;;  %v851_v56 = vld [vmem:[%s1031_s5] sm:$0xff]  }
  0x35   : > { %v478_v45 = vrot.slane %v464_v39, %v470_v43  ;;  %775 = vmatpush3.bf16.msra.mxu0 %v839_v42  ;;  %v471_v57 = vrot.slane %v752_v32, %v470_v43 }
  0x36   : > { %776 = vmatprep.subr.bf16.mxu0 %v840_v44 }
  0x37   : > { %609 = vmatprep.mubr.bf16.mxu0 %v478_v45  ;;  %v422_v60 = vld [vmem:[#allocation2] sm:$0x3] }
  0x39   : > { %777 = vmatpush3.bf16.msra.mxu0 %v841_v46 }
  0x3a   : > { %778 = vmatprep.subr.bf16.mxu0 %v842_v47 }
  0x3d   : > { %779 = vmatpush3.bf16.msra.mxu0 %v843_v48 }
  0x3e   : > { %780 = vmatprep.subr.bf16.mxu0 %v844_v49 }
  0x41   : > { %781 = vmatpush3.bf16.msra.mxu0 %v845_v50 }
  0x42   : > { %782 = vmatprep.subr.bf16.mxu0 %v846_v51 }
  0x45   : > { %783 = vmatpush3.bf16.msra.mxu0 %v847_v52 }
  0x46   : > { %784 = vmatprep.subr.bf16.mxu0 %v848_v53 }
  0x49   : > { %785 = vmatpush3.bf16.msra.mxu0 %v849_v54 }
  0x4a   : > { %786 = vmatprep.subr.bf16.mxu0 %v850_v55 }
  0x4d   : > { %787 = vmatpush3.bf16.msra.mxu0 %v851_v56 }
  0x50   : > { %610 = vmatmul.mubr.bf16.vlgmr.msra.gmra.mxu0 %v471_v57 }
 0x110   : > { %v788_v59 = vpop.f32.mrf.mxu0 }
 0x112   : > { %v789_v61 = vpop.f32.mrf.mxu0 }
 0x113   : > { %v790_v62 = vadd.f32 %v789_v61, %v788_v59 }
 0x114   : > { %v791_v63 = vpop.f32.mrf.mxu0 }
 0x115   : > { %v617_v0 = vadd.f32 %v790_v62, %v422_v60 }
 0x116   : > { %v792_v1 = vpop.f32.mrf.mxu0 }
 0x117   : > { %618 = vst [vmem:[#allocation2] sm:$0x3] %v617_v0 }
 0x11e   : > { %v622_v3 = vld [vmem:[#allocation2] sm:$0x3] }
 0x11f   : > { %v630_v4 = vadd.f32 %v769_v2, %v622_v3 }
 0x121   : > { %v631_v5 = vpack.c.bf16 %v630_v4, %v630_v4 }
 0x123   : > { %632 = vst [vmem:[%s415_s11] sm:$0x1] %v631_v5 }
 0x124 PF: > { %s13_s16 = sadd.s32 1, %s890_s16   ;;  %s1076_s12 = smov %s878_s13 }
 0x125   : > { %p10_p10 = scmp.ge.s32.totalorder %s13_s16, 6   ;;  %s1077_s13 = smov %s949_s20 }
 0x126   : > { %s1078_s14 = smov %s886_s15  ;;  %s1079_s15 = smov %s1081_s17 }
 0x127   :  { %12 = sbr.rel (!%p10_p10) target bundleno = 3 (0x3), region = 122 }

// kernel: sws_resnext_forward.36
= control target key start
LH: loop header
LB: loop body
LE: loop exit
PB: predicated region body
PF: predicated region fallthrough
CT: control target
= control target key end

     0   :  { %s993_s15 = smov 0   ;;  %s995_s16 = smov 0   ;;  %s1154_s0 = inlined_call_operand.vmem [shape: bf16[2,256], index: 0, kind: input, shape index: {}]   ;;  %s1155_s1 = inlined_call_operand.vmem [shape: bf16[256,512], index: 1, kind: input, shape index: {}]   ;;  %s1156_s2 = inlined_call_operand.vmem [shape: f32[1,512], index: 2, kind: input, shape index: {}]   ;;  %s1157_s3 = inlined_call_operand.vmem [shape: bf16[2,512], index: 3, kind: input, shape index: {}]   ;;  %s1158_s4 = inlined_call_operand.vmem [shape: bf16[2,512], index: 4, kind: output, shape index: {}]  }
   0x1   :  { %s997_s17 = smov 0   ;;  %s999_s18 = smov 0  }
   0x2   :  { %s1001_s19 = smov 0  }
   0x3 LB: > { %s29_s20 = sadd.s32 1, %s960_s18  ;;  %p77_p1 = scmp.ne.s32.totalorder %s952_s16, %s948_s15  ;;  %s964_s19 = sphi %s1001_s19, %s14_s19   ;;  %s960_s18 = sphi %s999_s18, %s1162_s18   ;;  %s956_s17 = sphi %s997_s17, %s1161_s17   ;;  %s952_s16 = sphi %s995_s16, %s1160_s16   ;;  %s948_s15 = sphi %s993_s15, %s1159_s15  }
   0x4   : > { %p31_p0 = scmp.ge.s32.totalorder %s29_s20, 4  ;;  %p78_p2 = scmp.eq.s32.totalorder %s964_s19, 0 }
   0x5   : > { %s70_s22 = sadd.s32 1, %s952_s16  ;;  %p821_p5 = scmp.ge.s32.totalorder %s964_s19, 4 }
   0x6   : > { %s1164_s20 = smov (%p31_p0, %s29_s20), 0  ;;  %p79_p3 = por %p78_p2, %p77_p1 }
   0x7   : > { %s66_s21 = ssub.s32 %s960_s18, %s1164_s20  ;;  %197 = sbr.rel (%p821_p5) target bundleno = 37 (0x25), region = 20 }
   0x8   : > { %p68_p4 = scmp.eq.s32.totalorder %s66_s21, 0 }
   0xa   : > { %s1028_s23 = scalar_select %p68_p4, %s952_s16, %s70_s22  }
   0xc   : > { %200 = sbr.rel (!%p79_p3) target bundleno = 37 (0x25), region = 24  ;;  %s202_s24 = sand.u32 (%p79_p3), 1, %s952_s16  }
   0xd   : > { %s823_s25 = sshll.u32 (%p79_p3), %s960_s18, 2  ;;  %s822_s26 = sshll.u32 (%p79_p3), %s202_s24, 7 }
   0xe   : > { %s1036_s29 = scalar_lea.vmem (%p79_p3), %s1155_s1, %s823_s25  ;;  %s1040_s30 = scalar_lea.vmem (%p79_p3), [#allocation3], %s822_s26 }
   0xf   : > { %v226_v0 = vld [vmem:[%s1036_s29] sm:$0xf] (%p79_p3)  ;;  %v228_v1 = vld [vmem:[%s1036_s29 + $0x10] sm:$0xf] (%p79_p3) }
  0x10   : > { %227 = vst [vmem:[%s1040_s30] sm:$0xf] (%p79_p3), %v226_v0  ;;  %229 = vst [vmem:[%s1040_s30 + $0x4] sm:$0xf] (%p79_p3), %v228_v1  ;;  %v230_v2 = vld [vmem:[%s1036_s29 + $0x20] sm:$0xf] (%p79_p3) }
  0x11   : > { %v232_v3 = vld [vmem:[%s1036_s29 + $0x30] sm:$0xf]  ;;  %v234_v4 = vld [vmem:[%s1036_s29 + $0x40] sm:$0xf]  ;;  %231 = vst [vmem:[%s1040_s30 + $0x8] sm:$0xf] %v230_v2 }
  0x12   : > { %233 = vst [vmem:[%s1040_s30 + $0xc] sm:$0xf] %v232_v3  ;;  %235 = vst [vmem:[%s1040_s30 + $0x10] sm:$0xf] %v234_v4  ;;  %v236_v5 = vld [vmem:[%s1036_s29 + $0x50] sm:$0xf] }
  0x13   : > { %v238_v6 = vld [vmem:[%s1036_s29 + $0x60] sm:$0xf]  ;;  %v240_v7 = vld [vmem:[%s1036_s29 + $0x70] sm:$0xf]  ;;  %237 = vst [vmem:[%s1040_s30 + $0x14] sm:$0xf] %v236_v5 }
  0x14   : > { %239 = vst [vmem:[%s1040_s30 + $0x18] sm:$0xf] %v238_v6  ;;  %241 = vst [vmem:[%s1040_s30 + $0x1c] sm:$0xf] %v240_v7  ;;  %v242_v8 = vld [vmem:[%s1036_s29 + $0x80] sm:$0xf] }
  0x15   : > { %v244_v9 = vld [vmem:[%s1036_s29 + $0x90] sm:$0xf]  ;;  %v246_v10 = vld [vmem:[%s1036_s29 + $0xa0] sm:$0xf]  ;;  %243 = vst [vmem:[%s1040_s30 + $0x20] sm:$0xf] %v242_v8 }
  0x16   : > { %245 = vst [vmem:[%s1040_s30 + $0x24] sm:$0xf] %v244_v9  ;;  %247 = vst [vmem:[%s1040_s30 + $0x28] sm:$0xf] %v246_v10  ;;  %v248_v11 = vld [vmem:[%s1036_s29 + $0xb0] sm:$0xf] }
  0x17   : > { %v250_v12 = vld [vmem:[%s1036_s29 + $0xc0] sm:$0xf]  ;;  %v252_v13 = vld [vmem:[%s1036_s29 + $0xd0] sm:$0xf]  ;;  %249 = vst [vmem:[%s1040_s30 + $0x2c] sm:$0xf] %v248_v11 }
  0x18   : > { %251 = vst [vmem:[%s1040_s30 + $0x30] sm:$0xf] %v250_v12  ;;  %253 = vst [vmem:[%s1040_s30 + $0x34] sm:$0xf] %v252_v13  ;;  %v254_v14 = vld [vmem:[%s1036_s29 + $0xe0] sm:$0xf] }
  0x19   : > { %v256_v15 = vld [vmem:[%s1036_s29 + $0xf0] sm:$0xf]  ;;  %v258_v16 = vld [vmem:[%s1036_s29 + $0x100] sm:$0xf]  ;;  %255 = vst [vmem:[%s1040_s30 + $0x38] sm:$0xf] %v254_v14 }
  0x1a   : > { %257 = vst [vmem:[%s1040_s30 + $0x3c] sm:$0xf] %v256_v15  ;;  %259 = vst [vmem:[%s1040_s30 + $0x40] sm:$0xf] %v258_v16  ;;  %v260_v17 = vld [vmem:[%s1036_s29 + $0x110] sm:$0xf] }
  0x1b   : > { %v262_v18 = vld [vmem:[%s1036_s29 + $0x120] sm:$0xf]  ;;  %v264_v19 = vld [vmem:[%s1036_s29 + $0x130] sm:$0xf]  ;;  %261 = vst [vmem:[%s1040_s30 + $0x44] sm:$0xf] %v260_v17 }
  0x1c   : > { %263 = vst [vmem:[%s1040_s30 + $0x48] sm:$0xf] %v262_v18  ;;  %265 = vst [vmem:[%s1040_s30 + $0x4c] sm:$0xf] %v264_v19  ;;  %v266_v20 = vld [vmem:[%s1036_s29 + $0x140] sm:$0xf] }
  0x1d   : > { %v268_v21 = vld [vmem:[%s1036_s29 + $0x150] sm:$0xf]  ;;  %v270_v22 = vld [vmem:[%s1036_s29 + $0x160] sm:$0xf]  ;;  %267 = vst [vmem:[%s1040_s30 + $0x50] sm:$0xf] %v266_v20 }
  0x1e   : > { %269 = vst [vmem:[%s1040_s30 + $0x54] sm:$0xf] %v268_v21  ;;  %271 = vst [vmem:[%s1040_s30 + $0x58] sm:$0xf] %v270_v22  ;;  %v272_v23 = vld [vmem:[%s1036_s29 + $0x170] sm:$0xf] }
  0x1f   : > { %v274_v24 = vld [vmem:[%s1036_s29 + $0x180] sm:$0xf]  ;;  %v276_v25 = vld [vmem:[%s1036_s29 + $0x190] sm:$0xf]  ;;  %273 = vst [vmem:[%s1040_s30 + $0x5c] sm:$0xf] %v272_v23 }
  0x20   : > { %275 = vst [vmem:[%s1040_s30 + $0x60] sm:$0xf] %v274_v24  ;;  %277 = vst [vmem:[%s1040_s30 + $0x64] sm:$0xf] %v276_v25  ;;  %v278_v26 = vld [vmem:[%s1036_s29 + $0x1a0] sm:$0xf] }
  0x21   : > { %v280_v27 = vld [vmem:[%s1036_s29 + $0x1b0] sm:$0xf]  ;;  %v282_v28 = vld [vmem:[%s1036_s29 + $0x1c0] sm:$0xf]  ;;  %279 = vst [vmem:[%s1040_s30 + $0x68] sm:$0xf] %v278_v26 }
  0x22   : > { %281 = vst [vmem:[%s1040_s30 + $0x6c] sm:$0xf] %v280_v27  ;;  %283 = vst [vmem:[%s1040_s30 + $0x70] sm:$0xf] %v282_v28  ;;  %v284_v29 = vld [vmem:[%s1036_s29 + $0x1d0] sm:$0xf] }
  0x23   : > { %v286_v30 = vld [vmem:[%s1036_s29 + $0x1e0] sm:$0xf]  ;;  %v288_v31 = vld [vmem:[%s1036_s29 + $0x1f0] sm:$0xf]  ;;  %285 = vst [vmem:[%s1040_s30 + $0x74] sm:$0xf] %v284_v29 }
  0x24   : > { %287 = vst [vmem:[%s1040_s30 + $0x78] sm:$0xf] %v286_v30  ;;  %289 = vst [vmem:[%s1040_s30 + $0x7c] sm:$0xf] %v288_v31 }
  0x25 PF: > { %p824_p6 = scmp.ge.s32.totalorder %s964_s19, 1  ;;  %p392_p7 = scmp.lt.s32.totalorder %s964_s19, 5 }
  0x27   : > { %p393_p8 = pnand %p824_p6, %p392_p7 }
  0x28   : > { %s399_s5 = sand.u32 (!%p393_p8), 1, %s948_s15   ;;  %p454_p9 = scmp.lt.s32.totalorder (!%p393_p8), %s956_s17, 3 }
  0x29   : > { %396 = sbr.rel (%p393_p8) target bundleno = 296 (0x128), region = 73  ;;  %s825_s8 = sshll.u32 (!%p393_p8), %s399_s5, 7 }
  0x2a   : > { %s1110_s9 = scalar_lea.vmem (!%p393_p8), [#allocation3], %s825_s8 }
  0x2e   : > { %v826_v32 = vld.sshfl [vmem:[%s1154_s0] sm:$0x11 pattern:$0x75316420]  ;;  %v523_v33 = vlaneseq  ;;  %v966_v34 = vmov 1966171168  }
  0x2f   : > { %v521_v35 = vunpack.c.l.s4 %v966_v34  ;;  %v910_v37 = vld [vmem:[%s1110_s9 + $0x78] sm:$0xff]   ;;  %v519_v39 = vcombine.high %v826_v32, %v826_v32  ;;  %v912_v41 = vld [vmem:[%s1110_s9 + $0x70] sm:$0xff]   ;;  %v914_v44 = vld [vmem:[%s1110_s9 + $0x68] sm:$0xff]   ;;  %v967_v58 = vmov 0.0   ;;  %s1166_s17 = smov (!%p454_p9, %s956_s17), 3 }
  0x30   : > { %v524_v36 = vshrl.u32 %v523_v33, 7  ;;  %v911_v38 = vld [vmem:[%s1110_s9 + $0x38] sm:$0xff]   ;;  %846 = vmatprep.subr.bf16.mxu0 %v910_v37  ;;  %v913_v42 = vld [vmem:[%s1110_s9 + $0x30] sm:$0xff]   ;;  %v915_v46 = vld [vmem:[%s1110_s9 + $0x28] sm:$0xff]   ;;  %476 = vst [vmem:[#allocation2] sm:$0x3] %v967_v58  ;;  %s463_s12 = scalar_lea.vmem %s1157_s3, %s1166_s17  ;;  %s456_s15 = scalar_lea.vmem %s1156_s2, %s1166_s17 }
  0x31   : > { %v522_v40 = vunpack.c.0.s8 %v521_v35  ;;  %847 = vmatpush3.bf16.msra.mxu0 %v911_v38  ;;  %v916_v47 = vld [vmem:[%s1110_s9 + $0x60] sm:$0xff]   ;;  %v918_v49 = vld [vmem:[%s1110_s9 + $0x58] sm:$0xff]   ;;  %v920_v51 = vld [vmem:[%s1110_s9 + $0x50] sm:$0xff]   ;;  %s470_s24 = scalar_lea.vmem %s1158_s4, %s1166_s17 }
  0x32   : > { %848 = vmatprep.subr.bf16.mxu0 %v912_v41  ;;  %v917_v48 = vld [vmem:[%s1110_s9 + $0x20] sm:$0xff]   ;;  %v919_v50 = vld [vmem:[%s1110_s9 + $0x18] sm:$0xff]   ;;  %v921_v52 = vld [vmem:[%s1110_s9 + $0x10] sm:$0xff]  }
  0x33   : > { %v525_v43 = vsub.s32 %v522_v40, %v524_v36  ;;  %v922_v53 = vld [vmem:[%s1110_s9 + $0x48] sm:$0xff]   ;;  %v924_v55 = vld [vmem:[%s1110_s9 + $0x40] sm:$0xff]   ;;  %v686_v2 = vld [vmem:[%s463_s12] sm:$0x1] }
  0x34   : > { %v923_v54 = vld [vmem:[%s1110_s9 + $0x8] sm:$0xff]   ;;  %v925_v56 = vld [vmem:[%s1110_s9] sm:$0xff]   ;;  %v843_v3 = vld [vmem:[%s456_s15] ss:$0 sm:$0xff]  ;;  %v687_v4 = vunpack.c.l.bf16 %v686_v2 }
  0x35   : > { %v533_v45 = vrot.slane %v519_v39, %v525_v43  ;;  %849 = vmatpush3.bf16.msra.mxu0 %v913_v42  ;;  %v526_v57 = vrot.slane %v826_v32, %v525_v43 }
  0x36   : > { %850 = vmatprep.subr.bf16.mxu0 %v914_v44 }
  0x37   : > { %664 = vmatprep.mubr.bf16.mxu0 %v533_v45  ;;  %v477_v60 = vld [vmem:[#allocation2] sm:$0x3] }
  0x39   : > { %851 = vmatpush3.bf16.msra.mxu0 %v915_v46 }
  0x3a   : > { %852 = vmatprep.subr.bf16.mxu0 %v916_v47 }
  0x3d   : > { %853 = vmatpush3.bf16.msra.mxu0 %v917_v48 }
  0x3e   : > { %854 = vmatprep.subr.bf16.mxu0 %v918_v49 }
  0x41   : > { %855 = vmatpush3.bf16.msra.mxu0 %v919_v50 }
  0x42   : > { %856 = vmatprep.subr.bf16.mxu0 %v920_v51 }
  0x45   : > { %857 = vmatpush3.bf16.msra.mxu0 %v921_v52 }
  0x46   : > { %858 = vmatprep.subr.bf16.mxu0 %v922_v53 }
  0x49   : > { %859 = vmatpush3.bf16.msra.mxu0 %v923_v54 }
  0x4a   : > { %860 = vmatprep.subr.bf16.mxu0 %v924_v55 }
  0x4d   : > { %861 = vmatpush3.bf16.msra.mxu0 %v925_v56 }
  0x50   : > { %665 = vmatmul.mubr.bf16.vlgmr.msra.gmra.mxu0 %v526_v57 }
 0x110   : > { %v862_v59 = vpop.f32.mrf.mxu0 }
 0x112   : > { %v863_v61 = vpop.f32.mrf.mxu0 }
 0x113   : > { %v864_v62 = vadd.f32 %v863_v61, %v862_v59 }
 0x114   : > { %v865_v63 = vpop.f32.mrf.mxu0 }
 0x115   : > { %v672_v0 = vadd.f32 %v864_v62, %v477_v60 }
 0x116   : > { %v866_v1 = vpop.f32.mrf.mxu0 }
 0x117   : > { %673 = vst [vmem:[#allocation2] sm:$0x3] %v672_v0 }
 0x11e   : > { %v677_v5 = vld [vmem:[#allocation2] sm:$0x3] }
 0x11f   : > { %v685_v6 = vadd.f32 %v843_v3, %v677_v5 }
 0x121   : > { %v688_v7 = vadd.f32 %v687_v4, %v685_v6 }
 0x123   : > { %v689_v8 = vmax.f32 %v688_v7, 0.0 }
 0x125   : > { %v690_v9 = vpack.c.bf16 %v689_v8, %v689_v8 }
 0x127   : > { %691 = vst [vmem:[%s470_s24] sm:$0x1] %v690_v9 }
 0x128 PF: > { %s14_s19 = sadd.s32 1, %s964_s19   ;;  %s1159_s15 = smov %s952_s16 }
 0x129   : > { %p11_p10 = scmp.ge.s32.totalorder %s14_s19, 6   ;;  %s1160_s16 = smov %s1028_s23 }
 0x12a   : > { %s1161_s17 = smov %s960_s18  ;;  %s1162_s18 = smov %s1164_s20 }
 0x12b   :  { %13 = sbr.rel (!%p11_p10) target bundleno = 3 (0x3), region = 129 }

// kernel: sws_resnext_forward.37
= control target key start
LH: loop header
LB: loop body
LE: loop exit
PB: predicated region body
PF: predicated region fallthrough
CT: control target
= control target key end

     0   :  { %8 = vsyncpa [#allocation3], 0  ;;  %s1024_s0 = inlined_call_operand.vmem [shape: bf16[2,1,512], index: 0, kind: input, shape index: {}]   ;;  %s1025_s1 = inlined_call_operand.vmem [shape: bf16[512,128], index: 1, kind: input, shape index: {}]   ;;  %s1026_s2 = inlined_call_operand.vmem [shape: f32[1,128], index: 2, kind: input, shape index: {}]   ;;  %s1027_s3 = inlined_call_operand.hbm [shape: f32[2,1,128], index: 3, kind: output, shape index: {}]  }
   0x1   :  { %10 = vsyncpa [#allocation3 + $0x1], 0  ;;  %s838_s12 = smov 0   ;;  %s840_s13 = smov 0  }
   0x2   :  { %s842_s14 = smov 0   ;;  %s844_s15 = smov 0  }
   0x3 LB: > { %s859_s16 = sadd.s32 4294967295, %s815_s15   ;;  %s600_s17 = sadd.s32 4294967294, %s815_s15   ;;  %s815_s15 = sphi %s844_s15, %s1033_s15   ;;  %s811_s14 = sphi %s842_s14, %s1032_s14   ;;  %s807_s13 = sphi %s840_s13, %s1031_s13   ;;  %s803_s12 = sphi %s838_s12, %s1030_s12  }
   0x4   : > { %s863_s18 = sadd.s32 1, %s815_s15   ;;  %s91_s19 = sadd.s32 1, %s811_s14 }
   0x5   : > { %s88_s20 = ssub.s32 %s815_s15, %s863_s18  ;;  %p101_p0 = scmp.ne.s32.totalorder %s811_s14, %s807_s13 }
   0x6   : > { %p89_p1 = scmp.eq.s32.totalorder %s88_s20, 0  ;;  %p102_p2 = scmp.eq.s32.totalorder %s859_s16, 1 }
   0x7   : > { %p107_p3 = scmp.ne.s32.totalorder %s807_s13, %s803_s12  ;;  %p108_p4 = scmp.eq.s32.totalorder %s600_s17, 1 }
   0x8   : > { %s874_s21 = scalar_select %p89_p1, %s811_s14, %s91_s19  }
   0x9   : > { %p876_p5 = por %p102_p2, %p101_p0  ;;  %p880_p6 = por %p108_p4, %p107_p3 }
   0xa   : > { %p603_p7 = scmp.ge.s32.totalorder %s815_s15, 1  ;;  %p139_p8 = scmp.lt.s32.totalorder %s815_s15, 3 }
   0xc   : > { %p140_p9 = pnand %p603_p7, %p139_p8 }
   0xd   : > { %p161_p10 = scmp.lt.s32.totalorder (!%p140_p9), %s859_s16, 1  ;;  %s159_s17 = sand.u32 (!%p140_p9), 1, %s807_s13  }
   0xe   : > { %143 = sbr.rel (%p140_p9) target bundleno = 267 (0x10b), region = 32  ;;  %s637_s24 = sshll.u32 (!%p140_p9), %s859_s16, 4 }
   0xf   : > { %s543_s29 = scalar_lea.hbm (!%p140_p9), %s1027_s3, %s637_s24  ;;  %s533_s30 = scalar_lea.sflag (!%p140_p9), [#allocation3], %s159_s17 }
  0x13   : > { %v723_v0 = vld [vmem:[%s1025_s1 + $0x78] sm:$0xff]   ;;  %v727_v4 = vld [vmem:[%s1025_s1 + $0x70] sm:$0xff]   ;;  %v731_v8 = vld [vmem:[%s1025_s1 + $0x68] sm:$0xff]   ;;  %v170_v21 = vlaneseq  ;;  %s162_s7 = scalar_select %p161_p10, %s859_s16, 1 }
  0x14   : > { %v724_v1 = vld [vmem:[%s1025_s1 + $0xf8] sm:$0xff]   ;;  %640 = vmatprep.subr.bf16.mxu0 %v723_v0  ;;  %v728_v5 = vld [vmem:[%s1025_s1 + $0xf0] sm:$0xff]   ;;  %v732_v9 = vld [vmem:[%s1025_s1 + $0xe8] sm:$0xff]   ;;  %s817_s16 = smov [#allocation2]  }
  0x15   : > { %v725_v2 = vld [vmem:[%s1025_s1 + $0x38] sm:$0xff]   ;;  %662 = vmatprep.subr.bf16.mxu1 %v724_v1  ;;  %v729_v6 = vld [vmem:[%s1025_s1 + $0x30] sm:$0xff]   ;;  %v733_v10 = vld [vmem:[%s1025_s1 + $0x28] sm:$0xff]   ;;  %v171_v26 = vshrl.u32 %v170_v21, 7  ;;  %s604_s25 = sshll.u32 %s162_s7, 2  ;;  %s759_s5 = sshll.u32 %s817_s16, 4  ;;  %s760_s5 = int_to_ptr.vmem [resolvable:$false] %s759_s5 }
  0x16   : > { %v726_v3 = vld [vmem:[%s1025_s1 + $0xb8] sm:$0xff]   ;;  %641 = vmatpush3.bf16.msra.mxu0 %v725_v2  ;;  %v730_v7 = vld [vmem:[%s1025_s1 + $0xb0] sm:$0xff]   ;;  %v734_v11 = vld [vmem:[%s1025_s1 + $0xa8] sm:$0xff]   ;;  %s164_s7 = scalar_lea.vmem %s1024_s0, %s604_s25  ;;  %s160_s25 = scalar_lea.vmem [#allocation2], %s159_s17 }
  0x17   : > { %663 = vmatpush3.bf16.msra.mxu1 %v726_v3  ;;  %642 = vmatprep.subr.bf16.mxu0 %v727_v4  ;;  %v735_v12 = vld [vmem:[%s1025_s1 + $0x60] sm:$0xff]   ;;  %v739_v16 = vld [vmem:[%s1025_s1 + $0x58] sm:$0xff]   ;;  %v743_v20 = vld [vmem:[%s1025_s1 + $0x50] sm:$0xff]   ;;  %v176_v31 = vsub.s32 2, %v171_v26  ;;  %v184_v33 = vsub.s32 6, %v171_v26  ;;  %v172_v35 = vsub.s32 0, %v171_v26 }
  0x18   : > { %664 = vmatprep.subr.bf16.mxu1 %v728_v5  ;;  %v736_v13 = vld [vmem:[%s1025_s1 + $0xe0] sm:$0xff]   ;;  %v740_v17 = vld [vmem:[%s1025_s1 + $0xd8] sm:$0xff]   ;;  %v744_v22 = vld [vmem:[%s1025_s1 + $0xd0] sm:$0xff]   ;;  %v180_v37 = vsub.s32 4, %v171_v26  ;;  %s545_s26 = sshll.u32 %s160_s25, 4  ;;  %s761_s6 = scalar_lea.vmem %s760_s5, 32  ;;  %s546_s26 = int_to_ptr.vmem [resolvable:$true] %s545_s26 }
  0x19   : > { %v737_v14 = vld [vmem:[%s1025_s1 + $0x20] sm:$0xff]   ;;  %v741_v18 = vld [vmem:[%s1025_s1 + $0x18] sm:$0xff]   ;;  %v745_v23 = vld [vmem:[%s1025_s1 + $0x10] sm:$0xff]   ;;  %s755_s4 = scalar_lea.vmem %s546_s26, 16  ;;  %p762_p0 = scmp.lt.s32.totalorder %s546_s26, %s760_s5 }
  0x1a   : > { %643 = vmatpush3.bf16.msra.mxu0 %v729_v6  ;;  %v738_v15 = vld [vmem:[%s1025_s1 + $0xa0] sm:$0xff]   ;;  %v742_v19 = vld [vmem:[%s1025_s1 + $0x98] sm:$0xff]   ;;  %v746_v24 = vld [vmem:[%s1025_s1 + $0x90] sm:$0xff]   ;;  %p756_p11 = scmp.ne.s32.totalorder %s546_s26, %s755_s4  ;;  %p763_p1 = scmp.lt.s32.totalorder %s761_s6, %s755_s4 }
  0x1b   : > { %665 = vmatpush3.bf16.msra.mxu1 %v730_v7  ;;  %644 = vmatprep.subr.bf16.mxu0 %v731_v8  ;;  %v747_v25 = vld [vmem:[%s1025_s1 + $0x48] sm:$0xff]   ;;  %v751_v30 = vld [vmem:[%s1025_s1 + $0x40] sm:$0xff]  }
  0x1c   : > { %666 = vmatprep.subr.bf16.mxu1 %v732_v9  ;;  %v748_v27 = vld [vmem:[%s1025_s1 + $0xc8] sm:$0xff]   ;;  %v752_v32 = vld [vmem:[%s1025_s1 + $0xc0] sm:$0xff]   ;;  %p757_p12 = pnand %p756_p11, %p876_p5  ;;  %p764_p2 = por %p763_p1, %p762_p0 }
  0x1d   : > { %v749_v28 = vld [vmem:[%s1025_s1 + $0x8] sm:$0xff]   ;;  %v753_v34 = vld [vmem:[%s1025_s1] sm:$0xff]  }
  0x1e   : > { %645 = vmatpush3.bf16.msra.mxu0 %v733_v10  ;;  %v750_v29 = vld [vmem:[%s1025_s1 + $0x88] sm:$0xff]   ;;  %v754_v36 = vld [vmem:[%s1025_s1 + $0x80] sm:$0xff]   ;;  %p758_p13 = pneg %p757_p12 }
  0x1f   : > { %667 = vmatpush3.bf16.msra.mxu1 %v734_v11  ;;  %646 = vmatprep.subr.bf16.mxu0 %v735_v12  ;;  %v166_v38 = vld [vmem:[%s164_s7] sm:$0xf] }
  0x20   : > { %668 = vmatprep.subr.bf16.mxu1 %v736_v13  ;;  %v167_v39 = vunpack.c.l.bf16 %v166_v38  ;;  %v258_v50 = vld [vmem:[%s1026_s2] sm:$0x1]  ;;  %p765_p3 = pnand %p764_p2, %p758_p13 }
  0x22   : > { %647 = vmatpush3.bf16.msra.mxu0 %v737_v14  ;;  %v177_v40 = vrot.slane %v167_v39, %v176_v31  ;;  %v185_v41 = vrot.slane %v167_v39, %v184_v33  ;;  %v173_v42 = vrot.slane %v167_v39, %v172_v35  ;;  %v181_v43 = vrot.slane %v167_v39, %v180_v37 }
  0x23   : > { %669 = vmatpush3.bf16.msra.mxu1 %v738_v15  ;;  %648 = vmatprep.subr.bf16.mxu0 %v739_v16 }
  0x24   : > { %670 = vmatprep.subr.bf16.mxu1 %v740_v17  ;;  %v191_v44 = vpack.c.bf16 %v177_v40, %v177_v40  ;;  %v193_v45 = vpack.c.bf16 %v185_v41, %v185_v41  ;;  %v190_v46 = vpack.c.bf16 %v173_v42, %v173_v42  ;;  %v192_v47 = vpack.c.bf16 %v181_v43, %v181_v43 }
  0x26   : > { %649 = vmatpush3.bf16.msra.mxu0 %v741_v18  ;;  %483 = vmatprep.mubr.bf16.mxu0 %v191_v44 }
  0x27   : > { %671 = vmatpush3.bf16.msra.mxu1 %v742_v19  ;;  %650 = vmatprep.subr.bf16.mxu0 %v743_v20 }
  0x28   : > { %672 = vmatprep.subr.bf16.mxu1 %v744_v22  ;;  %523 = vmatprep.mubr.bf16.mxu1 %v193_v45 }
  0x2a   : > { %651 = vmatpush3.bf16.msra.mxu0 %v745_v23 }
  0x2b   : > { %673 = vmatpush3.bf16.msra.mxu1 %v746_v24  ;;  %652 = vmatprep.subr.bf16.mxu0 %v747_v25 }
  0x2c   : > { %674 = vmatprep.subr.bf16.mxu1 %v748_v27 }
  0x2e   : > { %653 = vmatpush3.bf16.msra.mxu0 %v749_v28 }
  0x2f   : > { %675 = vmatpush3.bf16.msra.mxu1 %v750_v29  ;;  %654 = vmatprep.subr.bf16.mxu0 %v751_v30 }
  0x30   : > { %676 = vmatprep.subr.bf16.mxu1 %v752_v32 }
  0x32   : > { %655 = vmatpush3.bf16.msra.mxu0 %v753_v34 }
  0x33   : > { %677 = vmatpush3.bf16.msra.mxu1 %v754_v36 }
  0x35   : > { %484 = vmatmul.mubr.bf16.vlgmr.msra.gmra.mxu0 %v190_v46 }
  0x36   : > { %524 = vmatmul.mubr.bf16.vlgmr.msra.gmra.mxu1 %v192_v47 }
  0xf5   : > { %v656_v48 = vpop.f32.mrf.mxu0 }
  0xf6   : > { %v678_v49 = vpop.f32.mrf.mxu1 }
  0xf7   : > { %v657_v51 = vpop.f32.mrf.mxu0 }
  0xf8   : > { %v679_v52 = vpop.f32.mrf.mxu1  ;;  %v658_v53 = vadd.f32 %v657_v51, %v656_v48 }
  0xf9   : > { %v659_v54 = vpop.f32.mrf.mxu0  ;;  %v680_v57 = vadd.f32 %v679_v52, %v678_v49 }
  0xfa   : > { %v681_v55 = vpop.f32.mrf.mxu1  ;;  %v486_v56 = vadd.f32 %v658_v53, %v258_v50 }
  0xfb   : > { %v660_v58 = vpop.f32.mrf.mxu0 }
  0xfc   : > { %v682_v59 = vpop.f32.mrf.mxu1  ;;  %v526_v60 = vadd.f32 %v680_v57, %v486_v56 }
  0xfe   : > { %531 = vst [vmem:[%s160_s25] sm:$0x1] %v526_v60 }
  0xff   : > { %768 = shalt.err (!%p765_p3)
}
 0x100   : > { %s769_s7 = scalar_lea.hbm %s543_s29, 16  ;;  %s773_s10 = scalar_lea.hbm %s1027_s3, 32 }
 0x101   : > { %p770_p4 = scmp.ne.s32.totalorder %s543_s29, %s769_s7  ;;  %p774_p9 = scmp.lt.s32.totalorder %s543_s29, %s1027_s3 }
 0x102   : > { %p775_p10 = scmp.lt.s32.totalorder %s773_s10, %s769_s7 }
 0x103   : > { %p771_p7 = pnand %p770_p4, %p876_p5 }
 0x104   : > { %p776_p11 = por %p775_p10, %p774_p9 }
 0x105   : > { %p772_p8 = pneg %p771_p7 }
 0x107   : > { %p777_p12 = pnand %p776_p11, %p772_p8 }
 0x109   : > { %780 = shalt.err (!%p777_p12)
}
 0x10a   : > { %684 = dma.vmem_to_hbm [thread:$0]  (%p876_p5), %s546_s26, 16, %s543_s29, %s533_s30  }
 0x10b PF: > { %p690_p13 = scmp.ge.s32.totalorder %s815_s15, 2  ;;  %s557_s19 = sand.u32 1, %s803_s12  }
 0x10c   : > { %s558_s20 = scalar_lea.sflag [#allocation3], %s557_s19 }
 0x10d   : > { %p687_p0 = pnand %p690_p13, %p880_p6 }
 0x10f   : > { %p688_p1 = pneg %p687_p0 }
 0x111   : > { %798 = dma.done.wait (%p688_p1), %s558_s20, 16  }
 0x112   : > { %800 = vsyncadd (%p688_p1), %s558_s20, 4294967280  ;;  %p13_p2 = scmp.ge.s32.totalorder %s863_s18, 4   ;;  %s1030_s12 = smov %s807_s13 }
 0x113   : > { %s1031_s13 = smov %s811_s14  ;;  %s1032_s14 = smov %s874_s21 }
 0x114   : > { %s1033_s15 = smov %s863_s18  ;;  %15 = sbr.rel (!%p13_p2) target bundleno = 3 (0x3), region = 67 }
 0x119   :  { %562 = vsyncpa [#allocation3], 1 }
 0x11a   :  { %564 = vsyncpa [#allocation3 + $0x1], 1 }

// kernel: sws_resnext_forward.34
= control target key start
LH: loop header
LB: loop body
LE: loop exit
PB: predicated region body
PF: predicated region fallthrough
CT: control target
= control target key end

     0   :  { %s1535_s12 = smov 0   ;;  %s1537_s13 = smov 0   ;;  %s1732_s0 = inlined_call_operand.vmem [shape: bf16[32,2,72], index: 0, kind: input, shape index: {}]   ;;  %s1733_s1 = inlined_call_operand.vmem [shape: bf16[32,72,8], index: 1, kind: input, shape index: {}]   ;;  %s1734_s2 = inlined_call_operand.vmem [shape: f32[32,1,8], index: 2, kind: input, shape index: {}]   ;;  %s1735_s3 = inlined_call_operand.vmem [shape: bf16[32,2,8], index: 3, kind: output, shape index: {}]  }
   0x1   :  { %s1539_s14 = smov 0  }
   0x2 LB: > { %s22_s15 = sadd.s32 1, %s1507_s13  ;;  %p1114_p0 = scmp.ge.s32.totalorder %s1511_s14, 1  ;;  %s1511_s14 = sphi %s1539_s14, %s13_s14   ;;  %s1507_s13 = sphi %s1537_s13, %s1737_s13   ;;  %s1503_s12 = sphi %s1535_s12, %s1736_s12  }
   0x3   : > { %p23_p1 = scmp.ge.s32.totalorder %s22_s15, 4  ;;  %p178_p2 = scmp.lt.s32.totalorder %s1511_s14, 5 }
   0x5   : > { %s1739_s15 = smov (%p23_p1, %s22_s15), 0  ;;  %p179_p3 = pnand %p1114_p0, %p178_p2 }
   0x6   : > { %s1115_s16 = sshll.u32 (!%p179_p3), %s1503_s12, 3 }
   0x7   : > { %182 = sbr.rel (%p179_p3) target bundleno = 297 (0x129), region = 32  ;;  %p217_p4 = scmp.lt.s32.totalorder (!%p179_p3), %s1115_s16, 31 }
   0xc   : > { %v1513_v0 = vmov 0.0   ;;  %vm1514_vm0 = vmmov 0   ;;  %s1741_s16 = smov (!%p217_p4, %s1115_s16), 31  ;;  %vm293_vm1 = vcmask 1043456   ;;  %vm289_vm2 = vcmask 588800  }
   0xd   : > { %1310 = vmatprep.subr.bf16.mxu0 %v1513_v0  ;;  %1324 = vmatprep.subr.bf16.mxu1 %v1513_v0  ;;  %s1422_s17 = smul.u32 36, %s1741_s16  ;;  %s1590_s23 = scalar_lea.vmem %s1732_s0, %s1741_s16  ;;  %vm339_vm3 = vcmask 57344  }
   0xe   : > { %1320 = vmatprep.mubr.msk.bf16.mxu0 %vm1514_vm0, %v1513_v0  ;;  %1334 = vmatprep.mubr.msk.bf16.mxu1 %vm1514_vm0, %v1513_v0  ;;  %v245_v15 = vld [vmem:[%s1590_s23] sm:$0x1]  ;;  %v1127_v16 = vld [vmem:[%s1590_s23 + $0x1] sm:$0x1]  ;;  %v1146_v29 = vld [vmem:[%s1590_s23 + $0x2] sm:$0x1]  ;;  %s1691_s26 = scalar_lea.vmem %s1734_s2, %s1741_s16  ;;  %s1699_s29 = scalar_lea.vmem %s1735_s3, %s1741_s16 }
   0xf   : > { %s1565_s20 = scalar_lea.vmem %s1733_s1, %s1422_s17  ;;  %v1165_v30 = vld [vmem:[%s1590_s23 + $0x3] sm:$0x1]  ;;  %v1184_v43 = vld [vmem:[%s1590_s23 + $0x4] sm:$0x1]  ;;  %v1203_v44 = vld [vmem:[%s1590_s23 + $0x5] sm:$0x1] }
  0x10   : > { %v1449_v1 = vld [vmem:[%s1565_s20 + $0x20] ss:$0 sps:$4 sm:$0xff]   ;;  %v1450_v2 = vld [vmem:[%s1565_s20 + $0x44] ss:$0 sps:$4 sm:$0xff]   ;;  %v1451_v5 = vld [vmem:[%s1565_s20 + $0x18] sm:$0xff]  }
  0x11   : > { %v295_v3 = vsel %vm293_vm1, %v1449_v1, 0  ;;  %v392_v4 = vsel %vm293_vm1, %v1450_v2, 0  ;;  %v1452_v6 = vld [vmem:[%s1565_s20 + $0x3c] sm:$0xff]   ;;  %v1453_v7 = vld [vmem:[%s1565_s20 + $0x10] sm:$0xff]   ;;  %v1455_v9 = vld [vmem:[%s1565_s20 + $0x8] sm:$0xff]  }
  0x12   : > { %1311 = vmatpush3.bf16.msra.mxu0 %v295_v3  ;;  %1325 = vmatpush3.bf16.msra.mxu1 %v392_v4  ;;  %v1454_v8 = vld [vmem:[%s1565_s20 + $0x34] sm:$0xff]   ;;  %v1456_v10 = vld [vmem:[%s1565_s20 + $0x2c] sm:$0xff]   ;;  %v1457_v11 = vld [vmem:[%s1565_s20] sm:$0xff]  }
  0x13   : > { %1312 = vmatprep.subr.bf16.mxu0 %v1513_v0  ;;  %1326 = vmatprep.subr.bf16.mxu1 %v1513_v0  ;;  %v1458_v12 = vld [vmem:[%s1565_s20 + $0x24] sm:$0xff]   ;;  %v1460_v14 = vld [vmem:[%s1565_s20 + $0x8c] ss:$0 sps:$4 sm:$0xff]   ;;  %v1463_v21 = vld [vmem:[%s1565_s20 + $0x58] sm:$0xff]  }
  0x14   : > { %v1459_v13 = vld [vmem:[%s1565_s20 + $0x68] ss:$0 sps:$4 sm:$0xff]   ;;  %v586_v18 = vsel %vm293_vm1, %v1460_v14, 0  ;;  %v1461_v19 = vld [vmem:[%s1565_s20 + $0x60] sm:$0xff]   ;;  %v1465_v23 = vld [vmem:[%s1565_s20 + $0x50] sm:$0xff]  }
  0x15   : > { %v489_v17 = vsel %vm293_vm1, %v1459_v13, 0  ;;  %v1462_v20 = vld [vmem:[%s1565_s20 + $0x84] sm:$0xff]   ;;  %v1464_v22 = vld [vmem:[%s1565_s20 + $0x7c] sm:$0xff]   ;;  %v1466_v24 = vld [vmem:[%s1565_s20 + $0x74] sm:$0xff]  }
  0x16   : > { %1313 = vmatpush3.bf16.msra.mxu0 %v1451_v5  ;;  %1327 = vmatpush3.bf16.msra.mxu1 %v1452_v6  ;;  %v1467_v25 = vld [vmem:[%s1565_s20 + $0x48] sm:$0xff]   ;;  %v1469_v27 = vld [vmem:[%s1565_s20 + $0xb0] ss:$0 sps:$4 sm:$0xff]   ;;  %v1470_v28 = vld [vmem:[%s1565_s20 + $0xd4] ss:$0 sps:$4 sm:$0xff]  }
  0x17   : > { %1314 = vmatprep.subr.bf16.mxu0 %v1513_v0  ;;  %1328 = vmatprep.subr.bf16.mxu1 %v1513_v0  ;;  %v1468_v26 = vld [vmem:[%s1565_s20 + $0x6c] sm:$0xff]   ;;  %v683_v31 = vsel %vm293_vm1, %v1469_v27, 0  ;;  %v780_v32 = vsel %vm293_vm1, %v1470_v28, 0  ;;  %v1473_v35 = vld [vmem:[%s1565_s20 + $0xa0] sm:$0xff]   ;;  %v1475_v37 = vld [vmem:[%s1565_s20 + $0x98] sm:$0xff]  }
  0x18   : > { %v1471_v33 = vld [vmem:[%s1565_s20 + $0xa8] sm:$0xff]   ;;  %v1476_v38 = vld [vmem:[%s1565_s20 + $0xbc] sm:$0xff]   ;;  %v1477_v39 = vld [vmem:[%s1565_s20 + $0x90] sm:$0xff]  }
  0x19   : > { %v1472_v34 = vld [vmem:[%s1565_s20 + $0xcc] sm:$0xff]   ;;  %v1474_v36 = vld [vmem:[%s1565_s20 + $0xc4] sm:$0xff]   ;;  %v1478_v40 = vld [vmem:[%s1565_s20 + $0xb4] sm:$0xff]  }
  0x1a   : > { %1315 = vmatpush3.bf16.msra.mxu0 %v1453_v7  ;;  %1329 = vmatpush3.bf16.msra.mxu1 %v1454_v8  ;;  %v1479_v41 = vld [vmem:[%s1565_s20 + $0xf8] ss:$0 sps:$4 sm:$0xff]   ;;  %v1480_v42 = vld [vmem:[%s1565_s20 + $0x11c] ss:$0 sps:$4 sm:$0xff]   ;;  %v1481_v47 = vld [vmem:[%s1565_s20 + $0xf0] sm:$0xff]  }
  0x1b   : > { %1316 = vmatprep.subr.bf16.mxu0 %v1513_v0  ;;  %1330 = vmatprep.subr.bf16.mxu1 %v1513_v0  ;;  %v877_v45 = vsel %vm293_vm1, %v1479_v41, 0  ;;  %v974_v46 = vsel %vm293_vm1, %v1480_v42, 0  ;;  %v1482_v48 = vld [vmem:[%s1565_s20 + $0x114] sm:$0xff]   ;;  %v1483_v49 = vld [vmem:[%s1565_s20 + $0xe8] sm:$0xff]   ;;  %v1485_v51 = vld [vmem:[%s1565_s20 + $0xe0] sm:$0xff]  }
  0x1c   : > { %v1484_v50 = vld [vmem:[%s1565_s20 + $0x10c] sm:$0xff]   ;;  %v1486_v52 = vld [vmem:[%s1565_s20 + $0x104] sm:$0xff]   ;;  %v1487_v53 = vld [vmem:[%s1565_s20 + $0xd8] sm:$0xff]  }
  0x1d   : > { %v1488_v54 = vld [vmem:[%s1565_s20 + $0xfc] sm:$0xff]   ;;  %v1222_v55 = vld [vmem:[%s1590_s23 + $0x6] sm:$0x1]  ;;  %v1241_v56 = vld [vmem:[%s1590_s23 + $0x7] sm:$0x1] }
  0x1e   : > { %1317 = vmatpush3.bf16.msra.mxu0 %v1455_v9  ;;  %1331 = vmatpush3.bf16.msra.mxu1 %v1456_v10  ;;  %v1120_v57 = vld [vmem:[%s1691_s26] ss:$0 sm:$0xff]  ;;  %v1138_v58 = vld [vmem:[%s1691_s26 + $0x1] ss:$0 sm:$0xff]  ;;  %v1157_v9 = vld [vmem:[%s1691_s26 + $0x2] ss:$0 sm:$0xff] }
  0x1f   : > { %1318 = vmatprep.subr.bf16.mxu0 %v1513_v0  ;;  %1332 = vmatprep.subr.bf16.mxu1 %v1513_v0  ;;  %v1176_v10 = vld [vmem:[%s1691_s26 + $0x3] ss:$0 sm:$0xff]  ;;  %v1233_v41 = vld [vmem:[%s1691_s26 + $0x6] ss:$0 sm:$0xff]  ;;  %v1252_v42 = vld [vmem:[%s1691_s26 + $0x7] ss:$0 sm:$0xff] }
  0x22   : > { %1319 = vmatpush3.bf16.msra.mxu0 %v1457_v11  ;;  %1333 = vmatpush3.bf16.msra.mxu1 %v1458_v12 }
  0x23   : > { %1338 = vmatprep.subr.bf16.mxu0 %v1513_v0  ;;  %1352 = vmatprep.subr.bf16.mxu1 %v1513_v0 }
  0x25   : > { %1321 = vmatmul.mubr.msk.bf16.vlgmr.msra.gmra.mxu0 %vm289_vm2, %v245_v15  ;;  %1335 = vmatmul.mubr.msk.bf16.vlgmr.msra.gmra.mxu1 %vm289_vm2, %v1127_v16 }
  0x26   : > { %1339 = vmatpush3.bf16.msra.mxu0 %v489_v17  ;;  %1353 = vmatpush3.bf16.msra.mxu1 %v586_v18 }
  0x27   : > { %1340 = vmatprep.subr.bf16.mxu0 %v1513_v0  ;;  %1354 = vmatprep.subr.bf16.mxu1 %v1513_v0 }
  0x28   : > { %1348 = vmatprep.mubr.msk.bf16.mxu0 %vm1514_vm0, %v1513_v0  ;;  %1362 = vmatprep.mubr.msk.bf16.mxu1 %vm1514_vm0, %v1513_v0 }
  0x2a   : > { %1341 = vmatpush3.bf16.msra.mxu0 %v1461_v19  ;;  %1355 = vmatpush3.bf16.msra.mxu1 %v1462_v20 }
  0x2b   : > { %1342 = vmatprep.subr.bf16.mxu0 %v1513_v0  ;;  %1356 = vmatprep.subr.bf16.mxu1 %v1513_v0 }
  0x2e   : > { %1343 = vmatpush3.bf16.msra.mxu0 %v1463_v21  ;;  %1357 = vmatpush3.bf16.msra.mxu1 %v1464_v22 }
  0x2f   : > { %1344 = vmatprep.subr.bf16.mxu0 %v1513_v0  ;;  %1358 = vmatprep.subr.bf16.mxu1 %v1513_v0 }
  0x32   : > { %1345 = vmatpush3.bf16.msra.mxu0 %v1465_v23  ;;  %1359 = vmatpush3.bf16.msra.mxu1 %v1466_v24 }
  0x33   : > { %1346 = vmatprep.subr.bf16.mxu0 %v1513_v0  ;;  %1360 = vmatprep.subr.bf16.mxu1 %v1513_v0 }
  0x36   : > { %1347 = vmatpush3.bf16.msra.mxu0 %v1467_v25  ;;  %1361 = vmatpush3.bf16.msra.mxu1 %v1468_v26  ;;  %v1195_v25 = vld [vmem:[%s1691_s26 + $0x4] ss:$0 sm:$0xff]  ;;  %v1214_v26 = vld [vmem:[%s1691_s26 + $0x5] ss:$0 sm:$0xff] }
  0x37   : > { %1366 = vmatprep.subr.bf16.mxu0 %v1513_v0  ;;  %1380 = vmatprep.subr.bf16.mxu1 %v1513_v0 }
  0x39   : > { %1349 = vmatmul.mubr.msk.bf16.vlgmr.msra.gmra.mxu0 %vm289_vm2, %v1146_v29  ;;  %1363 = vmatmul.mubr.msk.bf16.vlgmr.msra.gmra.mxu1 %vm289_vm2, %v1165_v30 }
  0x3a   : > { %1367 = vmatpush3.bf16.msra.mxu0 %v683_v31  ;;  %1381 = vmatpush3.bf16.msra.mxu1 %v780_v32 }
  0x3b   : > { %1368 = vmatprep.subr.bf16.mxu0 %v1513_v0  ;;  %1382 = vmatprep.subr.bf16.mxu1 %v1513_v0 }
  0x3c   : > { %1376 = vmatprep.mubr.msk.bf16.mxu0 %vm1514_vm0, %v1513_v0  ;;  %1390 = vmatprep.mubr.msk.bf16.mxu1 %vm1514_vm0, %v1513_v0 }
  0x3e   : > { %1369 = vmatpush3.bf16.msra.mxu0 %v1471_v33  ;;  %1383 = vmatpush3.bf16.msra.mxu1 %v1472_v34 }
  0x3f   : > { %1370 = vmatprep.subr.bf16.mxu0 %v1513_v0  ;;  %1384 = vmatprep.subr.bf16.mxu1 %v1513_v0 }
  0x42   : > { %1371 = vmatpush3.bf16.msra.mxu0 %v1473_v35  ;;  %1385 = vmatpush3.bf16.msra.mxu1 %v1474_v36 }
  0x43   : > { %1372 = vmatprep.subr.bf16.mxu0 %v1513_v0  ;;  %1386 = vmatprep.subr.bf16.mxu1 %v1513_v0 }
  0x46   : > { %1373 = vmatpush3.bf16.msra.mxu0 %v1475_v37  ;;  %1387 = vmatpush3.bf16.msra.mxu1 %v1476_v38 }
  0x47   : > { %1374 = vmatprep.subr.bf16.mxu0 %v1513_v0  ;;  %1388 = vmatprep.subr.bf16.mxu1 %v1513_v0 }
  0x4a   : > { %1375 = vmatpush3.bf16.msra.mxu0 %v1477_v39  ;;  %1389 = vmatpush3.bf16.msra.mxu1 %v1478_v40 }
  0x4b   : > { %1394 = vmatprep.subr.bf16.mxu0 %v1513_v0  ;;  %1408 = vmatprep.subr.bf16.mxu1 %v1513_v0 }
  0x4d   : > { %1377 = vmatmul.mubr.msk.bf16.vlgmr.msra.gmra.mxu0 %vm289_vm2, %v1184_v43  ;;  %1391 = vmatmul.mubr.msk.bf16.vlgmr.msra.gmra.mxu1 %vm289_vm2, %v1203_v44 }
  0x4e   : > { %1395 = vmatpush3.bf16.msra.mxu0 %v877_v45  ;;  %1409 = vmatpush3.bf16.msra.mxu1 %v974_v46 }
  0x4f   : > { %1396 = vmatprep.subr.bf16.mxu0 %v1513_v0  ;;  %1410 = vmatprep.subr.bf16.mxu1 %v1513_v0 }
  0x50   : > { %1404 = vmatprep.mubr.msk.bf16.mxu0 %vm1514_vm0, %v1513_v0  ;;  %1418 = vmatprep.mubr.msk.bf16.mxu1 %vm1514_vm0, %v1513_v0 }
  0x52   : > { %1397 = vmatpush3.bf16.msra.mxu0 %v1481_v47  ;;  %1411 = vmatpush3.bf16.msra.mxu1 %v1482_v48 }
  0x53   : > { %1398 = vmatprep.subr.bf16.mxu0 %v1513_v0  ;;  %1412 = vmatprep.subr.bf16.mxu1 %v1513_v0 }
  0x56   : > { %1399 = vmatpush3.bf16.msra.mxu0 %v1483_v49  ;;  %1413 = vmatpush3.bf16.msra.mxu1 %v1484_v50 }
  0x57   : > { %1400 = vmatprep.subr.bf16.mxu0 %v1513_v0  ;;  %1414 = vmatprep.subr.bf16.mxu1 %v1513_v0 }
  0x5a   : > { %1401 = vmatpush3.bf16.msra.mxu0 %v1485_v51  ;;  %1415 = vmatpush3.bf16.msra.mxu1 %v1486_v52 }
  0x5b   : > { %1402 = vmatprep.subr.bf16.mxu0 %v1513_v0  ;;  %1416 = vmatprep.subr.bf16.mxu1 %v1513_v0 }
  0x5e   : > { %1403 = vmatpush3.bf16.msra.mxu0 %v1487_v53  ;;  %1417 = vmatpush3.bf16.msra.mxu1 %v1488_v54 }
  0x61   : > { %1405 = vmatmul.mubr.msk.bf16.vlgmr.msra.gmra.mxu0 %vm289_vm2, %v1222_v55  ;;  %1419 = vmatmul.mubr.msk.bf16.vlgmr.msra.gmra.mxu1 %vm289_vm2, %v1241_v56 }
  0xe5   : > { %v331_v59 = vpop.f32.mrf.mxu0  ;;  %v428_v61 = vpop.f32.mrf.mxu1 }
  0xe6   : > { %v332_v60 = vadd.f32 %v1120_v57, %v331_v59  ;;  %v429_v62 = vadd.f32 %v1138_v58, %v428_v61 }
  0xe7   : > { %v1322_v63 = vpop.f32.mrf.mxu0  ;;  %v1336_v1 = vpop.f32.mrf.mxu1 }
  0xe8   : > { %v337_v0 = vmax.f32 %v332_v60, 0.0  ;;  %v434_v2 = vmax.f32 %v429_v62, 0.0 }
  0xe9   : > { %v334_v3 = vpop.f32.mrf.mxu0  ;;  %v431_v5 = vpop.f32.mrf.mxu1 }
  0xea   : > { %v338_v4 = vpack.c.bf16 %v337_v0, %v337_v0  ;;  %v435_v6 = vpack.c.bf16 %v434_v2, %v434_v2 }
  0xeb   : > { %v1323_v7 = vpop.f32.mrf.mxu0  ;;  %v1337_v8 = vpop.f32.mrf.mxu1 }
  0xec   : > { %340 = vst.msk [vmem:[%s1699_s29] sm:$0x1] %vm339_vm3, %v338_v4  ;;  %1145 = vst.msk [vmem:[%s1699_s29 + $0x1] sm:$0x1] %vm339_vm3, %v435_v6 }
  0xf9   : > { %v525_v11 = vpop.f32.mrf.mxu0  ;;  %v622_v13 = vpop.f32.mrf.mxu1 }
  0xfa   : > { %v526_v12 = vadd.f32 %v1157_v9, %v525_v11  ;;  %v623_v14 = vadd.f32 %v1176_v10, %v622_v13 }
  0xfb   : > { %v1350_v15 = vpop.f32.mrf.mxu0  ;;  %v1364_v17 = vpop.f32.mrf.mxu1 }
  0xfc   : > { %v531_v16 = vmax.f32 %v526_v12, 0.0  ;;  %v628_v18 = vmax.f32 %v623_v14, 0.0 }
  0xfd   : > { %v528_v19 = vpop.f32.mrf.mxu0  ;;  %v625_v21 = vpop.f32.mrf.mxu1 }
  0xfe   : > { %v532_v20 = vpack.c.bf16 %v531_v16, %v531_v16  ;;  %v629_v22 = vpack.c.bf16 %v628_v18, %v628_v18 }
  0xff   : > { %v1351_v23 = vpop.f32.mrf.mxu0  ;;  %v1365_v24 = vpop.f32.mrf.mxu1 }
 0x100   : > { %1164 = vst.msk [vmem:[%s1699_s29 + $0x2] sm:$0x1] %vm339_vm3, %v532_v20  ;;  %1183 = vst.msk [vmem:[%s1699_s29 + $0x3] sm:$0x1] %vm339_vm3, %v629_v22 }
 0x10d   : > { %v719_v27 = vpop.f32.mrf.mxu0  ;;  %v816_v29 = vpop.f32.mrf.mxu1 }
 0x10e   : > { %v720_v28 = vadd.f32 %v1195_v25, %v719_v27  ;;  %v817_v30 = vadd.f32 %v1214_v26, %v816_v29 }
 0x10f   : > { %v1378_v31 = vpop.f32.mrf.mxu0  ;;  %v1392_v33 = vpop.f32.mrf.mxu1 }
 0x110   : > { %v725_v32 = vmax.f32 %v720_v28, 0.0  ;;  %v822_v34 = vmax.f32 %v817_v30, 0.0 }
 0x111   : > { %v722_v35 = vpop.f32.mrf.mxu0  ;;  %v819_v37 = vpop.f32.mrf.mxu1 }
 0x112   : > { %v726_v36 = vpack.c.bf16 %v725_v32, %v725_v32  ;;  %v823_v38 = vpack.c.bf16 %v822_v34, %v822_v34 }
 0x113   : > { %v1379_v39 = vpop.f32.mrf.mxu0  ;;  %v1393_v40 = vpop.f32.mrf.mxu1 }
 0x114   : > { %1202 = vst.msk [vmem:[%s1699_s29 + $0x4] sm:$0x1] %vm339_vm3, %v726_v36  ;;  %1221 = vst.msk [vmem:[%s1699_s29 + $0x5] sm:$0x1] %vm339_vm3, %v823_v38 }
 0x121   : > { %v913_v43 = vpop.f32.mrf.mxu0  ;;  %v1010_v45 = vpop.f32.mrf.mxu1 }
 0x122   : > { %v914_v44 = vadd.f32 %v1233_v41, %v913_v43  ;;  %v1011_v46 = vadd.f32 %v1252_v42, %v1010_v45 }
 0x123   : > { %v1406_v47 = vpop.f32.mrf.mxu0  ;;  %v1420_v49 = vpop.f32.mrf.mxu1 }
 0x124   : > { %v919_v48 = vmax.f32 %v914_v44, 0.0  ;;  %v1016_v50 = vmax.f32 %v1011_v46, 0.0 }
 0x125   : > { %v916_v51 = vpop.f32.mrf.mxu0  ;;  %v1013_v53 = vpop.f32.mrf.mxu1 }
 0x126   : > { %v920_v52 = vpack.c.bf16 %v919_v48, %v919_v48  ;;  %v1017_v54 = vpack.c.bf16 %v1016_v50, %v1016_v50 }
 0x127   : > { %v1407_v55 = vpop.f32.mrf.mxu0  ;;  %v1421_v56 = vpop.f32.mrf.mxu1 }
 0x128   : > { %1240 = vst.msk [vmem:[%s1699_s29 + $0x6] sm:$0x1] %vm339_vm3, %v920_v52  ;;  %1259 = vst.msk [vmem:[%s1699_s29 + $0x7] sm:$0x1] %vm339_vm3, %v1017_v54 }
 0x129 PF: > { %s13_s14 = sadd.s32 1, %s1511_s14   ;;  %s1736_s12 = smov %s1507_s13 }
 0x12a   : > { %p10_p5 = scmp.ge.s32.totalorder %s13_s14, 6   ;;  %s1737_s13 = smov %s1739_s15 }
 0x12c   :  { %12 = sbr.rel (!%p10_p5) target bundleno = 2 (0x2), region = 96 }

</bundles_post_ra>
